<compile_context>
chip_gen: v5e
topology: v5e:2x2
jax: 0.10.0
libtpu: 0.0.40
codegen_flags: <defaults>
</compile_context>

<pallas_src>
import jax
import jax.numpy as jnp
from jax.experimental import pallas as pl
from jax.experimental.pallas import tpu as pltpu


def _apply_gates(gates, c, scale, shift, Hp):
    """One EUP tanh over the whole (Bp, 4*Hp) gates tile.

    The inner 0.5 of sigmoid(x) = 0.5*(1 + tanh(x/2)) is pre-folded into the i/f/o
    weight/bias columns (wrapper-side), so only the outer scale/shift remain:
      i/f/o lanes: 0.5*tanh(.) + 0.5   g lanes: tanh(.)   pad lanes: tanh(0)*1+0 = 0
    Gate slices are at multiples of Hp=128 lanes -> vreg-aligned (free).
    """
    act = jnp.tanh(gates) * scale + shift
    i = act[:, 0 * Hp:1 * Hp]
    f = act[:, 1 * Hp:2 * Hp]
    g = act[:, 2 * Hp:3 * Hp]
    o = act[:, 3 * Hp:4 * Hp]
    c_new = f * c + i * g
    h_new = o * jnp.tanh(c_new)
    return h_new, c_new


def rn_policy_kernel(x_ref,
                     wih0_ref, whh0_ref, b0_ref,
                     wih1_ref, whh1_ref, b1_ref,
                     scale_ref, shift_ref,
                     wfc_ref, bfc_ref, wout_ref, bout_ref,
                     out_ref, hn_ref, cn_ref):
    rows, _ = x_ref.shape            # rows = T * Bp (pre-flattened by the wrapper)
    Bp, _ = out_ref.shape
    Hp = whh0_ref.shape[0]           # lane-padded hidden width (multiple of 128)
    G = whh0_ref.shape[1]            # 4 * Hp
    T = rows // Bp

    wih0 = wih0_ref[...]
    whh0 = whh0_ref[...]
    wih1 = wih1_ref[...]
    whh1 = whh1_ref[...]

    # --- Hoisted layer-0 input projection: one (T*Bp, D) x (D, 4Hp) matmul, b0 folded in.
    x = x_ref[...]
    x_proj = jnp.dot(x.astype(wih0.dtype), wih0,
                     preferred_element_type=jnp.float32) + b0_ref[...]

    # Loop-invariant broadcasts hoisted out of the static T-unroll.
    b1 = jnp.broadcast_to(b1_ref[...], (Bp, G))
    scale = jnp.broadcast_to(scale_ref[...], (Bp, G))
    shift = jnp.broadcast_to(shift_ref[...], (Bp, G))

    h0 = jnp.zeros((Bp, Hp), jnp.float32)
    c0 = jnp.zeros((Bp, Hp), jnp.float32)
    h1 = jnp.zeros((Bp, Hp), jnp.float32)
    c1 = jnp.zeros((Bp, Hp), jnp.float32)

    # Short fixed sequence -> static unroll; per step: 3 small dots + 2 tanh pairs.
    for t in range(T):
        # h1-dependent half of layer-1 gates: only needs step t-1 state, issued before
        # the layer-0 cell so the scheduler can hide it under layer 0's matmul.
        gates1_h = jnp.dot(h1.astype(whh1.dtype), whh1,
                           preferred_element_type=jnp.float32) + b1

        # Layer 0: recurrent-only matmul (input contribution precomputed above).
        gates0 = (jnp.dot(h0.astype(whh0.dtype), whh0,
                          preferred_element_type=jnp.float32)
                  + x_proj[t * Bp:(t + 1) * Bp, :])
        h0, c0 = _apply_gates(gates0, c0, scale, shift, Hp)

        # Layer 1: input half depends on the fresh h0 (no lane-concat).
        gates1 = jnp.dot(h0.astype(wih1.dtype), wih1,
                         preferred_element_type=jnp.float32) + gates1_h
        h1, c1 = _apply_gates(gates1, c1, scale, shift, Hp)

    # last_output = rnn_out[:, -1, :] == h1 (top layer, last step).
    fc = jnp.dot(h1.astype(wfc_ref.dtype), wfc_ref[...],
                 preferred_element_type=jnp.float32) + bfc_ref[...]
    fc = jnp.maximum(fc, 0.0)                          # activation='relu' after fc_layers
    out_ref[...] = (jnp.dot(fc.astype(wout_ref.dtype), wout_ref[...],
                            preferred_element_type=jnp.float32) + bout_ref[...])

    # Padded (Bp, Hp) states; wrapper slices back to (B, H).
    hn_ref[0] = h0
    hn_ref[1] = h1
    cn_ref[0] = c0
    cn_ref[1] = c1


# ----------------------------------------------------------------------------------
# Wrapper-side weight prep (layout fixups live in XLA, not on the kernel's critical path)
# ----------------------------------------------------------------------------------

def _round_up(n, m):
    return ((n + m - 1) // m) * m


def _prep_gate_cols(w, H, Hp):
    """(K, 4H) gate-ordered (i,f,g,o) -> (K, 4Hp): gate g placed at lanes [g*Hp, g*Hp+H),
    zeros elsewhere; i/f/o columns pre-scaled by 0.5 (sigmoid-as-tanh fold)."""
    K = w.shape[0]
    out = jnp.zeros((K, 4 * Hp), jnp.float32)
    for g in range(4):
        cols = w[:, g * H:(g + 1) * H]
        if g != 2:                       # i, f, o
            cols = cols * 0.5
        out = out.at[:, g * Hp:g * Hp + H].set(cols)
    return out


def _pad_rows(w, Hp):
    return jnp.pad(w, ((0, Hp - w.shape[0]), (0, 0)))


def init_params(key, input_dim, hidden_dim, fc_dim, output_dim):
    """Deterministic PyTorch-style uniform(-1/sqrt(fan), 1/sqrt(fan)) init."""
    ks = jax.random.split(key, 12)
    H, D, F, O = hidden_dim, input_dim, fc_dim, output_dim
    kH = 1.0 / jnp.sqrt(H)

    def u(k, shape, bound):
        return jax.random.uniform(k, shape, jnp.float32, -bound, bound)

    return {
        # LSTM layer 0 (D -> H), stored transposed for x @ W^T; gate order i,f,g,o.
        "wih0_t": u(ks[0], (D, 4 * H), kH),
        "whh0_t": u(ks[1], (H, 4 * H), kH),
        "b0":     u(ks[2], (1, 4 * H), kH) + u(ks[3], (1, 4 * H), kH),   # b_ih + b_hh
        # LSTM layer 1 (H -> H)
        "wih1_t": u(ks[4], (H, 4 * H), kH),
        "whh1_t": u(ks[5], (H, 4 * H), kH),
        "b1":     u(ks[6], (1, 4 * H), kH) + u(ks[7], (1, 4 * H), kH),
        # fc_layers: single Linear(H -> F)
        "wfc_t":  u(ks[8], (H, F), kH),
        "bfc":    u(ks[9], (1, F), kH),
        # output_layer: Linear(F -> O)
        "wout_t": u(ks[10], (F, O), 1.0 / jnp.sqrt(F)),
        "bout":   u(ks[11], (1, O), 1.0 / jnp.sqrt(F)),
    }


def rn_policy_forward(x, params, hidden_dim, output_dim, use_bf16_matmul=False):
    B, T, D = x.shape
    H = hidden_dim
    O = output_dim
    num_layers = 2
    Hp = _round_up(H, 128)              # lane-aligned per-gate width
    Bp = max(8, _round_up(B, 8))        # sublane-aligned batch

    # x -> time-major, batch-padded, pre-flattened (no in-kernel reshape/relayout).
    x_t = jnp.transpose(x, (1, 0, 2))                           # (T, B, D)
    x_t = jnp.pad(x_t, ((0, 0), (0, Bp - B), (0, 0)))           # (T, Bp, D)
    x_flat = x_t.reshape(T * Bp, D)                             # (T*Bp, D)

    # Gate-padded, 0.5-folded weights (one-time prep, fuses in XLA).
    wih0_p = _prep_gate_cols(params["wih0_t"], H, Hp)                       # (D, 4Hp)
    whh0_p = _pad_rows(_prep_gate_cols(params["whh0_t"], H, Hp), Hp)        # (Hp, 4Hp)
    b0_p = _prep_gate_cols(params["b0"], H, Hp)                             # (1, 4Hp)
    wih1_p = _pad_rows(_prep_gate_cols(params["wih1_t"], H, Hp), Hp)        # (Hp, 4Hp)
    whh1_p = _pad_rows(_prep_gate_cols(params["whh1_t"], H, Hp), Hp)        # (Hp, 4Hp)
    b1_p = _prep_gate_cols(params["b1"], H, Hp)                             # (1, 4Hp)
    wfc_p = _pad_rows(params["wfc_t"], Hp)                                  # (Hp, F)
    wout_p = params["wout_t"]

    if use_bf16_matmul:
        # Optional v6e/v7x lever: fewer MXU passes on the serial recurrence.
        # Numerics diverge from PyTorch f32 at the ULP level -> off by default.
        wih0_p, whh0_p, wih1_p, whh1_p, wfc_p, wout_p = (
            w.astype(jnp.bfloat16) for w in
            (wih0_p, whh0_p, wih1_p, whh1_p, wfc_p, wout_p))

    # Per-lane outer scale/shift of the sigmoid-as-tanh identity (pad lanes: 1/0 -> stay 0).
    lane = jnp.arange(4 * Hp)
    ifo_valid = ((lane // Hp) != 2) & ((lane % Hp) < H)
    gate_scale = jnp.where(ifo_valid, 0.5, 1.0).astype(jnp.float32)[None, :]
    gate_shift = jnp.where(ifo_valid, 0.5, 0.0).astype(jnp.float32)[None, :]

    vmem = pl.BlockSpec(memory_space=pltpu.MemorySpace.VMEM)
    args = (x_flat,
            wih0_p, whh0_p, b0_p,
            wih1_p, whh1_p, b1_p,
            gate_scale, gate_shift,
            wfc_p, params["bfc"], wout_p, params["bout"])

    out_p, hn_p, cn_p = pl.pallas_call(
        rn_policy_kernel,
        out_shape=(
            jax.ShapeDtypeStruct((Bp, O), jnp.float32),
            jax.ShapeDtypeStruct((num_layers, Bp, Hp), jnp.float32),
            jax.ShapeDtypeStruct((num_layers, Bp, Hp), jnp.float32),
        ),
        in_specs=[vmem] * len(args),
        out_specs=(vmem, vmem, vmem),
    )(*args)

    out = out_p[:B, :]
    h_n = hn_p[:, :B, :H]
    c_n = cn_p[:, :B, :H]
    return out, (h_n, c_n)


if __name__ == "__main__":
    # Small shapes consistent with the module's forward: x is (batch, seq, input_dim).
    B, T, D = 2, 8, 16
    H, F, O = 32, 32, 8    # hidden_dim, fc_dims=[32], output_dim

    key = jax.random.PRNGKey(0)
    k_x, k_p = jax.random.split(key)
    x = jax.random.normal(k_x, (B, T, D), jnp.float32)
    params = init_params(k_p, D, H, F, O)

    out, (h_n, c_n) = rn_policy_forward(x, params, H, O)
    jax.block_until_ready((out, h_n, c_n))

    assert out.shape == (B, O)
    assert h_n.shape == (2, B, H) and c_n.shape == (2, B, H)
    assert bool(jnp.all(jnp.isfinite(out)))
    print("KERNEL_OK")
</pallas_src>

<mosaic_0001>
module attributes {stable_mosaic.version = 11 : i64} {
  func.func @rn_policy_kernel(%arg0: memref<64x16xf32, #tpu.memory_space<vmem>>, %arg1: memref<16x512xf32, #tpu.memory_space<vmem>>, %arg2: memref<128x512xf32, #tpu.memory_space<vmem>>, %arg3: memref<1x512xf32, #tpu.memory_space<vmem>>, %arg4: memref<128x512xf32, #tpu.memory_space<vmem>>, %arg5: memref<128x512xf32, #tpu.memory_space<vmem>>, %arg6: memref<1x512xf32, #tpu.memory_space<vmem>>, %arg7: memref<1x512xf32, #tpu.memory_space<vmem>>, %arg8: memref<1x512xf32, #tpu.memory_space<vmem>>, %arg9: memref<128x32xf32, #tpu.memory_space<vmem>>, %arg10: memref<1x32xf32, #tpu.memory_space<vmem>>, %arg11: memref<32x8xf32, #tpu.memory_space<vmem>>, %arg12: memref<1x8xf32, #tpu.memory_space<vmem>>, %arg13: memref<8x8xf32, #tpu.memory_space<vmem>>, %arg14: memref<2x8x128xf32, #tpu.memory_space<vmem>>, %arg15: memref<2x8x128xf32, #tpu.memory_space<vmem>>) attributes {dimension_semantics = [], scalar_prefetch = 0 : i64, scratch_operands = 0 : i64, tpu.core_type = #tpu.core_type<tc>} {
    %c0 = arith.constant 0 : index
    %c0_0 = arith.constant 0 : index
    %0 = vector.load %arg1[%c0, %c0_0] : memref<16x512xf32, #tpu.memory_space<vmem>>, vector<16x512xf32>
    %c0_1 = arith.constant 0 : index
    %c0_2 = arith.constant 0 : index
    %1 = vector.load %arg2[%c0_1, %c0_2] : memref<128x512xf32, #tpu.memory_space<vmem>>, vector<128x512xf32>
    %c0_3 = arith.constant 0 : index
    %c0_4 = arith.constant 0 : index
    %2 = vector.load %arg4[%c0_3, %c0_4] : memref<128x512xf32, #tpu.memory_space<vmem>>, vector<128x512xf32>
    %c0_5 = arith.constant 0 : index
    %c0_6 = arith.constant 0 : index
    %3 = vector.load %arg5[%c0_5, %c0_6] : memref<128x512xf32, #tpu.memory_space<vmem>>, vector<128x512xf32>
    %c0_7 = arith.constant 0 : index
    %c0_8 = arith.constant 0 : index
    %4 = vector.load %arg0[%c0_7, %c0_8] : memref<64x16xf32, #tpu.memory_space<vmem>>, vector<64x16xf32>
    %cst = arith.constant dense<0.000000e+00> : vector<64x512xf32>
    %5 = tpu.matmul %4, %0, %cst {dimension_numbers = #tpu.dot_dimension_numbers<[1], [0], [0], [1], [0, 0, 1, 1], [], []>} : vector<64x16xf32>, vector<16x512xf32>, vector<64x512xf32> -> vector<64x512xf32>
    %c0_9 = arith.constant 0 : index
    %c0_10 = arith.constant 0 : index
    %6 = vector.load %arg3[%c0_9, %c0_10] : memref<1x512xf32, #tpu.memory_space<vmem>>, vector<1x512xf32>
    %7 = vector.broadcast %6 : vector<1x512xf32> to vector<64x512xf32>
    %8 = arith.addf %5, %7 : vector<64x512xf32>
    %c0_11 = arith.constant 0 : index
    %c0_12 = arith.constant 0 : index
    %9 = vector.load %arg6[%c0_11, %c0_12] : memref<1x512xf32, #tpu.memory_space<vmem>>, vector<1x512xf32>
    %10 = vector.shape_cast %9 : vector<1x512xf32> to vector<1x512xf32>
    %11 = vector.broadcast %10 : vector<1x512xf32> to vector<8x512xf32>
    %c0_13 = arith.constant 0 : index
    %c0_14 = arith.constant 0 : index
    %12 = vector.load %arg7[%c0_13, %c0_14] : memref<1x512xf32, #tpu.memory_space<vmem>>, vector<1x512xf32>
    %13 = vector.shape_cast %12 : vector<1x512xf32> to vector<1x512xf32>
    %14 = vector.broadcast %13 : vector<1x512xf32> to vector<8x512xf32>
    %c0_15 = arith.constant 0 : index
    %c0_16 = arith.constant 0 : index
    %15 = vector.load %arg8[%c0_15, %c0_16] : memref<1x512xf32, #tpu.memory_space<vmem>>, vector<1x512xf32>
    %16 = vector.shape_cast %15 : vector<1x512xf32> to vector<1x512xf32>
    %17 = vector.broadcast %16 : vector<1x512xf32> to vector<8x512xf32>
    %cst_17 = arith.constant 0.000000e+00 : f32
    %18 = vector.broadcast %cst_17 : f32 to vector<8x128xf32>
    %cst_18 = arith.constant 0.000000e+00 : f32
    %19 = vector.broadcast %cst_18 : f32 to vector<8x128xf32>
    %cst_19 = arith.constant 0.000000e+00 : f32
    %20 = vector.broadcast %cst_19 : f32 to vector<8x128xf32>
    %cst_20 = arith.constant 0.000000e+00 : f32
    %21 = vector.broadcast %cst_20 : f32 to vector<8x128xf32>
    %cst_21 = arith.constant dense<0.000000e+00> : vector<8x512xf32>
    %22 = tpu.matmul %20, %3, %cst_21 {dimension_numbers = #tpu.dot_dimension_numbers<[1], [0], [0], [1], [0, 0, 1, 1], [], []>} : vector<8x128xf32>, vector<128x512xf32>, vector<8x512xf32> -> vector<8x512xf32>
    %23 = arith.addf %22, %11 : vector<8x512xf32>
    %cst_22 = arith.constant dense<0.000000e+00> : vector<8x512xf32>
    %24 = tpu.matmul %18, %1, %cst_22 {dimension_numbers = #tpu.dot_dimension_numbers<[1], [0], [0], [1], [0, 0, 1, 1], [], []>} : vector<8x128xf32>, vector<128x512xf32>, vector<8x512xf32> -> vector<8x512xf32>
    %25 = vector.extract_strided_slice %8 {offsets = [0, 0], sizes = [8, 512], strides = [1, 1]} : vector<64x512xf32> to vector<8x512xf32>
    %26 = arith.addf %24, %25 : vector<8x512xf32>
    %27 = math.tanh %26 : vector<8x512xf32>
    %28 = arith.mulf %27, %14 : vector<8x512xf32>
    %29 = arith.addf %28, %17 : vector<8x512xf32>
    %30 = vector.extract_strided_slice %29 {offsets = [0, 0], sizes = [8, 128], strides = [1, 1]} : vector<8x512xf32> to vector<8x128xf32>
    %31 = vector.extract_strided_slice %29 {offsets = [0, 128], sizes = [8, 128], strides = [1, 1]} : vector<8x512xf32> to vector<8x128xf32>
    %32 = vector.extract_strided_slice %29 {offsets = [0, 256], sizes = [8, 128], strides = [1, 1]} : vector<8x512xf32> to vector<8x128xf32>
    %33 = vector.extract_strided_slice %29 {offsets = [0, 384], sizes = [8, 128], strides = [1, 1]} : vector<8x512xf32> to vector<8x128xf32>
    %34 = arith.mulf %31, %19 : vector<8x128xf32>
    %35 = arith.mulf %30, %32 : vector<8x128xf32>
    %36 = arith.addf %34, %35 : vector<8x128xf32>
    %37 = math.tanh %36 : vector<8x128xf32>
    %38 = arith.mulf %33, %37 : vector<8x128xf32>
    %cst_23 = arith.constant dense<0.000000e+00> : vector<8x512xf32>
    %39 = tpu.matmul %38, %2, %cst_23 {dimension_numbers = #tpu.dot_dimension_numbers<[1], [0], [0], [1], [0, 0, 1, 1], [], []>} : vector<8x128xf32>, vector<128x512xf32>, vector<8x512xf32> -> vector<8x512xf32>
    %40 = arith.addf %39, %23 : vector<8x512xf32>
    %41 = math.tanh %40 : vector<8x512xf32>
    %42 = arith.mulf %41, %14 : vector<8x512xf32>
    %43 = arith.addf %42, %17 : vector<8x512xf32>
    %44 = vector.extract_strided_slice %43 {offsets = [0, 0], sizes = [8, 128], strides = [1, 1]} : vector<8x512xf32> to vector<8x128xf32>
    %45 = vector.extract_strided_slice %43 {offsets = [0, 128], sizes = [8, 128], strides = [1, 1]} : vector<8x512xf32> to vector<8x128xf32>
    %46 = vector.extract_strided_slice %43 {offsets = [0, 256], sizes = [8, 128], strides = [1, 1]} : vector<8x512xf32> to vector<8x128xf32>
    %47 = vector.extract_strided_slice %43 {offsets = [0, 384], sizes = [8, 128], strides = [1, 1]} : vector<8x512xf32> to vector<8x128xf32>
    %48 = arith.mulf %45, %21 : vector<8x128xf32>
    %49 = arith.mulf %44, %46 : vector<8x128xf32>
    %50 = arith.addf %48, %49 : vector<8x128xf32>
    %51 = math.tanh %50 : vector<8x128xf32>
    %52 = arith.mulf %47, %51 : vector<8x128xf32>
    %cst_24 = arith.constant dense<0.000000e+00> : vector<8x512xf32>
    %53 = tpu.matmul %52, %3, %cst_24 {dimension_numbers = #tpu.dot_dimension_numbers<[1], [0], [0], [1], [0, 0, 1, 1], [], []>} : vector<8x128xf32>, vector<128x512xf32>, vector<8x512xf32> -> vector<8x512xf32>
    %54 = arith.addf %53, %11 : vector<8x512xf32>
    %cst_25 = arith.constant dense<0.000000e+00> : vector<8x512xf32>
    %55 = tpu.matmul %38, %1, %cst_25 {dimension_numbers = #tpu.dot_dimension_numbers<[1], [0], [0], [1], [0, 0, 1, 1], [], []>} : vector<8x128xf32>, vector<128x512xf32>, vector<8x512xf32> -> vector<8x512xf32>
    %56 = vector.extract_strided_slice %8 {offsets = [8, 0], sizes = [8, 512], strides = [1, 1]} : vector<64x512xf32> to vector<8x512xf32>
    %57 = arith.addf %55, %56 : vector<8x512xf32>
    %58 = math.tanh %57 : vector<8x512xf32>
    %59 = arith.mulf %58, %14 : vector<8x512xf32>
    %60 = arith.addf %59, %17 : vector<8x512xf32>
    %61 = vector.extract_strided_slice %60 {offsets = [0, 0], sizes = [8, 128], strides = [1, 1]} : vector<8x512xf32> to vector<8x128xf32>
    %62 = vector.extract_strided_slice %60 {offsets = [0, 128], sizes = [8, 128], strides = [1, 1]} : vector<8x512xf32> to vector<8x128xf32>
    %63 = vector.extract_strided_slice %60 {offsets = [0, 256], sizes = [8, 128], strides = [1, 1]} : vector<8x512xf32> to vector<8x128xf32>
    %64 = vector.extract_strided_slice %60 {offsets = [0, 384], sizes = [8, 128], strides = [1, 1]} : vector<8x512xf32> to vector<8x128xf32>
    %65 = arith.mulf %62, %36 : vector<8x128xf32>
    %66 = arith.mulf %61, %63 : vector<8x128xf32>
    %67 = arith.addf %65, %66 : vector<8x128xf32>
    %68 = math.tanh %67 : vector<8x128xf32>
    %69 = arith.mulf %64, %68 : vector<8x128xf32>
    %cst_26 = arith.constant dense<0.000000e+00> : vector<8x512xf32>
    %70 = tpu.matmul %69, %2, %cst_26 {dimension_numbers = #tpu.dot_dimension_numbers<[1], [0], [0], [1], [0, 0, 1, 1], [], []>} : vector<8x128xf32>, vector<128x512xf32>, vector<8x512xf32> -> vector<8x512xf32>
    %71 = arith.addf %70, %54 : vector<8x512xf32>
    %72 = math.tanh %71 : vector<8x512xf32>
    %73 = arith.mulf %72, %14 : vector<8x512xf32>
    %74 = arith.addf %73, %17 : vector<8x512xf32>
    %75 = vector.extract_strided_slice %74 {offsets = [0, 0], sizes = [8, 128], strides = [1, 1]} : vector<8x512xf32> to vector<8x128xf32>
    %76 = vector.extract_strided_slice %74 {offsets = [0, 128], sizes = [8, 128], strides = [1, 1]} : vector<8x512xf32> to vector<8x128xf32>
    %77 = vector.extract_strided_slice %74 {offsets = [0, 256], sizes = [8, 128], strides = [1, 1]} : vector<8x512xf32> to vector<8x128xf32>
    %78 = vector.extract_strided_slice %74 {offsets = [0, 384], sizes = [8, 128], strides = [1, 1]} : vector<8x512xf32> to vector<8x128xf32>
    %79 = arith.mulf %76, %50 : vector<8x128xf32>
    %80 = arith.mulf %75, %77 : vector<8x128xf32>
    %81 = arith.addf %79, %80 : vector<8x128xf32>
    %82 = math.tanh %81 : vector<8x128xf32>
    %83 = arith.mulf %78, %82 : vector<8x128xf32>
    %cst_27 = arith.constant dense<0.000000e+00> : vector<8x512xf32>
    %84 = tpu.matmul %83, %3, %cst_27 {dimension_numbers = #tpu.dot_dimension_numbers<[1], [0], [0], [1], [0, 0, 1, 1], [], []>} : vector<8x128xf32>, vector<128x512xf32>, vector<8x512xf32> -> vector<8x512xf32>
    %85 = arith.addf %84, %11 : vector<8x512xf32>
    %cst_28 = arith.constant dense<0.000000e+00> : vector<8x512xf32>
    %86 = tpu.matmul %69, %1, %cst_28 {dimension_numbers = #tpu.dot_dimension_numbers<[1], [0], [0], [1], [0, 0, 1, 1], [], []>} : vector<8x128xf32>, vector<128x512xf32>, vector<8x512xf32> -> vector<8x512xf32>
    %87 = vector.extract_strided_slice %8 {offsets = [16, 0], sizes = [8, 512], strides = [1, 1]} : vector<64x512xf32> to vector<8x512xf32>
    %88 = arith.addf %86, %87 : vector<8x512xf32>
    %89 = math.tanh %88 : vector<8x512xf32>
    %90 = arith.mulf %89, %14 : vector<8x512xf32>
    %91 = arith.addf %90, %17 : vector<8x512xf32>
    %92 = vector.extract_strided_slice %91 {offsets = [0, 0], sizes = [8, 128], strides = [1, 1]} : vector<8x512xf32> to vector<8x128xf32>
    %93 = vector.extract_strided_slice %91 {offsets = [0, 128], sizes = [8, 128], strides = [1, 1]} : vector<8x512xf32> to vector<8x128xf32>
    %94 = vector.extract_strided_slice %91 {offsets = [0, 256], sizes = [8, 128], strides = [1, 1]} : vector<8x512xf32> to vector<8x128xf32>
    %95 = vector.extract_strided_slice %91 {offsets = [0, 384], sizes = [8, 128], strides = [1, 1]} : vector<8x512xf32> to vector<8x128xf32>
    %96 = arith.mulf %93, %67 : vector<8x128xf32>
    %97 = arith.mulf %92, %94 : vector<8x128xf32>
    %98 = arith.addf %96, %97 : vector<8x128xf32>
    %99 = math.tanh %98 : vector<8x128xf32>
    %100 = arith.mulf %95, %99 : vector<8x128xf32>
    %cst_29 = arith.constant dense<0.000000e+00> : vector<8x512xf32>
    %101 = tpu.matmul %100, %2, %cst_29 {dimension_numbers = #tpu.dot_dimension_numbers<[1], [0], [0], [1], [0, 0, 1, 1], [], []>} : vector<8x128xf32>, vector<128x512xf32>, vector<8x512xf32> -> vector<8x512xf32>
    %102 = arith.addf %101, %85 : vector<8x512xf32>
    %103 = math.tanh %102 : vector<8x512xf32>
    %104 = arith.mulf %103, %14 : vector<8x512xf32>
    %105 = arith.addf %104, %17 : vector<8x512xf32>
    %106 = vector.extract_strided_slice %105 {offsets = [0, 0], sizes = [8, 128], strides = [1, 1]} : vector<8x512xf32> to vector<8x128xf32>
    %107 = vector.extract_strided_slice %105 {offsets = [0, 128], sizes = [8, 128], strides = [1, 1]} : vector<8x512xf32> to vector<8x128xf32>
    %108 = vector.extract_strided_slice %105 {offsets = [0, 256], sizes = [8, 128], strides = [1, 1]} : vector<8x512xf32> to vector<8x128xf32>
    %109 = vector.extract_strided_slice %105 {offsets = [0, 384], sizes = [8, 128], strides = [1, 1]} : vector<8x512xf32> to vector<8x128xf32>
    %110 = arith.mulf %107, %81 : vector<8x128xf32>
    %111 = arith.mulf %106, %108 : vector<8x128xf32>
    %112 = arith.addf %110, %111 : vector<8x128xf32>
    %113 = math.tanh %112 : vector<8x128xf32>
    %114 = arith.mulf %109, %113 : vector<8x128xf32>
    %cst_30 = arith.constant dense<0.000000e+00> : vector<8x512xf32>
    %115 = tpu.matmul %114, %3, %cst_30 {dimension_numbers = #tpu.dot_dimension_numbers<[1], [0], [0], [1], [0, 0, 1, 1], [], []>} : vector<8x128xf32>, vector<128x512xf32>, vector<8x512xf32> -> vector<8x512xf32>
    %116 = arith.addf %115, %11 : vector<8x512xf32>
    %cst_31 = arith.constant dense<0.000000e+00> : vector<8x512xf32>
    %117 = tpu.matmul %100, %1, %cst_31 {dimension_numbers = #tpu.dot_dimension_numbers<[1], [0], [0], [1], [0, 0, 1, 1], [], []>} : vector<8x128xf32>, vector<128x512xf32>, vector<8x512xf32> -> vector<8x512xf32>
    %118 = vector.extract_strided_slice %8 {offsets = [24, 0], sizes = [8, 512], strides = [1, 1]} : vector<64x512xf32> to vector<8x512xf32>
    %119 = arith.addf %117, %118 : vector<8x512xf32>
    %120 = math.tanh %119 : vector<8x512xf32>
    %121 = arith.mulf %120, %14 : vector<8x512xf32>
    %122 = arith.addf %121, %17 : vector<8x512xf32>
    %123 = vector.extract_strided_slice %122 {offsets = [0, 0], sizes = [8, 128], strides = [1, 1]} : vector<8x512xf32> to vector<8x128xf32>
    %124 = vector.extract_strided_slice %122 {offsets = [0, 128], sizes = [8, 128], strides = [1, 1]} : vector<8x512xf32> to vector<8x128xf32>
    %125 = vector.extract_strided_slice %122 {offsets = [0, 256], sizes = [8, 128], strides = [1, 1]} : vector<8x512xf32> to vector<8x128xf32>
    %126 = vector.extract_strided_slice %122 {offsets = [0, 384], sizes = [8, 128], strides = [1, 1]} : vector<8x512xf32> to vector<8x128xf32>
    %127 = arith.mulf %124, %98 : vector<8x128xf32>
    %128 = arith.mulf %123, %125 : vector<8x128xf32>
    %129 = arith.addf %127, %128 : vector<8x128xf32>
    %130 = math.tanh %129 : vector<8x128xf32>
    %131 = arith.mulf %126, %130 : vector<8x128xf32>
    %cst_32 = arith.constant dense<0.000000e+00> : vector<8x512xf32>
    %132 = tpu.matmul %131, %2, %cst_32 {dimension_numbers = #tpu.dot_dimension_numbers<[1], [0], [0], [1], [0, 0, 1, 1], [], []>} : vector<8x128xf32>, vector<128x512xf32>, vector<8x512xf32> -> vector<8x512xf32>
    %133 = arith.addf %132, %116 : vector<8x512xf32>
    %134 = math.tanh %133 : vector<8x512xf32>
    %135 = arith.mulf %134, %14 : vector<8x512xf32>
    %136 = arith.addf %135, %17 : vector<8x512xf32>
    %137 = vector.extract_strided_slice %136 {offsets = [0, 0], sizes = [8, 128], strides = [1, 1]} : vector<8x512xf32> to vector<8x128xf32>
    %138 = vector.extract_strided_slice %136 {offsets = [0, 128], sizes = [8, 128], strides = [1, 1]} : vector<8x512xf32> to vector<8x128xf32>
    %139 = vector.extract_strided_slice %136 {offsets = [0, 256], sizes = [8, 128], strides = [1, 1]} : vector<8x512xf32> to vector<8x128xf32>
    %140 = vector.extract_strided_slice %136 {offsets = [0, 384], sizes = [8, 128], strides = [1, 1]} : vector<8x512xf32> to vector<8x128xf32>
    %141 = arith.mulf %138, %112 : vector<8x128xf32>
    %142 = arith.mulf %137, %139 : vector<8x128xf32>
    %143 = arith.addf %141, %142 : vector<8x128xf32>
    %144 = math.tanh %143 : vector<8x128xf32>
    %145 = arith.mulf %140, %144 : vector<8x128xf32>
    %cst_33 = arith.constant dense<0.000000e+00> : vector<8x512xf32>
    %146 = tpu.matmul %145, %3, %cst_33 {dimension_numbers = #tpu.dot_dimension_numbers<[1], [0], [0], [1], [0, 0, 1, 1], [], []>} : vector<8x128xf32>, vector<128x512xf32>, vector<8x512xf32> -> vector<8x512xf32>
    %147 = arith.addf %146, %11 : vector<8x512xf32>
    %cst_34 = arith.constant dense<0.000000e+00> : vector<8x512xf32>
    %148 = tpu.matmul %131, %1, %cst_34 {dimension_numbers = #tpu.dot_dimension_numbers<[1], [0], [0], [1], [0, 0, 1, 1], [], []>} : vector<8x128xf32>, vector<128x512xf32>, vector<8x512xf32> -> vector<8x512xf32>
    %149 = vector.extract_strided_slice %8 {offsets = [32, 0], sizes = [8, 512], strides = [1, 1]} : vector<64x512xf32> to vector<8x512xf32>
    %150 = arith.addf %148, %149 : vector<8x512xf32>
    %151 = math.tanh %150 : vector<8x512xf32>
    %152 = arith.mulf %151, %14 : vector<8x512xf32>
    %153 = arith.addf %152, %17 : vector<8x512xf32>
    %154 = vector.extract_strided_slice %153 {offsets = [0, 0], sizes = [8, 128], strides = [1, 1]} : vector<8x512xf32> to vector<8x128xf32>
    %155 = vector.extract_strided_slice %153 {offsets = [0, 128], sizes = [8, 128], strides = [1, 1]} : vector<8x512xf32> to vector<8x128xf32>
    %156 = vector.extract_strided_slice %153 {offsets = [0, 256], sizes = [8, 128], strides = [1, 1]} : vector<8x512xf32> to vector<8x128xf32>
    %157 = vector.extract_strided_slice %153 {offsets = [0, 384], sizes = [8, 128], strides = [1, 1]} : vector<8x512xf32> to vector<8x128xf32>
    %158 = arith.mulf %155, %129 : vector<8x128xf32>
    %159 = arith.mulf %154, %156 : vector<8x128xf32>
    %160 = arith.addf %158, %159 : vector<8x128xf32>
    %161 = math.tanh %160 : vector<8x128xf32>
    %162 = arith.mulf %157, %161 : vector<8x128xf32>
    %cst_35 = arith.constant dense<0.000000e+00> : vector<8x512xf32>
    %163 = tpu.matmul %162, %2, %cst_35 {dimension_numbers = #tpu.dot_dimension_numbers<[1], [0], [0], [1], [0, 0, 1, 1], [], []>} : vector<8x128xf32>, vector<128x512xf32>, vector<8x512xf32> -> vector<8x512xf32>
    %164 = arith.addf %163, %147 : vector<8x512xf32>
    %165 = math.tanh %164 : vector<8x512xf32>
    %166 = arith.mulf %165, %14 : vector<8x512xf32>
    %167 = arith.addf %166, %17 : vector<8x512xf32>
    %168 = vector.extract_strided_slice %167 {offsets = [0, 0], sizes = [8, 128], strides = [1, 1]} : vector<8x512xf32> to vector<8x128xf32>
    %169 = vector.extract_strided_slice %167 {offsets = [0, 128], sizes = [8, 128], strides = [1, 1]} : vector<8x512xf32> to vector<8x128xf32>
    %170 = vector.extract_strided_slice %167 {offsets = [0, 256], sizes = [8, 128], strides = [1, 1]} : vector<8x512xf32> to vector<8x128xf32>
    %171 = vector.extract_strided_slice %167 {offsets = [0, 384], sizes = [8, 128], strides = [1, 1]} : vector<8x512xf32> to vector<8x128xf32>
    %172 = arith.mulf %169, %143 : vector<8x128xf32>
    %173 = arith.mulf %168, %170 : vector<8x128xf32>
    %174 = arith.addf %172, %173 : vector<8x128xf32>
    %175 = math.tanh %174 : vector<8x128xf32>
    %176 = arith.mulf %171, %175 : vector<8x128xf32>
    %cst_36 = arith.constant dense<0.000000e+00> : vector<8x512xf32>
    %177 = tpu.matmul %176, %3, %cst_36 {dimension_numbers = #tpu.dot_dimension_numbers<[1], [0], [0], [1], [0, 0, 1, 1], [], []>} : vector<8x128xf32>, vector<128x512xf32>, vector<8x512xf32> -> vector<8x512xf32>
    %178 = arith.addf %177, %11 : vector<8x512xf32>
    %cst_37 = arith.constant dense<0.000000e+00> : vector<8x512xf32>
    %179 = tpu.matmul %162, %1, %cst_37 {dimension_numbers = #tpu.dot_dimension_numbers<[1], [0], [0], [1], [0, 0, 1, 1], [], []>} : vector<8x128xf32>, vector<128x512xf32>, vector<8x512xf32> -> vector<8x512xf32>
    %180 = vector.extract_strided_slice %8 {offsets = [40, 0], sizes = [8, 512], strides = [1, 1]} : vector<64x512xf32> to vector<8x512xf32>
    %181 = arith.addf %179, %180 : vector<8x512xf32>
    %182 = math.tanh %181 : vector<8x512xf32>
    %183 = arith.mulf %182, %14 : vector<8x512xf32>
    %184 = arith.addf %183, %17 : vector<8x512xf32>
    %185 = vector.extract_strided_slice %184 {offsets = [0, 0], sizes = [8, 128], strides = [1, 1]} : vector<8x512xf32> to vector<8x128xf32>
    %186 = vector.extract_strided_slice %184 {offsets = [0, 128], sizes = [8, 128], strides = [1, 1]} : vector<8x512xf32> to vector<8x128xf32>
    %187 = vector.extract_strided_slice %184 {offsets = [0, 256], sizes = [8, 128], strides = [1, 1]} : vector<8x512xf32> to vector<8x128xf32>
    %188 = vector.extract_strided_slice %184 {offsets = [0, 384], sizes = [8, 128], strides = [1, 1]} : vector<8x512xf32> to vector<8x128xf32>
    %189 = arith.mulf %186, %160 : vector<8x128xf32>
    %190 = arith.mulf %185, %187 : vector<8x128xf32>
    %191 = arith.addf %189, %190 : vector<8x128xf32>
    %192 = math.tanh %191 : vector<8x128xf32>
    %193 = arith.mulf %188, %192 : vector<8x128xf32>
    %cst_38 = arith.constant dense<0.000000e+00> : vector<8x512xf32>
    %194 = tpu.matmul %193, %2, %cst_38 {dimension_numbers = #tpu.dot_dimension_numbers<[1], [0], [0], [1], [0, 0, 1, 1], [], []>} : vector<8x128xf32>, vector<128x512xf32>, vector<8x512xf32> -> vector<8x512xf32>
    %195 = arith.addf %194, %178 : vector<8x512xf32>
    %196 = math.tanh %195 : vector<8x512xf32>
    %197 = arith.mulf %196, %14 : vector<8x512xf32>
    %198 = arith.addf %197, %17 : vector<8x512xf32>
    %199 = vector.extract_strided_slice %198 {offsets = [0, 0], sizes = [8, 128], strides = [1, 1]} : vector<8x512xf32> to vector<8x128xf32>
    %200 = vector.extract_strided_slice %198 {offsets = [0, 128], sizes = [8, 128], strides = [1, 1]} : vector<8x512xf32> to vector<8x128xf32>
    %201 = vector.extract_strided_slice %198 {offsets = [0, 256], sizes = [8, 128], strides = [1, 1]} : vector<8x512xf32> to vector<8x128xf32>
    %202 = vector.extract_strided_slice %198 {offsets = [0, 384], sizes = [8, 128], strides = [1, 1]} : vector<8x512xf32> to vector<8x128xf32>
    %203 = arith.mulf %200, %174 : vector<8x128xf32>
    %204 = arith.mulf %199, %201 : vector<8x128xf32>
    %205 = arith.addf %203, %204 : vector<8x128xf32>
    %206 = math.tanh %205 : vector<8x128xf32>
    %207 = arith.mulf %202, %206 : vector<8x128xf32>
    %cst_39 = arith.constant dense<0.000000e+00> : vector<8x512xf32>
    %208 = tpu.matmul %207, %3, %cst_39 {dimension_numbers = #tpu.dot_dimension_numbers<[1], [0], [0], [1], [0, 0, 1, 1], [], []>} : vector<8x128xf32>, vector<128x512xf32>, vector<8x512xf32> -> vector<8x512xf32>
    %209 = arith.addf %208, %11 : vector<8x512xf32>
    %cst_40 = arith.constant dense<0.000000e+00> : vector<8x512xf32>
    %210 = tpu.matmul %193, %1, %cst_40 {dimension_numbers = #tpu.dot_dimension_numbers<[1], [0], [0], [1], [0, 0, 1, 1], [], []>} : vector<8x128xf32>, vector<128x512xf32>, vector<8x512xf32> -> vector<8x512xf32>
    %211 = vector.extract_strided_slice %8 {offsets = [48, 0], sizes = [8, 512], strides = [1, 1]} : vector<64x512xf32> to vector<8x512xf32>
    %212 = arith.addf %210, %211 : vector<8x512xf32>
    %213 = math.tanh %212 : vector<8x512xf32>
    %214 = arith.mulf %213, %14 : vector<8x512xf32>
    %215 = arith.addf %214, %17 : vector<8x512xf32>
    %216 = vector.extract_strided_slice %215 {offsets = [0, 0], sizes = [8, 128], strides = [1, 1]} : vector<8x512xf32> to vector<8x128xf32>
    %217 = vector.extract_strided_slice %215 {offsets = [0, 128], sizes = [8, 128], strides = [1, 1]} : vector<8x512xf32> to vector<8x128xf32>
    %218 = vector.extract_strided_slice %215 {offsets = [0, 256], sizes = [8, 128], strides = [1, 1]} : vector<8x512xf32> to vector<8x128xf32>
    %219 = vector.extract_strided_slice %215 {offsets = [0, 384], sizes = [8, 128], strides = [1, 1]} : vector<8x512xf32> to vector<8x128xf32>
    %220 = arith.mulf %217, %191 : vector<8x128xf32>
    %221 = arith.mulf %216, %218 : vector<8x128xf32>
    %222 = arith.addf %220, %221 : vector<8x128xf32>
    %223 = math.tanh %222 : vector<8x128xf32>
    %224 = arith.mulf %219, %223 : vector<8x128xf32>
    %cst_41 = arith.constant dense<0.000000e+00> : vector<8x512xf32>
    %225 = tpu.matmul %224, %2, %cst_41 {dimension_numbers = #tpu.dot_dimension_numbers<[1], [0], [0], [1], [0, 0, 1, 1], [], []>} : vector<8x128xf32>, vector<128x512xf32>, vector<8x512xf32> -> vector<8x512xf32>
    %226 = arith.addf %225, %209 : vector<8x512xf32>
    %227 = math.tanh %226 : vector<8x512xf32>
    %228 = arith.mulf %227, %14 : vector<8x512xf32>
    %229 = arith.addf %228, %17 : vector<8x512xf32>
    %230 = vector.extract_strided_slice %229 {offsets = [0, 0], sizes = [8, 128], strides = [1, 1]} : vector<8x512xf32> to vector<8x128xf32>
    %231 = vector.extract_strided_slice %229 {offsets = [0, 128], sizes = [8, 128], strides = [1, 1]} : vector<8x512xf32> to vector<8x128xf32>
    %232 = vector.extract_strided_slice %229 {offsets = [0, 256], sizes = [8, 128], strides = [1, 1]} : vector<8x512xf32> to vector<8x128xf32>
    %233 = vector.extract_strided_slice %229 {offsets = [0, 384], sizes = [8, 128], strides = [1, 1]} : vector<8x512xf32> to vector<8x128xf32>
    %234 = arith.mulf %231, %205 : vector<8x128xf32>
    %235 = arith.mulf %230, %232 : vector<8x128xf32>
    %236 = arith.addf %234, %235 : vector<8x128xf32>
    %237 = math.tanh %236 : vector<8x128xf32>
    %238 = arith.mulf %233, %237 : vector<8x128xf32>
    %cst_42 = arith.constant dense<0.000000e+00> : vector<8x512xf32>
    %239 = tpu.matmul %238, %3, %cst_42 {dimension_numbers = #tpu.dot_dimension_numbers<[1], [0], [0], [1], [0, 0, 1, 1], [], []>} : vector<8x128xf32>, vector<128x512xf32>, vector<8x512xf32> -> vector<8x512xf32>
    %240 = arith.addf %239, %11 : vector<8x512xf32>
    %cst_43 = arith.constant dense<0.000000e+00> : vector<8x512xf32>
    %241 = tpu.matmul %224, %1, %cst_43 {dimension_numbers = #tpu.dot_dimension_numbers<[1], [0], [0], [1], [0, 0, 1, 1], [], []>} : vector<8x128xf32>, vector<128x512xf32>, vector<8x512xf32> -> vector<8x512xf32>
    %242 = vector.extract_strided_slice %8 {offsets = [56, 0], sizes = [8, 512], strides = [1, 1]} : vector<64x512xf32> to vector<8x512xf32>
    %243 = arith.addf %241, %242 : vector<8x512xf32>
    %244 = math.tanh %243 : vector<8x512xf32>
    %245 = arith.mulf %244, %14 : vector<8x512xf32>
    %246 = arith.addf %245, %17 : vector<8x512xf32>
    %247 = vector.extract_strided_slice %246 {offsets = [0, 0], sizes = [8, 128], strides = [1, 1]} : vector<8x512xf32> to vector<8x128xf32>
    %248 = vector.extract_strided_slice %246 {offsets = [0, 128], sizes = [8, 128], strides = [1, 1]} : vector<8x512xf32> to vector<8x128xf32>
    %249 = vector.extract_strided_slice %246 {offsets = [0, 256], sizes = [8, 128], strides = [1, 1]} : vector<8x512xf32> to vector<8x128xf32>
    %250 = vector.extract_strided_slice %246 {offsets = [0, 384], sizes = [8, 128], strides = [1, 1]} : vector<8x512xf32> to vector<8x128xf32>
    %251 = arith.mulf %248, %222 : vector<8x128xf32>
    %252 = arith.mulf %247, %249 : vector<8x128xf32>
    %253 = arith.addf %251, %252 : vector<8x128xf32>
    %254 = math.tanh %253 : vector<8x128xf32>
    %255 = arith.mulf %250, %254 : vector<8x128xf32>
    %cst_44 = arith.constant dense<0.000000e+00> : vector<8x512xf32>
    %256 = tpu.matmul %255, %2, %cst_44 {dimension_numbers = #tpu.dot_dimension_numbers<[1], [0], [0], [1], [0, 0, 1, 1], [], []>} : vector<8x128xf32>, vector<128x512xf32>, vector<8x512xf32> -> vector<8x512xf32>
    %257 = arith.addf %256, %240 : vector<8x512xf32>
    %258 = math.tanh %257 : vector<8x512xf32>
    %259 = arith.mulf %258, %14 : vector<8x512xf32>
    %260 = arith.addf %259, %17 : vector<8x512xf32>
    %261 = vector.extract_strided_slice %260 {offsets = [0, 0], sizes = [8, 128], strides = [1, 1]} : vector<8x512xf32> to vector<8x128xf32>
    %262 = vector.extract_strided_slice %260 {offsets = [0, 128], sizes = [8, 128], strides = [1, 1]} : vector<8x512xf32> to vector<8x128xf32>
    %263 = vector.extract_strided_slice %260 {offsets = [0, 256], sizes = [8, 128], strides = [1, 1]} : vector<8x512xf32> to vector<8x128xf32>
    %264 = vector.extract_strided_slice %260 {offsets = [0, 384], sizes = [8, 128], strides = [1, 1]} : vector<8x512xf32> to vector<8x128xf32>
    %265 = arith.mulf %262, %236 : vector<8x128xf32>
    %266 = arith.mulf %261, %263 : vector<8x128xf32>
    %267 = arith.addf %265, %266 : vector<8x128xf32>
    %268 = math.tanh %267 : vector<8x128xf32>
    %269 = arith.mulf %264, %268 : vector<8x128xf32>
    %c0_45 = arith.constant 0 : index
    %c0_46 = arith.constant 0 : index
    %270 = vector.load %arg9[%c0_45, %c0_46] : memref<128x32xf32, #tpu.memory_space<vmem>>, vector<128x32xf32>
    %cst_47 = arith.constant dense<0.000000e+00> : vector<8x32xf32>
    %271 = tpu.matmul %269, %270, %cst_47 {dimension_numbers = #tpu.dot_dimension_numbers<[1], [0], [0], [1], [0, 0, 1, 1], [], []>} : vector<8x128xf32>, vector<128x32xf32>, vector<8x32xf32> -> vector<8x32xf32>
    %c0_48 = arith.constant 0 : index
    %c0_49 = arith.constant 0 : index
    %272 = vector.load %arg10[%c0_48, %c0_49] : memref<1x32xf32, #tpu.memory_space<vmem>>, vector<1x32xf32>
    %273 = vector.broadcast %272 : vector<1x32xf32> to vector<8x32xf32>
    %274 = arith.addf %271, %273 : vector<8x32xf32>
    %cst_50 = arith.constant 0.000000e+00 : f32
    %275 = vector.broadcast %cst_50 : f32 to vector<8x32xf32>
    %276 = arith.maximumf %274, %275 : vector<8x32xf32>
    %c0_51 = arith.constant 0 : index
    %c0_52 = arith.constant 0 : index
    %277 = vector.load %arg11[%c0_51, %c0_52] : memref<32x8xf32, #tpu.memory_space<vmem>>, vector<32x8xf32>
    %cst_53 = arith.constant dense<0.000000e+00> : vector<8x8xf32>
    %278 = tpu.matmul %276, %277, %cst_53 {dimension_numbers = #tpu.dot_dimension_numbers<[1], [0], [0], [1], [0, 0, 1, 1], [], []>} : vector<8x32xf32>, vector<32x8xf32>, vector<8x8xf32> -> vector<8x8xf32>
    %c0_54 = arith.constant 0 : index
    %c0_55 = arith.constant 0 : index
    %279 = vector.load %arg12[%c0_54, %c0_55] : memref<1x8xf32, #tpu.memory_space<vmem>>, vector<1x8xf32>
    %280 = vector.broadcast %279 : vector<1x8xf32> to vector<8x8xf32>
    %281 = arith.addf %278, %280 : vector<8x8xf32>
    %c0_56 = arith.constant 0 : index
    %c0_57 = arith.constant 0 : index
    %282 = vector.load %arg13[%c0_56, %c0_57] : memref<8x8xf32, #tpu.memory_space<vmem>>, vector<8x8xf32>
    tpu.vector_store %arg13[%c0_56, %c0_57], %281 {strides = array<i32>} : memref<8x8xf32, #tpu.memory_space<vmem>>, vector<8x8xf32>,
    %c0_58 = arith.constant 0 : index
    %c0_59 = arith.constant 0 : index
    %c0_60 = arith.constant 0 : index
    %283 = vector.load %arg14[%c0_58, %c0_59, %c0_60] : memref<2x8x128xf32, #tpu.memory_space<vmem>>, vector<1x8x128xf32>
    %284 = vector.shape_cast %283 : vector<1x8x128xf32> to vector<8x128xf32>
    %285 = vector.shape_cast %255 : vector<8x128xf32> to vector<1x8x128xf32>
    tpu.vector_store %arg14[%c0_58, %c0_59, %c0_60], %285 {strides = array<i32>} : memref<2x8x128xf32, #tpu.memory_space<vmem>>, vector<1x8x128xf32>,
    %c1 = arith.constant 1 : index
    %c0_61 = arith.constant 0 : index
    %c0_62 = arith.constant 0 : index
    %286 = vector.load %arg14[%c1, %c0_61, %c0_62] : memref<2x8x128xf32, #tpu.memory_space<vmem>>, vector<1x8x128xf32>
    %287 = vector.shape_cast %286 : vector<1x8x128xf32> to vector<8x128xf32>
    %288 = vector.shape_cast %269 : vector<8x128xf32> to vector<1x8x128xf32>
    tpu.vector_store %arg14[%c1, %c0_61, %c0_62], %288 {strides = array<i32>} : memref<2x8x128xf32, #tpu.memory_space<vmem>>, vector<1x8x128xf32>,
    %c0_63 = arith.constant 0 : index
    %c0_64 = arith.constant 0 : index
    %c0_65 = arith.constant 0 : index
    %289 = vector.load %arg15[%c0_63, %c0_64, %c0_65] : memref<2x8x128xf32, #tpu.memory_space<vmem>>, vector<1x8x128xf32>
    %290 = vector.shape_cast %289 : vector<1x8x128xf32> to vector<8x128xf32>
    %291 = vector.shape_cast %253 : vector<8x128xf32> to vector<1x8x128xf32>
    tpu.vector_store %arg15[%c0_63, %c0_64, %c0_65], %291 {strides = array<i32>} : memref<2x8x128xf32, #tpu.memory_space<vmem>>, vector<1x8x128xf32>,
    %c1_66 = arith.constant 1 : index
    %c0_67 = arith.constant 0 : index
    %c0_68 = arith.constant 0 : index
    %292 = vector.load %arg15[%c1_66, %c0_67, %c0_68] : memref<2x8x128xf32, #tpu.memory_space<vmem>>, vector<1x8x128xf32>
    %293 = vector.shape_cast %292 : vector<1x8x128xf32> to vector<8x128xf32>
    %294 = vector.shape_cast %267 : vector<8x128xf32> to vector<1x8x128xf32>
    tpu.vector_store %arg15[%c1_66, %c0_67, %c0_68], %294 {strides = array<i32>} : memref<2x8x128xf32, #tpu.memory_space<vmem>>, vector<1x8x128xf32>,
    return
  }
}

</mosaic_0001>

<bundles_post_ra>
// kernel: tpu_custom_call.1
= control target key start
LH: loop header
LB: loop body
LE: loop exit
PB: predicated region body
PF: predicated region fallthrough
CT: control target
= control target key end

     0   :  { %21 = vsyncpa [#allocation3], 0  ;;  %s7732_s0 = inlined_call_operand.vmem [shape: f32[64,16], index: 0, kind: input, shape index: {}]   ;;  %s7733_s1 = inlined_call_operand.vmem [shape: f32[16,512], index: 1, kind: input, shape index: {}]   ;;  %s7734_s2 = inlined_call_operand.hbm [shape: f32[128,512], index: 2, kind: input, shape index: {}]   ;;  %s7735_s3 = inlined_call_operand.vmem [shape: f32[1,512], index: 3, kind: input, shape index: {}]   ;;  %s7736_s4 = inlined_call_operand.hbm [shape: f32[128,512], index: 4, kind: input, shape index: {}]   ;;  %s7737_s5 = inlined_call_operand.hbm [shape: f32[128,512], index: 5, kind: input, shape index: {}]   ;;  %s7738_s6 = inlined_call_operand.vmem [shape: f32[1,512], index: 6, kind: input, shape index: {}]   ;;  %s7739_s7 = inlined_call_operand.vmem [shape: f32[1,512], index: 7, kind: input, shape index: {}]   ;;  %s7740_s8 = inlined_call_operand.vmem [shape: f32[1,512], index: 8, kind: input, shape index: {}]   ;;  %s7741_s9 = inlined_call_operand.vmem [shape: f32[128,32], index: 9, kind: input, shape index: {}]   ;;  %s7742_s10 = inlined_call_operand.vmem [shape: f32[1,32], index: 10, kind: input, shape index: {}]   ;;  %s7743_s11 = inlined_call_operand.vmem [shape: f32[32,8], index: 11, kind: input, shape index: {}]   ;;  %s7744_s12 = inlined_call_operand.vmem [shape: f32[1,8], index: 12, kind: input, shape index: {}]   ;;  %s7745_s13 = inlined_call_operand.hbm [shape: f32[8,8], index: 13, kind: output, shape index: {0}]   ;;  %s7746_s14 = inlined_call_operand.hbm [shape: f32[2,8,128], index: 14, kind: output, shape index: {1}]   ;;  %s7747_s15 = inlined_call_operand.hbm [shape: f32[2,8,128], index: 15, kind: output, shape index: {2}]  }
   0x1   :  { %22 = vsyncpa [#allocation6], 0 }
   0x2   :  { %23 = vsyncpa [#allocation4], 0 }
   0x3   :  { %24 = vsyncpa [#allocation10], 0  ;;  %s48_s20 = sshll.u32 %s7736_s4, 4  ;;  %s3795_s21 = smov [#allocation5]   ;;  %s49_s20 = int_to_ptr.hbm [resolvable:$true] %s48_s20 }
   0x4   :  { %s50_s22 = sshll.u32 %s3795_s21, 4  ;;  %s33_s25 = sshll.u32 %s7734_s2, 4  ;;  %s51_s22 = int_to_ptr.vmem [resolvable:$true] %s50_s22  ;;  %s34_s25 = int_to_ptr.hbm [resolvable:$true] %s33_s25 }
   0x5   :  { %s3796_s26 = smov 512   ;;  %s3797_s27 = smov 32  }
   0x6   :  { %56 = dma.hbm_to_vmem [thread:$0]  %s49_s20, 8192, %s51_s22, [#allocation6], %s3796_s26, %s3796_s26, %s3797_s27  }
   0x7   :  { %s3798_s28 = smov [#allocation2]   ;;  %s61_s17 = sshll.u32 %s7737_s5, 4  ;;  %s62_s17 = int_to_ptr.hbm [resolvable:$true] %s61_s17 }
   0x8   :  { %s35_s29 = sshll.u32 %s3798_s28, 4  ;;  %s3799_s4 = smov [#allocation7]   ;;  %s36_s29 = int_to_ptr.vmem [resolvable:$true] %s35_s29 }
   0x9   :  { %41 = dma.hbm_to_vmem [thread:$0]  %s34_s25, 8192, %s36_s29, [#allocation3], %s3796_s26, %s3796_s26, %s3797_s27  }
   0xa   :  { %s63_s18 = sshll.u32 %s3799_s4, 4  ;;  %s64_s18 = int_to_ptr.vmem [resolvable:$true] %s63_s18 }
   0xb   :  { %69 = dma.hbm_to_vmem [thread:$0]  %s62_s17, 8192, %s64_s18, [#allocation6], %s3796_s26, %s3796_s26, %s3797_s27  }
   0xc   :  { %3787 = dma.done.wait [#allocation3], 8192  }
   0xd   :  { %3788 = vsyncadd [#allocation3], 4294959104 }
   0xe   :  { %3789 = dma.done.wait [#allocation6], 16384  }
   0xf   :  { %3790 = vsyncadd [#allocation6], 4294950912  ;;  %v100_v0 = vld [vmem:[%s7733_s1 + $0x20] sm:$0xff]  ;;  %v101_v1 = vld [vmem:[%s7733_s1 + $0x28] sm:$0xff]  ;;  %vm314_vm0 = vcmask 130048   ;;  %vm2774_vm1 = vcmask 261120  }
  0x10   :  { %v103_v2 = vld [vmem:[%s7733_s1 + $0x38] sm:$0xff]  ;;  %353 = vmatpush.msra.mxu0 %v100_v0  ;;  %2892 = vmatpush.msra.mxu2 %v100_v0  ;;  %v96_v3 = vld [vmem:[%s7733_s1] sm:$0xff]  ;;  %v97_v4 = vld [vmem:[%s7733_s1 + $0x8] sm:$0xff]  ;;  %s2823_s16 = sshll.u32 %s7746_s14, 4  ;;  %s3804_s18 = smov [#allocation11]   ;;  %vm2798_vm2 = vcmask 64512   ;;  %s2824_s16 = int_to_ptr.hbm [resolvable:$true] %s2823_s16 }
  0x11   :  { %v99_v5 = vld [vmem:[%s7733_s1 + $0x18] sm:$0xff]  ;;  %394 = vmatpush.msra.mxu1 %v101_v1  ;;  %476 = vmatpush.msra.mxu3 %v103_v2  ;;  %v3916_v6 = vld [vmem:[%s7732_s0 + $0x30] sm:$0xff]  ;;  %v3921_v7 = vld [vmem:[%s7732_s0] sm:$0xff]  ;;  %s2834_s2 = sshll.u32 %s3804_s18, 4  ;;  %s3805_s14 = smov [#allocation8]   ;;  %s2835_s2 = int_to_ptr.vmem [resolvable:$true] %s2834_s2 }
  0x12   :  { %354 = vmatpush.msra.mxu0 %v96_v3  ;;  %2893 = vmatpush.msra.mxu2 %v96_v3  ;;  %v102_v8 = vld [vmem:[%s7733_s1 + $0x30] sm:$0xff]  ;;  %v3926_v9 = vld [vmem:[#allocation7 + $0x1e0] sm:$0xff]  ;;  %v3939_v12 = vld [vmem:[#allocation7 + $0x1e8] sm:$0xff]  ;;  %s2811_s20 = sshll.u32 %s3805_s14, 4  ;;  %s2813_s22 = sshll.u32 %s7745_s13, 4  ;;  %s2812_s20 = int_to_ptr.vmem [resolvable:$true] %s2811_s20  ;;  %s2814_s22 = int_to_ptr.hbm [resolvable:$true] %s2813_s22 }
  0x13   :  { %395 = vmatpush.msra.mxu1 %v97_v4  ;;  %477 = vmatpush.msra.mxu3 %v99_v5  ;;  %v98_v10 = vld [vmem:[%s7733_s1 + $0x10] sm:$0xff]  ;;  %v3937_v11 = vld [vmem:[#allocation7 + $0x1c0] sm:$0xff]  ;;  %v3941_v13 = vld [vmem:[#allocation7 + $0x1f8] sm:$0xff] }
  0x14   :  { %2865 = vmatmul.msk.f32.vlgmr.msra.gmra.mxu2 %vm314_vm0, %v3916_v6  ;;  %2867 = vmatmul.msk.f32.vlgmr.msra.gmra.mxu1 %vm314_vm0, %v3921_v7  ;;  %v3945_v14 = vld [vmem:[#allocation7 + $0x1c8] sm:$0xff]  ;;  %v3947_v15 = vld [vmem:[#allocation7 + $0x1a0] sm:$0xff]  ;;  %v3951_v16 = vld [vmem:[#allocation7 + $0x1d8] sm:$0xff] }
  0x15   :  { %435 = vmatpush.msrb.mxu2 %v102_v8  ;;  %2883 = vmatmul.msk.f32.vlgmr.msra.gmra.mxu3 %vm314_vm0, %v3921_v7  ;;  %v3955_v17 = vld [vmem:[#allocation7 + $0x1a8] sm:$0xff]  ;;  %v3957_v18 = vld [vmem:[#allocation7 + $0x1f0] sm:$0xff]  ;;  %v3959_v19 = vld [vmem:[#allocation7 + $0x180] sm:$0xff] }
  0x16   :  { %533 = vmatpush.msrb.mxu0 %v3926_v9  ;;  %553 = vmatpush.msrb.mxu1 %v3939_v12  ;;  %v3964_v20 = vld [vmem:[%s7732_s0 + $0x38] sm:$0xff]  ;;  %v3972_v21 = vld [vmem:[%s7732_s0 + $0x8] sm:$0xff]  ;;  %v3975_v22 = vld [vmem:[#allocation7 + $0x160] sm:$0xff] }
  0x17   :  { %2859 = vmatmul.msk.f32.vlgmr.msra.gmra.mxu0 %vm314_vm0, %v3921_v7  ;;  %436 = vmatpush.msrb.mxu2 %v98_v10  ;;  %v3978_v23 = vld [vmem:[#allocation7 + $0x1b8] sm:$0xff]  ;;  %v3983_v24 = vld [vmem:[#allocation7 + $0x188] sm:$0xff]  ;;  %v3989_v25 = vld [vmem:[#allocation7 + $0x140] sm:$0xff] }
  0x18   :  { %534 = vmatpush.msrb.mxu0 %v3937_v11  ;;  %593 = vmatpush.msrb.mxu3 %v3941_v13  ;;  %v3991_v26 = vld [vmem:[#allocation7 + $0x198] sm:$0xff]  ;;  %v3995_v27 = vld [vmem:[#allocation7 + $0x168] sm:$0xff]  ;;  %v3997_v28 = vld [vmem:[#allocation7 + $0x1d0] sm:$0xff] }
  0x19   :  { %554 = vmatpush.msrb.mxu1 %v3945_v14  ;;  %573 = vmatpush.msra.mxu2 %v3957_v18  ;;  %v3999_v29 = vld [vmem:[#allocation7 + $0x120] sm:$0xff]  ;;  %v4004_v30 = vld [vmem:[#allocation7 + $0x178] sm:$0xff]  ;;  %v4008_v31 = vld [vmem:[#allocation7 + $0x148] sm:$0xff] }
  0x1a   :  { %535 = vmatpush.msrb.mxu0 %v3947_v15  ;;  %594 = vmatpush.msrb.mxu3 %v3951_v16  ;;  %v4010_v32 = vld [vmem:[#allocation7 + $0x1b0] sm:$0xff]  ;;  %v4012_v33 = vld [vmem:[#allocation7 + $0x100] sm:$0xff]  ;;  %v4026_v36 = vld [vmem:[#allocation7 + $0x158] sm:$0xff] }
  0x1b   :  { %555 = vmatpush.msrb.mxu1 %v3955_v17  ;;  %574 = vmatpush.msra.mxu2 %v3997_v28  ;;  %v4020_v34 = vld [vmem:[%s7732_s0 + $0x10] sm:$0xff]  ;;  %v4023_v35 = vld [vmem:[#allocation7 + $0xe0] sm:$0xff]  ;;  %v4032_v37 = vld [vmem:[#allocation7 + $0x128] sm:$0xff] }
  0x1c   :  { %536 = vmatpush.msrb.mxu0 %v3959_v19  ;;  %2866 = vmatmul.msk.f32.gmra.mxu2 %vm314_vm0, %v3964_v20  ;;  %v4038_v38 = vld [vmem:[#allocation7 + $0xc0] sm:$0xff]  ;;  %v4040_v39 = vld [vmem:[#allocation7 + $0x138] sm:$0xff]  ;;  %v4044_v40 = vld [vmem:[#allocation7 + $0x108] sm:$0xff] }
  0x1d   :  { %2868 = vmatmul.msk.f32.gmra.mxu1 %vm314_vm0, %v3972_v21  ;;  %2884 = vmatmul.msk.f32.gmra.mxu3 %vm314_vm0, %v3972_v21  ;;  %v4046_v41 = vld [vmem:[#allocation7 + $0x190] sm:$0xff]  ;;  %v4048_v42 = vld [vmem:[#allocation7 + $0xa0] sm:$0xff]  ;;  %v4053_v43 = vld [vmem:[#allocation7 + $0x118] sm:$0xff] }
  0x1e   :  { %537 = vmatpush.msrb.mxu0 %v3975_v22  ;;  %595 = vmatpush.msrb.mxu3 %v3978_v23  ;;  %v4057_v44 = vld [vmem:[#allocation7 + $0xe8] sm:$0xff]  ;;  %v4059_v45 = vld [vmem:[#allocation7 + $0x170] sm:$0xff]  ;;  %v4061_v46 = vld [vmem:[#allocation7 + $0x80] sm:$0xff] }
  0x1f   :  { %2860 = vmatmul.msk.f32.gmra.mxu0 %vm314_vm0, %v3972_v21  ;;  %556 = vmatpush.msrb.mxu1 %v3983_v24  ;;  %v4069_v47 = vld [vmem:[%s7732_s0 + $0x18] sm:$0xff]  ;;  %v4072_v48 = vld [vmem:[#allocation7 + $0x60] sm:$0xff]  ;;  %v4081_v50 = vld [vmem:[#allocation7 + $0xc8] sm:$0xff] }
  0x20   :  { %538 = vmatpush.msrb.mxu0 %v3989_v25  ;;  %596 = vmatpush.msrb.mxu3 %v3991_v26  ;;  %8331 = vst [vmem:[#allocation16_spill] sm:$0xff] %v4072_v48  ;;  %v4075_v49 = vld [vmem:[#allocation7 + $0xf8] sm:$0xff]  ;;  %v4087_v51 = vld [vmem:[#allocation7 + $0x40] sm:$0xff]  ;;  %v4093_v53 = vld [vmem:[#allocation7 + $0xa8] sm:$0xff] }
  0x21   :  { %557 = vmatpush.msrb.mxu1 %v3995_v27  ;;  %575 = vmatpush.msra.mxu2 %v4010_v32  ;;  %8332 = vst [vmem:[#allocation17_spill] sm:$0xff] %v4087_v51  ;;  %v4089_v52 = vld [vmem:[#allocation7 + $0xd8] sm:$0xff]  ;;  %v4095_v54 = vld [vmem:[#allocation7 + $0x150] sm:$0xff]  ;;  %v4097_v55 = vld [vmem:[#allocation7 + $0x20] sm:$0xff] }
  0x22   :  { %539 = vmatpush.msrb.mxu0 %v3999_v29  ;;  %597 = vmatpush.msrb.mxu3 %v4004_v30  ;;  %8333 = vst [vmem:[#allocation18_spill] sm:$0xff] %v4097_v55  ;;  %v4102_v56 = vld [vmem:[#allocation7 + $0xb8] sm:$0xff]  ;;  %v4106_v57 = vld [vmem:[#allocation7 + $0x88] sm:$0xff]  ;;  %v4108_v58 = vld [vmem:[#allocation7 + $0x130] sm:$0xff] }
  0x23   :  { %558 = vmatpush.msrb.mxu1 %v4008_v31  ;;  %576 = vmatpush.msra.mxu2 %v4046_v41  ;;  %v4110_v59 = vld [vmem:[#allocation7] sm:$0xff]  ;;  %v4124_v62 = vld [vmem:[#allocation7 + $0x68] sm:$0xff]  ;;  %v4130_v63 = vld [vmem:[#allocation7 + $0x98] sm:$0xff] }
  0x24   :  { %540 = vmatpush.msrb.mxu0 %v4012_v33  ;;  %2875 = vmatmul.msk.f32.vlgmr.msrb.gmra.mxu2 %vm314_vm0, %v3921_v7  ;;  %8334 = vst [vmem:[#allocation19_spill] sm:$0xff] %v4110_v59  ;;  %v4116_v60 = vld [vmem:[#allocation2 + $0x1e0] sm:$0xff]  ;;  %v4137_v1 = vld [vmem:[#allocation7 + $0x48] sm:$0xff]  ;;  %v4142_v2 = vld [vmem:[#allocation7 + $0x78] sm:$0xff] }
  0x25   :  { %2869 = vmatmul.msk.f32.gmra.mxu1 %vm314_vm0, %v4020_v34  ;;  %2885 = vmatmul.msk.f32.gmra.mxu3 %vm314_vm0, %v4020_v34  ;;  %8335 = vst [vmem:[#allocation20_spill] sm:$0xff] %v4116_v60  ;;  %v4121_v61 = vld [vmem:[%s7732_s0 + $0x20] sm:$0xff]  ;;  %v4148_v4 = vld [vmem:[#allocation7 + $0x28] sm:$0xff]  ;;  %v4150_v5 = vld [vmem:[#allocation7 + $0x110] sm:$0xff] }
  0x26   :  { %541 = vmatpush.msrb.mxu0 %v4023_v35  ;;  %598 = vmatpush.msrb.mxu3 %v4026_v36  ;;  %8336 = vst [vmem:[#allocation21_spill] sm:$0xff] %v4124_v62  ;;  %v4132_v0 = vld [vmem:[#allocation2 + $0x1c0] sm:$0xff]  ;;  %v4153_v7 = vld [vmem:[#allocation7 + $0x58] sm:$0xff]  ;;  %v4161_v10 = vld [vmem:[#allocation7 + $0x8] sm:$0xff] }
  0x27   :  { %2861 = vmatmul.msk.f32.gmra.mxu0 %vm314_vm0, %v4020_v34  ;;  %559 = vmatpush.msrb.mxu1 %v4032_v37  ;;  %8337 = vst [vmem:[#allocation22_spill] sm:$0xff] %v4130_v63  ;;  %v4144_v3 = vld [vmem:[#allocation2 + $0x1a0] sm:$0xff] }
  0x28   :  { %542 = vmatpush.msrb.mxu0 %v4038_v38  ;;  %599 = vmatpush.msrb.mxu3 %v4040_v39  ;;  %8338 = vst [vmem:[#allocation23_spill] sm:$0xff] %v4132_v0  ;;  %v4155_v8 = vld [vmem:[#allocation2 + $0x180] sm:$0xff] }
  0x29   :  { %560 = vmatpush.msrb.mxu1 %v4044_v40  ;;  %577 = vmatpush.msra.mxu2 %v4059_v45  ;;  %8339 = vst [vmem:[#allocation24_spill] sm:$0xff] %v4137_v1 }
  0x2a   :  { %543 = vmatpush.msrb.mxu0 %v4048_v42  ;;  %600 = vmatpush.msrb.mxu3 %v4053_v43  ;;  %8340 = vst [vmem:[#allocation25_spill] sm:$0xff] %v4142_v2 }
  0x2b   :  { %561 = vmatpush.msrb.mxu1 %v4057_v44  ;;  %578 = vmatpush.msra.mxu2 %v4095_v54  ;;  %8341 = vst [vmem:[#allocation26_spill] sm:$0xff] %v4144_v3 }
  0x2c   :  { %544 = vmatpush.msrb.mxu0 %v4061_v46  ;;  %2876 = vmatmul.msk.f32.gmra.mxu2 %vm314_vm0, %v3972_v21  ;;  %8342 = vst [vmem:[#allocation27_spill] sm:$0xff] %v4148_v4  ;;  %v4164_v21 = vld [vmem:[#allocation7 + $0x38] sm:$0xff] }
  0x2d   :  { %2870 = vmatmul.msk.f32.gmra.mxu1 %vm314_vm0, %v4069_v47  ;;  %2886 = vmatmul.msk.f32.gmra.mxu3 %vm314_vm0, %v4069_v47  ;;  %8343 = vst [vmem:[#allocation28_spill] sm:$0xff] %v4153_v7 }
  0x2e   :  { %545 = vmatpush.msrb.mxu0 %v4072_v48  ;;  %601 = vmatpush.msrb.mxu3 %v4075_v49  ;;  %8344 = vst [vmem:[#allocation29_spill] sm:$0xff] %v4155_v8  ;;  %v4664_v48 = vld [vmem:[#allocation5 + $0x30] sm:$0xff] }
  0x2f   :  { %562 = vmatpush.msrb.mxu1 %v4081_v50  ;;  %2862 = vmatmul.msk.f32.gmra.mxu0 %vm314_vm0, %v4069_v47  ;;  %8345 = vst [vmem:[#allocation30_spill] sm:$0xff] %v4161_v10 }
  0x30   :  { %546 = vmatpush.msrb.mxu0 %v4087_v51  ;;  %602 = vmatpush.msrb.mxu3 %v4089_v52  ;;  %8346 = vst [vmem:[#allocation31_spill] sm:$0xff] %v4164_v21  ;;  %v4267_v51 = vld [vmem:[#allocation2 + $0x128] sm:$0xff] }
  0x31   :  { %563 = vmatpush.msrb.mxu1 %v4093_v53  ;;  %579 = vmatpush.msra.mxu2 %v4108_v58  ;;  %8371 = vst [vmem:[#allocation56_spill] sm:$0xff] %v4267_v51 }
  0x32   :  { %547 = vmatpush.msrb.mxu0 %v4097_v55  ;;  %603 = vmatpush.msrb.mxu3 %v4102_v56  ;;  %v4207_v55 = vld [vmem:[#allocation2 + $0x100] sm:$0xff] }
  0x33   :  { %564 = vmatpush.msrb.mxu1 %v4106_v57  ;;  %580 = vmatpush.msra.mxu2 %v4150_v5  ;;  %8355 = vst [vmem:[#allocation40_spill] sm:$0xff] %v4207_v55 }
  0x34   :  { %548 = vmatpush.msrb.mxu0 %v4110_v59  ;;  %2877 = vmatmul.msk.f32.gmra.mxu2 %vm314_vm0, %v4020_v34  ;;  %v4166_v34 = vld [vmem:[#allocation2 + $0x160] sm:$0xff]  ;;  %v4185_v59 = vld [vmem:[#allocation2 + $0x1e8] sm:$0xff] }
  0x35   :  { %2871 = vmatmul.msk.f32.gmra.mxu1 %vm314_vm0, %v4121_v61  ;;  %2887 = vmatmul.msk.f32.gmra.mxu3 %vm314_vm0, %v4121_v61  ;;  %8347 = vst [vmem:[#allocation32_spill] sm:$0xff] %v4166_v34 }
  0x36   :  { %613 = vmatpush.msra.mxu0 %v4116_v60  ;;  %565 = vmatpush.msrb.mxu1 %v4124_v62  ;;  %v4181_v60 = vld [vmem:[#allocation2 + $0x140] sm:$0xff]  ;;  %8350 = vst [vmem:[#allocation35_spill] sm:$0xff] %v4185_v59 }
  0x37   :  { %604 = vmatpush.msrb.mxu3 %v4130_v63  ;;  %2863 = vmatmul.msk.f32.gmra.mxu0 %vm314_vm0, %v4121_v61  ;;  %8349 = vst [vmem:[#allocation34_spill] sm:$0xff] %v4181_v60 }
  0x38   :  { %614 = vmatpush.msra.mxu0 %v4132_v0  ;;  %566 = vmatpush.msrb.mxu1 %v4137_v1  ;;  %v4174_v0 = vld [vmem:[%s7732_s0 + $0x28] sm:$0xff]  ;;  %v4263_v1 = vld [vmem:[#allocation2 + $0x80] sm:$0xff] }
  0x39   :  { %605 = vmatpush.msrb.mxu3 %v4142_v2  ;;  %8370 = vst [vmem:[#allocation55_spill] sm:$0xff] %v4263_v1  ;;  %v4269_v2 = vld [vmem:[#allocation2 + $0x138] sm:$0xff] }
  0x3a   :  { %615 = vmatpush.msra.mxu0 %v4144_v3  ;;  %567 = vmatpush.msrb.mxu1 %v4148_v4  ;;  %v4179_v3 = vld [vmem:[#allocation7 + $0x18] sm:$0xff]  ;;  %v4205_v4 = vld [vmem:[#allocation7 + $0xd0] sm:$0xff]  ;;  %8372 = vst [vmem:[#allocation57_spill] sm:$0xff] %v4269_v2 }
  0x3b   :  { %606 = vmatpush.msrb.mxu3 %v4153_v7  ;;  %8348 = vst [vmem:[#allocation33_spill] sm:$0xff] %v4179_v3  ;;  %v4211_v7 = vld [vmem:[#allocation2 + $0x1a8] sm:$0xff] }
  0x3c   :  { %616 = vmatpush.msra.mxu0 %v4155_v8  ;;  %2878 = vmatmul.msk.f32.gmra.mxu2 %vm314_vm0, %v4069_v47  ;;  %v4187_v8 = vld [vmem:[#allocation2 + $0x1f8] sm:$0xff]  ;;  %v4193_v47 = vld [vmem:[#allocation7 + $0xf0] sm:$0xff]  ;;  %8356 = vst [vmem:[#allocation41_spill] sm:$0xff] %v4211_v7 }
  0x3d   :  { %568 = vmatpush.msrb.mxu1 %v4161_v10  ;;  %607 = vmatpush.msrb.mxu3 %v4164_v21  ;;  %8351 = vst [vmem:[#allocation36_spill] sm:$0xff] %v4187_v8  ;;  %v4195_v10 = vld [vmem:[#allocation2 + $0x120] sm:$0xff]  ;;  %v4199_v21 = vld [vmem:[#allocation2 + $0x1c8] sm:$0xff] }
  0x3e   :  { %617 = vmatpush.msra.mxu0 %v4166_v34  ;;  %2872 = vmatmul.msk.f32.gmra.mxu1 %vm314_vm0, %v4174_v0  ;;  %8352 = vst [vmem:[#allocation37_spill] sm:$0xff] %v4195_v10  ;;  %v4201_v34 = vld [vmem:[#allocation2 + $0x1d8] sm:$0xff] }
  0x3f   :  { %2888 = vmatmul.msk.f32.gmra.mxu3 %vm314_vm0, %v4174_v0  ;;  %8353 = vst [vmem:[#allocation38_spill] sm:$0xff] %v4199_v21  ;;  %633 = vmatpush.msra.mxu1 %v4185_v59  ;;  %v4223_v59 = vld [vmem:[#allocation2 + $0x188] sm:$0xff] }
  0x40   :  { %608 = vmatpush.msrb.mxu3 %v4179_v3  ;;  %618 = vmatpush.msra.mxu0 %v4181_v60  ;;  %8354 = vst [vmem:[#allocation39_spill] sm:$0xff] %v4201_v34  ;;  %v4213_v3 = vld [vmem:[#allocation2 + $0x1b8] sm:$0xff]  ;;  %v4217_v60 = vld [vmem:[#allocation7 + $0xb0] sm:$0xff] }
  0x41   :  { %581 = vmatpush.msra.mxu2 %v4193_v47  ;;  %8357 = vst [vmem:[#allocation42_spill] sm:$0xff] %v4213_v3  ;;  %634 = vmatpush.msra.mxu1 %v4199_v21  ;;  %v4257_v21 = vld [vmem:[#allocation2 + $0x158] sm:$0xff] }
  0x42   :  { %673 = vmatpush.msra.mxu3 %v4187_v8  ;;  %619 = vmatpush.msra.mxu0 %v4195_v10  ;;  %v4221_v8 = vld [vmem:[#allocation2 + $0xe0] sm:$0xff]  ;;  %8359 = vst [vmem:[#allocation44_spill] sm:$0xff] %v4223_v59  ;;  %v4227_v10 = vld [vmem:[#allocation2 + $0x198] sm:$0xff] }
  0x43   :  { %582 = vmatpush.msra.mxu2 %v4205_v4  ;;  %8358 = vst [vmem:[#allocation43_spill] sm:$0xff] %v4221_v8  ;;  %635 = vmatpush.msra.mxu1 %v4211_v7  ;;  %v4243_v7 = vld [vmem:[#allocation2 + $0x178] sm:$0xff] }
  0x44   :  { %674 = vmatpush.msra.mxu3 %v4201_v34  ;;  %620 = vmatpush.msra.mxu0 %v4207_v55  ;;  %8360 = vst [vmem:[#allocation45_spill] sm:$0xff] %v4227_v10  ;;  %v4234_v55 = vld [vmem:[#allocation7 + $0x90] sm:$0xff]  ;;  %v4236_v34 = vld [vmem:[#allocation2 + $0xc0] sm:$0xff] }
  0x45   :  { %2864 = vmatmul.msk.f32.gmra.mxu0 %vm314_vm0, %v4174_v0  ;;  %583 = vmatpush.msra.mxu2 %v4217_v60  ;;  %8361 = vst [vmem:[#allocation46_spill] sm:$0xff] %v4234_v55 }
  0x46   :  { %675 = vmatpush.msra.mxu3 %v4213_v3  ;;  %621 = vmatpush.msra.mxu0 %v4221_v8  ;;  %8362 = vst [vmem:[#allocation47_spill] sm:$0xff] %v4236_v34  ;;  %v4241_v3 = vld [vmem:[#allocation2 + $0x168] sm:$0xff]  ;;  %v4249_v8 = vld [vmem:[#allocation7 + $0x70] sm:$0xff] }
  0x47   :  { %636 = vmatpush.msra.mxu1 %v4223_v59  ;;  %8363 = vst [vmem:[#allocation48_spill] sm:$0xff] %v4241_v3  ;;  %2879 = vmatmul.msk.f32.gmra.mxu2 %vm314_vm0, %v4121_v61  ;;  %v4251_v59 = vld [vmem:[#allocation2 + $0xa0] sm:$0xff]  ;;  %v4261_v61 = vld [vmem:[#allocation7 + $0x50] sm:$0xff] }
  0x48   :  { %676 = vmatpush.msra.mxu3 %v4227_v10  ;;  %2873 = vmatmul.msk.f32.gmra.mxu1 %vm314_vm0, %v3916_v6  ;;  %8364 = vst [vmem:[#allocation49_spill] sm:$0xff] %v4243_v7  ;;  %v4255_v10 = vld [vmem:[#allocation2 + $0x148] sm:$0xff] }
  0x49   :  { %2889 = vmatmul.msk.f32.gmra.mxu3 %vm314_vm0, %v3916_v6  ;;  %8365 = vst [vmem:[#allocation50_spill] sm:$0xff] %v4249_v8  ;;  %584 = vmatpush.msra.mxu2 %v4234_v55  ;;  %v4680_v55 = vld [vmem:[#allocation5 + $0x8] sm:$0xff] }
  0x4a   :  { %8366 = vst [vmem:[#allocation51_spill] sm:$0xff] %v4251_v59  ;;  %622 = vmatpush.msra.mxu0 %v4236_v34  ;;  %637 = vmatpush.msra.mxu1 %v4241_v3  ;;  %v4273_v34 = vld [vmem:[#allocation7 + $0x30] sm:$0xff]  ;;  %v4279_v3 = vld [vmem:[#allocation2 + $0x108] sm:$0xff] }
  0x4b   :  { %8367 = vst [vmem:[#allocation52_spill] sm:$0xff] %v4255_v10  ;;  %677 = vmatpush.msra.mxu3 %v4243_v7  ;;  %585 = vmatpush.msra.mxu2 %v4249_v8  ;;  %v4277_v7 = vld [vmem:[#allocation2 + $0x60] sm:$0xff]  ;;  %v7784_v8 = vmov 0.0  }
  0x4c   :  { %8368 = vst [vmem:[#allocation53_spill] sm:$0xff] %v4257_v21  ;;  %623 = vmatpush.msra.mxu0 %v4251_v59  ;;  %638 = vmatpush.msra.mxu1 %v4255_v10  ;;  %v4283_v59 = vld [vmem:[#allocation2 + $0x118] sm:$0xff]  ;;  %v4318_v10 = vld [vmem:[#allocation2] sm:$0xff] }
  0x4d   :  { %8369 = vst [vmem:[#allocation54_spill] sm:$0xff] %v4261_v61  ;;  %678 = vmatpush.msra.mxu3 %v4257_v21  ;;  %586 = vmatpush.msra.mxu2 %v4261_v61  ;;  %v4291_v21 = vld [vmem:[#allocation2 + $0x40] sm:$0xff] }
  0x4e   :  { %8373 = vst [vmem:[#allocation58_spill] sm:$0xff] %v4273_v34  ;;  %624 = vmatpush.msra.mxu0 %v4263_v1  ;;  %639 = vmatpush.msra.mxu1 %v4267_v51  ;;  %v4289_v1 = vld [vmem:[#allocation7 + $0x10] sm:$0xff] }
  0x4f   :  { %8374 = vst [vmem:[#allocation59_spill] sm:$0xff] %v4277_v7  ;;  %679 = vmatpush.msra.mxu3 %v4269_v2  ;;  %549 = vmatmul.f32.vlgmr.msrb.gmra.mxu0 %v7784_v8  ;;  %v4296_v2 = vld [vmem:[#allocation2 + $0xe8] sm:$0xff]  ;;  %v4298_v51 = vld [vmem:[#allocation2 + $0x1f0] sm:$0xff]  ;;  %v4304_v8 = vld [vmem:[#allocation2 + $0xf8] sm:$0xff] }
  0x50   :  { %8375 = vst [vmem:[#allocation60_spill] sm:$0xff] %v4279_v3  ;;  %587 = vmatpush.msra.mxu2 %v4273_v34  ;;  %625 = vmatpush.msra.mxu0 %v4277_v7  ;;  %v4306_v7 = vld [vmem:[#allocation2 + $0x20] sm:$0xff]  ;;  %v4322_v34 = vld [vmem:[#allocation2 + $0xa8] sm:$0xff] }
  0x51   :  { %8376 = vst [vmem:[#allocation61_spill] sm:$0xff] %v4283_v59  ;;  %640 = vmatpush.msra.mxu1 %v4279_v3  ;;  %680 = vmatpush.msra.mxu3 %v4283_v59  ;;  %v4310_v59 = vld [vmem:[#allocation2 + $0xc8] sm:$0xff]  ;;  %v4312_v3 = vld [vmem:[#allocation2 + $0x1d0] sm:$0xff] }
  0x52   :  { %8377 = vst [vmem:[#allocation62_spill] sm:$0xff] %v4289_v1  ;;  %2874 = vmatmul.msk.f32.gmra.mxu1 %vm314_vm0, %v3964_v20  ;;  %2880 = vmatmul.msk.f32.gmra.mxu2 %vm314_vm0, %v4174_v0  ;;  %v4316_v0 = vld [vmem:[#allocation2 + $0xd8] sm:$0xff] }
  0x53   :  { %8378 = vst [vmem:[#allocation63_spill] sm:$0xff] %v4291_v21  ;;  %2890 = vmatmul.msk.f32.gmra.mxu3 %vm314_vm0, %v3964_v20  ;;  %588 = vmatpush.msra.mxu2 %v4289_v1  ;;  %v4324_v1 = vld [vmem:[#allocation2 + $0x1b0] sm:$0xff] }
  0x54   :  { %8379 = vst [vmem:[#allocation64_spill] sm:$0xff] %v4296_v2  ;;  %626 = vmatpush.msra.mxu0 %v4291_v21  ;;  %641 = vmatpush.msra.mxu1 %v4296_v2  ;;  %v4328_v21 = vld [vmem:[#allocation2 + $0xb8] sm:$0xff]  ;;  %v4332_v2 = vld [vmem:[#allocation2 + $0x88] sm:$0xff] }
  0x55   :  { %8380 = vst [vmem:[#allocation65_spill] sm:$0xff] %v4298_v51  ;;  %653 = vmatpush.msrb.mxu2 %v4298_v51  ;;  %681 = vmatpush.msra.mxu3 %v4304_v8  ;;  %v4334_v51 = vld [vmem:[#allocation2 + $0x190] sm:$0xff] }
  0x56   :  { %8381 = vst [vmem:[#allocation66_spill] sm:$0xff] %v4304_v8  ;;  %627 = vmatpush.msra.mxu0 %v4306_v7  ;;  %642 = vmatpush.msra.mxu1 %v4310_v59  ;;  %v4361_v8 = vld [vmem:[#allocation2 + $0x58] sm:$0xff] }
  0x57   :  { %8382 = vst [vmem:[#allocation67_spill] sm:$0xff] %v4306_v7  ;;  %654 = vmatpush.msrb.mxu2 %v4312_v3  ;;  %682 = vmatpush.msra.mxu3 %v4316_v0  ;;  %v4338_v7 = vld [vmem:[#allocation2 + $0x98] sm:$0xff] }
  0x58   :  { %8383 = vst [vmem:[#allocation68_spill] sm:$0xff] %v4310_v59  ;;  %628 = vmatpush.msra.mxu0 %v4318_v10  ;;  %643 = vmatpush.msra.mxu1 %v4322_v34  ;;  %v8393_v59 = vmov 0.0  }
  0x59   :  { %8384 = vst [vmem:[#allocation69_spill] sm:$0xff] %v4312_v3  ;;  %655 = vmatpush.msrb.mxu2 %v4324_v1  ;;  %683 = vmatpush.msra.mxu3 %v4328_v21 }
  0x5a   :  { %8385 = vst [vmem:[#allocation70_spill] sm:$0xff] %v4316_v0  ;;  %629 = vmatmul.f32.vlgmr.msra.gmra.mxu0 %v8393_v59  ;;  %644 = vmatpush.msra.mxu1 %v4332_v2  ;;  %v4344_v0 = vld [vmem:[#allocation2 + $0x68] sm:$0xff] }
  0x5b   :  { %8386 = vst [vmem:[#allocation71_spill] sm:$0xff] %v4318_v10  ;;  %656 = vmatpush.msrb.mxu2 %v4334_v51  ;;  %v4346_v10 = vld [vmem:[#allocation2 + $0x170] sm:$0xff]  ;;  %684 = vmatpush.msra.mxu3 %v4338_v7 }
  0x5c   :  { %8387 = vst [vmem:[#allocation72_spill] sm:$0xff] %v4322_v34  ;;  %2881 = vmatmul.msk.f32.gmra.mxu2 %vm314_vm0, %v3916_v6  ;;  %v4351_v34 = vld [vmem:[#allocation2 + $0x78] sm:$0xff]  ;;  %569 = vmatmul.f32.vlgmr.msrb.gmra.mxu1 %v8393_v59  ;;  %v4366_v6 = vld [vmem:[#allocation2 + $0x130] sm:$0xff] }
  0x5d   :  { %8388 = vst [vmem:[#allocation73_spill] sm:$0xff] %v4324_v1  ;;  %609 = vmatmul.f32.vlgmr.msrb.gmra.mxu3 %v8393_v59  ;;  %645 = vmatpush.msra.mxu1 %v4344_v0  ;;  %v4373_v1 = vld [vmem:[#allocation2 + $0x8] sm:$0xff] }
  0x5e   :  { %8389 = vst [vmem:[#allocation74_spill] sm:$0xff] %v4328_v21  ;;  %v4355_v21 = vld [vmem:[#allocation2 + $0x48] sm:$0xff]  ;;  %657 = vmatpush.msrb.mxu2 %v4346_v10  ;;  %685 = vmatpush.msra.mxu3 %v4351_v34 }
  0x5f   :  { %8390 = vst [vmem:[#allocation75_spill] sm:$0xff] %v4332_v2  ;;  %v4357_v2 = vld [vmem:[#allocation2 + $0x150] sm:$0xff]  ;;  %646 = vmatpush.msra.mxu1 %v4355_v21 }
  0x60   :  { %8391 = vst [vmem:[#allocation76_spill] sm:$0xff] %v4334_v51  ;;  %658 = vmatpush.msrb.mxu2 %v4357_v2  ;;  %v4370_v51 = vld [vmem:[#allocation2 + $0x38] sm:$0xff]  ;;  %686 = vmatpush.msra.mxu3 %v4361_v8 }
  0x61   :  { %8392 = vst [vmem:[#allocation77_spill] sm:$0xff] %v4338_v7  ;;  %v4364_v7 = vld [vmem:[#allocation2 + $0x28] sm:$0xff] }
  0x62   :  { %8394 = vst [vmem:[#allocation78_spill] sm:$0xff] %v4344_v0  ;;  %v4375_v0 = vld [vmem:[#allocation2 + $0x110] sm:$0xff]  ;;  %647 = vmatpush.msra.mxu1 %v4364_v7  ;;  %659 = vmatpush.msrb.mxu2 %v4366_v6 }
  0x63   :  { %8395 = vst [vmem:[#allocation79_spill] sm:$0xff] %v4346_v10  ;;  %687 = vmatpush.msra.mxu3 %v4370_v51 }
  0x64   :  { %8396 = vst [vmem:[#allocation80_spill] sm:$0xff] %v4351_v34  ;;  %v4379_v34 = vld [vmem:[#allocation2 + $0x18] sm:$0xff]  ;;  %648 = vmatpush.msra.mxu1 %v4373_v1  ;;  %660 = vmatpush.msrb.mxu2 %v4375_v0 }
  0x65   :  { %8397 = vst [vmem:[#allocation81_spill] sm:$0xff] %v4355_v21  ;;  %v4384_v21 = vld [vmem:[#allocation2 + $0xf0] sm:$0xff]  ;;  %688 = vmatpush.msra.mxu3 %v4379_v34  ;;  %2882 = vmatmul.msk.f32.gmra.mxu2 %vm314_vm0, %v3964_v20 }
  0x66   :  { %8398 = vst [vmem:[#allocation82_spill] sm:$0xff] %v4357_v2  ;;  %649 = vmatmul.f32.vlgmr.msra.gmra.mxu1 %v8393_v59  ;;  %689 = vmatmul.f32.vlgmr.msra.gmra.mxu3 %v8393_v59  ;;  %v4404_v20 = vld [vmem:[#allocation2 + $0x50] sm:$0xff] }
  0x67   :  { %8399 = vst [vmem:[#allocation83_spill] sm:$0xff] %v4361_v8  ;;  %661 = vmatpush.msrb.mxu2 %v4384_v21  ;;  %v4407_v8 = vld [vmem:[#allocation2 + $0x30] sm:$0xff] }
  0x68   :  { %8400 = vst [vmem:[#allocation84_spill] sm:$0xff] %v4364_v7  ;;  %v4391_v7 = vld [vmem:[#allocation2 + $0xd0] sm:$0xff] }
  0x69   :  { %8401 = vst [vmem:[#allocation85_spill] sm:$0xff] %v4366_v6  ;;  %662 = vmatpush.msrb.mxu2 %v4391_v7 }
  0x6a   :  { %8402 = vst [vmem:[#allocation86_spill] sm:$0xff] %v4370_v51  ;;  %v4394_v51 = vld [vmem:[#allocation2 + $0xb0] sm:$0xff] }
  0x6b   :  { %8403 = vst [vmem:[#allocation87_spill] sm:$0xff] %v4373_v1  ;;  %v4397_v1 = vld [vmem:[#allocation2 + $0x90] sm:$0xff]  ;;  %663 = vmatpush.msrb.mxu2 %v4394_v51 }
  0x6c   :  { %8404 = vst [vmem:[#allocation88_spill] sm:$0xff] %v4375_v0 }
  0x6d   :  { %8405 = vst [vmem:[#allocation89_spill] sm:$0xff] %v4379_v34  ;;  %v4400_v34 = vld [vmem:[#allocation2 + $0x70] sm:$0xff]  ;;  %664 = vmatpush.msrb.mxu2 %v4397_v1 }
  0x6e   :  { %8406 = vst [vmem:[#allocation90_spill] sm:$0xff] %v4384_v21  ;;  %589 = vmatmul.f32.vlgmr.msra.gmra.mxu2 %v8393_v59  ;;  %v4410_v21 = vld [vmem:[#allocation2 + $0x10] sm:$0xff] }
  0x6f   :  { %8407 = vst [vmem:[#allocation91_spill] sm:$0xff] %v4391_v7  ;;  %665 = vmatpush.msrb.mxu2 %v4400_v34 }
  0x70   :  { %8408 = vst [vmem:[#allocation92_spill] sm:$0xff] %v4394_v51 }
  0x71   :  { %8409 = vst [vmem:[#allocation93_spill] sm:$0xff] %v4397_v1  ;;  %666 = vmatpush.msrb.mxu2 %v4404_v20 }
  0x72   :  { %8410 = vst [vmem:[#allocation94_spill] sm:$0xff] %v4400_v34 }
  0x73   :  { %8411 = vst [vmem:[#allocation95_spill] sm:$0xff] %v4404_v20  ;;  %667 = vmatpush.msrb.mxu2 %v4407_v8 }
  0x74   :  { %8412 = vst [vmem:[#allocation96_spill] sm:$0xff] %v4407_v8 }
  0x75   :  { %8413 = vst [vmem:[#allocation97_spill] sm:$0xff] %v4410_v21  ;;  %668 = vmatpush.msrb.mxu2 %v4410_v21 }
  0x76   :  { %669 = vmatmul.f32.vlgmr.msrb.gmra.mxu2 %v8393_v59 }
  0x91   :  { %v4415_v51 = vpop.f32.mrf.mxu1 }
  0x94   :  { %v4429_v2 = vpop.f32.mrf.mxu0 }
  0x97   :  { %v4417_v1 = vpop.f32.mrf.mxu2 }
  0x98   :  { %8414 = vst [vmem:[#allocation98_spill] sm:$0xff] %v4417_v1  ;;  %v4423_v34 = vpop.f32.mrf.mxu3 }
  0x9a   :  { %v4419_v7 = vpop.f32.mrf.mxu1 }
  0x9b   :  { %8415 = vst [vmem:[#allocation99_spill] sm:$0xff] %v4419_v7 }
  0x9c   :  { %v4437_v10 = vpop.f32.mrf.mxu0 }
  0x9d   :  { %8421 = vst [vmem:[#allocation105_spill] sm:$0xff] %v4437_v10 }
  0x9f   :  { %v4421_v0 = vpop.f32.mrf.mxu2 }
  0xa0   :  { %8416 = vst [vmem:[#allocation100_spill] sm:$0xff] %v4421_v0  ;;  %v4431_v8 = vpop.f32.mrf.mxu3 }
  0xa1   :  { %8418 = vst [vmem:[#allocation102_spill] sm:$0xff] %v4431_v8 }
  0xa2   :  { %v4427_v20 = vpop.f32.mrf.mxu1 }
  0xa3   :  { %8417 = vst [vmem:[#allocation101_spill] sm:$0xff] %v4427_v20 }
  0xa4   :  { %v4445_v3 = vpop.f32.mrf.mxu0 }
  0xa5   :  { %8425 = vst [vmem:[#allocation109_spill] sm:$0xff] %v4445_v3  ;;  %v4467_v3 = vld [vmem:[#allocation5 + $0x1e8] sm:$0xff] }
  0xa6   :  { %8436 = vst [vmem:[#allocation120_spill] sm:$0xff] %v4467_v3  ;;  %730 = vmatpush.msrb.mxu1 %v4467_v3 }
  0xa7   :  { %v4425_v6 = vpop.f32.mrf.mxu2 }
  0xa8   :  { %v4439_v1 = vpop.f32.mrf.mxu3 }
  0xa9   :  { %8422 = vst [vmem:[#allocation106_spill] sm:$0xff] %v4439_v1 }
  0xaa   :  { %v4435_v59 = vpop.f32.mrf.mxu1 }
  0xab   :  { %8420 = vst [vmem:[#allocation104_spill] sm:$0xff] %v4435_v59 }
  0xac   :  { %v4453_v8 = vpop.f32.mrf.mxu0 }
  0xad   :  { %8429 = vst [vmem:[#allocation113_spill] sm:$0xff] %v4453_v8  ;;  %v4493_v8 = vld [vmem:[#allocation5 + $0x1a8] sm:$0xff] }
  0xae   :  { %8445 = vst [vmem:[#allocation129_spill] sm:$0xff] %v4493_v8 }
  0xaf   :  { %v4433_v21 = vpop.f32.mrf.mxu2 }
  0xb0   :  { %8419 = vst [vmem:[#allocation103_spill] sm:$0xff] %v4433_v21  ;;  %v4447_v61 = vpop.f32.mrf.mxu3 }
  0xb1   :  { %8426 = vst [vmem:[#allocation110_spill] sm:$0xff] %v4447_v61  ;;  %v4469_v61 = vld [vmem:[#allocation5 + $0x1f0] sm:$0xff] }
  0xb2   :  { %v4443_v0 = vpop.f32.mrf.mxu1  ;;  %8437 = vst [vmem:[#allocation121_spill] sm:$0xff] %v4469_v61  ;;  %750 = vmatpush.msra.mxu2 %v4469_v61 }
  0xb3   :  { %8424 = vst [vmem:[#allocation108_spill] sm:$0xff] %v4443_v0  ;;  %v4465_v0 = vld [vmem:[#allocation5 + $0x1e0] sm:$0xff] }
  0xb4   :  { %v4461_v1 = vpop.f32.mrf.mxu0  ;;  %8435 = vst [vmem:[#allocation119_spill] sm:$0xff] %v4465_v0  ;;  %710 = vmatpush.msrb.mxu0 %v4465_v0  ;;  %v4607_v0 = vld [vmem:[#allocation5 + $0xb0] sm:$0xff] }
  0xb5   :  { %8433 = vst [vmem:[#allocation117_spill] sm:$0xff] %v4461_v1  ;;  %v4485_v1 = vld [vmem:[#allocation5 + $0x1d8] sm:$0xff] }
  0xb6   :  { %8443 = vst [vmem:[#allocation127_spill] sm:$0xff] %v4485_v1 }
  0xb7   :  { %v4441_v7 = vpop.f32.mrf.mxu2  ;;  %8486 = vst [vmem:[#allocation170_spill] sm:$0xff] %v4607_v0 }
  0xb8   :  { %8423 = vst [vmem:[#allocation107_spill] sm:$0xff] %v4441_v7  ;;  %v4455_v21 = vpop.f32.mrf.mxu3 }
  0xb9   :  { %8430 = vst [vmem:[#allocation114_spill] sm:$0xff] %v4455_v21  ;;  %v4475_v21 = vld [vmem:[#allocation5 + $0x1c0] sm:$0xff] }
  0xba   :  { %8439 = vst [vmem:[#allocation123_spill] sm:$0xff] %v4475_v21  ;;  %711 = vmatpush.msrb.mxu0 %v4475_v21 }
  0xbb   :  { %v4451_v62 = vpop.f32.mrf.mxu1 }
  0xbc   :  { %8428 = vst [vmem:[#allocation112_spill] sm:$0xff] %v4451_v62  ;;  %v4473_v62 = vld [vmem:[#allocation5 + $0x1f8] sm:$0xff] }
  0xbd   :  { %8438 = vst [vmem:[#allocation122_spill] sm:$0xff] %v4473_v62  ;;  %770 = vmatpush.msrb.mxu3 %v4473_v62  ;;  %v4499_v62 = vld [vmem:[#allocation5 + $0x1b8] sm:$0xff] }
  0xbe   :  { %8447 = vst [vmem:[#allocation131_spill] sm:$0xff] %v4499_v62 }
  0xbf   :  { %v4449_v20 = vpop.f32.mrf.mxu2  ;;  %771 = vmatpush.msrb.mxu3 %v4485_v1  ;;  %v4507_v1 = vld [vmem:[#allocation5 + $0x190] sm:$0xff] }
  0xc0   :  { %8427 = vst [vmem:[#allocation111_spill] sm:$0xff] %v4449_v20  ;;  %v4491_v20 = vld [vmem:[#allocation5 + $0x1a0] sm:$0xff] }
  0xc1   :  { %8444 = vst [vmem:[#allocation128_spill] sm:$0xff] %v4491_v20  ;;  %712 = vmatpush.msrb.mxu0 %v4491_v20  ;;  %772 = vmatpush.msrb.mxu3 %v4499_v62  ;;  %v4513_v20 = vld [vmem:[#allocation5 + $0x198] sm:$0xff]  ;;  %v4519_v62 = vld [vmem:[#allocation5 + $0x168] sm:$0xff] }
  0xc2   :  { %v4463_v7 = vpop.f32.mrf.mxu3  ;;  %8450 = vst [vmem:[#allocation134_spill] sm:$0xff] %v4507_v1  ;;  %v4523_v61 = vpop.f32.mrf.mxu0 }
  0xc3   :  { %8434 = vst [vmem:[#allocation118_spill] sm:$0xff] %v4463_v7  ;;  %v4483_v7 = vld [vmem:[#allocation5 + $0x1d0] sm:$0xff]  ;;  %773 = vmatpush.msrb.mxu3 %v4513_v20 }
  0xc4   :  { %8442 = vst [vmem:[#allocation126_spill] sm:$0xff] %v4483_v7  ;;  %751 = vmatpush.msra.mxu2 %v4483_v7  ;;  %v4505_v7 = vld [vmem:[#allocation5 + $0x188] sm:$0xff] }
  0xc5   :  { %v4459_v10 = vpop.f32.mrf.mxu1  ;;  %8449 = vst [vmem:[#allocation133_spill] sm:$0xff] %v4505_v7 }
  0xc6   :  { %8432 = vst [vmem:[#allocation116_spill] sm:$0xff] %v4459_v10 }
  0xc7   :  { %8452 = vst [vmem:[#allocation136_spill] sm:$0xff] %v4513_v20  ;;  %v4533_v20 = vld [vmem:[#allocation5 + $0x140] sm:$0xff] }
  0xc8   :  { %8454 = vst [vmem:[#allocation138_spill] sm:$0xff] %v4519_v62 }
  0xc9   :  { %8456 = vst [vmem:[#allocation140_spill] sm:$0xff] %v4523_v61  ;;  %v4543_v61 = vld [vmem:[#allocation5 + $0x158] sm:$0xff] }
  0xca   :  { %v4457_v59 = vpop.f32.mrf.mxu2  ;;  %8459 = vst [vmem:[#allocation143_spill] sm:$0xff] %v4533_v20 }
  0xcb   :  { %8431 = vst [vmem:[#allocation115_spill] sm:$0xff] %v4457_v59  ;;  %v4477_v59 = vld [vmem:[#allocation5 + $0x1c8] sm:$0xff] }
  0xcc   :  { %8440 = vst [vmem:[#allocation124_spill] sm:$0xff] %v4477_v59  ;;  %731 = vmatpush.msrb.mxu1 %v4477_v59  ;;  %v4503_v59 = vld [vmem:[#allocation5 + $0x180] sm:$0xff] }
  0xcd   :  { %8448 = vst [vmem:[#allocation132_spill] sm:$0xff] %v4503_v59  ;;  %713 = vmatpush.msrb.mxu0 %v4503_v59  ;;  %v4537_v59 = vld [vmem:[#allocation5 + $0x150] sm:$0xff] }
  0xce   :  { %732 = vmatpush.msrb.mxu1 %v4493_v8  ;;  %v4521_v8 = vld [vmem:[#allocation5 + $0x170] sm:$0xff]  ;;  %8461 = vst [vmem:[#allocation145_spill] sm:$0xff] %v4537_v59 }
  0xcf   :  { %v4509_v21 = vpop.f32.mrf.mxu1  ;;  %8455 = vst [vmem:[#allocation139_spill] sm:$0xff] %v4521_v8 }
  0xd0   :  { %8451 = vst [vmem:[#allocation135_spill] sm:$0xff] %v4509_v21  ;;  %733 = vmatpush.msrb.mxu1 %v4505_v7  ;;  %v4527_v21 = vld [vmem:[#allocation5 + $0x178] sm:$0xff]  ;;  %v4529_v7 = vpop.f32.mrf.mxu3 }
  0xd1   :  { %8457 = vst [vmem:[#allocation141_spill] sm:$0xff] %v4527_v21  ;;  %774 = vmatpush.msrb.mxu3 %v4527_v21  ;;  %v4549_v21 = vld [vmem:[#allocation5 + $0x128] sm:$0xff] }
  0xd2   :  { %734 = vmatpush.msrb.mxu1 %v4519_v62  ;;  %8458 = vst [vmem:[#allocation142_spill] sm:$0xff] %v4529_v7  ;;  %v4547_v7 = vld [vmem:[#allocation5 + $0x120] sm:$0xff]  ;;  %v4591_v62 = vpop.f32.mrf.mxu0 }
  0xd3   :  { %8463 = vst [vmem:[#allocation147_spill] sm:$0xff] %v4543_v61  ;;  %775 = vmatpush.msrb.mxu3 %v4543_v61  ;;  %v4563_v61 = vld [vmem:[#allocation5 + $0x110] sm:$0xff] }
  0xd4   :  { %8464 = vst [vmem:[#allocation148_spill] sm:$0xff] %v4547_v7 }
  0xd5   :  { %v4479_v10 = vpop.f32.mrf.mxu2  ;;  %8465 = vst [vmem:[#allocation149_spill] sm:$0xff] %v4549_v21 }
  0xd6   :  { %8441 = vst [vmem:[#allocation125_spill] sm:$0xff] %v4479_v10  ;;  %v4495_v10 = vld [vmem:[#allocation5 + $0x1b0] sm:$0xff] }
  0xd7   :  { %8446 = vst [vmem:[#allocation130_spill] sm:$0xff] %v4495_v10  ;;  %752 = vmatpush.msra.mxu2 %v4495_v10  ;;  %v4517_v10 = vld [vmem:[#allocation5 + $0x160] sm:$0xff] }
  0xd8   :  { %8453 = vst [vmem:[#allocation137_spill] sm:$0xff] %v4517_v10  ;;  %714 = vmatpush.msrb.mxu0 %v4517_v10 }
  0xd9   :  { %753 = vmatpush.msra.mxu2 %v4507_v1  ;;  %v4535_v1 = vld [vmem:[#allocation5 + $0x148] sm:$0xff]  ;;  %8470 = vst [vmem:[#allocation154_spill] sm:$0xff] %v4563_v61 }
  0xda   :  { %8460 = vst [vmem:[#allocation144_spill] sm:$0xff] %v4535_v1  ;;  %715 = vmatpush.msrb.mxu0 %v4533_v20  ;;  %735 = vmatpush.msrb.mxu1 %v4535_v1  ;;  %v4559_v1 = vld [vmem:[#allocation5 + $0x100] sm:$0xff]  ;;  %v4567_v20 = vld [vmem:[#allocation5 + $0x118] sm:$0xff] }
  0xdb   :  { %754 = vmatpush.msra.mxu2 %v4521_v8  ;;  %v4551_v8 = vld [vmem:[#allocation5 + $0x130] sm:$0xff]  ;;  %8468 = vst [vmem:[#allocation152_spill] sm:$0xff] %v4559_v1 }
  0xdc   :  { %8466 = vst [vmem:[#allocation150_spill] sm:$0xff] %v4551_v8  ;;  %716 = vmatpush.msrb.mxu0 %v4547_v7  ;;  %736 = vmatpush.msrb.mxu1 %v4549_v21  ;;  %v4571_v21 = vld [vmem:[#allocation5 + $0xe0] sm:$0xff]  ;;  %v4577_v7 = vpop.f32.mrf.mxu1 }
  0xdd   :  { %755 = vmatpush.msra.mxu2 %v4537_v59  ;;  %v4561_v59 = vld [vmem:[#allocation5 + $0x108] sm:$0xff]  ;;  %8471 = vst [vmem:[#allocation155_spill] sm:$0xff] %v4567_v20 }
  0xde   :  { %8469 = vst [vmem:[#allocation153_spill] sm:$0xff] %v4561_v59  ;;  %717 = vmatpush.msrb.mxu0 %v4559_v1  ;;  %737 = vmatpush.msrb.mxu1 %v4561_v59  ;;  %v4581_v1 = vld [vmem:[#allocation5 + $0xf8] sm:$0xff]  ;;  %v4589_v59 = vld [vmem:[#allocation5 + $0xd0] sm:$0xff] }
  0xdf   :  { %v4539_v3 = vpop.f32.mrf.mxu2  ;;  %756 = vmatpush.msra.mxu2 %v4551_v8  ;;  %8472 = vst [vmem:[#allocation156_spill] sm:$0xff] %v4571_v21  ;;  %v4573_v8 = vld [vmem:[#allocation5 + $0xe8] sm:$0xff] }
  0xe0   :  { %8462 = vst [vmem:[#allocation146_spill] sm:$0xff] %v4539_v3  ;;  %v4555_v3 = vld [vmem:[#allocation5 + $0x138] sm:$0xff]  ;;  %718 = vmatpush.msrb.mxu0 %v4571_v21  ;;  %738 = vmatpush.msrb.mxu1 %v4573_v8 }
  0xe1   :  { %8467 = vst [vmem:[#allocation151_spill] sm:$0xff] %v4555_v3  ;;  %776 = vmatpush.msrb.mxu3 %v4555_v3  ;;  %757 = vmatpush.msra.mxu2 %v4563_v61  ;;  %v4575_v3 = vld [vmem:[#allocation5 + $0xf0] sm:$0xff]  ;;  %v4585_v61 = vld [vmem:[#allocation5 + $0xc0] sm:$0xff]  ;;  %v4595_v21 = vld [vmem:[#allocation5 + $0xd8] sm:$0xff] }
  0xe2   :  { %8473 = vst [vmem:[#allocation157_spill] sm:$0xff] %v4573_v8  ;;  %719 = vmatpush.msrb.mxu0 %v4585_v61  ;;  %v4597_v8 = vpop.f32.mrf.mxu3 }
  0xe3   :  { %777 = vmatpush.msrb.mxu3 %v4567_v20  ;;  %8474 = vst [vmem:[#allocation158_spill] sm:$0xff] %v4575_v3  ;;  %758 = vmatpush.msra.mxu2 %v4575_v3  ;;  %v4587_v20 = vld [vmem:[#allocation5 + $0xc8] sm:$0xff] }
  0xe4   :  { %8475 = vst [vmem:[#allocation159_spill] sm:$0xff] %v4577_v7  ;;  %739 = vmatpush.msrb.mxu1 %v4587_v20  ;;  %v4605_v3 = vld [vmem:[#allocation5 + $0xa8] sm:$0xff] }
  0xe5   :  { %8476 = vst [vmem:[#allocation160_spill] sm:$0xff] %v4581_v1  ;;  %778 = vmatpush.msrb.mxu3 %v4581_v1  ;;  %759 = vmatpush.msra.mxu2 %v4589_v59  ;;  %v4603_v1 = vld [vmem:[#allocation5 + $0xa0] sm:$0xff] }
  0xe6   :  { %8477 = vst [vmem:[#allocation161_spill] sm:$0xff] %v4585_v61  ;;  %720 = vmatpush.msrb.mxu0 %v4603_v1  ;;  %740 = vmatpush.msrb.mxu1 %v4605_v3  ;;  %v4636_v61 = vld [vmem:[#allocation5 + $0x70] sm:$0xff] }
  0xe7   :  { %8478 = vst [vmem:[#allocation162_spill] sm:$0xff] %v4587_v20  ;;  %779 = vmatpush.msrb.mxu3 %v4595_v21  ;;  %v4611_v20 = vld [vmem:[#allocation5 + $0xb8] sm:$0xff]  ;;  %760 = vmatpush.msra.mxu2 %v4607_v0  ;;  %v4634_v0 = vld [vmem:[#allocation5 + $0x68] sm:$0xff] }
  0xe8   :  { %8479 = vst [vmem:[#allocation163_spill] sm:$0xff] %v4589_v59  ;;  %v4599_v10 = vpop.f32.mrf.mxu2  ;;  %v304_v59 = vld [vmem:[%s7735_s3] sm:$0xf] }
  0xe9   :  { %8480 = vst [vmem:[#allocation164_spill] sm:$0xff] %v4591_v62  ;;  %780 = vmatpush.msrb.mxu3 %v4611_v20  ;;  %v650_v62 = vpop.f32.mrf.mxu1  ;;  %v4656_v7 = vperm.slane %v304_v59, 0 }
  0xea   :  { %8481 = vst [vmem:[#allocation165_spill] sm:$0xff] %v4595_v21  ;;  %v4619_v21 = vld [vmem:[#allocation5 + $0x90] sm:$0xff] }
  0xeb   :  { %8482 = vst [vmem:[#allocation166_spill] sm:$0xff] %v4597_v8  ;;  %v4615_v8 = vld [vmem:[#allocation5 + $0x80] sm:$0xff]  ;;  %761 = vmatpush.msra.mxu2 %v4619_v21 }
  0xec   :  { %8483 = vst [vmem:[#allocation167_spill] sm:$0xff] %v4599_v10  ;;  %v4617_v10 = vld [vmem:[#allocation5 + $0x88] sm:$0xff]  ;;  %721 = vmatpush.msrb.mxu0 %v4615_v8 }
  0xed   :  { %8484 = vst [vmem:[#allocation168_spill] sm:$0xff] %v4603_v1  ;;  %741 = vmatpush.msrb.mxu1 %v4617_v10  ;;  %v4628_v1 = vperm.slane %v304_v59, 1  ;;  %762 = vmatpush.msra.mxu2 %v4636_v61 }
  0xee   :  { %8485 = vst [vmem:[#allocation169_spill] sm:$0xff] %v4605_v3  ;;  %v4626_v3 = vld [vmem:[#allocation5 + $0x98] sm:$0xff] }
  0xef   :  { %8487 = vst [vmem:[#allocation171_spill] sm:$0xff] %v4611_v20  ;;  %781 = vmatpush.msrb.mxu3 %v4626_v3  ;;  %v4632_v20 = vld [vmem:[#allocation5 + $0x60] sm:$0xff]  ;;  %742 = vmatpush.msrb.mxu1 %v4634_v0 }
  0xf0   :  { %8488 = vst [vmem:[#allocation172_spill] sm:$0xff] %v4615_v8  ;;  %722 = vmatpush.msrb.mxu0 %v4632_v20  ;;  %v4640_v8 = vld [vmem:[#allocation5 + $0x78] sm:$0xff] }
  0xf1   :  { %8489 = vst [vmem:[#allocation173_spill] sm:$0xff] %v4617_v10  ;;  %782 = vmatpush.msrb.mxu3 %v4640_v8  ;;  %v4644_v10 = vld [vmem:[#allocation5 + $0x40] sm:$0xff]  ;;  %v4666_v63 = vpop.f32.mrf.mxu2 }
  0xf2   :  { %8490 = vst [vmem:[#allocation174_spill] sm:$0xff] %v4619_v21  ;;  %v4646_v21 = vld [vmem:[#allocation5 + $0x48] sm:$0xff]  ;;  %723 = vmatpush.msrb.mxu0 %v4644_v10 }
  0xf3   :  { %8491 = vst [vmem:[#allocation175_spill] sm:$0xff] %v4626_v3  ;;  %v4648_v3 = vld [vmem:[#allocation5 + $0x50] sm:$0xff]  ;;  %743 = vmatpush.msrb.mxu1 %v4646_v21 }
  0xf4   :  { %8492 = vst [vmem:[#allocation176_spill] sm:$0xff] %v4628_v1  ;;  %763 = vmatpush.msra.mxu2 %v4648_v3 }
  0xf5   :  { %8493 = vst [vmem:[#allocation177_spill] sm:$0xff] %v4632_v20  ;;  %v4652_v20 = vld [vmem:[#allocation5 + $0x58] sm:$0xff] }
  0xf6   :  { %8494 = vst [vmem:[#allocation178_spill] sm:$0xff] %v4634_v0  ;;  %v398_v0 = vadd.f32 %v4415_v51, %v4628_v1  ;;  %783 = vmatpush.msrb.mxu3 %v4652_v20  ;;  %v4670_v51 = vld [vmem:[#allocation5 + $0x38] sm:$0xff]  ;;  %v357_v1 = vadd.f32 %v4429_v2, %v4656_v7  ;;  %764 = vmatpush.msra.mxu2 %v4664_v48  ;;  %v4688_v2 = vperm.slane %v304_v59, 2 }
  0xf7   :  { %8495 = vst [vmem:[#allocation179_spill] sm:$0xff] %v4636_v61  ;;  %v4662_v61 = vld [vmem:[#allocation5 + $0x28] sm:$0xff] }
  0xf8   :  { %8496 = vst [vmem:[#allocation180_spill] sm:$0xff] %v4640_v8  ;;  %v4660_v8 = vld [vmem:[#allocation5 + $0x20] sm:$0xff]  ;;  %744 = vmatpush.msrb.mxu1 %v4662_v61  ;;  %784 = vmatpush.msrb.mxu3 %v4670_v51 }
  0xf9   :  { %8497 = vst [vmem:[#allocation181_spill] sm:$0xff] %v4644_v10  ;;  %v630_v10 = vpop.f32.mrf.mxu0  ;;  %724 = vmatpush.msrb.mxu0 %v4660_v8 }
  0xfa   :  { %8498 = vst [vmem:[#allocation182_spill] sm:$0xff] %v4646_v21  ;;  %v4678_v21 = vld [vmem:[#allocation5] sm:$0xff]  ;;  %745 = vmatpush.msrb.mxu1 %v4680_v55 }
  0xfb   :  { %8499 = vst [vmem:[#allocation183_spill] sm:$0xff] %v4648_v3  ;;  %v4674_v3 = vpop.f32.mrf.mxu3  ;;  %725 = vmatpush.msrb.mxu0 %v4678_v21 }
  0xfc   :  { %8500 = vst [vmem:[#allocation184_spill] sm:$0xff] %v4652_v20  ;;  %v651_v20 = vadd.f32 %v650_v62, %v398_v0  ;;  %827 = vmatpush.msra.mxu1 %v3939_v12  ;;  %v439_v62 = vadd.f32 %v4425_v6, %v4688_v2  ;;  %v670_v12 = vpop.f32.mrf.mxu2  ;;  %v8521_v0 = vld [vmem:[#allocation33_spill] sm:$0xff]  ;;  %v8522_v6 = vld [vmem:[#allocation20_spill] sm:$0xff] }
  0xfd   :  { %8501 = vst [vmem:[#allocation185_spill] sm:$0xff] %v4656_v7  ;;  %v631_v7 = vadd.f32 %v630_v10, %v357_v1  ;;  %807 = vmatpush.msra.mxu0 %v3926_v9  ;;  %v4702_v9 = vperm.slane %v304_v59, 3  ;;  %v8515_v1 = vld [vmem:[#allocation27_spill] sm:$0xff]  ;;  %v8524_v59 = vld [vmem:[#allocation65_spill] sm:$0xff] }
  0xfe   :  { %8502 = vst [vmem:[#allocation186_spill] sm:$0xff] %v4662_v61  ;;  %v4686_v61 = vld [vmem:[#allocation5 + $0x18] sm:$0xff]  ;;  %2907 = vtanh.f32 %v651_v20  ;;  %828 = vmatpush.msra.mxu1 %v3945_v14  ;;  %v8518_v10 = vld [vmem:[#allocation19_spill] sm:$0xff] }
  0xff   :  { %8503 = vst [vmem:[#allocation187_spill] sm:$0xff] %v4666_v63  ;;  %v4682_v63 = vld [vmem:[#allocation5 + $0x10] sm:$0xff]  ;;  %785 = vmatpush.msrb.mxu3 %v4686_v61  ;;  %808 = vmatpush.msra.mxu0 %v3937_v11  ;;  %2909 = vtanh.f32 %v631_v7  ;;  %v513_v11 = vld [vmem:[%s7739_s7] sm:$0xf]  ;;  %s3801_s7 = smov [#allocation9]  }
 0x100   :  { %765 = vmatpush.msra.mxu2 %v4682_v63  ;;  %829 = vmatpush.msra.mxu1 %v3955_v17  ;;  %v4711_v14 = vperm.slane %v513_v11, 1  ;;  %v4719_v17 = vperm.slane %v513_v11, 0  ;;  %v8517_v7 = vld [vmem:[#allocation31_spill] sm:$0xff]  ;;  %s2821_s17 = sshll.u32 %s3801_s7, 4  ;;  %s2822_s17 = int_to_ptr.vmem [resolvable:$true] %s2821_s17 }
 0x101   :  { %867 = vmatpush.msra.mxu3 %v3941_v13  ;;  %809 = vmatpush.msra.mxu0 %v3947_v15  ;;  %v671_v13 = vadd.f32 %v670_v12, %v439_v62  ;;  %v480_v15 = vadd.f32 %v4423_v34, %v4702_v9  ;;  %v8519_v34 = vld [vmem:[#allocation30_spill] sm:$0xff]  ;;  %v8523_v20 = vld [vmem:[#allocation35_spill] sm:$0xff]  ;;  %v8525_v62 = vld [vmem:[#allocation36_spill] sm:$0xff] }
 0x102   :  { %847 = vmatpush.msrb.mxu2 %v3957_v18  ;;  %830 = vmatpush.msra.mxu1 %v3983_v24  ;;  %v8526_v12 = vld [vmem:[#allocation23_spill] sm:$0xff] }
 0x103   :  { %868 = vmatpush.msra.mxu3 %v3951_v16  ;;  %810 = vmatpush.msra.mxu0 %v3959_v19  ;;  %v690_v18 = vpop.f32.mrf.mxu3  ;;  %2911 = vtanh.f32 %v671_v13  ;;  %v523_v19 = vld [vmem:[%s7740_s8] sm:$0xf]  ;;  %v8528_v13 = vld [vmem:[#allocation69_spill] sm:$0xff]  ;;  %s3802_s8 = smov 128  }
 0x104   :  { %848 = vmatpush.msrb.mxu2 %v3997_v28  ;;  %v2908_v16 = vpop.eup %2907  ;;  %831 = vmatpush.msra.mxu1 %v3995_v27  ;;  %v4728_v24 = vperm.slane %v523_v19, 1  ;;  %v691_v28 = vadd.f32 %v690_v18, %v480_v15  ;;  %v8530_v18 = vld [vmem:[#allocation26_spill] sm:$0xff]  ;;  %v8531_v15 = vld [vmem:[#allocation41_spill] sm:$0xff] }
 0x105   :  { %869 = vmatpush.msra.mxu3 %v3978_v23  ;;  %811 = vmatpush.msra.mxu0 %v3975_v22  ;;  %v2910_v23 = vpop.eup %2909  ;;  %v4737_v22 = vperm.slane %v523_v19, 0 }
 0x106   :  { %849 = vmatpush.msrb.mxu2 %v4010_v32  ;;  %v4731_v32 = vperm.slane %v513_v11, 2  ;;  %832 = vmatpush.msra.mxu1 %v4008_v31  ;;  %v697_v27 = vmul.f32 %v2910_v23, %v4719_v17  ;;  %2913 = vtanh.f32 %v691_v28  ;;  %v8532_v23 = vld [vmem:[#allocation73_spill] sm:$0xff]  ;;  %v8535_v28 = vld [vmem:[#allocation44_spill] sm:$0xff] }
 0x107   :  { %870 = vmatpush.msra.mxu3 %v3991_v26  ;;  %v698_v26 = vmul.f32 %v2908_v16, %v4711_v14  ;;  %812 = vmatpush.msra.mxu0 %v3989_v25  ;;  %v8529_v16 = vld [vmem:[#allocation39_spill] sm:$0xff] }
 0x108   :  { %850 = vmatpush.msrb.mxu2 %v4046_v41  ;;  %833 = vmatpush.msra.mxu1 %v4032_v37 }
 0x109   :  { %871 = vmatpush.msra.mxu3 %v4004_v30  ;;  %v4740_v30 = vperm.slane %v523_v19, 2  ;;  %813 = vmatpush.msra.mxu0 %v3999_v29  ;;  %v2912_v41 = vpop.eup %2911  ;;  %v702_v25 = vadd.f32 %v698_v26, %v4728_v24  ;;  %v701_v29 = vadd.f32 %v697_v27, %v4737_v22  ;;  %v8534_v26 = vld [vmem:[#allocation29_spill] sm:$0xff]  ;;  %v8536_v27 = vld [vmem:[#allocation76_spill] sm:$0xff] }
 0x10a   :  { %851 = vmatpush.msrb.mxu2 %v4059_v45  ;;  %v699_v31 = vmul.f32 %v2912_v41, %v4731_v32  ;;  %834 = vmatpush.msra.mxu1 %v4044_v40  ;;  %v8505_v45 = vld [vmem:[#allocation22_spill] sm:$0xff]  ;;  %v8537_v41 = vld [vmem:[#allocation45_spill] sm:$0xff] }
 0x10b   :  { %872 = vmatpush.msra.mxu3 %v4026_v36  ;;  %814 = vmatpush.msra.mxu0 %v4012_v33  ;;  %v705_v37 = vmul.f32 0.0, %v702_v25  ;;  %v8538_v25 = vld [vmem:[#allocation32_spill] sm:$0xff] }
 0x10c   :  { %852 = vmatpush.msrb.mxu2 %v4095_v54  ;;  %v703_v36 = vadd.f32 %v699_v31, %v4740_v30  ;;  %835 = vmatpush.msra.mxu1 %v4057_v44  ;;  %v2914_v40 = vpop.eup %2913  ;;  %v8504_v44 = vld [vmem:[#allocation46_spill] sm:$0xff]  ;;  %v8539_v31 = vld [vmem:[#allocation48_spill] sm:$0xff] }
 0x10d   :  { %873 = vmatpush.msra.mxu3 %v4040_v39  ;;  %815 = vmatpush.msra.mxu0 %v4023_v35  ;;  %v4760_v39 = vperm.slane %v513_v11, 3  ;;  %v8527_v11 = vld [vmem:[#allocation38_spill] sm:$0xff] }
 0x10e   :  { %853 = vmatpush.msrb.mxu2 %v4108_v58  ;;  %v706_v33 = vmul.f32 %v703_v36, %v701_v29  ;;  %836 = vmatpush.msra.mxu1 %v4081_v50  ;;  %v8508_v50 = vld [vmem:[#allocation50_spill] sm:$0xff]  ;;  %v8540_v29 = vld [vmem:[#allocation79_spill] sm:$0xff]  ;;  %v8541_v36 = vld [vmem:[#allocation49_spill] sm:$0xff] }
 0x10f   :  { %874 = vmatpush.msra.mxu3 %v4053_v43  ;;  %816 = vmatpush.msra.mxu0 %v4038_v38  ;;  %v4773_v38 = vperm.slane %v523_v19, 3  ;;  %v700_v43 = vmul.f32 %v2914_v40, %v4760_v39  ;;  %v8533_v19 = vld [vmem:[#allocation42_spill] sm:$0xff] }
 0x110   :  { %854 = vmatpush.msrb.mxu2 %v4150_v5  ;;  %v4764_v35 = vadd.f32 %v706_v33, %v705_v37  ;;  %837 = vmatpush.msra.mxu1 %v4093_v53  ;;  %v8510_v53 = vld [vmem:[#allocation17_spill] sm:$0xff]  ;;  %v8516_v5 = vld [vmem:[#allocation58_spill] sm:$0xff]  ;;  %v8543_v33 = vld [vmem:[#allocation52_spill] sm:$0xff] }
 0x111   :  { %875 = vmatpush.msra.mxu3 %v4075_v49  ;;  %817 = vmatpush.msra.mxu0 %v4048_v42  ;;  %v8506_v42 = vld [vmem:[#allocation16_spill] sm:$0xff]  ;;  %v8507_v49 = vld [vmem:[#allocation21_spill] sm:$0xff]  ;;  %v704_v54 = vadd.f32 %v700_v43, %v4773_v38  ;;  %v8542_v37 = vld [vmem:[#allocation34_spill] sm:$0xff] }
 0x112   :  { %855 = vmatpush.msrb.mxu2 %v4193_v47  ;;  %2915 = vtanh.f32 %v4764_v35  ;;  %838 = vmatpush.msra.mxu1 %v4106_v57  ;;  %v8513_v57 = vld [vmem:[#allocation28_spill] sm:$0xff]  ;;  %v8520_v47 = vld [vmem:[#allocation62_spill] sm:$0xff]  ;;  %v8545_v43 = vld [vmem:[#allocation53_spill] sm:$0xff] }
 0x113   :  { %876 = vmatpush.msra.mxu3 %v4089_v52  ;;  %818 = vmatpush.msra.mxu0 %v4061_v46  ;;  %v8509_v52 = vld [vmem:[#allocation25_spill] sm:$0xff]  ;;  %v8511_v46 = vld [vmem:[#allocation24_spill] sm:$0xff]  ;;  %v8544_v40 = vld [vmem:[#allocation82_spill] sm:$0xff] }
 0x114   :  { %856 = vmatpush.msrb.mxu2 %v4205_v4  ;;  %839 = vmatpush.msra.mxu1 %v8507_v49  ;;  %v8549_v49 = vld [vmem:[#allocation57_spill] sm:$0xff] }
 0x115   :  { %877 = vmatpush.msra.mxu3 %v4102_v56  ;;  %819 = vmatpush.msra.mxu0 %v8506_v42  ;;  %v8512_v56 = vld [vmem:[#allocation54_spill] sm:$0xff]  ;;  %v8548_v42 = vld [vmem:[#allocation85_spill] sm:$0xff] }
 0x116   :  { %857 = vmatpush.msrb.mxu2 %v4217_v60  ;;  %840 = vmatpush.msra.mxu1 %v8511_v46  ;;  %v8514_v60 = vld [vmem:[#allocation18_spill] sm:$0xff]  ;;  %v8553_v46 = vld [vmem:[#allocation61_spill] sm:$0xff] }
 0x117   :  { %878 = vmatpush.msra.mxu3 %v8505_v45  ;;  %820 = vmatpush.msra.mxu0 %v8510_v53  ;;  %v8547_v45 = vld [vmem:[#allocation56_spill] sm:$0xff] }
 0x118   :  { %858 = vmatpush.msrb.mxu2 %v8504_v44  ;;  %v2916_v58 = vpop.eup %2915  ;;  %841 = vmatpush.msra.mxu1 %v8515_v1  ;;  %v8546_v44 = vld [vmem:[#allocation37_spill] sm:$0xff]  ;;  %v8552_v53 = vld [vmem:[#allocation88_spill] sm:$0xff] }
 0x119   :  { %879 = vmatpush.msra.mxu3 %v8509_v52  ;;  %821 = vmatpush.msra.mxu0 %v8514_v60  ;;  %v4789_v4 = vmul.f32 %v2916_v58, %v704_v54  ;;  %v8551_v52 = vld [vmem:[#allocation60_spill] sm:$0xff]  ;;  %v8554_v54 = vld [vmem:[#allocation43_spill] sm:$0xff]  ;;  %v8557_v58 = vld [vmem:[#allocation66_spill] sm:$0xff] }
 0x11a   :  { %859 = vmatpush.msrb.mxu2 %v8508_v50  ;;  %842 = vmatpush.msra.mxu1 %v8519_v34  ;;  %v8550_v50 = vld [vmem:[#allocation40_spill] sm:$0xff]  ;;  %v8558_v60 = vld [vmem:[#allocation47_spill] sm:$0xff] }
 0x11b   :  { %880 = vmatpush.msra.mxu3 %v8513_v57  ;;  %822 = vmatpush.msra.mxu0 %v8518_v10  ;;  %v8556_v57 = vld [vmem:[#allocation90_spill] sm:$0xff]  ;;  %v8559_v1 = vld [vmem:[#allocation68_spill] sm:$0xff]  ;;  %v8562_v10 = vld [vmem:[#allocation51_spill] sm:$0xff] }
 0x11c   :  { %860 = vmatpush.msrb.mxu2 %v8512_v56  ;;  %726 = vmatmul.f32.vlgmr.msrb.gmra.mxu0 %v4789_v4  ;;  %v8555_v56 = vld [vmem:[#allocation64_spill] sm:$0xff] }
 0x11d   :  { %881 = vmatpush.msra.mxu3 %v8517_v7  ;;  %746 = vmatmul.f32.vlgmr.msrb.gmra.mxu1 %v4789_v4  ;;  %v8561_v7 = vld [vmem:[#allocation70_spill] sm:$0xff]  ;;  %v8563_v34 = vld [vmem:[#allocation72_spill] sm:$0xff] }
 0x11e   :  { %861 = vmatpush.msrb.mxu2 %v8516_v5  ;;  %786 = vmatmul.f32.vlgmr.msrb.gmra.mxu3 %v4789_v4  ;;  %v8560_v5 = vld [vmem:[#allocation91_spill] sm:$0xff] }
 0x11f   :  { %766 = vmatmul.f32.vlgmr.msra.gmra.mxu2 %v4789_v4  ;;  %882 = vmatpush.msra.mxu3 %v8521_v0  ;;  %v8565_v0 = vld [vmem:[#allocation74_spill] sm:$0xff] }
 0x120   :  { %862 = vmatpush.msrb.mxu2 %v8520_v47  ;;  %887 = vmatpush.msrb.mxu0 %v8522_v6  ;;  %v8564_v47 = vld [vmem:[#allocation92_spill] sm:$0xff]  ;;  %v8566_v6 = vld [vmem:[#allocation55_spill] sm:$0xff] }
 0x121   :  { %907 = vmatpush.msrb.mxu1 %v8523_v20  ;;  %947 = vmatpush.msrb.mxu3 %v8525_v62  ;;  %v8567_v20 = vld [vmem:[#allocation75_spill] sm:$0xff]  ;;  %v8569_v62 = vld [vmem:[#allocation77_spill] sm:$0xff] }
 0x122   :  { %927 = vmatpush.msra.mxu2 %v8524_v59  ;;  %888 = vmatpush.msrb.mxu0 %v8526_v12  ;;  %v8568_v59 = vld [vmem:[#allocation93_spill] sm:$0xff]  ;;  %v8570_v12 = vld [vmem:[#allocation59_spill] sm:$0xff] }
 0x123   :  { %908 = vmatpush.msrb.mxu1 %v8527_v11  ;;  %948 = vmatpush.msrb.mxu3 %v8529_v16  ;;  %v8571_v11 = vld [vmem:[#allocation78_spill] sm:$0xff]  ;;  %v8573_v16 = vld [vmem:[#allocation80_spill] sm:$0xff] }
 0x124   :  { %928 = vmatpush.msra.mxu2 %v8528_v13  ;;  %889 = vmatpush.msrb.mxu0 %v8530_v18  ;;  %v8572_v13 = vld [vmem:[#allocation94_spill] sm:$0xff]  ;;  %v8574_v18 = vld [vmem:[#allocation63_spill] sm:$0xff] }
 0x125   :  { %909 = vmatpush.msrb.mxu1 %v8531_v15  ;;  %949 = vmatpush.msrb.mxu3 %v8533_v19  ;;  %v8575_v15 = vld [vmem:[#allocation81_spill] sm:$0xff]  ;;  %v8577_v19 = vld [vmem:[#allocation83_spill] sm:$0xff] }
 0x126   :  { %929 = vmatpush.msra.mxu2 %v8532_v23  ;;  %890 = vmatpush.msrb.mxu0 %v8534_v26  ;;  %v8576_v23 = vld [vmem:[#allocation95_spill] sm:$0xff] }
 0x127   :  { %910 = vmatpush.msrb.mxu1 %v8535_v28  ;;  %950 = vmatpush.msrb.mxu3 %v8537_v41  ;;  %v8578_v26 = vld [vmem:[#allocation67_spill] sm:$0xff]  ;;  %v8579_v28 = vld [vmem:[#allocation84_spill] sm:$0xff]  ;;  %v8581_v41 = vld [vmem:[#allocation86_spill] sm:$0xff] }
 0x128   :  { %930 = vmatpush.msra.mxu2 %v8536_v27  ;;  %891 = vmatpush.msrb.mxu0 %v8538_v25  ;;  %v8580_v27 = vld [vmem:[#allocation96_spill] sm:$0xff]  ;;  %v8582_v25 = vld [vmem:[#allocation71_spill] sm:$0xff] }
 0x129   :  { %911 = vmatpush.msrb.mxu1 %v8539_v31  ;;  %951 = vmatpush.msrb.mxu3 %v8541_v36  ;;  %v8583_v31 = vld [vmem:[#allocation87_spill] sm:$0xff]  ;;  %v8585_v36 = vld [vmem:[#allocation89_spill] sm:$0xff] }
 0x12a   :  { %931 = vmatpush.msra.mxu2 %v8540_v29  ;;  %892 = vmatpush.msrb.mxu0 %v8542_v37  ;;  %v8584_v29 = vld [vmem:[#allocation97_spill] sm:$0xff]  ;;  %v503_v37 = vld [vmem:[%s7738_s6] sm:$0xf] }
 0x12b   :  { %912 = vmatpush.msrb.mxu1 %v8543_v33  ;;  %952 = vmatpush.msrb.mxu3 %v8545_v43  ;;  %v4868_v33 = vperm.slane %v503_v37, 1  ;;  %v8588_v43 = vld [vmem:[#allocation159_spill] sm:$0xff] }
 0x12c   :  { %932 = vmatpush.msra.mxu2 %v8544_v40  ;;  %893 = vmatpush.msrb.mxu0 %v8546_v44  ;;  %v4870_v40 = vperm.slane %v503_v37, 0 }
 0x12d   :  { %913 = vmatpush.msrb.mxu1 %v8547_v45  ;;  %953 = vmatpush.msrb.mxu3 %v8549_v49  ;;  %8586 = vst [vmem:[#allocation46_spill] sm:$0xff] %v4868_v33  ;;  %v571_v44 = vadd.f32 %v8588_v43, %v4868_v33  ;;  %v8589_v45 = vld [vmem:[#allocation164_spill] sm:$0xff]  ;;  %v8600_v43 = vld [vmem:[#allocation129_spill] sm:$0xff] }
 0x12e   :  { %933 = vmatpush.msra.mxu2 %v8548_v42  ;;  %894 = vmatpush.msrb.mxu0 %v8550_v50  ;;  %8587 = vst [vmem:[#allocation22_spill] sm:$0xff] %v4870_v40  ;;  %v551_v42 = vadd.f32 %v8589_v45, %v4870_v40  ;;  %v8602_v45 = vld [vmem:[#allocation131_spill] sm:$0xff] }
 0x12f   :  { %914 = vmatpush.msrb.mxu1 %v8551_v52  ;;  %954 = vmatpush.msrb.mxu3 %v8553_v46 }
 0x130   :  { %934 = vmatpush.msra.mxu2 %v8552_v53  ;;  %895 = vmatpush.msrb.mxu0 %v8554_v54  ;;  %v4876_v53 = vperm.slane %v503_v37, 2  ;;  %v8590_v54 = vld [vmem:[#allocation187_spill] sm:$0xff] }
 0x131   :  { %915 = vmatpush.msrb.mxu1 %v8555_v56  ;;  %955 = vmatpush.msrb.mxu3 %v8557_v58 }
 0x132   :  { %935 = vmatpush.msra.mxu2 %v8556_v57  ;;  %896 = vmatpush.msrb.mxu0 %v8558_v60  ;;  %v591_v56 = vadd.f32 %v8590_v54, %v4876_v53  ;;  %v4880_v57 = vperm.slane %v503_v37, 3  ;;  %v8599_v37 = vld [vmem:[#allocation128_spill] sm:$0xff]  ;;  %v8608_v54 = vld [vmem:[#allocation138_spill] sm:$0xff] }
 0x133   :  { %916 = vmatpush.msrb.mxu1 %v8559_v1  ;;  %956 = vmatpush.msrb.mxu3 %v8561_v7 }
 0x134   :  { %936 = vmatpush.msra.mxu2 %v8560_v5  ;;  %897 = vmatpush.msrb.mxu0 %v8562_v10  ;;  %v611_v7 = vadd.f32 %v4674_v3, %v4880_v57 }
 0x135   :  { %917 = vmatpush.msrb.mxu1 %v8563_v34  ;;  %957 = vmatpush.msrb.mxu3 %v8565_v0 }
 0x136   :  { %937 = vmatpush.msra.mxu2 %v8564_v47  ;;  %898 = vmatpush.msrb.mxu0 %v8566_v6 }
 0x137   :  { %918 = vmatpush.msrb.mxu1 %v8567_v20  ;;  %958 = vmatpush.msrb.mxu3 %v8569_v62 }
 0x138   :  { %938 = vmatpush.msra.mxu2 %v8568_v59  ;;  %899 = vmatpush.msrb.mxu0 %v8570_v12 }
 0x139   :  { %919 = vmatpush.msrb.mxu1 %v8571_v11  ;;  %959 = vmatpush.msrb.mxu3 %v8573_v16 }
 0x13a   :  { %939 = vmatpush.msra.mxu2 %v8572_v13  ;;  %900 = vmatpush.msrb.mxu0 %v8574_v18 }
 0x13b   :  { %920 = vmatpush.msrb.mxu1 %v8575_v15  ;;  %960 = vmatpush.msrb.mxu3 %v8577_v19 }
 0x13c   :  { %940 = vmatpush.msra.mxu2 %v8576_v23  ;;  %901 = vmatpush.msrb.mxu0 %v8578_v26  ;;  %v8591_v26 = vld [vmem:[#allocation119_spill] sm:$0xff] }
 0x13d   :  { %921 = vmatpush.msrb.mxu1 %v8579_v28  ;;  %961 = vmatpush.msrb.mxu3 %v8581_v41  ;;  %v8592_v28 = vld [vmem:[#allocation120_spill] sm:$0xff]  ;;  %v8594_v41 = vld [vmem:[#allocation122_spill] sm:$0xff] }
 0x13e   :  { %941 = vmatpush.msra.mxu2 %v8580_v27  ;;  %902 = vmatpush.msrb.mxu0 %v8582_v25  ;;  %v8593_v27 = vld [vmem:[#allocation121_spill] sm:$0xff]  ;;  %v8595_v25 = vld [vmem:[#allocation123_spill] sm:$0xff] }
 0x13f   :  { %922 = vmatpush.msrb.mxu1 %v8583_v31  ;;  %962 = vmatpush.msrb.mxu3 %v8585_v36  ;;  %v8596_v31 = vld [vmem:[#allocation124_spill] sm:$0xff]  ;;  %v8598_v36 = vld [vmem:[#allocation127_spill] sm:$0xff] }
 0x140   :  { %942 = vmatpush.msra.mxu2 %v8584_v29  ;;  %v8597_v29 = vld [vmem:[#allocation126_spill] sm:$0xff] }
 0x199   :  { %v727_v49 = vpop.f32.mrf.mxu0 }
 0x19a   :  { %v747_v50 = vpop.f32.mrf.mxu1  ;;  %v728_v46 = vadd.f32 %v727_v49, %v551_v42  ;;  %v8603_v42 = vld [vmem:[#allocation132_spill] sm:$0xff]  ;;  %v8604_v49 = vld [vmem:[#allocation133_spill] sm:$0xff] }
 0x19b   :  { %v748_v52 = vadd.f32 %v747_v50, %v571_v44  ;;  %v8601_v44 = vld [vmem:[#allocation130_spill] sm:$0xff] }
 0x19c   :  { %v8605_v50 = vld [vmem:[#allocation134_spill] sm:$0xff] }
 0x19d   :  { %2917 = vtanh.f32 %v748_v52  ;;  %v8606_v52 = vld [vmem:[#allocation136_spill] sm:$0xff] }
 0x19e   :  { %2919 = vtanh.f32 %v728_v46  ;;  %v8607_v46 = vld [vmem:[#allocation137_spill] sm:$0xff] }
 0x1a1   :  { %v787_v5 = vpop.f32.mrf.mxu3 }
 0x1a2   :  { %v767_v58 = vpop.f32.mrf.mxu2  ;;  %v788_v47 = vadd.f32 %v787_v5, %v611_v7  ;;  %v8614_v5 = vld [vmem:[#allocation147_spill] sm:$0xff]  ;;  %v8615_v7 = vld [vmem:[#allocation148_spill] sm:$0xff] }
 0x1a3   :  { %v768_v60 = vadd.f32 %v767_v58, %v591_v56  ;;  %v2918_v1 = vpop.eup %2917  ;;  %v8609_v56 = vld [vmem:[#allocation139_spill] sm:$0xff]  ;;  %v8610_v58 = vld [vmem:[#allocation141_spill] sm:$0xff] }
 0x1a4   :  { %v2920_v10 = vpop.eup %2919  ;;  %v795_v34 = vmul.f32 %v2918_v1, %v4711_v14  ;;  %v8612_v1 = vld [vmem:[#allocation144_spill] sm:$0xff] }
 0x1a5   :  { %2921 = vtanh.f32 %v768_v60  ;;  %v794_v0 = vmul.f32 %v2920_v10, %v4719_v17  ;;  %v8611_v60 = vld [vmem:[#allocation143_spill] sm:$0xff]  ;;  %v8616_v10 = vld [vmem:[#allocation149_spill] sm:$0xff] }
 0x1a6   :  { %v799_v20 = vadd.f32 %v795_v34, %v4728_v24  ;;  %2923 = vtanh.f32 %v788_v47  ;;  %v8617_v34 = vld [vmem:[#allocation150_spill] sm:$0xff]  ;;  %v8618_v47 = vld [vmem:[#allocation151_spill] sm:$0xff] }
 0x1a7   :  { %v798_v62 = vadd.f32 %v794_v0, %v4737_v22  ;;  %v8619_v0 = vld [vmem:[#allocation152_spill] sm:$0xff] }
 0x1a8   :  { %v802_v11 = vmul.f32 0.0, %v799_v20  ;;  %v8621_v20 = vld [vmem:[#allocation154_spill] sm:$0xff] }
 0x1ab   :  { %v2922_v6 = vpop.eup %2921 }
 0x1ac   :  { %v796_v59 = vmul.f32 %v2922_v6, %v4731_v32  ;;  %v2924_v16 = vpop.eup %2923  ;;  %v8620_v6 = vld [vmem:[#allocation153_spill] sm:$0xff] }
 0x1ad   :  { %v797_v18 = vmul.f32 %v2924_v16, %v4760_v39  ;;  %v8627_v16 = vld [vmem:[#allocation161_spill] sm:$0xff] }
 0x1ae   :  { %v800_v12 = vadd.f32 %v796_v59, %v4740_v30  ;;  %v8622_v59 = vld [vmem:[#allocation155_spill] sm:$0xff] }
 0x1af   :  { %v801_v15 = vadd.f32 %v797_v18, %v4773_v38  ;;  %v8628_v18 = vld [vmem:[#allocation162_spill] sm:$0xff] }
 0x1b0   :  { %v803_v13 = vmul.f32 %v800_v12, %v798_v62  ;;  %v8623_v62 = vld [vmem:[#allocation156_spill] sm:$0xff]  ;;  %v8624_v12 = vld [vmem:[#allocation157_spill] sm:$0xff] }
 0x1b2   :  { %v4890_v3 = vadd.f32 %v803_v13, %v802_v11  ;;  %v8625_v11 = vld [vmem:[#allocation158_spill] sm:$0xff]  ;;  %v8626_v13 = vld [vmem:[#allocation160_spill] sm:$0xff] }
 0x1b4   :  { %2925 = vtanh.f32 %v4890_v3 }
 0x1ba   :  { %v2926_v23 = vpop.eup %2925 }
 0x1bb   :  { %v806_v19 = vmul.f32 %v2926_v23, %v801_v15  ;;  %v8629_v15 = vld [vmem:[#allocation163_spill] sm:$0xff]  ;;  %v8630_v23 = vld [vmem:[#allocation165_spill] sm:$0xff] }
 0x1bd   :  { %823 = vmatmul.f32.vlgmr.msra.gmra.mxu0 %v806_v19  ;;  %843 = vmatmul.f32.vlgmr.msra.gmra.mxu1 %v806_v19 }
 0x1be   :  { %863 = vmatmul.f32.vlgmr.msrb.gmra.mxu2 %v806_v19  ;;  %883 = vmatmul.f32.vlgmr.msra.gmra.mxu3 %v806_v19  ;;  %v8631_v19 = vld [vmem:[#allocation168_spill] sm:$0xff] }
 0x1bf   :  { %984 = vmatpush.msra.mxu0 %v8591_v26  ;;  %1004 = vmatpush.msra.mxu1 %v8592_v28  ;;  %v8632_v26 = vld [vmem:[#allocation169_spill] sm:$0xff]  ;;  %v8633_v28 = vld [vmem:[#allocation170_spill] sm:$0xff] }
 0x1c0   :  { %1024 = vmatpush.msrb.mxu2 %v8593_v27  ;;  %1044 = vmatpush.msra.mxu3 %v8594_v41  ;;  %v8634_v27 = vld [vmem:[#allocation171_spill] sm:$0xff]  ;;  %v8635_v41 = vld [vmem:[#allocation172_spill] sm:$0xff] }
 0x1c1   :  { %985 = vmatpush.msra.mxu0 %v8595_v25  ;;  %1005 = vmatpush.msra.mxu1 %v8596_v31  ;;  %v8636_v25 = vld [vmem:[#allocation173_spill] sm:$0xff]  ;;  %v8637_v31 = vld [vmem:[#allocation174_spill] sm:$0xff] }
 0x1c2   :  { %1025 = vmatpush.msrb.mxu2 %v8597_v29  ;;  %1045 = vmatpush.msra.mxu3 %v8598_v36  ;;  %v8638_v29 = vld [vmem:[#allocation175_spill] sm:$0xff]  ;;  %v8639_v36 = vld [vmem:[#allocation177_spill] sm:$0xff] }
 0x1c3   :  { %986 = vmatpush.msra.mxu0 %v8599_v37  ;;  %1006 = vmatpush.msra.mxu1 %v8600_v43  ;;  %v8640_v37 = vld [vmem:[#allocation178_spill] sm:$0xff]  ;;  %v8641_v43 = vld [vmem:[#allocation179_spill] sm:$0xff] }
 0x1c4   :  { %1026 = vmatpush.msrb.mxu2 %v8601_v44  ;;  %1046 = vmatpush.msra.mxu3 %v8602_v45  ;;  %v8642_v44 = vld [vmem:[#allocation180_spill] sm:$0xff]  ;;  %v8643_v45 = vld [vmem:[#allocation181_spill] sm:$0xff] }
 0x1c5   :  { %903 = vmatmul.f32.vlgmr.msrb.gmra.mxu0 %v4789_v4  ;;  %923 = vmatmul.f32.vlgmr.msrb.gmra.mxu1 %v4789_v4 }
 0x1c6   :  { %943 = vmatmul.f32.vlgmr.msra.gmra.mxu2 %v4789_v4  ;;  %963 = vmatmul.f32.vlgmr.msrb.gmra.mxu3 %v4789_v4  ;;  %v8613_v4 = vld [vmem:[#allocation145_spill] sm:$0xff] }
 0x1c7   :  { %987 = vmatpush.msra.mxu0 %v8603_v42  ;;  %1007 = vmatpush.msra.mxu1 %v8604_v49  ;;  %v8644_v42 = vld [vmem:[#allocation182_spill] sm:$0xff]  ;;  %v8645_v49 = vld [vmem:[#allocation183_spill] sm:$0xff] }
 0x1c8   :  { %1027 = vmatpush.msrb.mxu2 %v8605_v50  ;;  %1047 = vmatpush.msra.mxu3 %v8606_v52  ;;  %v8646_v50 = vld [vmem:[#allocation184_spill] sm:$0xff]  ;;  %v8647_v52 = vld [vmem:[#allocation186_spill] sm:$0xff] }
 0x1c9   :  { %988 = vmatpush.msra.mxu0 %v8607_v46  ;;  %1008 = vmatpush.msra.mxu1 %v8608_v54  ;;  %v4963_v46 = vld [vmem:[#allocation7 + $0x1e0] sm:$0xff]  ;;  %v4966_v54 = vld [vmem:[#allocation7 + $0x1e8] sm:$0xff] }
 0x1ca   :  { %1028 = vmatpush.msrb.mxu2 %v8609_v56  ;;  %1048 = vmatpush.msra.mxu3 %v8610_v58  ;;  %v4990_v56 = vld [vmem:[#allocation7 + $0x1a8] sm:$0xff]  ;;  %v4993_v58 = vld [vmem:[#allocation7 + $0x1b0] sm:$0xff] }
 0x1cb   :  { %989 = vmatpush.msra.mxu0 %v8611_v60  ;;  %1009 = vmatpush.msra.mxu1 %v8612_v1  ;;  %v4996_v60 = vld [vmem:[#allocation7 + $0x1b8] sm:$0xff]  ;;  %v4999_v1 = vld [vmem:[#allocation7 + $0x180] sm:$0xff] }
 0x1cc   :  { %1029 = vmatpush.msrb.mxu2 %v8613_v4  ;;  %1049 = vmatpush.msra.mxu3 %v8614_v5  ;;  %v5002_v4 = vld [vmem:[#allocation7 + $0x188] sm:$0xff]  ;;  %v5005_v5 = vld [vmem:[#allocation7 + $0x190] sm:$0xff] }
 0x1cd   :  { %990 = vmatpush.msra.mxu0 %v8615_v7  ;;  %1010 = vmatpush.msra.mxu1 %v8616_v10  ;;  %v5008_v7 = vld [vmem:[#allocation7 + $0x198] sm:$0xff]  ;;  %v5011_v10 = vld [vmem:[#allocation7 + $0x160] sm:$0xff] }
 0x1ce   :  { %1030 = vmatpush.msrb.mxu2 %v8617_v34  ;;  %1050 = vmatpush.msra.mxu3 %v8618_v47  ;;  %v5014_v34 = vld [vmem:[#allocation7 + $0x168] sm:$0xff]  ;;  %v5017_v47 = vld [vmem:[#allocation7 + $0x170] sm:$0xff] }
 0x1cf   :  { %991 = vmatpush.msra.mxu0 %v8619_v0  ;;  %1011 = vmatpush.msra.mxu1 %v8620_v6  ;;  %v5020_v0 = vld [vmem:[#allocation7 + $0x178] sm:$0xff]  ;;  %v5023_v6 = vld [vmem:[#allocation7 + $0x140] sm:$0xff] }
 0x1d0   :  { %1031 = vmatpush.msrb.mxu2 %v8621_v20  ;;  %1051 = vmatpush.msra.mxu3 %v8622_v59  ;;  %v5026_v20 = vld [vmem:[#allocation7 + $0x148] sm:$0xff]  ;;  %v5029_v59 = vld [vmem:[#allocation7 + $0x150] sm:$0xff] }
 0x1d1   :  { %992 = vmatpush.msra.mxu0 %v8623_v62  ;;  %1012 = vmatpush.msra.mxu1 %v8624_v12  ;;  %v5032_v62 = vld [vmem:[#allocation7 + $0x158] sm:$0xff]  ;;  %v5035_v12 = vld [vmem:[#allocation7 + $0x120] sm:$0xff] }
 0x1d2   :  { %1032 = vmatpush.msrb.mxu2 %v8625_v11  ;;  %1052 = vmatpush.msra.mxu3 %v8626_v13  ;;  %v5038_v11 = vld [vmem:[#allocation7 + $0x128] sm:$0xff]  ;;  %v5041_v13 = vld [vmem:[#allocation7 + $0x130] sm:$0xff] }
 0x1d3   :  { %993 = vmatpush.msra.mxu0 %v8627_v16  ;;  %1013 = vmatpush.msra.mxu1 %v8628_v18  ;;  %v5044_v16 = vld [vmem:[#allocation7 + $0x138] sm:$0xff]  ;;  %v5047_v18 = vld [vmem:[#allocation7 + $0x100] sm:$0xff] }
 0x1d4   :  { %1033 = vmatpush.msrb.mxu2 %v8629_v15  ;;  %1053 = vmatpush.msra.mxu3 %v8630_v23  ;;  %8648 = vst [vmem:[#allocation16_spill] sm:$0xff] %v5044_v16  ;;  %v5050_v15 = vld [vmem:[#allocation7 + $0x108] sm:$0xff]  ;;  %v5053_v23 = vld [vmem:[#allocation7 + $0x110] sm:$0xff] }
 0x1d5   :  { %994 = vmatpush.msra.mxu0 %v8631_v19  ;;  %1014 = vmatpush.msra.mxu1 %v8632_v26  ;;  %8649 = vst [vmem:[#allocation21_spill] sm:$0xff] %v5047_v18  ;;  %v5056_v19 = vld [vmem:[#allocation7 + $0x118] sm:$0xff]  ;;  %v5059_v26 = vld [vmem:[#allocation7 + $0xe0] sm:$0xff] }
 0x1d6   :  { %1034 = vmatpush.msrb.mxu2 %v8633_v28  ;;  %1054 = vmatpush.msra.mxu3 %v8634_v27  ;;  %8650 = vst [vmem:[#allocation50_spill] sm:$0xff] %v5050_v15  ;;  %v5062_v28 = vld [vmem:[#allocation7 + $0xe8] sm:$0xff]  ;;  %v5065_v27 = vld [vmem:[#allocation7 + $0xf0] sm:$0xff] }
 0x1d7   :  { %995 = vmatpush.msra.mxu0 %v8635_v41  ;;  %1015 = vmatpush.msra.mxu1 %v8636_v25  ;;  %8651 = vst [vmem:[#allocation25_spill] sm:$0xff] %v5053_v23  ;;  %v5068_v41 = vld [vmem:[#allocation7 + $0xf8] sm:$0xff]  ;;  %v5071_v25 = vld [vmem:[#allocation7 + $0xc0] sm:$0xff] }
 0x1d8   :  { %1035 = vmatpush.msrb.mxu2 %v8637_v31  ;;  %1055 = vmatpush.msra.mxu3 %v8638_v29  ;;  %8652 = vst [vmem:[#allocation17_spill] sm:$0xff] %v5056_v19  ;;  %v5074_v31 = vld [vmem:[#allocation7 + $0xc8] sm:$0xff]  ;;  %v5077_v29 = vld [vmem:[#allocation7 + $0xd0] sm:$0xff] }
 0x1d9   :  { %996 = vmatpush.msra.mxu0 %v8639_v36  ;;  %1016 = vmatpush.msra.mxu1 %v8640_v37  ;;  %8653 = vst [vmem:[#allocation24_spill] sm:$0xff] %v5059_v26  ;;  %v5080_v36 = vld [vmem:[#allocation7 + $0xd8] sm:$0xff]  ;;  %v5083_v37 = vld [vmem:[#allocation7 + $0xa0] sm:$0xff] }
 0x1da   :  { %1036 = vmatpush.msrb.mxu2 %v8641_v43  ;;  %1056 = vmatpush.msra.mxu3 %v8642_v44  ;;  %8654 = vst [vmem:[#allocation54_spill] sm:$0xff] %v5062_v28  ;;  %v5086_v43 = vld [vmem:[#allocation7 + $0xa8] sm:$0xff]  ;;  %v5089_v44 = vld [vmem:[#allocation7 + $0xb0] sm:$0xff] }
 0x1db   :  { %997 = vmatpush.msra.mxu0 %v8643_v45  ;;  %1017 = vmatpush.msra.mxu1 %v8644_v42  ;;  %8655 = vst [vmem:[#allocation28_spill] sm:$0xff] %v5065_v27  ;;  %v5092_v45 = vld [vmem:[#allocation7 + $0xb8] sm:$0xff]  ;;  %v5095_v42 = vld [vmem:[#allocation7 + $0x80] sm:$0xff] }
 0x1dc   :  { %1037 = vmatpush.msrb.mxu2 %v8645_v49  ;;  %1057 = vmatpush.msra.mxu3 %v8646_v50  ;;  %8656 = vst [vmem:[#allocation18_spill] sm:$0xff] %v5068_v41  ;;  %v5098_v49 = vld [vmem:[#allocation7 + $0x88] sm:$0xff]  ;;  %v5101_v50 = vld [vmem:[#allocation7 + $0x90] sm:$0xff] }
 0x1dd   :  { %998 = vmatpush.msra.mxu0 %v4660_v8  ;;  %1018 = vmatpush.msra.mxu1 %v8647_v52  ;;  %v4969_v8 = vld [vmem:[#allocation7 + $0x1f0] sm:$0xff]  ;;  %8657 = vst [vmem:[#allocation27_spill] sm:$0xff] %v5071_v25  ;;  %v5104_v52 = vld [vmem:[#allocation7 + $0x98] sm:$0xff] }
 0x1de   :  { %1038 = vmatpush.msrb.mxu2 %v4664_v48  ;;  %1058 = vmatpush.msra.mxu3 %v4670_v51  ;;  %v4972_v48 = vld [vmem:[#allocation7 + $0x1f8] sm:$0xff]  ;;  %v4987_v51 = vld [vmem:[#allocation7 + $0x1a0] sm:$0xff]  ;;  %8658 = vst [vmem:[#allocation58_spill] sm:$0xff] %v5074_v31 }
 0x1df   :  { %999 = vmatpush.msra.mxu0 %v4678_v21  ;;  %1019 = vmatpush.msra.mxu1 %v4680_v55  ;;  %v4975_v55 = vld [vmem:[#allocation7 + $0x1c0] sm:$0xff]  ;;  %v4981_v21 = vld [vmem:[#allocation7 + $0x1d0] sm:$0xff]  ;;  %8659 = vst [vmem:[#allocation31_spill] sm:$0xff] %v5077_v29 }
 0x1e0   :  { %1039 = vmatpush.msrb.mxu2 %v4682_v63  ;;  %1059 = vmatpush.msra.mxu3 %v4686_v61  ;;  %v4978_v63 = vld [vmem:[#allocation7 + $0x1c8] sm:$0xff]  ;;  %v4984_v61 = vld [vmem:[#allocation7 + $0x1d8] sm:$0xff]  ;;  %8660 = vst [vmem:[#allocation19_spill] sm:$0xff] %v5080_v36 }
 0x1e1   :  { %1081 = vmatpush.msrb.mxu0 %v4963_v46  ;;  %1101 = vmatpush.msrb.mxu1 %v4966_v54  ;;  %8661 = vst [vmem:[#allocation30_spill] sm:$0xff] %v5083_v37 }
 0x1e2   :  { %1121 = vmatpush.msra.mxu2 %v4969_v8  ;;  %1141 = vmatpush.msrb.mxu3 %v4972_v48  ;;  %8662 = vst [vmem:[#allocation62_spill] sm:$0xff] %v5086_v43 }
 0x1e3   :  { %1082 = vmatpush.msrb.mxu0 %v4975_v55  ;;  %1102 = vmatpush.msrb.mxu1 %v4978_v63  ;;  %8663 = vst [vmem:[#allocation33_spill] sm:$0xff] %v5089_v44 }
 0x1e4   :  { %1122 = vmatpush.msra.mxu2 %v4981_v21  ;;  %1142 = vmatpush.msrb.mxu3 %v4984_v61  ;;  %8664 = vst [vmem:[#allocation20_spill] sm:$0xff] %v5092_v45 }
 0x1e5   :  { %1083 = vmatpush.msrb.mxu0 %v4987_v51  ;;  %1103 = vmatpush.msrb.mxu1 %v4990_v56  ;;  %8665 = vst [vmem:[#allocation35_spill] sm:$0xff] %v5095_v42 }
 0x1e6   :  { %1123 = vmatpush.msra.mxu2 %v4993_v58  ;;  %1143 = vmatpush.msrb.mxu3 %v4996_v60  ;;  %8666 = vst [vmem:[#allocation65_spill] sm:$0xff] %v5098_v49 }
 0x1e7   :  { %1084 = vmatpush.msrb.mxu0 %v4999_v1  ;;  %1104 = vmatpush.msrb.mxu1 %v5002_v4  ;;  %8667 = vst [vmem:[#allocation36_spill] sm:$0xff] %v5101_v50 }
 0x1e8   :  { %1124 = vmatpush.msra.mxu2 %v5005_v5  ;;  %1144 = vmatpush.msrb.mxu3 %v5008_v7  ;;  %8668 = vst [vmem:[#allocation23_spill] sm:$0xff] %v5104_v52 }
 0x1e9   :  { %1085 = vmatpush.msrb.mxu0 %v5011_v10  ;;  %1105 = vmatpush.msrb.mxu1 %v5014_v34 }
 0x1ea   :  { %1125 = vmatpush.msra.mxu2 %v5017_v47  ;;  %1145 = vmatpush.msrb.mxu3 %v5020_v0 }
 0x1eb   :  { %1086 = vmatpush.msrb.mxu0 %v5023_v6  ;;  %1106 = vmatpush.msrb.mxu1 %v5026_v20 }
 0x1ec   :  { %1126 = vmatpush.msra.mxu2 %v5029_v59  ;;  %1146 = vmatpush.msrb.mxu3 %v5032_v62 }
 0x1ed   :  { %1087 = vmatpush.msrb.mxu0 %v5035_v12  ;;  %1107 = vmatpush.msrb.mxu1 %v5038_v11 }
 0x1ee   :  { %1127 = vmatpush.msra.mxu2 %v5041_v13  ;;  %1147 = vmatpush.msrb.mxu3 %v5044_v16 }
 0x1ef   :  { %1088 = vmatpush.msrb.mxu0 %v5047_v18  ;;  %1108 = vmatpush.msrb.mxu1 %v5050_v15 }
 0x1f0   :  { %1128 = vmatpush.msra.mxu2 %v5053_v23  ;;  %1148 = vmatpush.msrb.mxu3 %v5056_v19 }
 0x1f1   :  { %1089 = vmatpush.msrb.mxu0 %v5059_v26  ;;  %1109 = vmatpush.msrb.mxu1 %v5062_v28 }
 0x1f2   :  { %1129 = vmatpush.msra.mxu2 %v5065_v27  ;;  %1149 = vmatpush.msrb.mxu3 %v5068_v41 }
 0x1f3   :  { %1090 = vmatpush.msrb.mxu0 %v5071_v25  ;;  %1110 = vmatpush.msrb.mxu1 %v5074_v31  ;;  %v8688_v31 = vld [vmem:[#allocation105_spill] sm:$0xff] }
 0x1f4   :  { %1130 = vmatpush.msra.mxu2 %v5077_v29  ;;  %1150 = vmatpush.msrb.mxu3 %v5080_v36 }
 0x1f5   :  { %1091 = vmatpush.msrb.mxu0 %v5083_v37  ;;  %1111 = vmatpush.msrb.mxu1 %v5086_v43  ;;  %v8686_v37 = vld [vmem:[#allocation99_spill] sm:$0xff] }
 0x1f6   :  { %1131 = vmatpush.msra.mxu2 %v5089_v44  ;;  %1151 = vmatpush.msrb.mxu3 %v5092_v45  ;;  %v5107_v44 = vld [vmem:[#allocation7 + $0x60] sm:$0xff]  ;;  %v5110_v45 = vld [vmem:[#allocation7 + $0x68] sm:$0xff] }
 0x1f7   :  { %1092 = vmatpush.msrb.mxu0 %v5095_v42  ;;  %1112 = vmatpush.msrb.mxu1 %v5098_v49  ;;  %8669 = vst [vmem:[#allocation38_spill] sm:$0xff] %v5107_v44  ;;  %v5113_v42 = vld [vmem:[#allocation7 + $0x70] sm:$0xff]  ;;  %v5116_v49 = vld [vmem:[#allocation7 + $0x78] sm:$0xff] }
 0x1f8   :  { %1132 = vmatpush.msra.mxu2 %v5101_v50  ;;  %1152 = vmatpush.msrb.mxu3 %v5104_v52  ;;  %8670 = vst [vmem:[#allocation69_spill] sm:$0xff] %v5110_v45  ;;  %v5119_v50 = vld [vmem:[#allocation7 + $0x40] sm:$0xff]  ;;  %v5122_v52 = vld [vmem:[#allocation7 + $0x48] sm:$0xff] }
 0x1f9   :  { %1093 = vmatpush.msrb.mxu0 %v5107_v44  ;;  %1113 = vmatpush.msrb.mxu1 %v5110_v45  ;;  %8671 = vst [vmem:[#allocation39_spill] sm:$0xff] %v5113_v42  ;;  %v5125_v44 = vld [vmem:[#allocation7 + $0x50] sm:$0xff]  ;;  %v5128_v45 = vld [vmem:[#allocation7 + $0x58] sm:$0xff] }
 0x1fa   :  { %1133 = vmatpush.msra.mxu2 %v5113_v42  ;;  %8672 = vst [vmem:[#allocation26_spill] sm:$0xff] %v5116_v49  ;;  %1153 = vmatpush.msrb.mxu3 %v5116_v49  ;;  %v5131_v42 = vld [vmem:[#allocation7 + $0x20] sm:$0xff]  ;;  %v5134_v49 = vld [vmem:[#allocation7 + $0x28] sm:$0xff] }
 0x1fb   :  { %8673 = vst [vmem:[#allocation41_spill] sm:$0xff] %v5119_v50  ;;  %1094 = vmatpush.msrb.mxu0 %v5119_v50  ;;  %1114 = vmatpush.msrb.mxu1 %v5122_v52  ;;  %v5137_v50 = vld [vmem:[#allocation7 + $0x30] sm:$0xff] }
 0x1fc   :  { %8674 = vst [vmem:[#allocation73_spill] sm:$0xff] %v5122_v52  ;;  %1134 = vmatpush.msra.mxu2 %v5125_v44  ;;  %1154 = vmatpush.msrb.mxu3 %v5128_v45  ;;  %v5140_v52 = vld [vmem:[#allocation7 + $0x38] sm:$0xff] }
 0x1fd   :  { %8675 = vst [vmem:[#allocation42_spill] sm:$0xff] %v5125_v44  ;;  %1095 = vmatpush.msrb.mxu0 %v5131_v42  ;;  %1115 = vmatpush.msrb.mxu1 %v5134_v49  ;;  %v5143_v44 = vld [vmem:[#allocation7] sm:$0xff] }
 0x1fe   :  { %8676 = vst [vmem:[#allocation29_spill] sm:$0xff] %v5128_v45  ;;  %1135 = vmatpush.msra.mxu2 %v5137_v50  ;;  %1155 = vmatpush.msrb.mxu3 %v5140_v52  ;;  %v5146_v45 = vld [vmem:[#allocation7 + $0x8] sm:$0xff] }
 0x1ff   :  { %8677 = vst [vmem:[#allocation44_spill] sm:$0xff] %v5131_v42  ;;  %1096 = vmatpush.msrb.mxu0 %v5143_v44  ;;  %1116 = vmatpush.msrb.mxu1 %v5146_v45  ;;  %v5149_v42 = vld [vmem:[#allocation7 + $0x10] sm:$0xff] }
 0x200   :  { %8678 = vst [vmem:[#allocation76_spill] sm:$0xff] %v5134_v49  ;;  %1136 = vmatpush.msra.mxu2 %v5149_v42  ;;  %v5152_v49 = vld [vmem:[#allocation7 + $0x18] sm:$0xff] }
 0x201   :  { %8679 = vst [vmem:[#allocation45_spill] sm:$0xff] %v5137_v50  ;;  %1156 = vmatpush.msrb.mxu3 %v5152_v49 }
 0x202   :  { %8680 = vst [vmem:[#allocation32_spill] sm:$0xff] %v5140_v52  ;;  %v8685_v52 = vld [vmem:[#allocation176_spill] sm:$0xff] }
 0x203   :  { %8681 = vst [vmem:[#allocation48_spill] sm:$0xff] %v5143_v44  ;;  %v401_v36 = vadd.f32 %v8686_v37, %v8685_v52  ;;  %v8690_v52 = vld [vmem:[#allocation102_spill] sm:$0xff] }
 0x204   :  { %8682 = vst [vmem:[#allocation79_spill] sm:$0xff] %v5146_v45  ;;  %v8687_v45 = vld [vmem:[#allocation185_spill] sm:$0xff]  ;;  %v483_v18 = vadd.f32 %v8690_v52, %v4702_v9 }
 0x205   :  { %8683 = vst [vmem:[#allocation49_spill] sm:$0xff] %v5149_v42  ;;  %v360_v25 = vadd.f32 %v8688_v31, %v8687_v45 }
 0x206   :  { %8684 = vst [vmem:[#allocation34_spill] sm:$0xff] %v5152_v49  ;;  %v8689_v49 = vld [vmem:[#allocation103_spill] sm:$0xff] }
 0x207   :  { %v442_v26 = vadd.f32 %v8689_v49, %v4688_v2 }
 0x23a   :  { %v5155_v50 = vpop.f32.mrf.mxu0  ;;  %v5157_v43 = vpop.f32.mrf.mxu1 }
 0x241   :  { %v5161_v44 = vpop.f32.mrf.mxu2  ;;  %v5163_v29 = vpop.f32.mrf.mxu3 }
 0x242   :  { %v904_v41 = vpop.f32.mrf.mxu0  ;;  %v924_v42 = vpop.f32.mrf.mxu1 }
 0x243   :  { %v925_v27 = vadd.f32 %v924_v42, %v401_v36  ;;  %v905_v28 = vadd.f32 %v904_v41, %v360_v25 }
 0x245   :  { %2927 = vtanh.f32 %v925_v27 }
 0x246   :  { %2929 = vtanh.f32 %v905_v28 }
 0x249   :  { %v944_v19 = vpop.f32.mrf.mxu2  ;;  %v964_v37 = vpop.f32.mrf.mxu3 }
 0x24a   :  { %v945_v23 = vadd.f32 %v944_v19, %v442_v26  ;;  %v965_v45 = vadd.f32 %v964_v37, %v483_v18  ;;  %v5195_v37 = vld [vmem:[#allocation2 + $0x1f0] sm:$0xff] }
 0x24b   :  { %v2928_v15 = vpop.eup %2927 }
 0x24c   :  { %2931 = vtanh.f32 %v945_v23  ;;  %v2930_v16 = vpop.eup %2929  ;;  %v972_v31 = vmul.f32 %v2928_v15, %v4711_v14 }
 0x24d   :  { %v971_v36 = vmul.f32 %v2930_v16, %v4719_v17  ;;  %2933 = vtanh.f32 %v965_v45  ;;  %v5192_v45 = vld [vmem:[#allocation2 + $0x1e8] sm:$0xff] }
 0x24e   :  { %v976_v27 = vadd.f32 %v972_v31, %v4728_v24  ;;  %v5198_v31 = vld [vmem:[#allocation2 + $0x1f8] sm:$0xff] }
 0x24f   :  { %v975_v19 = vadd.f32 %v971_v36, %v4737_v22  ;;  %v5201_v36 = vld [vmem:[#allocation2 + $0x1c0] sm:$0xff] }
 0x250   :  { %v979_v26 = vmul.f32 %v976_v27, %v4764_v35  ;;  %v5189_v35 = vld [vmem:[#allocation2 + $0x1e0] sm:$0xff]  ;;  %v5207_v27 = vld [vmem:[#allocation2 + $0x1d0] sm:$0xff] }
 0x251   :  { %8692 = vst [vmem:[#allocation82_spill] sm:$0xff] %v5207_v27 }
 0x252   :  { %v2932_v41 = vpop.eup %2931 }
 0x253   :  { %v973_v25 = vmul.f32 %v2932_v41, %v4731_v32  ;;  %v2934_v42 = vpop.eup %2933  ;;  %v5204_v41 = vld [vmem:[#allocation2 + $0x1c8] sm:$0xff] }
 0x254   :  { %v974_v16 = vmul.f32 %v2934_v42, %v4760_v39  ;;  %8691 = vst [vmem:[#allocation52_spill] sm:$0xff] %v5204_v41  ;;  %v5225_v42 = vld [vmem:[#allocation2 + $0x180] sm:$0xff] }
 0x255   :  { %v977_v23 = vadd.f32 %v973_v25, %v4740_v30  ;;  %v5210_v25 = vld [vmem:[#allocation2 + $0x1d8] sm:$0xff]  ;;  %8698 = vst [vmem:[#allocation40_spill] sm:$0xff] %v5225_v42 }
 0x256   :  { %v978_v18 = vadd.f32 %v974_v16, %v4773_v38  ;;  %8693 = vst [vmem:[#allocation53_spill] sm:$0xff] %v5210_v25  ;;  %v5228_v16 = vld [vmem:[#allocation2 + $0x188] sm:$0xff] }
 0x257   :  { %v980_v28 = vmul.f32 %v977_v23, %v975_v19  ;;  %v5213_v19 = vld [vmem:[#allocation2 + $0x1a0] sm:$0xff]  ;;  %v5216_v23 = vld [vmem:[#allocation2 + $0x1a8] sm:$0xff]  ;;  %8699 = vst [vmem:[#allocation60_spill] sm:$0xff] %v5228_v16 }
 0x258   :  { %8694 = vst [vmem:[#allocation37_spill] sm:$0xff] %v5213_v19 }
 0x259   :  { %v5178_v49 = vadd.f32 %v980_v28, %v979_v26  ;;  %8695 = vst [vmem:[#allocation56_spill] sm:$0xff] %v5216_v23  ;;  %v5219_v26 = vld [vmem:[#allocation2 + $0x1b0] sm:$0xff]  ;;  %v5222_v28 = vld [vmem:[#allocation2 + $0x1b8] sm:$0xff] }
 0x25a   :  { %8696 = vst [vmem:[#allocation85_spill] sm:$0xff] %v5219_v26 }
 0x25b   :  { %2935 = vtanh.f32 %v5178_v49  ;;  %8697 = vst [vmem:[#allocation57_spill] sm:$0xff] %v5222_v28 }
 0x261   :  { %v2936_v15 = vpop.eup %2935 }
 0x262   :  { %v5183_v52 = vmul.f32 %v2936_v15, %v978_v18  ;;  %v5231_v18 = vld [vmem:[#allocation2 + $0x190] sm:$0xff]  ;;  %v5234_v15 = vld [vmem:[#allocation2 + $0x198] sm:$0xff] }
 0x263   :  { %8700 = vst [vmem:[#allocation88_spill] sm:$0xff] %v5231_v18 }
 0x264   :  { %1000 = vmatmul.f32.vlgmr.msra.gmra.mxu0 %v5183_v52  ;;  %1020 = vmatmul.f32.vlgmr.msra.gmra.mxu1 %v5183_v52  ;;  %8701 = vst [vmem:[#allocation61_spill] sm:$0xff] %v5234_v15 }
 0x265   :  { %1040 = vmatmul.f32.vlgmr.msrb.gmra.mxu2 %v5183_v52  ;;  %1060 = vmatmul.f32.vlgmr.msra.gmra.mxu3 %v5183_v52 }
 0x266   :  { %1161 = vmatpush.msra.mxu0 %v5189_v35  ;;  %1181 = vmatpush.msra.mxu1 %v5192_v45 }
 0x267   :  { %1201 = vmatpush.msrb.mxu2 %v5195_v37  ;;  %1221 = vmatpush.msra.mxu3 %v5198_v31 }
 0x268   :  { %1162 = vmatpush.msra.mxu0 %v5201_v36  ;;  %1182 = vmatpush.msra.mxu1 %v5204_v41 }
 0x269   :  { %1202 = vmatpush.msrb.mxu2 %v5207_v27  ;;  %1222 = vmatpush.msra.mxu3 %v5210_v25 }
 0x26a   :  { %1163 = vmatpush.msra.mxu0 %v5213_v19  ;;  %1183 = vmatpush.msra.mxu1 %v5216_v23 }
 0x26b   :  { %1203 = vmatpush.msrb.mxu2 %v5219_v26  ;;  %1223 = vmatpush.msra.mxu3 %v5222_v28  ;;  %v5237_v26 = vld [vmem:[#allocation2 + $0x160] sm:$0xff]  ;;  %v5240_v28 = vld [vmem:[#allocation2 + $0x168] sm:$0xff] }
 0x26c   :  { %1164 = vmatpush.msra.mxu0 %v5225_v42  ;;  %1184 = vmatpush.msra.mxu1 %v5228_v16  ;;  %8702 = vst [vmem:[#allocation43_spill] sm:$0xff] %v5237_v26  ;;  %v5243_v42 = vld [vmem:[#allocation2 + $0x170] sm:$0xff]  ;;  %v5246_v16 = vld [vmem:[#allocation2 + $0x178] sm:$0xff] }
 0x26d   :  { %1204 = vmatpush.msrb.mxu2 %v5231_v18  ;;  %1224 = vmatpush.msra.mxu3 %v5234_v15  ;;  %8703 = vst [vmem:[#allocation64_spill] sm:$0xff] %v5240_v28  ;;  %v5249_v18 = vld [vmem:[#allocation2 + $0x140] sm:$0xff]  ;;  %v5252_v15 = vld [vmem:[#allocation2 + $0x148] sm:$0xff] }
 0x26e   :  { %1165 = vmatpush.msra.mxu0 %v5237_v26  ;;  %1185 = vmatpush.msra.mxu1 %v5240_v28  ;;  %8704 = vst [vmem:[#allocation90_spill] sm:$0xff] %v5243_v42  ;;  %v5255_v26 = vld [vmem:[#allocation2 + $0x150] sm:$0xff]  ;;  %v5258_v28 = vld [vmem:[#allocation2 + $0x158] sm:$0xff] }
 0x26f   :  { %1205 = vmatpush.msrb.mxu2 %v5243_v42  ;;  %8705 = vst [vmem:[#allocation66_spill] sm:$0xff] %v5246_v16  ;;  %1225 = vmatpush.msra.mxu3 %v5246_v16  ;;  %v5261_v42 = vld [vmem:[#allocation2 + $0x120] sm:$0xff]  ;;  %v5264_v16 = vld [vmem:[#allocation2 + $0x128] sm:$0xff] }
 0x270   :  { %8706 = vst [vmem:[#allocation47_spill] sm:$0xff] %v5249_v18  ;;  %1166 = vmatpush.msra.mxu0 %v5249_v18  ;;  %1186 = vmatpush.msra.mxu1 %v5252_v15  ;;  %v5267_v18 = vld [vmem:[#allocation2 + $0x130] sm:$0xff] }
 0x271   :  { %8707 = vst [vmem:[#allocation68_spill] sm:$0xff] %v5252_v15  ;;  %1206 = vmatpush.msrb.mxu2 %v5255_v26  ;;  %1226 = vmatpush.msra.mxu3 %v5258_v28  ;;  %v5270_v15 = vld [vmem:[#allocation2 + $0x138] sm:$0xff] }
 0x272   :  { %8708 = vst [vmem:[#allocation91_spill] sm:$0xff] %v5255_v26  ;;  %1167 = vmatpush.msra.mxu0 %v5261_v42  ;;  %1187 = vmatpush.msra.mxu1 %v5264_v16  ;;  %v5273_v26 = vld [vmem:[#allocation2 + $0x100] sm:$0xff] }
 0x273   :  { %8709 = vst [vmem:[#allocation70_spill] sm:$0xff] %v5258_v28  ;;  %1207 = vmatpush.msrb.mxu2 %v5267_v18  ;;  %1227 = vmatpush.msra.mxu3 %v5270_v15  ;;  %v5276_v28 = vld [vmem:[#allocation2 + $0x108] sm:$0xff] }
 0x274   :  { %8710 = vst [vmem:[#allocation51_spill] sm:$0xff] %v5261_v42  ;;  %1168 = vmatpush.msra.mxu0 %v5273_v26  ;;  %1188 = vmatpush.msra.mxu1 %v5276_v28  ;;  %v5279_v42 = vld [vmem:[#allocation2 + $0x110] sm:$0xff] }
 0x275   :  { %8711 = vst [vmem:[#allocation72_spill] sm:$0xff] %v5264_v16  ;;  %1208 = vmatpush.msrb.mxu2 %v5279_v42  ;;  %v5282_v16 = vld [vmem:[#allocation2 + $0x118] sm:$0xff] }
 0x276   :  { %8712 = vst [vmem:[#allocation92_spill] sm:$0xff] %v5267_v18  ;;  %1228 = vmatpush.msra.mxu3 %v5282_v16  ;;  %v5285_v18 = vld [vmem:[#allocation2 + $0xe0] sm:$0xff] }
 0x277   :  { %8713 = vst [vmem:[#allocation74_spill] sm:$0xff] %v5270_v15  ;;  %1169 = vmatpush.msra.mxu0 %v5285_v18  ;;  %v5288_v15 = vld [vmem:[#allocation2 + $0xe8] sm:$0xff] }
 0x278   :  { %8714 = vst [vmem:[#allocation55_spill] sm:$0xff] %v5273_v26  ;;  %1189 = vmatpush.msra.mxu1 %v5288_v15  ;;  %v5291_v26 = vld [vmem:[#allocation2 + $0xf0] sm:$0xff] }
 0x279   :  { %8715 = vst [vmem:[#allocation75_spill] sm:$0xff] %v5276_v28  ;;  %1209 = vmatpush.msrb.mxu2 %v5291_v26  ;;  %v5294_v28 = vld [vmem:[#allocation2 + $0xf8] sm:$0xff] }
 0x27a   :  { %8716 = vst [vmem:[#allocation93_spill] sm:$0xff] %v5279_v42  ;;  %1229 = vmatpush.msra.mxu3 %v5294_v28  ;;  %v5297_v42 = vld [vmem:[#allocation2 + $0xc0] sm:$0xff] }
 0x27b   :  { %8717 = vst [vmem:[#allocation77_spill] sm:$0xff] %v5282_v16  ;;  %1170 = vmatpush.msra.mxu0 %v5297_v42  ;;  %v5300_v16 = vld [vmem:[#allocation2 + $0xc8] sm:$0xff] }
 0x27c   :  { %8718 = vst [vmem:[#allocation59_spill] sm:$0xff] %v5285_v18  ;;  %1190 = vmatpush.msra.mxu1 %v5300_v16  ;;  %v5303_v18 = vld [vmem:[#allocation2 + $0xd0] sm:$0xff] }
 0x27d   :  { %8719 = vst [vmem:[#allocation78_spill] sm:$0xff] %v5288_v15  ;;  %1210 = vmatpush.msrb.mxu2 %v5303_v18  ;;  %v5306_v15 = vld [vmem:[#allocation2 + $0xd8] sm:$0xff] }
 0x27e   :  { %8720 = vst [vmem:[#allocation94_spill] sm:$0xff] %v5291_v26  ;;  %1230 = vmatpush.msra.mxu3 %v5306_v15  ;;  %v5309_v26 = vld [vmem:[#allocation2 + $0xa0] sm:$0xff] }
 0x27f   :  { %8721 = vst [vmem:[#allocation80_spill] sm:$0xff] %v5294_v28  ;;  %1171 = vmatpush.msra.mxu0 %v5309_v26  ;;  %v5312_v28 = vld [vmem:[#allocation2 + $0xa8] sm:$0xff] }
 0x280   :  { %8722 = vst [vmem:[#allocation63_spill] sm:$0xff] %v5297_v42  ;;  %1191 = vmatpush.msra.mxu1 %v5312_v28  ;;  %v5315_v42 = vld [vmem:[#allocation2 + $0xb0] sm:$0xff] }
 0x281   :  { %8723 = vst [vmem:[#allocation81_spill] sm:$0xff] %v5300_v16  ;;  %1211 = vmatpush.msrb.mxu2 %v5315_v42  ;;  %v5318_v16 = vld [vmem:[#allocation2 + $0xb8] sm:$0xff] }
 0x282   :  { %8724 = vst [vmem:[#allocation95_spill] sm:$0xff] %v5303_v18  ;;  %1231 = vmatpush.msra.mxu3 %v5318_v16  ;;  %v5321_v18 = vld [vmem:[#allocation2 + $0x80] sm:$0xff] }
 0x283   :  { %8725 = vst [vmem:[#allocation83_spill] sm:$0xff] %v5306_v15  ;;  %1172 = vmatpush.msra.mxu0 %v5321_v18  ;;  %v5324_v15 = vld [vmem:[#allocation2 + $0x88] sm:$0xff] }
 0x284   :  { %8726 = vst [vmem:[#allocation67_spill] sm:$0xff] %v5309_v26  ;;  %1192 = vmatpush.msra.mxu1 %v5324_v15  ;;  %v5327_v26 = vld [vmem:[#allocation2 + $0x90] sm:$0xff] }
 0x285   :  { %8727 = vst [vmem:[#allocation84_spill] sm:$0xff] %v5312_v28  ;;  %1212 = vmatpush.msrb.mxu2 %v5327_v26  ;;  %v5330_v28 = vld [vmem:[#allocation2 + $0x98] sm:$0xff] }
 0x286   :  { %8728 = vst [vmem:[#allocation96_spill] sm:$0xff] %v5315_v42  ;;  %1232 = vmatpush.msra.mxu3 %v5330_v28  ;;  %v5333_v42 = vld [vmem:[#allocation2 + $0x60] sm:$0xff] }
 0x287   :  { %8729 = vst [vmem:[#allocation86_spill] sm:$0xff] %v5318_v16  ;;  %1173 = vmatpush.msra.mxu0 %v5333_v42  ;;  %v5336_v16 = vld [vmem:[#allocation2 + $0x68] sm:$0xff] }
 0x288   :  { %8730 = vst [vmem:[#allocation71_spill] sm:$0xff] %v5321_v18  ;;  %1193 = vmatpush.msra.mxu1 %v5336_v16  ;;  %v5339_v18 = vld [vmem:[#allocation2 + $0x70] sm:$0xff] }
 0x289   :  { %8731 = vst [vmem:[#allocation87_spill] sm:$0xff] %v5324_v15  ;;  %1213 = vmatpush.msrb.mxu2 %v5339_v18  ;;  %v5342_v15 = vld [vmem:[#allocation2 + $0x78] sm:$0xff] }
 0x28a   :  { %8732 = vst [vmem:[#allocation97_spill] sm:$0xff] %v5327_v26  ;;  %1233 = vmatpush.msra.mxu3 %v5342_v15  ;;  %v5345_v26 = vld [vmem:[#allocation2 + $0x40] sm:$0xff] }
 0x28b   :  { %8733 = vst [vmem:[#allocation89_spill] sm:$0xff] %v5330_v28  ;;  %1174 = vmatpush.msra.mxu0 %v5345_v26  ;;  %v5348_v28 = vld [vmem:[#allocation2 + $0x48] sm:$0xff] }
 0x28c   :  { %8734 = vst [vmem:[#allocation159_spill] sm:$0xff] %v5333_v42  ;;  %1194 = vmatpush.msra.mxu1 %v5348_v28  ;;  %v5351_v42 = vld [vmem:[#allocation2 + $0x50] sm:$0xff] }
 0x28d   :  { %8735 = vst [vmem:[#allocation164_spill] sm:$0xff] %v5336_v16  ;;  %1214 = vmatpush.msrb.mxu2 %v5351_v42  ;;  %v5354_v16 = vld [vmem:[#allocation2 + $0x58] sm:$0xff] }
 0x28e   :  { %8736 = vst [vmem:[#allocation187_spill] sm:$0xff] %v5339_v18  ;;  %1234 = vmatpush.msra.mxu3 %v5354_v16  ;;  %v5357_v18 = vld [vmem:[#allocation2 + $0x20] sm:$0xff] }
 0x28f   :  { %8737 = vst [vmem:[#allocation119_spill] sm:$0xff] %v5342_v15  ;;  %1175 = vmatpush.msra.mxu0 %v5357_v18  ;;  %v5360_v15 = vld [vmem:[#allocation2 + $0x28] sm:$0xff] }
 0x290   :  { %8738 = vst [vmem:[#allocation120_spill] sm:$0xff] %v5345_v26  ;;  %1195 = vmatpush.msra.mxu1 %v5360_v15  ;;  %v5363_v26 = vld [vmem:[#allocation2 + $0x30] sm:$0xff] }
 0x291   :  { %8739 = vst [vmem:[#allocation121_spill] sm:$0xff] %v5348_v28  ;;  %1215 = vmatpush.msrb.mxu2 %v5363_v26  ;;  %v5366_v28 = vld [vmem:[#allocation2 + $0x38] sm:$0xff] }
 0x292   :  { %8740 = vst [vmem:[#allocation122_spill] sm:$0xff] %v5351_v42  ;;  %1235 = vmatpush.msra.mxu3 %v5366_v28  ;;  %v5369_v42 = vld [vmem:[#allocation2] sm:$0xff] }
 0x293   :  { %8741 = vst [vmem:[#allocation123_spill] sm:$0xff] %v5354_v16  ;;  %1176 = vmatpush.msra.mxu0 %v5369_v42  ;;  %v5372_v16 = vld [vmem:[#allocation2 + $0x8] sm:$0xff] }
 0x294   :  { %8742 = vst [vmem:[#allocation124_spill] sm:$0xff] %v5357_v18  ;;  %1196 = vmatpush.msra.mxu1 %v5372_v16  ;;  %v5375_v18 = vld [vmem:[#allocation2 + $0x10] sm:$0xff] }
 0x295   :  { %8743 = vst [vmem:[#allocation126_spill] sm:$0xff] %v5360_v15  ;;  %1216 = vmatpush.msrb.mxu2 %v5375_v18  ;;  %v5378_v15 = vld [vmem:[#allocation2 + $0x18] sm:$0xff] }
 0x296   :  { %8744 = vst [vmem:[#allocation127_spill] sm:$0xff] %v5363_v26  ;;  %1236 = vmatpush.msra.mxu3 %v5378_v15  ;;  %v845_v26 = vadd.f32 %v5157_v43, %v4868_v33  ;;  %v885_v43 = vadd.f32 %v5163_v29, %v4880_v57 }
 0x297   :  { %8745 = vst [vmem:[#allocation128_spill] sm:$0xff] %v5366_v28  ;;  %v825_v28 = vadd.f32 %v5155_v50, %v4870_v40 }
 0x298   :  { %8746 = vst [vmem:[#allocation129_spill] sm:$0xff] %v5369_v42 }
 0x299   :  { %8747 = vst [vmem:[#allocation130_spill] sm:$0xff] %v5372_v16  ;;  %v865_v16 = vadd.f32 %v5161_v44, %v4876_v53 }
 0x29a   :  { %8748 = vst [vmem:[#allocation131_spill] sm:$0xff] %v5375_v18 }
 0x29b   :  { %8749 = vst [vmem:[#allocation132_spill] sm:$0xff] %v5378_v15 }
 0x2e1   :  { %v1001_v23 = vpop.f32.mrf.mxu0  ;;  %v1021_v42 = vpop.f32.mrf.mxu1 }
 0x2e2   :  { %v1022_v19 = vadd.f32 %v1021_v42, %v845_v26  ;;  %v1002_v25 = vadd.f32 %v1001_v23, %v825_v28 }
 0x2e4   :  { %2937 = vtanh.f32 %v1022_v19 }
 0x2e5   :  { %2939 = vtanh.f32 %v1002_v25 }
 0x2e8   :  { %v1041_v18 = vpop.f32.mrf.mxu2  ;;  %v1061_v15 = vpop.f32.mrf.mxu3 }
 0x2e9   :  { %v1042_v27 = vadd.f32 %v1041_v18, %v865_v16  ;;  %v1062_v40 = vadd.f32 %v1061_v15, %v885_v43  ;;  %v5407_v43 = vld [vmem:[#allocation5 + $0x1f0] sm:$0xff] }
 0x2ea   :  { %v2938_v41 = vpop.eup %2937 }
 0x2eb   :  { %2941 = vtanh.f32 %v1042_v27  ;;  %v2940_v33 = vpop.eup %2939  ;;  %v1069_v50 = vmul.f32 %v2938_v41, %v4711_v14 }
 0x2ec   :  { %v1068_v26 = vmul.f32 %v2940_v33, %v4719_v17  ;;  %2943 = vtanh.f32 %v1062_v40  ;;  %v5401_v40 = vld [vmem:[#allocation5 + $0x1e0] sm:$0xff] }
 0x2ed   :  { %v1073_v19 = vadd.f32 %v1069_v50, %v4728_v24  ;;  %v5410_v50 = vld [vmem:[#allocation5 + $0x1f8] sm:$0xff] }
 0x2ee   :  { %v1072_v25 = vadd.f32 %v1068_v26, %v4737_v22  ;;  %v5413_v26 = vld [vmem:[#allocation5 + $0x1c0] sm:$0xff] }
 0x2ef   :  { %v1076_v28 = vmul.f32 %v1073_v19, %v4890_v3  ;;  %v5404_v3 = vld [vmem:[#allocation5 + $0x1e8] sm:$0xff]  ;;  %v5419_v19 = vld [vmem:[#allocation5 + $0x1d0] sm:$0xff] }
 0x2f1   :  { %v2942_v23 = vpop.eup %2941 }
 0x2f2   :  { %v1070_v44 = vmul.f32 %v2942_v23, %v4731_v32  ;;  %v2944_v29 = vpop.eup %2943  ;;  %v5416_v23 = vld [vmem:[#allocation5 + $0x1c8] sm:$0xff] }
 0x2f3   :  { %v1071_v33 = vmul.f32 %v2944_v29, %v4760_v39  ;;  %v5441_v29 = vld [vmem:[#allocation5 + $0x180] sm:$0xff] }
 0x2f4   :  { %v1074_v27 = vadd.f32 %v1070_v44, %v4740_v30  ;;  %v5422_v44 = vld [vmem:[#allocation5 + $0x1d8] sm:$0xff]  ;;  %8750 = vst [vmem:[#allocation133_spill] sm:$0xff] %v5441_v29 }
 0x2f5   :  { %v1075_v41 = vadd.f32 %v1071_v33, %v4773_v38  ;;  %v5444_v33 = vld [vmem:[#allocation5 + $0x188] sm:$0xff] }
 0x2f6   :  { %v1077_v42 = vmul.f32 %v1074_v27, %v1072_v25  ;;  %v5425_v25 = vld [vmem:[#allocation5 + $0x1a0] sm:$0xff]  ;;  %v5428_v27 = vld [vmem:[#allocation5 + $0x1a8] sm:$0xff]  ;;  %8751 = vst [vmem:[#allocation134_spill] sm:$0xff] %v5444_v33 }
 0x2f8   :  { %v5396_v16 = vadd.f32 %v1077_v42, %v1076_v28  ;;  %v5431_v28 = vld [vmem:[#allocation5 + $0x1b0] sm:$0xff]  ;;  %v5434_v42 = vld [vmem:[#allocation5 + $0x1b8] sm:$0xff] }
 0x2fa   :  { %2945 = vtanh.f32 %v5396_v16 }
 0x300   :  { %v2946_v18 = vpop.eup %2945 }
 0x301   :  { %v1080_v15 = vmul.f32 %v2946_v18, %v1075_v41  ;;  %v5447_v41 = vld [vmem:[#allocation5 + $0x190] sm:$0xff]  ;;  %v5450_v18 = vld [vmem:[#allocation5 + $0x198] sm:$0xff] }
 0x302   :  { %8752 = vst [vmem:[#allocation136_spill] sm:$0xff] %v5447_v41 }
 0x303   :  { %1097 = vmatmul.f32.vlgmr.msrb.gmra.mxu0 %v1080_v15  ;;  %1117 = vmatmul.f32.vlgmr.msrb.gmra.mxu1 %v1080_v15  ;;  %8753 = vst [vmem:[#allocation137_spill] sm:$0xff] %v5450_v18 }
 0x304   :  { %1137 = vmatmul.f32.vlgmr.msra.gmra.mxu2 %v1080_v15  ;;  %1157 = vmatmul.f32.vlgmr.msrb.gmra.mxu3 %v1080_v15  ;;  %v5453_v15 = vld [vmem:[#allocation5 + $0x160] sm:$0xff] }
 0x305   :  { %1258 = vmatpush.msrb.mxu0 %v5401_v40  ;;  %1278 = vmatpush.msrb.mxu1 %v5404_v3  ;;  %8754 = vst [vmem:[#allocation138_spill] sm:$0xff] %v5453_v15 }
 0x306   :  { %1298 = vmatpush.msra.mxu2 %v5407_v43  ;;  %1318 = vmatpush.msrb.mxu3 %v5410_v50 }
 0x307   :  { %1259 = vmatpush.msrb.mxu0 %v5413_v26  ;;  %1279 = vmatpush.msrb.mxu1 %v5416_v23 }
 0x308   :  { %1299 = vmatpush.msra.mxu2 %v5419_v19  ;;  %1319 = vmatpush.msrb.mxu3 %v5422_v44 }
 0x309   :  { %1260 = vmatpush.msrb.mxu0 %v5425_v25  ;;  %1280 = vmatpush.msrb.mxu1 %v5428_v27 }
 0x30a   :  { %1300 = vmatpush.msra.mxu2 %v5431_v28  ;;  %1320 = vmatpush.msrb.mxu3 %v5434_v42 }
 0x30b   :  { %1177 = vmatmul.f32.vlgmr.msra.gmra.mxu0 %v5183_v52  ;;  %1197 = vmatmul.f32.vlgmr.msra.gmra.mxu1 %v5183_v52 }
 0x30c   :  { %1217 = vmatmul.f32.vlgmr.msrb.gmra.mxu2 %v5183_v52  ;;  %1237 = vmatmul.f32.vlgmr.msra.gmra.mxu3 %v5183_v52  ;;  %v5456_v52 = vld [vmem:[#allocation5 + $0x168] sm:$0xff] }
 0x30d   :  { %1261 = vmatpush.msrb.mxu0 %v5441_v29  ;;  %1281 = vmatpush.msrb.mxu1 %v5444_v33  ;;  %8755 = vst [vmem:[#allocation139_spill] sm:$0xff] %v5456_v52  ;;  %v5459_v29 = vld [vmem:[#allocation5 + $0x170] sm:$0xff]  ;;  %v5462_v33 = vld [vmem:[#allocation5 + $0x178] sm:$0xff] }
 0x30e   :  { %1301 = vmatpush.msra.mxu2 %v5447_v41  ;;  %1321 = vmatpush.msrb.mxu3 %v5450_v18  ;;  %8756 = vst [vmem:[#allocation141_spill] sm:$0xff] %v5459_v29  ;;  %v5465_v41 = vld [vmem:[#allocation5 + $0x140] sm:$0xff]  ;;  %v5468_v18 = vld [vmem:[#allocation5 + $0x148] sm:$0xff] }
 0x30f   :  { %1262 = vmatpush.msrb.mxu0 %v5453_v15  ;;  %1282 = vmatpush.msrb.mxu1 %v5456_v52  ;;  %8757 = vst [vmem:[#allocation143_spill] sm:$0xff] %v5462_v33  ;;  %v5471_v15 = vld [vmem:[#allocation5 + $0x150] sm:$0xff]  ;;  %v5474_v52 = vld [vmem:[#allocation5 + $0x158] sm:$0xff] }
 0x310   :  { %1302 = vmatpush.msra.mxu2 %v5459_v29  ;;  %1322 = vmatpush.msrb.mxu3 %v5462_v33  ;;  %8758 = vst [vmem:[#allocation144_spill] sm:$0xff] %v5465_v41  ;;  %v5477_v29 = vld [vmem:[#allocation5 + $0x120] sm:$0xff]  ;;  %v5480_v33 = vld [vmem:[#allocation5 + $0x128] sm:$0xff] }
 0x311   :  { %1263 = vmatpush.msrb.mxu0 %v5465_v41  ;;  %8759 = vst [vmem:[#allocation145_spill] sm:$0xff] %v5468_v18  ;;  %1283 = vmatpush.msrb.mxu1 %v5468_v18  ;;  %v5483_v41 = vld [vmem:[#allocation5 + $0x130] sm:$0xff]  ;;  %v5486_v18 = vld [vmem:[#allocation5 + $0x138] sm:$0xff] }
 0x312   :  { %8760 = vst [vmem:[#allocation147_spill] sm:$0xff] %v5471_v15  ;;  %1303 = vmatpush.msra.mxu2 %v5471_v15  ;;  %1323 = vmatpush.msrb.mxu3 %v5474_v52  ;;  %v5489_v15 = vld [vmem:[#allocation5 + $0x100] sm:$0xff] }
 0x313   :  { %8761 = vst [vmem:[#allocation148_spill] sm:$0xff] %v5474_v52  ;;  %1264 = vmatpush.msrb.mxu0 %v5477_v29  ;;  %1284 = vmatpush.msrb.mxu1 %v5480_v33  ;;  %v5492_v52 = vld [vmem:[#allocation5 + $0x108] sm:$0xff] }
 0x314   :  { %8762 = vst [vmem:[#allocation149_spill] sm:$0xff] %v5477_v29  ;;  %1304 = vmatpush.msra.mxu2 %v5483_v41  ;;  %1324 = vmatpush.msrb.mxu3 %v5486_v18  ;;  %v5495_v29 = vld [vmem:[#allocation5 + $0x110] sm:$0xff] }
 0x315   :  { %8763 = vst [vmem:[#allocation150_spill] sm:$0xff] %v5480_v33  ;;  %1265 = vmatpush.msrb.mxu0 %v5489_v15  ;;  %1285 = vmatpush.msrb.mxu1 %v5492_v52  ;;  %v5498_v33 = vld [vmem:[#allocation5 + $0x118] sm:$0xff] }
 0x316   :  { %8764 = vst [vmem:[#allocation151_spill] sm:$0xff] %v5483_v41  ;;  %1305 = vmatpush.msra.mxu2 %v5495_v29  ;;  %1325 = vmatpush.msrb.mxu3 %v5498_v33  ;;  %v5501_v41 = vld [vmem:[#allocation5 + $0xe0] sm:$0xff] }
 0x317   :  { %8765 = vst [vmem:[#allocation152_spill] sm:$0xff] %v5486_v18  ;;  %1266 = vmatpush.msrb.mxu0 %v5501_v41  ;;  %v5504_v18 = vld [vmem:[#allocation5 + $0xe8] sm:$0xff] }
 0x318   :  { %8766 = vst [vmem:[#allocation153_spill] sm:$0xff] %v5489_v15  ;;  %1286 = vmatpush.msrb.mxu1 %v5504_v18  ;;  %v5507_v15 = vld [vmem:[#allocation5 + $0xf0] sm:$0xff] }
 0x319   :  { %8767 = vst [vmem:[#allocation154_spill] sm:$0xff] %v5492_v52  ;;  %1306 = vmatpush.msra.mxu2 %v5507_v15  ;;  %v5510_v52 = vld [vmem:[#allocation5 + $0xf8] sm:$0xff] }
 0x31a   :  { %8768 = vst [vmem:[#allocation155_spill] sm:$0xff] %v5495_v29  ;;  %1326 = vmatpush.msrb.mxu3 %v5510_v52  ;;  %v5513_v29 = vld [vmem:[#allocation5 + $0xc0] sm:$0xff] }
 0x31b   :  { %8769 = vst [vmem:[#allocation156_spill] sm:$0xff] %v5498_v33  ;;  %1267 = vmatpush.msrb.mxu0 %v5513_v29  ;;  %v5516_v33 = vld [vmem:[#allocation5 + $0xc8] sm:$0xff] }
 0x31c   :  { %8770 = vst [vmem:[#allocation157_spill] sm:$0xff] %v5501_v41  ;;  %1287 = vmatpush.msrb.mxu1 %v5516_v33  ;;  %v5519_v41 = vld [vmem:[#allocation5 + $0xd0] sm:$0xff] }
 0x31d   :  { %8771 = vst [vmem:[#allocation158_spill] sm:$0xff] %v5504_v18  ;;  %1307 = vmatpush.msra.mxu2 %v5519_v41  ;;  %v5522_v18 = vld [vmem:[#allocation5 + $0xd8] sm:$0xff] }
 0x31e   :  { %8772 = vst [vmem:[#allocation160_spill] sm:$0xff] %v5507_v15  ;;  %1327 = vmatpush.msrb.mxu3 %v5522_v18  ;;  %v5525_v15 = vld [vmem:[#allocation5 + $0xa0] sm:$0xff] }
 0x31f   :  { %8773 = vst [vmem:[#allocation161_spill] sm:$0xff] %v5510_v52  ;;  %1268 = vmatpush.msrb.mxu0 %v5525_v15  ;;  %v5528_v52 = vld [vmem:[#allocation5 + $0xa8] sm:$0xff] }
 0x320   :  { %8774 = vst [vmem:[#allocation162_spill] sm:$0xff] %v5513_v29  ;;  %1288 = vmatpush.msrb.mxu1 %v5528_v52  ;;  %v5531_v29 = vld [vmem:[#allocation5 + $0xb0] sm:$0xff] }
 0x321   :  { %8775 = vst [vmem:[#allocation163_spill] sm:$0xff] %v5516_v33  ;;  %1308 = vmatpush.msra.mxu2 %v5531_v29  ;;  %v5534_v33 = vld [vmem:[#allocation5 + $0xb8] sm:$0xff] }
 0x322   :  { %8776 = vst [vmem:[#allocation165_spill] sm:$0xff] %v5519_v41  ;;  %1328 = vmatpush.msrb.mxu3 %v5534_v33  ;;  %v5537_v41 = vld [vmem:[#allocation5 + $0x80] sm:$0xff] }
 0x323   :  { %8777 = vst [vmem:[#allocation168_spill] sm:$0xff] %v5522_v18  ;;  %1269 = vmatpush.msrb.mxu0 %v5537_v41  ;;  %v5540_v18 = vld [vmem:[#allocation5 + $0x88] sm:$0xff] }
 0x324   :  { %8778 = vst [vmem:[#allocation169_spill] sm:$0xff] %v5525_v15  ;;  %1289 = vmatpush.msrb.mxu1 %v5540_v18  ;;  %v5543_v15 = vld [vmem:[#allocation5 + $0x90] sm:$0xff] }
 0x325   :  { %8779 = vst [vmem:[#allocation170_spill] sm:$0xff] %v5528_v52  ;;  %1309 = vmatpush.msra.mxu2 %v5543_v15  ;;  %v5546_v52 = vld [vmem:[#allocation5 + $0x98] sm:$0xff] }
 0x326   :  { %8780 = vst [vmem:[#allocation171_spill] sm:$0xff] %v5531_v29  ;;  %1329 = vmatpush.msrb.mxu3 %v5546_v52  ;;  %v5549_v29 = vld [vmem:[#allocation5 + $0x60] sm:$0xff] }
 0x327   :  { %8781 = vst [vmem:[#allocation172_spill] sm:$0xff] %v5534_v33  ;;  %1270 = vmatpush.msrb.mxu0 %v5549_v29  ;;  %v5552_v33 = vld [vmem:[#allocation5 + $0x68] sm:$0xff] }
 0x328   :  { %8782 = vst [vmem:[#allocation173_spill] sm:$0xff] %v5537_v41  ;;  %1290 = vmatpush.msrb.mxu1 %v5552_v33  ;;  %v5555_v41 = vld [vmem:[#allocation5 + $0x70] sm:$0xff] }
 0x329   :  { %8783 = vst [vmem:[#allocation174_spill] sm:$0xff] %v5540_v18  ;;  %1310 = vmatpush.msra.mxu2 %v5555_v41  ;;  %v5558_v18 = vld [vmem:[#allocation5 + $0x78] sm:$0xff] }
 0x32a   :  { %8784 = vst [vmem:[#allocation175_spill] sm:$0xff] %v5543_v15  ;;  %1330 = vmatpush.msrb.mxu3 %v5558_v18  ;;  %v5561_v15 = vld [vmem:[#allocation5 + $0x40] sm:$0xff] }
 0x32b   :  { %8785 = vst [vmem:[#allocation177_spill] sm:$0xff] %v5546_v52  ;;  %1271 = vmatpush.msrb.mxu0 %v5561_v15  ;;  %v5564_v52 = vld [vmem:[#allocation5 + $0x48] sm:$0xff] }
 0x32c   :  { %8786 = vst [vmem:[#allocation178_spill] sm:$0xff] %v5549_v29  ;;  %1291 = vmatpush.msrb.mxu1 %v5564_v52  ;;  %v5567_v29 = vld [vmem:[#allocation5 + $0x50] sm:$0xff] }
 0x32d   :  { %8787 = vst [vmem:[#allocation179_spill] sm:$0xff] %v5552_v33  ;;  %1311 = vmatpush.msra.mxu2 %v5567_v29  ;;  %v5570_v33 = vld [vmem:[#allocation5 + $0x58] sm:$0xff] }
 0x32e   :  { %8788 = vst [vmem:[#allocation180_spill] sm:$0xff] %v5555_v41  ;;  %1331 = vmatpush.msrb.mxu3 %v5570_v33  ;;  %v5573_v41 = vld [vmem:[#allocation5 + $0x20] sm:$0xff] }
 0x32f   :  { %8789 = vst [vmem:[#allocation181_spill] sm:$0xff] %v5558_v18  ;;  %1272 = vmatpush.msrb.mxu0 %v5573_v41  ;;  %v5576_v18 = vld [vmem:[#allocation5 + $0x28] sm:$0xff] }
 0x330   :  { %8790 = vst [vmem:[#allocation182_spill] sm:$0xff] %v5561_v15  ;;  %1292 = vmatpush.msrb.mxu1 %v5576_v18  ;;  %v5579_v15 = vld [vmem:[#allocation5 + $0x30] sm:$0xff] }
 0x331   :  { %8791 = vst [vmem:[#allocation183_spill] sm:$0xff] %v5564_v52  ;;  %1312 = vmatpush.msra.mxu2 %v5579_v15  ;;  %v5582_v52 = vld [vmem:[#allocation5 + $0x38] sm:$0xff] }
 0x332   :  { %8792 = vst [vmem:[#allocation184_spill] sm:$0xff] %v5567_v29  ;;  %1332 = vmatpush.msrb.mxu3 %v5582_v52  ;;  %v5585_v29 = vld [vmem:[#allocation5] sm:$0xff] }
 0x333   :  { %8793 = vst [vmem:[#allocation186_spill] sm:$0xff] %v5570_v33  ;;  %1273 = vmatpush.msrb.mxu0 %v5585_v29  ;;  %v5588_v33 = vld [vmem:[#allocation5 + $0x8] sm:$0xff] }
 0x334   :  { %8794 = vst [vmem:[#allocation99_spill] sm:$0xff] %v5573_v41  ;;  %1293 = vmatpush.msrb.mxu1 %v5588_v33  ;;  %v5591_v41 = vld [vmem:[#allocation5 + $0x10] sm:$0xff] }
 0x335   :  { %8795 = vst [vmem:[#allocation105_spill] sm:$0xff] %v5576_v18  ;;  %1313 = vmatpush.msra.mxu2 %v5591_v41  ;;  %v5594_v18 = vld [vmem:[#allocation5 + $0x18] sm:$0xff]  ;;  %1355 = vmatpush.msra.mxu0 %v4963_v46  ;;  %v8796_v46 = vld [vmem:[#allocation16_spill] sm:$0xff] }
 0x336   :  { %1333 = vmatpush.msrb.mxu3 %v5594_v18  ;;  %1375 = vmatpush.msra.mxu1 %v4966_v54  ;;  %v8797_v54 = vld [vmem:[#allocation21_spill] sm:$0xff] }
 0x337   :  { %1395 = vmatpush.msrb.mxu2 %v4969_v8  ;;  %1356 = vmatpush.msra.mxu0 %v4975_v55  ;;  %v8798_v8 = vld [vmem:[#allocation50_spill] sm:$0xff]  ;;  %v8800_v55 = vld [vmem:[#allocation17_spill] sm:$0xff] }
 0x338   :  { %1415 = vmatpush.msra.mxu3 %v4972_v48  ;;  %1376 = vmatpush.msra.mxu1 %v4978_v63  ;;  %v8799_v48 = vld [vmem:[#allocation25_spill] sm:$0xff]  ;;  %v8801_v63 = vld [vmem:[#allocation24_spill] sm:$0xff] }
 0x339   :  { %1396 = vmatpush.msrb.mxu2 %v4981_v21  ;;  %1357 = vmatpush.msra.mxu0 %v4987_v51  ;;  %v8802_v21 = vld [vmem:[#allocation54_spill] sm:$0xff] }
 0x33a   :  { %1416 = vmatpush.msra.mxu3 %v4984_v61  ;;  %1377 = vmatpush.msra.mxu1 %v4990_v56  ;;  %v8803_v61 = vld [vmem:[#allocation28_spill] sm:$0xff]  ;;  %v8804_v51 = vld [vmem:[#allocation18_spill] sm:$0xff]  ;;  %v8805_v56 = vld [vmem:[#allocation27_spill] sm:$0xff] }
 0x33b   :  { %1397 = vmatpush.msrb.mxu2 %v4993_v58  ;;  %1358 = vmatpush.msra.mxu0 %v4999_v1  ;;  %v8806_v58 = vld [vmem:[#allocation58_spill] sm:$0xff]  ;;  %v8808_v1 = vld [vmem:[#allocation19_spill] sm:$0xff] }
 0x33c   :  { %1417 = vmatpush.msra.mxu3 %v4996_v60  ;;  %1378 = vmatpush.msra.mxu1 %v5002_v4  ;;  %v8807_v60 = vld [vmem:[#allocation31_spill] sm:$0xff]  ;;  %v8809_v4 = vld [vmem:[#allocation30_spill] sm:$0xff] }
 0x33d   :  { %1398 = vmatpush.msrb.mxu2 %v5005_v5  ;;  %1359 = vmatpush.msra.mxu0 %v5011_v10  ;;  %v8810_v5 = vld [vmem:[#allocation62_spill] sm:$0xff]  ;;  %v8812_v10 = vld [vmem:[#allocation20_spill] sm:$0xff] }
 0x33e   :  { %1418 = vmatpush.msra.mxu3 %v5008_v7  ;;  %1379 = vmatpush.msra.mxu1 %v5014_v34  ;;  %v8811_v7 = vld [vmem:[#allocation33_spill] sm:$0xff]  ;;  %v8813_v34 = vld [vmem:[#allocation35_spill] sm:$0xff] }
 0x33f   :  { %1399 = vmatpush.msrb.mxu2 %v5017_v47  ;;  %1360 = vmatpush.msra.mxu0 %v5023_v6  ;;  %v8814_v47 = vld [vmem:[#allocation65_spill] sm:$0xff]  ;;  %v8816_v6 = vld [vmem:[#allocation23_spill] sm:$0xff] }
 0x340   :  { %1419 = vmatpush.msra.mxu3 %v5020_v0  ;;  %1380 = vmatpush.msra.mxu1 %v5026_v20  ;;  %v8815_v0 = vld [vmem:[#allocation36_spill] sm:$0xff]  ;;  %v8817_v20 = vld [vmem:[#allocation38_spill] sm:$0xff] }
 0x341   :  { %1400 = vmatpush.msrb.mxu2 %v5029_v59  ;;  %1361 = vmatpush.msra.mxu0 %v5035_v12  ;;  %v8818_v59 = vld [vmem:[#allocation69_spill] sm:$0xff]  ;;  %v8820_v12 = vld [vmem:[#allocation26_spill] sm:$0xff] }
 0x342   :  { %1420 = vmatpush.msra.mxu3 %v5032_v62  ;;  %1381 = vmatpush.msra.mxu1 %v5038_v11  ;;  %v8819_v62 = vld [vmem:[#allocation39_spill] sm:$0xff]  ;;  %v8821_v11 = vld [vmem:[#allocation41_spill] sm:$0xff] }
 0x343   :  { %1401 = vmatpush.msrb.mxu2 %v5041_v13  ;;  %1362 = vmatpush.msra.mxu0 %v8797_v54  ;;  %v8822_v13 = vld [vmem:[#allocation73_spill] sm:$0xff] }
 0x344   :  { %1421 = vmatpush.msra.mxu3 %v8796_v46  ;;  %1382 = vmatpush.msra.mxu1 %v8798_v8  ;;  %v8823_v46 = vld [vmem:[#allocation42_spill] sm:$0xff]  ;;  %v8824_v54 = vld [vmem:[#allocation29_spill] sm:$0xff]  ;;  %v8825_v8 = vld [vmem:[#allocation44_spill] sm:$0xff] }
 0x345   :  { %1402 = vmatpush.msrb.mxu2 %v8799_v48  ;;  %1363 = vmatpush.msra.mxu0 %v8801_v63  ;;  %v8826_v48 = vld [vmem:[#allocation76_spill] sm:$0xff] }
 0x346   :  { %1422 = vmatpush.msra.mxu3 %v8800_v55  ;;  %1383 = vmatpush.msra.mxu1 %v8802_v21  ;;  %v8827_v55 = vld [vmem:[#allocation45_spill] sm:$0xff]  ;;  %v8828_v63 = vld [vmem:[#allocation32_spill] sm:$0xff] }
 0x347   :  { %1403 = vmatpush.msrb.mxu2 %v8803_v61  ;;  %1364 = vmatpush.msra.mxu0 %v8805_v56  ;;  %v8829_v21 = vld [vmem:[#allocation48_spill] sm:$0xff]  ;;  %v8830_v61 = vld [vmem:[#allocation79_spill] sm:$0xff]  ;;  %v8832_v56 = vld [vmem:[#allocation34_spill] sm:$0xff] }
 0x348   :  { %1423 = vmatpush.msra.mxu3 %v8804_v51  ;;  %1384 = vmatpush.msra.mxu1 %v8806_v58  ;;  %v8831_v51 = vld [vmem:[#allocation49_spill] sm:$0xff] }
 0x349   :  { %1404 = vmatpush.msrb.mxu2 %v8807_v60  ;;  %1365 = vmatpush.msra.mxu0 %v8809_v4  ;;  %v8834_v4 = vld [vmem:[#allocation101_spill] sm:$0xff] }
 0x34a   :  { %1424 = vmatpush.msra.mxu3 %v8808_v1  ;;  %1385 = vmatpush.msra.mxu1 %v8810_v5  ;;  %v8833_v1 = vld [vmem:[#allocation176_spill] sm:$0xff] }
 0x34b   :  { %1405 = vmatpush.msrb.mxu2 %v8811_v7  ;;  %1366 = vmatpush.msra.mxu0 %v8813_v34  ;;  %v404_v5 = vadd.f32 %v8834_v4, %v8833_v1  ;;  %v8835_v34 = vld [vmem:[#allocation185_spill] sm:$0xff] }
 0x34c   :  { %1425 = vmatpush.msra.mxu3 %v8812_v10  ;;  %1386 = vmatpush.msra.mxu1 %v8814_v47  ;;  %v8836_v47 = vld [vmem:[#allocation109_spill] sm:$0xff] }
 0x34d   :  { %1406 = vmatpush.msrb.mxu2 %v8815_v0  ;;  %1367 = vmatpush.msra.mxu0 %v8817_v20  ;;  %v363_v0 = vadd.f32 %v8836_v47, %v8835_v34 }
 0x34e   :  { %1426 = vmatpush.msra.mxu3 %v8816_v6  ;;  %1387 = vmatpush.msra.mxu1 %v8818_v59 }
 0x34f   :  { %1407 = vmatpush.msrb.mxu2 %v8819_v62  ;;  %1368 = vmatpush.msra.mxu0 %v8821_v11 }
 0x350   :  { %1427 = vmatpush.msra.mxu3 %v8820_v12  ;;  %1388 = vmatpush.msra.mxu1 %v8822_v13  ;;  %v8837_v12 = vld [vmem:[#allocation107_spill] sm:$0xff] }
 0x351   :  { %1408 = vmatpush.msrb.mxu2 %v8823_v46  ;;  %1369 = vmatpush.msra.mxu0 %v8825_v8  ;;  %v445_v11 = vadd.f32 %v8837_v12, %v4688_v2 }
 0x352   :  { %1428 = vmatpush.msra.mxu3 %v8824_v54  ;;  %1389 = vmatpush.msra.mxu1 %v8826_v48  ;;  %v8838_v48 = vld [vmem:[#allocation106_spill] sm:$0xff] }
 0x353   :  { %1409 = vmatpush.msrb.mxu2 %v8827_v55  ;;  %1370 = vmatpush.msra.mxu0 %v8829_v21  ;;  %v486_v55 = vadd.f32 %v8838_v48, %v4702_v9  ;;  %v8842_v48 = vld [vmem:[#allocation37_spill] sm:$0xff] }
 0x354   :  { %1429 = vmatpush.msra.mxu3 %v8828_v63  ;;  %1390 = vmatpush.msra.mxu1 %v8830_v61 }
 0x355   :  { %1410 = vmatpush.msrb.mxu2 %v8831_v51 }
 0x356   :  { %1430 = vmatpush.msra.mxu3 %v8832_v56 }
 0x380   :  { %v5661_v58 = vpop.f32.mrf.mxu0  ;;  %v5663_v60 = vpop.f32.mrf.mxu1 }
 0x387   :  { %v5667_v7 = vpop.f32.mrf.mxu2  ;;  %v5669_v10 = vpop.f32.mrf.mxu3 }
 0x388   :  { %v1178_v6 = vpop.f32.mrf.mxu0  ;;  %v1198_v20 = vpop.f32.mrf.mxu1 }
 0x389   :  { %v1199_v59 = vadd.f32 %v1198_v20, %v404_v5  ;;  %v1179_v62 = vadd.f32 %v1178_v6, %v363_v0 }
 0x38b   :  { %2947 = vtanh.f32 %v1199_v59 }
 0x38c   :  { %2949 = vtanh.f32 %v1179_v62 }
 0x38f   :  { %v1218_v13 = vpop.f32.mrf.mxu2  ;;  %v1238_v8 = vpop.f32.mrf.mxu3 }
 0x390   :  { %v1219_v46 = vadd.f32 %v1218_v13, %v445_v11  ;;  %v1239_v61 = vadd.f32 %v1238_v8, %v486_v55  ;;  %v8841_v8 = vld [vmem:[#allocation53_spill] sm:$0xff]  ;;  %v8843_v55 = vld [vmem:[#allocation56_spill] sm:$0xff] }
 0x391   :  { %v2948_v54 = vpop.eup %2947 }
 0x392   :  { %2951 = vtanh.f32 %v1219_v46  ;;  %v2950_v63 = vpop.eup %2949  ;;  %v1246_v21 = vmul.f32 %v2948_v54, %v4711_v14  ;;  %v8840_v54 = vld [vmem:[#allocation82_spill] sm:$0xff] }
 0x393   :  { %v1245_v51 = vmul.f32 %v2950_v63, %v4719_v17  ;;  %2953 = vtanh.f32 %v1239_v61  ;;  %v8844_v63 = vld [vmem:[#allocation85_spill] sm:$0xff]  ;;  %v8851_v61 = vld [vmem:[#allocation64_spill] sm:$0xff] }
 0x394   :  { %v1250_v4 = vadd.f32 %v1246_v21, %v4728_v24  ;;  %v8850_v21 = vld [vmem:[#allocation43_spill] sm:$0xff] }
 0x395   :  { %v1249_v47 = vadd.f32 %v1245_v51, %v4737_v22  ;;  %v8852_v51 = vld [vmem:[#allocation90_spill] sm:$0xff] }
 0x396   :  { %v1253_v6 = vmul.f32 %v1250_v4, %v5178_v49  ;;  %v8839_v49 = vld [vmem:[#allocation52_spill] sm:$0xff]  ;;  %v8854_v4 = vld [vmem:[#allocation47_spill] sm:$0xff] }
 0x398   :  { %v2952_v56 = vpop.eup %2951 }
 0x399   :  { %v1247_v5 = vmul.f32 %v2952_v56, %v4731_v32  ;;  %v2954_v59 = vpop.eup %2953  ;;  %v8853_v56 = vld [vmem:[#allocation66_spill] sm:$0xff] }
 0x39a   :  { %v1248_v12 = vmul.f32 %v2954_v59, %v4760_v39  ;;  %v8860_v59 = vld [vmem:[#allocation92_spill] sm:$0xff] }
 0x39b   :  { %v1251_v0 = vadd.f32 %v1247_v5, %v4740_v30  ;;  %v8855_v5 = vld [vmem:[#allocation68_spill] sm:$0xff] }
 0x39c   :  { %v1252_v11 = vadd.f32 %v1248_v12, %v4773_v38  ;;  %v8861_v12 = vld [vmem:[#allocation74_spill] sm:$0xff] }
 0x39d   :  { %v1254_v20 = vmul.f32 %v1251_v0, %v1249_v47  ;;  %v8856_v47 = vld [vmem:[#allocation91_spill] sm:$0xff]  ;;  %v8857_v0 = vld [vmem:[#allocation70_spill] sm:$0xff] }
 0x39f   :  { %v5684_v62 = vadd.f32 %v1254_v20, %v1253_v6  ;;  %v8858_v6 = vld [vmem:[#allocation51_spill] sm:$0xff]  ;;  %v8859_v20 = vld [vmem:[#allocation72_spill] sm:$0xff] }
 0x3a1   :  { %2955 = vtanh.f32 %v5684_v62 }
 0x3a7   :  { %v2956_v13 = vpop.eup %2955 }
 0x3a8   :  { %v5689_v46 = vmul.f32 %v2956_v13, %v1252_v11  ;;  %v8862_v11 = vld [vmem:[#allocation55_spill] sm:$0xff] }
 0x3a9   :  { %v8863_v13 = vld [vmem:[#allocation75_spill] sm:$0xff] }
 0x3aa   :  { %1274 = vmatmul.f32.vlgmr.msrb.gmra.mxu0 %v5689_v46  ;;  %1294 = vmatmul.f32.vlgmr.msrb.gmra.mxu1 %v5689_v46 }
 0x3ab   :  { %1314 = vmatmul.f32.vlgmr.msra.gmra.mxu2 %v5689_v46  ;;  %1334 = vmatmul.f32.vlgmr.msrb.gmra.mxu3 %v5689_v46 }
 0x3ac   :  { %1435 = vmatpush.msrb.mxu0 %v5189_v35  ;;  %1455 = vmatpush.msrb.mxu1 %v5192_v45  ;;  %v8845_v35 = vld [vmem:[#allocation57_spill] sm:$0xff]  ;;  %v8846_v45 = vld [vmem:[#allocation40_spill] sm:$0xff] }
 0x3ad   :  { %1475 = vmatpush.msra.mxu2 %v5195_v37  ;;  %1495 = vmatpush.msrb.mxu3 %v5198_v31  ;;  %v8847_v37 = vld [vmem:[#allocation60_spill] sm:$0xff] }
 0x3ae   :  { %1436 = vmatpush.msrb.mxu0 %v5201_v36  ;;  %1456 = vmatpush.msrb.mxu1 %v8839_v49  ;;  %v8848_v31 = vld [vmem:[#allocation88_spill] sm:$0xff]  ;;  %v8849_v36 = vld [vmem:[#allocation61_spill] sm:$0xff] }
 0x3af   :  { %1476 = vmatpush.msra.mxu2 %v8840_v54  ;;  %1496 = vmatpush.msrb.mxu3 %v8841_v8  ;;  %v8864_v49 = vld [vmem:[#allocation93_spill] sm:$0xff]  ;;  %v8866_v8 = vld [vmem:[#allocation59_spill] sm:$0xff] }
 0x3b0   :  { %1437 = vmatpush.msrb.mxu0 %v8842_v48  ;;  %1457 = vmatpush.msrb.mxu1 %v8843_v55  ;;  %v8865_v54 = vld [vmem:[#allocation77_spill] sm:$0xff]  ;;  %v8867_v48 = vld [vmem:[#allocation78_spill] sm:$0xff] }
 0x3b1   :  { %1477 = vmatpush.msra.mxu2 %v8844_v63  ;;  %1497 = vmatpush.msrb.mxu3 %v8845_v35  ;;  %v8868_v55 = vld [vmem:[#allocation94_spill] sm:$0xff]  ;;  %v8869_v63 = vld [vmem:[#allocation80_spill] sm:$0xff]  ;;  %v8870_v35 = vld [vmem:[#allocation63_spill] sm:$0xff] }
 0x3b2   :  { %1438 = vmatpush.msrb.mxu0 %v8846_v45  ;;  %1458 = vmatpush.msrb.mxu1 %v8847_v37  ;;  %v8871_v45 = vld [vmem:[#allocation81_spill] sm:$0xff]  ;;  %v8872_v37 = vld [vmem:[#allocation95_spill] sm:$0xff] }
 0x3b3   :  { %1478 = vmatpush.msra.mxu2 %v8848_v31  ;;  %1498 = vmatpush.msrb.mxu3 %v8849_v36  ;;  %v8873_v31 = vld [vmem:[#allocation83_spill] sm:$0xff] }
 0x3b4   :  { %1439 = vmatpush.msrb.mxu0 %v8850_v21  ;;  %1459 = vmatpush.msrb.mxu1 %v8851_v61  ;;  %v8874_v36 = vld [vmem:[#allocation67_spill] sm:$0xff]  ;;  %v8875_v21 = vld [vmem:[#allocation84_spill] sm:$0xff] }
 0x3b5   :  { %1479 = vmatpush.msra.mxu2 %v8852_v51  ;;  %1499 = vmatpush.msrb.mxu3 %v8853_v56  ;;  %v8876_v61 = vld [vmem:[#allocation96_spill] sm:$0xff]  ;;  %v8877_v51 = vld [vmem:[#allocation86_spill] sm:$0xff]  ;;  %v8878_v56 = vld [vmem:[#allocation71_spill] sm:$0xff] }
 0x3b6   :  { %1440 = vmatpush.msrb.mxu0 %v8854_v4  ;;  %1460 = vmatpush.msrb.mxu1 %v8855_v5  ;;  %v8879_v4 = vld [vmem:[#allocation87_spill] sm:$0xff]  ;;  %v8880_v5 = vld [vmem:[#allocation97_spill] sm:$0xff] }
 0x3b7   :  { %1480 = vmatpush.msra.mxu2 %v8856_v47  ;;  %1500 = vmatpush.msrb.mxu3 %v8857_v0  ;;  %v8881_v47 = vld [vmem:[#allocation89_spill] sm:$0xff]  ;;  %v8882_v0 = vld [vmem:[#allocation159_spill] sm:$0xff] }
 0x3b8   :  { %1441 = vmatpush.msrb.mxu0 %v8858_v6  ;;  %1461 = vmatpush.msrb.mxu1 %v8859_v20  ;;  %v8883_v6 = vld [vmem:[#allocation164_spill] sm:$0xff]  ;;  %v8884_v20 = vld [vmem:[#allocation187_spill] sm:$0xff] }
 0x3b9   :  { %1481 = vmatpush.msra.mxu2 %v8860_v59  ;;  %1501 = vmatpush.msrb.mxu3 %v8861_v12  ;;  %v8885_v59 = vld [vmem:[#allocation119_spill] sm:$0xff]  ;;  %v8886_v12 = vld [vmem:[#allocation120_spill] sm:$0xff] }
 0x3ba   :  { %1442 = vmatpush.msrb.mxu0 %v8862_v11  ;;  %1462 = vmatpush.msrb.mxu1 %v8863_v13  ;;  %v8887_v11 = vld [vmem:[#allocation121_spill] sm:$0xff]  ;;  %v8888_v13 = vld [vmem:[#allocation122_spill] sm:$0xff] }
 0x3bb   :  { %1482 = vmatpush.msra.mxu2 %v8864_v49  ;;  %1502 = vmatpush.msrb.mxu3 %v8865_v54  ;;  %v8889_v49 = vld [vmem:[#allocation123_spill] sm:$0xff]  ;;  %v8890_v54 = vld [vmem:[#allocation124_spill] sm:$0xff] }
 0x3bc   :  { %1443 = vmatpush.msrb.mxu0 %v8866_v8  ;;  %1463 = vmatpush.msrb.mxu1 %v8867_v48  ;;  %v8891_v8 = vld [vmem:[#allocation126_spill] sm:$0xff]  ;;  %v8892_v48 = vld [vmem:[#allocation127_spill] sm:$0xff] }
 0x3bd   :  { %1483 = vmatpush.msra.mxu2 %v8868_v55  ;;  %1503 = vmatpush.msrb.mxu3 %v8869_v63  ;;  %v8893_v55 = vld [vmem:[#allocation128_spill] sm:$0xff]  ;;  %v8894_v63 = vld [vmem:[#allocation129_spill] sm:$0xff] }
 0x3be   :  { %1444 = vmatpush.msrb.mxu0 %v8870_v35  ;;  %1464 = vmatpush.msrb.mxu1 %v8871_v45  ;;  %v8895_v35 = vld [vmem:[#allocation130_spill] sm:$0xff]  ;;  %v8896_v45 = vld [vmem:[#allocation131_spill] sm:$0xff] }
 0x3bf   :  { %1484 = vmatpush.msra.mxu2 %v8872_v37  ;;  %1504 = vmatpush.msrb.mxu3 %v8873_v31  ;;  %v8897_v37 = vld [vmem:[#allocation132_spill] sm:$0xff]  ;;  %v8898_v31 = vld [vmem:[#allocation46_spill] sm:$0xff] }
 0x3c0   :  { %1445 = vmatpush.msrb.mxu0 %v8874_v36  ;;  %1465 = vmatpush.msrb.mxu1 %v8875_v21  ;;  %v1119_v36 = vadd.f32 %v5663_v60, %v8898_v31  ;;  %v8899_v21 = vld [vmem:[#allocation22_spill] sm:$0xff]  ;;  %v1159_v60 = vadd.f32 %v5669_v10, %v4880_v57 }
 0x3c1   :  { %1485 = vmatpush.msra.mxu2 %v8876_v61  ;;  %1505 = vmatpush.msrb.mxu3 %v8877_v51  ;;  %v1099_v61 = vadd.f32 %v5661_v58, %v8899_v21 }
 0x3c2   :  { %1446 = vmatpush.msrb.mxu0 %v8878_v56  ;;  %1466 = vmatpush.msrb.mxu1 %v8879_v4 }
 0x3c3   :  { %1486 = vmatpush.msra.mxu2 %v8880_v5  ;;  %1506 = vmatpush.msrb.mxu3 %v8881_v47  ;;  %v1139_v47 = vadd.f32 %v5667_v7, %v4876_v53 }
 0x3c4   :  { %1447 = vmatpush.msrb.mxu0 %v8882_v0  ;;  %1467 = vmatpush.msrb.mxu1 %v8883_v6 }
 0x3c5   :  { %1487 = vmatpush.msra.mxu2 %v8884_v20  ;;  %1507 = vmatpush.msrb.mxu3 %v8885_v59 }
 0x3c6   :  { %1448 = vmatpush.msrb.mxu0 %v8886_v12  ;;  %1468 = vmatpush.msrb.mxu1 %v8887_v11 }
 0x3c7   :  { %1488 = vmatpush.msra.mxu2 %v8888_v13  ;;  %1508 = vmatpush.msrb.mxu3 %v8889_v49 }
 0x3c8   :  { %1449 = vmatpush.msrb.mxu0 %v8890_v54  ;;  %1469 = vmatpush.msrb.mxu1 %v8891_v8 }
 0x3c9   :  { %1489 = vmatpush.msra.mxu2 %v8892_v48  ;;  %1509 = vmatpush.msrb.mxu3 %v8893_v55 }
 0x3ca   :  { %1450 = vmatpush.msrb.mxu0 %v8894_v63  ;;  %1470 = vmatpush.msrb.mxu1 %v8895_v35 }
 0x3cb   :  { %1490 = vmatpush.msra.mxu2 %v8896_v45  ;;  %1510 = vmatpush.msrb.mxu3 %v8897_v37 }
 0x427   :  { %v1275_v51 = vpop.f32.mrf.mxu0  ;;  %v1295_v56 = vpop.f32.mrf.mxu1 }
 0x428   :  { %v1296_v4 = vadd.f32 %v1295_v56, %v1119_v36  ;;  %v1276_v5 = vadd.f32 %v1275_v51, %v1099_v61  ;;  %v8914_v51 = vld [vmem:[#allocation151_spill] sm:$0xff]  ;;  %v8915_v56 = vld [vmem:[#allocation152_spill] sm:$0xff] }
 0x42a   :  { %2957 = vtanh.f32 %v1296_v4  ;;  %v8916_v4 = vld [vmem:[#allocation153_spill] sm:$0xff] }
 0x42b   :  { %2959 = vtanh.f32 %v1276_v5  ;;  %v8917_v5 = vld [vmem:[#allocation154_spill] sm:$0xff] }
 0x42e   :  { %v1315_v0 = vpop.f32.mrf.mxu2  ;;  %v1335_v59 = vpop.f32.mrf.mxu3 }
 0x42f   :  { %v1316_v6 = vadd.f32 %v1315_v0, %v1139_v47  ;;  %v1336_v11 = vadd.f32 %v1335_v59, %v1159_v60  ;;  %v8918_v47 = vld [vmem:[#allocation155_spill] sm:$0xff]  ;;  %v8919_v0 = vld [vmem:[#allocation156_spill] sm:$0xff]  ;;  %v8923_v60 = vld [vmem:[#allocation161_spill] sm:$0xff] }
 0x430   :  { %v2958_v20 = vpop.eup %2957  ;;  %v8922_v59 = vld [vmem:[#allocation160_spill] sm:$0xff] }
 0x431   :  { %2961 = vtanh.f32 %v1316_v6  ;;  %v2960_v12 = vpop.eup %2959  ;;  %v1343_v58 = vmul.f32 %v2958_v20, %v4711_v14  ;;  %v8920_v6 = vld [vmem:[#allocation157_spill] sm:$0xff]  ;;  %v8921_v20 = vld [vmem:[#allocation158_spill] sm:$0xff] }
 0x432   :  { %v1342_v13 = vmul.f32 %v2960_v12, %v4719_v17  ;;  %2963 = vtanh.f32 %v1336_v11  ;;  %v8924_v12 = vld [vmem:[#allocation162_spill] sm:$0xff]  ;;  %v8926_v11 = vld [vmem:[#allocation165_spill] sm:$0xff] }
 0x433   :  { %v1347_v54 = vadd.f32 %v1343_v58, %v4728_v24  ;;  %v8925_v58 = vld [vmem:[#allocation163_spill] sm:$0xff] }
 0x434   :  { %v1346_v8 = vadd.f32 %v1342_v13, %v4737_v22  ;;  %v8927_v13 = vld [vmem:[#allocation168_spill] sm:$0xff] }
 0x435   :  { %v1350_v55 = vmul.f32 %v1347_v54, %v5396_v16  ;;  %v8900_v16 = vld [vmem:[#allocation133_spill] sm:$0xff]  ;;  %v8929_v54 = vld [vmem:[#allocation170_spill] sm:$0xff] }
 0x437   :  { %v2962_v49 = vpop.eup %2961 }
 0x438   :  { %v1344_v7 = vmul.f32 %v2962_v49, %v4731_v32  ;;  %v2964_v10 = vpop.eup %2963  ;;  %v8928_v49 = vld [vmem:[#allocation169_spill] sm:$0xff] }
 0x439   :  { %v1345_v45 = vmul.f32 %v2964_v10, %v4760_v39  ;;  %v8935_v10 = vld [vmem:[#allocation177_spill] sm:$0xff] }
 0x43a   :  { %v1348_v48 = vadd.f32 %v1344_v7, %v4740_v30  ;;  %v8930_v7 = vld [vmem:[#allocation171_spill] sm:$0xff] }
 0x43b   :  { %v1349_v37 = vadd.f32 %v1345_v45, %v4773_v38  ;;  %v8936_v45 = vld [vmem:[#allocation178_spill] sm:$0xff] }
 0x43c   :  { %v1351_v63 = vmul.f32 %v1348_v48, %v1346_v8  ;;  %v8931_v8 = vld [vmem:[#allocation172_spill] sm:$0xff]  ;;  %v8932_v48 = vld [vmem:[#allocation173_spill] sm:$0xff] }
 0x43e   :  { %v5774_v35 = vadd.f32 %v1351_v63, %v1350_v55  ;;  %v8933_v55 = vld [vmem:[#allocation174_spill] sm:$0xff]  ;;  %v8934_v63 = vld [vmem:[#allocation175_spill] sm:$0xff] }
 0x440   :  { %2965 = vtanh.f32 %v5774_v35 }
 0x446   :  { %v2966_v36 = vpop.eup %2965 }
 0x447   :  { %v1354_v61 = vmul.f32 %v2966_v36, %v1349_v37  ;;  %v8937_v37 = vld [vmem:[#allocation179_spill] sm:$0xff]  ;;  %v8938_v36 = vld [vmem:[#allocation180_spill] sm:$0xff] }
 0x449   :  { %1371 = vmatmul.f32.vlgmr.msra.gmra.mxu0 %v1354_v61  ;;  %1391 = vmatmul.f32.vlgmr.msra.gmra.mxu1 %v1354_v61 }
 0x44a   :  { %1411 = vmatmul.f32.vlgmr.msrb.gmra.mxu2 %v1354_v61  ;;  %1431 = vmatmul.f32.vlgmr.msra.gmra.mxu3 %v1354_v61  ;;  %v8939_v61 = vld [vmem:[#allocation181_spill] sm:$0xff] }
 0x44b   :  { %1532 = vmatpush.msra.mxu0 %v5401_v40  ;;  %1552 = vmatpush.msra.mxu1 %v5404_v3  ;;  %v8901_v40 = vld [vmem:[#allocation134_spill] sm:$0xff]  ;;  %v8902_v3 = vld [vmem:[#allocation136_spill] sm:$0xff] }
 0x44c   :  { %1572 = vmatpush.msrb.mxu2 %v5407_v43  ;;  %1592 = vmatpush.msra.mxu3 %v5410_v50  ;;  %v8903_v43 = vld [vmem:[#allocation137_spill] sm:$0xff]  ;;  %v8904_v50 = vld [vmem:[#allocation138_spill] sm:$0xff] }
 0x44d   :  { %1533 = vmatpush.msra.mxu0 %v5413_v26  ;;  %1553 = vmatpush.msra.mxu1 %v5416_v23  ;;  %v8905_v26 = vld [vmem:[#allocation139_spill] sm:$0xff]  ;;  %v8906_v23 = vld [vmem:[#allocation141_spill] sm:$0xff] }
 0x44e   :  { %1573 = vmatpush.msrb.mxu2 %v5419_v19  ;;  %1593 = vmatpush.msra.mxu3 %v5422_v44  ;;  %v8907_v19 = vld [vmem:[#allocation143_spill] sm:$0xff]  ;;  %v8908_v44 = vld [vmem:[#allocation144_spill] sm:$0xff] }
 0x44f   :  { %1534 = vmatpush.msra.mxu0 %v5425_v25  ;;  %1554 = vmatpush.msra.mxu1 %v5428_v27  ;;  %v8909_v25 = vld [vmem:[#allocation145_spill] sm:$0xff]  ;;  %v8910_v27 = vld [vmem:[#allocation147_spill] sm:$0xff] }
 0x450   :  { %1574 = vmatpush.msrb.mxu2 %v5431_v28  ;;  %1594 = vmatpush.msra.mxu3 %v5434_v42  ;;  %v8911_v28 = vld [vmem:[#allocation148_spill] sm:$0xff]  ;;  %v8912_v42 = vld [vmem:[#allocation149_spill] sm:$0xff] }
 0x451   :  { %1451 = vmatmul.f32.vlgmr.msrb.gmra.mxu0 %v5689_v46  ;;  %1471 = vmatmul.f32.vlgmr.msrb.gmra.mxu1 %v5689_v46 }
 0x452   :  { %1491 = vmatmul.f32.vlgmr.msra.gmra.mxu2 %v5689_v46  ;;  %1511 = vmatmul.f32.vlgmr.msrb.gmra.mxu3 %v5689_v46  ;;  %v8913_v46 = vld [vmem:[#allocation150_spill] sm:$0xff] }
 0x453   :  { %1535 = vmatpush.msra.mxu0 %v8900_v16  ;;  %1555 = vmatpush.msra.mxu1 %v8901_v40  ;;  %v8940_v16 = vld [vmem:[#allocation182_spill] sm:$0xff]  ;;  %v8941_v40 = vld [vmem:[#allocation183_spill] sm:$0xff] }
 0x454   :  { %1575 = vmatpush.msrb.mxu2 %v8902_v3  ;;  %1595 = vmatpush.msra.mxu3 %v8903_v43  ;;  %v8942_v3 = vld [vmem:[#allocation184_spill] sm:$0xff]  ;;  %v8943_v43 = vld [vmem:[#allocation186_spill] sm:$0xff] }
 0x455   :  { %1536 = vmatpush.msra.mxu0 %v8904_v50  ;;  %1556 = vmatpush.msra.mxu1 %v8905_v26  ;;  %v8944_v50 = vld [vmem:[#allocation99_spill] sm:$0xff]  ;;  %v8945_v26 = vld [vmem:[#allocation105_spill] sm:$0xff] }
 0x456   :  { %1576 = vmatpush.msrb.mxu2 %v8906_v23  ;;  %1596 = vmatpush.msra.mxu3 %v8907_v19  ;;  %v5847_v23 = vld [vmem:[#allocation7 + $0x1e0] sm:$0xff]  ;;  %v5850_v19 = vld [vmem:[#allocation7 + $0x1e8] sm:$0xff] }
 0x457   :  { %1537 = vmatpush.msra.mxu0 %v8908_v44  ;;  %1557 = vmatpush.msra.mxu1 %v8909_v25  ;;  %v5853_v44 = vld [vmem:[#allocation7 + $0x1f0] sm:$0xff]  ;;  %v5874_v25 = vld [vmem:[#allocation7 + $0x1a8] sm:$0xff] }
 0x458   :  { %1577 = vmatpush.msrb.mxu2 %v8910_v27  ;;  %1597 = vmatpush.msra.mxu3 %v8911_v28  ;;  %v5877_v27 = vld [vmem:[#allocation7 + $0x1b0] sm:$0xff]  ;;  %v5880_v28 = vld [vmem:[#allocation7 + $0x1b8] sm:$0xff] }
 0x459   :  { %1538 = vmatpush.msra.mxu0 %v8912_v42  ;;  %1558 = vmatpush.msra.mxu1 %v8913_v46  ;;  %v5883_v42 = vld [vmem:[#allocation7 + $0x180] sm:$0xff]  ;;  %v5886_v46 = vld [vmem:[#allocation7 + $0x188] sm:$0xff] }
 0x45a   :  { %1578 = vmatpush.msrb.mxu2 %v8914_v51  ;;  %1598 = vmatpush.msra.mxu3 %v8915_v56  ;;  %v5889_v51 = vld [vmem:[#allocation7 + $0x190] sm:$0xff]  ;;  %v5892_v56 = vld [vmem:[#allocation7 + $0x198] sm:$0xff] }
 0x45b   :  { %1539 = vmatpush.msra.mxu0 %v8916_v4  ;;  %1559 = vmatpush.msra.mxu1 %v8917_v5  ;;  %v5895_v4 = vld [vmem:[#allocation7 + $0x160] sm:$0xff]  ;;  %v5898_v5 = vld [vmem:[#allocation7 + $0x168] sm:$0xff] }
 0x45c   :  { %1579 = vmatpush.msrb.mxu2 %v8918_v47  ;;  %1599 = vmatpush.msra.mxu3 %v8919_v0  ;;  %v5901_v47 = vld [vmem:[#allocation7 + $0x170] sm:$0xff]  ;;  %v5904_v0 = vld [vmem:[#allocation7 + $0x178] sm:$0xff] }
 0x45d   :  { %1540 = vmatpush.msra.mxu0 %v8920_v6  ;;  %1560 = vmatpush.msra.mxu1 %v8921_v20  ;;  %v5907_v6 = vld [vmem:[#allocation7 + $0x140] sm:$0xff]  ;;  %v5910_v20 = vld [vmem:[#allocation7 + $0x148] sm:$0xff] }
 0x45e   :  { %1580 = vmatpush.msrb.mxu2 %v8922_v59  ;;  %1600 = vmatpush.msra.mxu3 %v8923_v60  ;;  %v5913_v59 = vld [vmem:[#allocation7 + $0x150] sm:$0xff]  ;;  %v5916_v60 = vld [vmem:[#allocation7 + $0x158] sm:$0xff] }
 0x45f   :  { %1541 = vmatpush.msra.mxu0 %v8924_v12  ;;  %1561 = vmatpush.msra.mxu1 %v8925_v58  ;;  %v5919_v12 = vld [vmem:[#allocation7 + $0x120] sm:$0xff]  ;;  %v5922_v58 = vld [vmem:[#allocation7 + $0x128] sm:$0xff] }
 0x460   :  { %1581 = vmatpush.msrb.mxu2 %v8926_v11  ;;  %1601 = vmatpush.msra.mxu3 %v8927_v13  ;;  %v5925_v11 = vld [vmem:[#allocation7 + $0x130] sm:$0xff]  ;;  %v5928_v13 = vld [vmem:[#allocation7 + $0x138] sm:$0xff] }
 0x461   :  { %1542 = vmatpush.msra.mxu0 %v8928_v49  ;;  %1562 = vmatpush.msra.mxu1 %v8929_v54  ;;  %8946 = vst [vmem:[#allocation103_spill] sm:$0xff] %v5928_v13  ;;  %v5931_v49 = vld [vmem:[#allocation7 + $0x100] sm:$0xff]  ;;  %v5934_v54 = vld [vmem:[#allocation7 + $0x108] sm:$0xff] }
 0x462   :  { %1582 = vmatpush.msrb.mxu2 %v8930_v7  ;;  %1602 = vmatpush.msra.mxu3 %v8931_v8  ;;  %8947 = vst [vmem:[#allocation102_spill] sm:$0xff] %v5931_v49  ;;  %v5937_v7 = vld [vmem:[#allocation7 + $0x110] sm:$0xff]  ;;  %v5940_v8 = vld [vmem:[#allocation7 + $0x118] sm:$0xff] }
 0x463   :  { %1543 = vmatpush.msra.mxu0 %v8932_v48  ;;  %1563 = vmatpush.msra.mxu1 %v8933_v55  ;;  %8948 = vst [vmem:[#allocation16_spill] sm:$0xff] %v5934_v54  ;;  %v5943_v48 = vld [vmem:[#allocation7 + $0xe0] sm:$0xff]  ;;  %v5946_v55 = vld [vmem:[#allocation7 + $0xe8] sm:$0xff] }
 0x464   :  { %1583 = vmatpush.msrb.mxu2 %v8934_v63  ;;  %1603 = vmatpush.msra.mxu3 %v8935_v10  ;;  %8949 = vst [vmem:[#allocation21_spill] sm:$0xff] %v5937_v7  ;;  %v5949_v63 = vld [vmem:[#allocation7 + $0xf0] sm:$0xff]  ;;  %v5952_v10 = vld [vmem:[#allocation7 + $0xf8] sm:$0xff] }
 0x465   :  { %1544 = vmatpush.msra.mxu0 %v8936_v45  ;;  %1564 = vmatpush.msra.mxu1 %v8937_v37  ;;  %8950 = vst [vmem:[#allocation50_spill] sm:$0xff] %v5940_v8  ;;  %v5955_v45 = vld [vmem:[#allocation7 + $0xc0] sm:$0xff]  ;;  %v5958_v37 = vld [vmem:[#allocation7 + $0xc8] sm:$0xff] }
 0x466   :  { %1584 = vmatpush.msrb.mxu2 %v8938_v36  ;;  %1604 = vmatpush.msra.mxu3 %v8939_v61  ;;  %8951 = vst [vmem:[#allocation25_spill] sm:$0xff] %v5943_v48  ;;  %v5961_v36 = vld [vmem:[#allocation7 + $0xd0] sm:$0xff]  ;;  %v5964_v61 = vld [vmem:[#allocation7 + $0xd8] sm:$0xff] }
 0x467   :  { %1545 = vmatpush.msra.mxu0 %v8940_v16  ;;  %1565 = vmatpush.msra.mxu1 %v8941_v40  ;;  %8952 = vst [vmem:[#allocation17_spill] sm:$0xff] %v5946_v55  ;;  %v5967_v16 = vld [vmem:[#allocation7 + $0xa0] sm:$0xff]  ;;  %v5970_v40 = vld [vmem:[#allocation7 + $0xa8] sm:$0xff] }
 0x468   :  { %1585 = vmatpush.msrb.mxu2 %v8942_v3  ;;  %1605 = vmatpush.msra.mxu3 %v8943_v43  ;;  %8953 = vst [vmem:[#allocation24_spill] sm:$0xff] %v5949_v63  ;;  %v5973_v3 = vld [vmem:[#allocation7 + $0xb0] sm:$0xff]  ;;  %v5976_v43 = vld [vmem:[#allocation7 + $0xb8] sm:$0xff] }
 0x469   :  { %1546 = vmatpush.msra.mxu0 %v8944_v50  ;;  %1566 = vmatpush.msra.mxu1 %v8945_v26  ;;  %8954 = vst [vmem:[#allocation54_spill] sm:$0xff] %v5952_v10  ;;  %v5979_v50 = vld [vmem:[#allocation7 + $0x80] sm:$0xff]  ;;  %v5982_v26 = vld [vmem:[#allocation7 + $0x88] sm:$0xff] }
 0x46a   :  { %1586 = vmatpush.msrb.mxu2 %v5579_v15  ;;  %1606 = vmatpush.msra.mxu3 %v5582_v52  ;;  %v5856_v15 = vld [vmem:[#allocation7 + $0x1f8] sm:$0xff]  ;;  %v5871_v52 = vld [vmem:[#allocation7 + $0x1a0] sm:$0xff]  ;;  %8955 = vst [vmem:[#allocation28_spill] sm:$0xff] %v5955_v45 }
 0x46b   :  { %1547 = vmatpush.msra.mxu0 %v5585_v29  ;;  %1567 = vmatpush.msra.mxu1 %v5588_v33  ;;  %v5859_v29 = vld [vmem:[#allocation7 + $0x1c0] sm:$0xff]  ;;  %v5862_v33 = vld [vmem:[#allocation7 + $0x1c8] sm:$0xff]  ;;  %8956 = vst [vmem:[#allocation18_spill] sm:$0xff] %v5958_v37 }
 0x46c   :  { %1587 = vmatpush.msrb.mxu2 %v5591_v41  ;;  %1607 = vmatpush.msra.mxu3 %v5594_v18  ;;  %v5865_v41 = vld [vmem:[#allocation7 + $0x1d0] sm:$0xff]  ;;  %v5868_v18 = vld [vmem:[#allocation7 + $0x1d8] sm:$0xff]  ;;  %8957 = vst [vmem:[#allocation27_spill] sm:$0xff] %v5961_v36 }
 0x46d   :  { %1629 = vmatpush.msrb.mxu0 %v5847_v23  ;;  %1649 = vmatpush.msrb.mxu1 %v5850_v19  ;;  %8958 = vst [vmem:[#allocation58_spill] sm:$0xff] %v5964_v61 }
 0x46e   :  { %1669 = vmatpush.msra.mxu2 %v5853_v44  ;;  %1689 = vmatpush.msrb.mxu3 %v5856_v15  ;;  %8959 = vst [vmem:[#allocation31_spill] sm:$0xff] %v5967_v16 }
 0x46f   :  { %1630 = vmatpush.msrb.mxu0 %v5859_v29  ;;  %1650 = vmatpush.msrb.mxu1 %v5862_v33  ;;  %8960 = vst [vmem:[#allocation19_spill] sm:$0xff] %v5970_v40 }
 0x470   :  { %1670 = vmatpush.msra.mxu2 %v5865_v41  ;;  %1690 = vmatpush.msrb.mxu3 %v5868_v18  ;;  %8961 = vst [vmem:[#allocation30_spill] sm:$0xff] %v5973_v3 }
 0x471   :  { %1631 = vmatpush.msrb.mxu0 %v5871_v52  ;;  %1651 = vmatpush.msrb.mxu1 %v5874_v25  ;;  %8962 = vst [vmem:[#allocation62_spill] sm:$0xff] %v5976_v43 }
 0x472   :  { %1671 = vmatpush.msra.mxu2 %v5877_v27  ;;  %1691 = vmatpush.msrb.mxu3 %v5880_v28  ;;  %8963 = vst [vmem:[#allocation33_spill] sm:$0xff] %v5979_v50 }
 0x473   :  { %1632 = vmatpush.msrb.mxu0 %v5883_v42  ;;  %1652 = vmatpush.msrb.mxu1 %v5886_v46  ;;  %8964 = vst [vmem:[#allocation20_spill] sm:$0xff] %v5982_v26 }
 0x474   :  { %1672 = vmatpush.msra.mxu2 %v5889_v51  ;;  %1692 = vmatpush.msrb.mxu3 %v5892_v56 }
 0x475   :  { %1633 = vmatpush.msrb.mxu0 %v5895_v4  ;;  %1653 = vmatpush.msrb.mxu1 %v5898_v5 }
 0x476   :  { %1673 = vmatpush.msra.mxu2 %v5901_v47  ;;  %1693 = vmatpush.msrb.mxu3 %v5904_v0 }
 0x477   :  { %1634 = vmatpush.msrb.mxu0 %v5907_v6  ;;  %1654 = vmatpush.msrb.mxu1 %v5910_v20 }
 0x478   :  { %1674 = vmatpush.msra.mxu2 %v5913_v59  ;;  %1694 = vmatpush.msrb.mxu3 %v5916_v60 }
 0x479   :  { %1635 = vmatpush.msrb.mxu0 %v5919_v12  ;;  %1655 = vmatpush.msrb.mxu1 %v5922_v58 }
 0x47a   :  { %1675 = vmatpush.msra.mxu2 %v5925_v11  ;;  %1695 = vmatpush.msrb.mxu3 %v5928_v13 }
 0x47b   :  { %1636 = vmatpush.msrb.mxu0 %v5931_v49  ;;  %1656 = vmatpush.msrb.mxu1 %v5934_v54 }
 0x47c   :  { %1676 = vmatpush.msra.mxu2 %v5937_v7  ;;  %1696 = vmatpush.msrb.mxu3 %v5940_v8 }
 0x47d   :  { %1637 = vmatpush.msrb.mxu0 %v5943_v48  ;;  %1657 = vmatpush.msrb.mxu1 %v5946_v55 }
 0x47e   :  { %1677 = vmatpush.msra.mxu2 %v5949_v63  ;;  %1697 = vmatpush.msrb.mxu3 %v5952_v10 }
 0x47f   :  { %1638 = vmatpush.msrb.mxu0 %v5955_v45  ;;  %1658 = vmatpush.msrb.mxu1 %v5958_v37 }
 0x480   :  { %1678 = vmatpush.msra.mxu2 %v5961_v36  ;;  %1698 = vmatpush.msrb.mxu3 %v5964_v61 }
 0x481   :  { %1639 = vmatpush.msrb.mxu0 %v5967_v16  ;;  %1659 = vmatpush.msrb.mxu1 %v5970_v40  ;;  %v5985_v16 = vld [vmem:[#allocation7 + $0x90] sm:$0xff]  ;;  %v5988_v40 = vld [vmem:[#allocation7 + $0x98] sm:$0xff] }
 0x482   :  { %1679 = vmatpush.msra.mxu2 %v5973_v3  ;;  %1699 = vmatpush.msrb.mxu3 %v5976_v43  ;;  %8965 = vst [vmem:[#allocation35_spill] sm:$0xff] %v5985_v16  ;;  %v5991_v3 = vld [vmem:[#allocation7 + $0x60] sm:$0xff]  ;;  %v5994_v43 = vld [vmem:[#allocation7 + $0x68] sm:$0xff] }
 0x483   :  { %1640 = vmatpush.msrb.mxu0 %v5979_v50  ;;  %1660 = vmatpush.msrb.mxu1 %v5982_v26  ;;  %8966 = vst [vmem:[#allocation65_spill] sm:$0xff] %v5988_v40  ;;  %v5997_v50 = vld [vmem:[#allocation7 + $0x70] sm:$0xff]  ;;  %v6000_v26 = vld [vmem:[#allocation7 + $0x78] sm:$0xff] }
 0x484   :  { %1680 = vmatpush.msra.mxu2 %v5985_v16  ;;  %1700 = vmatpush.msrb.mxu3 %v5988_v40  ;;  %8967 = vst [vmem:[#allocation36_spill] sm:$0xff] %v5991_v3  ;;  %v6003_v16 = vld [vmem:[#allocation7 + $0x40] sm:$0xff]  ;;  %v6006_v40 = vld [vmem:[#allocation7 + $0x48] sm:$0xff] }
 0x485   :  { %1641 = vmatpush.msrb.mxu0 %v5991_v3  ;;  %8968 = vst [vmem:[#allocation23_spill] sm:$0xff] %v5994_v43  ;;  %1661 = vmatpush.msrb.mxu1 %v5994_v43  ;;  %v6009_v3 = vld [vmem:[#allocation7 + $0x50] sm:$0xff]  ;;  %v6012_v43 = vld [vmem:[#allocation7 + $0x58] sm:$0xff] }
 0x486   :  { %8969 = vst [vmem:[#allocation38_spill] sm:$0xff] %v5997_v50  ;;  %1681 = vmatpush.msra.mxu2 %v5997_v50  ;;  %1701 = vmatpush.msrb.mxu3 %v6000_v26  ;;  %v6015_v50 = vld [vmem:[#allocation7 + $0x20] sm:$0xff] }
 0x487   :  { %8970 = vst [vmem:[#allocation69_spill] sm:$0xff] %v6000_v26  ;;  %1642 = vmatpush.msrb.mxu0 %v6003_v16  ;;  %1662 = vmatpush.msrb.mxu1 %v6006_v40  ;;  %v6018_v26 = vld [vmem:[#allocation7 + $0x28] sm:$0xff] }
 0x488   :  { %8971 = vst [vmem:[#allocation39_spill] sm:$0xff] %v6003_v16  ;;  %1682 = vmatpush.msra.mxu2 %v6009_v3  ;;  %1702 = vmatpush.msrb.mxu3 %v6012_v43  ;;  %v6021_v16 = vld [vmem:[#allocation7 + $0x30] sm:$0xff] }
 0x489   :  { %8972 = vst [vmem:[#allocation26_spill] sm:$0xff] %v6006_v40  ;;  %1643 = vmatpush.msrb.mxu0 %v6015_v50  ;;  %1663 = vmatpush.msrb.mxu1 %v6018_v26  ;;  %v6024_v40 = vld [vmem:[#allocation7 + $0x38] sm:$0xff] }
 0x48a   :  { %8973 = vst [vmem:[#allocation41_spill] sm:$0xff] %v6009_v3  ;;  %1683 = vmatpush.msra.mxu2 %v6021_v16  ;;  %1703 = vmatpush.msrb.mxu3 %v6024_v40  ;;  %v6027_v3 = vld [vmem:[#allocation7] sm:$0xff] }
 0x48b   :  { %8974 = vst [vmem:[#allocation73_spill] sm:$0xff] %v6012_v43  ;;  %1644 = vmatpush.msrb.mxu0 %v6027_v3  ;;  %v6030_v43 = vld [vmem:[#allocation7 + $0x8] sm:$0xff] }
 0x48c   :  { %8975 = vst [vmem:[#allocation42_spill] sm:$0xff] %v6015_v50  ;;  %1664 = vmatpush.msrb.mxu1 %v6030_v43  ;;  %v6033_v50 = vld [vmem:[#allocation7 + $0x10] sm:$0xff] }
 0x48d   :  { %8976 = vst [vmem:[#allocation29_spill] sm:$0xff] %v6018_v26  ;;  %1684 = vmatpush.msra.mxu2 %v6033_v50  ;;  %v6036_v26 = vld [vmem:[#allocation7 + $0x18] sm:$0xff] }
 0x48e   :  { %8977 = vst [vmem:[#allocation44_spill] sm:$0xff] %v6021_v16  ;;  %1704 = vmatpush.msrb.mxu3 %v6036_v26 }
 0x48f   :  { %8978 = vst [vmem:[#allocation76_spill] sm:$0xff] %v6024_v40  ;;  %v8983_v40 = vld [vmem:[#allocation104_spill] sm:$0xff] }
 0x490   :  { %8979 = vst [vmem:[#allocation45_spill] sm:$0xff] %v6027_v3  ;;  %v407_v36 = vadd.f32 %v8983_v40, %v8833_v1  ;;  %v8986_v1 = vld [vmem:[#allocation110_spill] sm:$0xff] }
 0x491   :  { %8980 = vst [vmem:[#allocation32_spill] sm:$0xff] %v6030_v43  ;;  %v8984_v43 = vld [vmem:[#allocation113_spill] sm:$0xff]  ;;  %v489_v49 = vadd.f32 %v8986_v1, %v4702_v9 }
 0x492   :  { %8981 = vst [vmem:[#allocation48_spill] sm:$0xff] %v6033_v50  ;;  %v366_v45 = vadd.f32 %v8984_v43, %v8835_v34 }
 0x493   :  { %8982 = vst [vmem:[#allocation79_spill] sm:$0xff] %v6036_v26  ;;  %v8985_v26 = vld [vmem:[#allocation111_spill] sm:$0xff] }
 0x494   :  { %v448_v48 = vadd.f32 %v8985_v26, %v4688_v2 }
 0x4c6   :  { %v6039_v16 = vpop.f32.mrf.mxu0  ;;  %v6041_v61 = vpop.f32.mrf.mxu1 }
 0x4cd   :  { %v6045_v3 = vpop.f32.mrf.mxu2  ;;  %v6047_v37 = vpop.f32.mrf.mxu3 }
 0x4ce   :  { %v1452_v10 = vpop.f32.mrf.mxu0  ;;  %v1472_v50 = vpop.f32.mrf.mxu1 }
 0x4cf   :  { %v1473_v63 = vadd.f32 %v1472_v50, %v407_v36  ;;  %v1453_v55 = vadd.f32 %v1452_v10, %v366_v45 }
 0x4d1   :  { %2967 = vtanh.f32 %v1473_v63 }
 0x4d2   :  { %2969 = vtanh.f32 %v1453_v55 }
 0x4d5   :  { %v1492_v8 = vpop.f32.mrf.mxu2  ;;  %v1512_v40 = vpop.f32.mrf.mxu3 }
 0x4d6   :  { %v1493_v7 = vadd.f32 %v1492_v8, %v448_v48  ;;  %v1513_v34 = vadd.f32 %v1512_v40, %v489_v49  ;;  %v6079_v40 = vld [vmem:[#allocation2 + $0x1f0] sm:$0xff] }
 0x4d7   :  { %v2968_v54 = vpop.eup %2967 }
 0x4d8   :  { %2971 = vtanh.f32 %v1493_v7  ;;  %v2970_v13 = vpop.eup %2969  ;;  %v1520_v43 = vmul.f32 %v2968_v54, %v4711_v14 }
 0x4d9   :  { %v1519_v36 = vmul.f32 %v2970_v13, %v4719_v17  ;;  %2973 = vtanh.f32 %v1513_v34  ;;  %v6073_v34 = vld [vmem:[#allocation2 + $0x1e0] sm:$0xff] }
 0x4da   :  { %v1524_v63 = vadd.f32 %v1520_v43, %v4728_v24  ;;  %v6082_v43 = vld [vmem:[#allocation2 + $0x1f8] sm:$0xff] }
 0x4db   :  { %v1523_v8 = vadd.f32 %v1519_v36, %v4737_v22  ;;  %v6085_v36 = vld [vmem:[#allocation2 + $0x1c0] sm:$0xff] }
 0x4dc   :  { %v1527_v48 = vmul.f32 %v1524_v63, %v5684_v62  ;;  %v6076_v62 = vld [vmem:[#allocation2 + $0x1e8] sm:$0xff]  ;;  %v6091_v63 = vld [vmem:[#allocation2 + $0x1d0] sm:$0xff] }
 0x4dd   :  { %8988 = vst [vmem:[#allocation34_spill] sm:$0xff] %v6091_v63 }
 0x4de   :  { %v2972_v10 = vpop.eup %2971 }
 0x4df   :  { %v1521_v45 = vmul.f32 %v2972_v10, %v4731_v32  ;;  %v2974_v1 = vpop.eup %2973  ;;  %v6088_v10 = vld [vmem:[#allocation2 + $0x1c8] sm:$0xff] }
 0x4e0   :  { %v1522_v13 = vmul.f32 %v2974_v1, %v4760_v39  ;;  %8987 = vst [vmem:[#allocation49_spill] sm:$0xff] %v6088_v10  ;;  %v6109_v1 = vld [vmem:[#allocation2 + $0x180] sm:$0xff] }
 0x4e1   :  { %v1525_v7 = vadd.f32 %v1521_v45, %v4740_v30  ;;  %v6094_v45 = vld [vmem:[#allocation2 + $0x1d8] sm:$0xff]  ;;  %8994 = vst [vmem:[#allocation82_spill] sm:$0xff] %v6109_v1 }
 0x4e2   :  { %v1526_v49 = vadd.f32 %v1522_v13, %v4773_v38  ;;  %8989 = vst [vmem:[#allocation101_spill] sm:$0xff] %v6094_v45  ;;  %v6112_v13 = vld [vmem:[#allocation2 + $0x188] sm:$0xff] }
 0x4e3   :  { %v1528_v55 = vmul.f32 %v1525_v7, %v1523_v8  ;;  %v6097_v8 = vld [vmem:[#allocation2 + $0x1a0] sm:$0xff]  ;;  %v6100_v7 = vld [vmem:[#allocation2 + $0x1a8] sm:$0xff]  ;;  %8995 = vst [vmem:[#allocation53_spill] sm:$0xff] %v6112_v13 }
 0x4e4   :  { %8990 = vst [vmem:[#allocation109_spill] sm:$0xff] %v6097_v8 }
 0x4e5   :  { %v6062_v50 = vadd.f32 %v1528_v55, %v1527_v48  ;;  %8991 = vst [vmem:[#allocation107_spill] sm:$0xff] %v6100_v7  ;;  %v6103_v48 = vld [vmem:[#allocation2 + $0x1b0] sm:$0xff]  ;;  %v6106_v55 = vld [vmem:[#allocation2 + $0x1b8] sm:$0xff] }
 0x4e6   :  { %8992 = vst [vmem:[#allocation106_spill] sm:$0xff] %v6103_v48 }
 0x4e7   :  { %2975 = vtanh.f32 %v6062_v50  ;;  %8993 = vst [vmem:[#allocation52_spill] sm:$0xff] %v6106_v55 }
 0x4ed   :  { %v2976_v54 = vpop.eup %2975 }
 0x4ee   :  { %v6067_v26 = vmul.f32 %v2976_v54, %v1526_v49  ;;  %v6115_v49 = vld [vmem:[#allocation2 + $0x190] sm:$0xff]  ;;  %v6118_v54 = vld [vmem:[#allocation2 + $0x198] sm:$0xff] }
 0x4ef   :  { %8996 = vst [vmem:[#allocation37_spill] sm:$0xff] %v6115_v49 }
 0x4f0   :  { %1548 = vmatmul.f32.vlgmr.msra.gmra.mxu0 %v6067_v26  ;;  %1568 = vmatmul.f32.vlgmr.msra.gmra.mxu1 %v6067_v26  ;;  %8997 = vst [vmem:[#allocation56_spill] sm:$0xff] %v6118_v54 }
 0x4f1   :  { %1588 = vmatmul.f32.vlgmr.msrb.gmra.mxu2 %v6067_v26  ;;  %1608 = vmatmul.f32.vlgmr.msra.gmra.mxu3 %v6067_v26 }
 0x4f2   :  { %1709 = vmatpush.msra.mxu0 %v6073_v34  ;;  %1729 = vmatpush.msra.mxu1 %v6076_v62 }
 0x4f3   :  { %1749 = vmatpush.msrb.mxu2 %v6079_v40  ;;  %1769 = vmatpush.msra.mxu3 %v6082_v43 }
 0x4f4   :  { %1710 = vmatpush.msra.mxu0 %v6085_v36  ;;  %1730 = vmatpush.msra.mxu1 %v6088_v10 }
 0x4f5   :  { %1750 = vmatpush.msrb.mxu2 %v6091_v63  ;;  %1770 = vmatpush.msra.mxu3 %v6094_v45 }
 0x4f6   :  { %1711 = vmatpush.msra.mxu0 %v6097_v8  ;;  %1731 = vmatpush.msra.mxu1 %v6100_v7 }
 0x4f7   :  { %1751 = vmatpush.msrb.mxu2 %v6103_v48  ;;  %1771 = vmatpush.msra.mxu3 %v6106_v55  ;;  %v6121_v48 = vld [vmem:[#allocation2 + $0x160] sm:$0xff]  ;;  %v6124_v55 = vld [vmem:[#allocation2 + $0x168] sm:$0xff] }
 0x4f8   :  { %1712 = vmatpush.msra.mxu0 %v6109_v1  ;;  %1732 = vmatpush.msra.mxu1 %v6112_v13  ;;  %8998 = vst [vmem:[#allocation85_spill] sm:$0xff] %v6121_v48  ;;  %v6127_v1 = vld [vmem:[#allocation2 + $0x170] sm:$0xff]  ;;  %v6130_v13 = vld [vmem:[#allocation2 + $0x178] sm:$0xff] }
 0x4f9   :  { %1752 = vmatpush.msrb.mxu2 %v6115_v49  ;;  %1772 = vmatpush.msra.mxu3 %v6118_v54  ;;  %8999 = vst [vmem:[#allocation57_spill] sm:$0xff] %v6124_v55  ;;  %v6133_v49 = vld [vmem:[#allocation2 + $0x140] sm:$0xff]  ;;  %v6136_v54 = vld [vmem:[#allocation2 + $0x148] sm:$0xff] }
 0x4fa   :  { %1713 = vmatpush.msra.mxu0 %v6121_v48  ;;  %1733 = vmatpush.msra.mxu1 %v6124_v55  ;;  %9000 = vst [vmem:[#allocation40_spill] sm:$0xff] %v6127_v1  ;;  %v6139_v48 = vld [vmem:[#allocation2 + $0x150] sm:$0xff]  ;;  %v6142_v55 = vld [vmem:[#allocation2 + $0x158] sm:$0xff] }
 0x4fb   :  { %1753 = vmatpush.msrb.mxu2 %v6127_v1  ;;  %9001 = vst [vmem:[#allocation60_spill] sm:$0xff] %v6130_v13  ;;  %1773 = vmatpush.msra.mxu3 %v6130_v13  ;;  %v6145_v1 = vld [vmem:[#allocation2 + $0x120] sm:$0xff]  ;;  %v6148_v13 = vld [vmem:[#allocation2 + $0x128] sm:$0xff] }
 0x4fc   :  { %9002 = vst [vmem:[#allocation88_spill] sm:$0xff] %v6133_v49  ;;  %1714 = vmatpush.msra.mxu0 %v6133_v49  ;;  %1734 = vmatpush.msra.mxu1 %v6136_v54  ;;  %v6151_v49 = vld [vmem:[#allocation2 + $0x130] sm:$0xff] }
 0x4fd   :  { %9003 = vst [vmem:[#allocation61_spill] sm:$0xff] %v6136_v54  ;;  %1754 = vmatpush.msrb.mxu2 %v6139_v48  ;;  %1774 = vmatpush.msra.mxu3 %v6142_v55  ;;  %v6154_v54 = vld [vmem:[#allocation2 + $0x138] sm:$0xff] }
 0x4fe   :  { %9004 = vst [vmem:[#allocation43_spill] sm:$0xff] %v6139_v48  ;;  %1715 = vmatpush.msra.mxu0 %v6145_v1  ;;  %1735 = vmatpush.msra.mxu1 %v6148_v13  ;;  %v6157_v48 = vld [vmem:[#allocation2 + $0x100] sm:$0xff] }
 0x4ff   :  { %9005 = vst [vmem:[#allocation64_spill] sm:$0xff] %v6142_v55  ;;  %1755 = vmatpush.msrb.mxu2 %v6151_v49  ;;  %1775 = vmatpush.msra.mxu3 %v6154_v54  ;;  %v6160_v55 = vld [vmem:[#allocation2 + $0x108] sm:$0xff] }
 0x500   :  { %9006 = vst [vmem:[#allocation90_spill] sm:$0xff] %v6145_v1  ;;  %1716 = vmatpush.msra.mxu0 %v6157_v48  ;;  %1736 = vmatpush.msra.mxu1 %v6160_v55  ;;  %v6163_v1 = vld [vmem:[#allocation2 + $0x110] sm:$0xff] }
 0x501   :  { %9007 = vst [vmem:[#allocation66_spill] sm:$0xff] %v6148_v13  ;;  %1756 = vmatpush.msrb.mxu2 %v6163_v1  ;;  %v6166_v13 = vld [vmem:[#allocation2 + $0x118] sm:$0xff] }
 0x502   :  { %9008 = vst [vmem:[#allocation47_spill] sm:$0xff] %v6151_v49  ;;  %1776 = vmatpush.msra.mxu3 %v6166_v13  ;;  %v6169_v49 = vld [vmem:[#allocation2 + $0xe0] sm:$0xff] }
 0x503   :  { %9009 = vst [vmem:[#allocation68_spill] sm:$0xff] %v6154_v54  ;;  %1717 = vmatpush.msra.mxu0 %v6169_v49  ;;  %v6172_v54 = vld [vmem:[#allocation2 + $0xe8] sm:$0xff] }
 0x504   :  { %9010 = vst [vmem:[#allocation91_spill] sm:$0xff] %v6157_v48  ;;  %1737 = vmatpush.msra.mxu1 %v6172_v54  ;;  %v6175_v48 = vld [vmem:[#allocation2 + $0xf0] sm:$0xff] }
 0x505   :  { %9011 = vst [vmem:[#allocation70_spill] sm:$0xff] %v6160_v55  ;;  %1757 = vmatpush.msrb.mxu2 %v6175_v48  ;;  %v6178_v55 = vld [vmem:[#allocation2 + $0xf8] sm:$0xff] }
 0x506   :  { %9012 = vst [vmem:[#allocation51_spill] sm:$0xff] %v6163_v1  ;;  %1777 = vmatpush.msra.mxu3 %v6178_v55  ;;  %v6181_v1 = vld [vmem:[#allocation2 + $0xc0] sm:$0xff] }
 0x507   :  { %9013 = vst [vmem:[#allocation72_spill] sm:$0xff] %v6166_v13  ;;  %1718 = vmatpush.msra.mxu0 %v6181_v1  ;;  %v6184_v13 = vld [vmem:[#allocation2 + $0xc8] sm:$0xff] }
 0x508   :  { %9014 = vst [vmem:[#allocation92_spill] sm:$0xff] %v6169_v49  ;;  %1738 = vmatpush.msra.mxu1 %v6184_v13  ;;  %v6187_v49 = vld [vmem:[#allocation2 + $0xd0] sm:$0xff] }
 0x509   :  { %9015 = vst [vmem:[#allocation74_spill] sm:$0xff] %v6172_v54  ;;  %1758 = vmatpush.msrb.mxu2 %v6187_v49  ;;  %v6190_v54 = vld [vmem:[#allocation2 + $0xd8] sm:$0xff] }
 0x50a   :  { %9016 = vst [vmem:[#allocation55_spill] sm:$0xff] %v6175_v48  ;;  %1778 = vmatpush.msra.mxu3 %v6190_v54  ;;  %v6193_v48 = vld [vmem:[#allocation2 + $0xa0] sm:$0xff] }
 0x50b   :  { %9017 = vst [vmem:[#allocation75_spill] sm:$0xff] %v6178_v55  ;;  %1719 = vmatpush.msra.mxu0 %v6193_v48  ;;  %v6196_v55 = vld [vmem:[#allocation2 + $0xa8] sm:$0xff] }
 0x50c   :  { %9018 = vst [vmem:[#allocation93_spill] sm:$0xff] %v6181_v1  ;;  %1739 = vmatpush.msra.mxu1 %v6196_v55  ;;  %v6199_v1 = vld [vmem:[#allocation2 + $0xb0] sm:$0xff] }
 0x50d   :  { %9019 = vst [vmem:[#allocation77_spill] sm:$0xff] %v6184_v13  ;;  %1759 = vmatpush.msrb.mxu2 %v6199_v1  ;;  %v6202_v13 = vld [vmem:[#allocation2 + $0xb8] sm:$0xff] }
 0x50e   :  { %9020 = vst [vmem:[#allocation59_spill] sm:$0xff] %v6187_v49  ;;  %1779 = vmatpush.msra.mxu3 %v6202_v13  ;;  %v6205_v49 = vld [vmem:[#allocation2 + $0x80] sm:$0xff] }
 0x50f   :  { %9021 = vst [vmem:[#allocation78_spill] sm:$0xff] %v6190_v54  ;;  %1720 = vmatpush.msra.mxu0 %v6205_v49  ;;  %v6208_v54 = vld [vmem:[#allocation2 + $0x88] sm:$0xff] }
 0x510   :  { %9022 = vst [vmem:[#allocation94_spill] sm:$0xff] %v6193_v48  ;;  %1740 = vmatpush.msra.mxu1 %v6208_v54  ;;  %v6211_v48 = vld [vmem:[#allocation2 + $0x90] sm:$0xff] }
 0x511   :  { %9023 = vst [vmem:[#allocation80_spill] sm:$0xff] %v6196_v55  ;;  %1760 = vmatpush.msrb.mxu2 %v6211_v48  ;;  %v6214_v55 = vld [vmem:[#allocation2 + $0x98] sm:$0xff] }
 0x512   :  { %9024 = vst [vmem:[#allocation63_spill] sm:$0xff] %v6199_v1  ;;  %1780 = vmatpush.msra.mxu3 %v6214_v55  ;;  %v6217_v1 = vld [vmem:[#allocation2 + $0x60] sm:$0xff] }
 0x513   :  { %9025 = vst [vmem:[#allocation81_spill] sm:$0xff] %v6202_v13  ;;  %1721 = vmatpush.msra.mxu0 %v6217_v1  ;;  %v6220_v13 = vld [vmem:[#allocation2 + $0x68] sm:$0xff] }
 0x514   :  { %9026 = vst [vmem:[#allocation95_spill] sm:$0xff] %v6205_v49  ;;  %1741 = vmatpush.msra.mxu1 %v6220_v13  ;;  %v6223_v49 = vld [vmem:[#allocation2 + $0x70] sm:$0xff] }
 0x515   :  { %9027 = vst [vmem:[#allocation83_spill] sm:$0xff] %v6208_v54  ;;  %1761 = vmatpush.msrb.mxu2 %v6223_v49  ;;  %v6226_v54 = vld [vmem:[#allocation2 + $0x78] sm:$0xff] }
 0x516   :  { %9028 = vst [vmem:[#allocation67_spill] sm:$0xff] %v6211_v48  ;;  %1781 = vmatpush.msra.mxu3 %v6226_v54  ;;  %v6229_v48 = vld [vmem:[#allocation2 + $0x40] sm:$0xff] }
 0x517   :  { %9029 = vst [vmem:[#allocation84_spill] sm:$0xff] %v6214_v55  ;;  %1722 = vmatpush.msra.mxu0 %v6229_v48  ;;  %v6232_v55 = vld [vmem:[#allocation2 + $0x48] sm:$0xff] }
 0x518   :  { %9030 = vst [vmem:[#allocation96_spill] sm:$0xff] %v6217_v1  ;;  %1742 = vmatpush.msra.mxu1 %v6232_v55  ;;  %v6235_v1 = vld [vmem:[#allocation2 + $0x50] sm:$0xff] }
 0x519   :  { %9031 = vst [vmem:[#allocation86_spill] sm:$0xff] %v6220_v13  ;;  %1762 = vmatpush.msrb.mxu2 %v6235_v1  ;;  %v6238_v13 = vld [vmem:[#allocation2 + $0x58] sm:$0xff] }
 0x51a   :  { %9032 = vst [vmem:[#allocation71_spill] sm:$0xff] %v6223_v49  ;;  %1782 = vmatpush.msra.mxu3 %v6238_v13  ;;  %v6241_v49 = vld [vmem:[#allocation2 + $0x20] sm:$0xff] }
 0x51b   :  { %9033 = vst [vmem:[#allocation87_spill] sm:$0xff] %v6226_v54  ;;  %1723 = vmatpush.msra.mxu0 %v6241_v49  ;;  %v6244_v54 = vld [vmem:[#allocation2 + $0x28] sm:$0xff] }
 0x51c   :  { %9034 = vst [vmem:[#allocation97_spill] sm:$0xff] %v6229_v48  ;;  %1743 = vmatpush.msra.mxu1 %v6244_v54  ;;  %v6247_v48 = vld [vmem:[#allocation2 + $0x30] sm:$0xff] }
 0x51d   :  { %9035 = vst [vmem:[#allocation89_spill] sm:$0xff] %v6232_v55  ;;  %1763 = vmatpush.msrb.mxu2 %v6247_v48  ;;  %v6250_v55 = vld [vmem:[#allocation2 + $0x38] sm:$0xff] }
 0x51e   :  { %9036 = vst [vmem:[#allocation159_spill] sm:$0xff] %v6235_v1  ;;  %1783 = vmatpush.msra.mxu3 %v6250_v55  ;;  %v6253_v1 = vld [vmem:[#allocation2] sm:$0xff] }
 0x51f   :  { %9037 = vst [vmem:[#allocation164_spill] sm:$0xff] %v6238_v13  ;;  %1724 = vmatpush.msra.mxu0 %v6253_v1  ;;  %v6256_v13 = vld [vmem:[#allocation2 + $0x8] sm:$0xff] }
 0x520   :  { %9038 = vst [vmem:[#allocation187_spill] sm:$0xff] %v6241_v49  ;;  %1744 = vmatpush.msra.mxu1 %v6256_v13  ;;  %v6259_v49 = vld [vmem:[#allocation2 + $0x10] sm:$0xff] }
 0x521   :  { %9039 = vst [vmem:[#allocation119_spill] sm:$0xff] %v6244_v54  ;;  %1764 = vmatpush.msrb.mxu2 %v6259_v49  ;;  %v6262_v54 = vld [vmem:[#allocation2 + $0x18] sm:$0xff] }
 0x522   :  { %9040 = vst [vmem:[#allocation120_spill] sm:$0xff] %v6247_v48  ;;  %1784 = vmatpush.msra.mxu3 %v6262_v54  ;;  %v1393_v48 = vadd.f32 %v6041_v61, %v8898_v31  ;;  %v1433_v61 = vadd.f32 %v6047_v37, %v4880_v57 }
 0x523   :  { %9041 = vst [vmem:[#allocation121_spill] sm:$0xff] %v6250_v55  ;;  %v1373_v55 = vadd.f32 %v6039_v16, %v8899_v21 }
 0x524   :  { %9042 = vst [vmem:[#allocation122_spill] sm:$0xff] %v6253_v1 }
 0x525   :  { %9043 = vst [vmem:[#allocation123_spill] sm:$0xff] %v6256_v13  ;;  %v1413_v13 = vadd.f32 %v6045_v3, %v4876_v53 }
 0x526   :  { %9044 = vst [vmem:[#allocation124_spill] sm:$0xff] %v6259_v49 }
 0x527   :  { %9045 = vst [vmem:[#allocation126_spill] sm:$0xff] %v6262_v54 }
 0x56d   :  { %v1549_v7 = vpop.f32.mrf.mxu0  ;;  %v1569_v1 = vpop.f32.mrf.mxu1 }
 0x56e   :  { %v1570_v8 = vadd.f32 %v1569_v1, %v1393_v48  ;;  %v1550_v45 = vadd.f32 %v1549_v7, %v1373_v55 }
 0x570   :  { %2977 = vtanh.f32 %v1570_v8 }
 0x571   :  { %2979 = vtanh.f32 %v1550_v45 }
 0x574   :  { %v1589_v49 = vpop.f32.mrf.mxu2  ;;  %v1609_v54 = vpop.f32.mrf.mxu3 }
 0x575   :  { %v1590_v63 = vadd.f32 %v1589_v49, %v1413_v13  ;;  %v1610_v21 = vadd.f32 %v1609_v54, %v1433_v61  ;;  %v6291_v61 = vld [vmem:[#allocation5 + $0x1f0] sm:$0xff] }
 0x576   :  { %v2978_v10 = vpop.eup %2977 }
 0x577   :  { %2981 = vtanh.f32 %v1590_v63  ;;  %v2980_v31 = vpop.eup %2979  ;;  %v1617_v16 = vmul.f32 %v2978_v10, %v4711_v14 }
 0x578   :  { %v1616_v48 = vmul.f32 %v2980_v31, %v4719_v17  ;;  %2983 = vtanh.f32 %v1610_v21  ;;  %v6285_v21 = vld [vmem:[#allocation5 + $0x1e0] sm:$0xff] }
 0x579   :  { %v1621_v8 = vadd.f32 %v1617_v16, %v4728_v24  ;;  %v6294_v16 = vld [vmem:[#allocation5 + $0x1f8] sm:$0xff] }
 0x57a   :  { %v1620_v45 = vadd.f32 %v1616_v48, %v4737_v22  ;;  %v6297_v48 = vld [vmem:[#allocation5 + $0x1c0] sm:$0xff] }
 0x57b   :  { %v1624_v55 = vmul.f32 %v1621_v8, %v5774_v35  ;;  %v6288_v35 = vld [vmem:[#allocation5 + $0x1e8] sm:$0xff]  ;;  %v6303_v8 = vld [vmem:[#allocation5 + $0x1d0] sm:$0xff] }
 0x57d   :  { %v2982_v7 = vpop.eup %2981 }
 0x57e   :  { %v1618_v3 = vmul.f32 %v2982_v7, %v4731_v32  ;;  %v2984_v37 = vpop.eup %2983  ;;  %v6300_v7 = vld [vmem:[#allocation5 + $0x1c8] sm:$0xff] }
 0x57f   :  { %v1619_v31 = vmul.f32 %v2984_v37, %v4760_v39  ;;  %v6325_v37 = vld [vmem:[#allocation5 + $0x180] sm:$0xff] }
 0x580   :  { %v1622_v63 = vadd.f32 %v1618_v3, %v4740_v30  ;;  %v6306_v3 = vld [vmem:[#allocation5 + $0x1d8] sm:$0xff]  ;;  %9046 = vst [vmem:[#allocation127_spill] sm:$0xff] %v6325_v37 }
 0x581   :  { %v1623_v10 = vadd.f32 %v1619_v31, %v4773_v38  ;;  %v6328_v31 = vld [vmem:[#allocation5 + $0x188] sm:$0xff] }
 0x582   :  { %v1625_v1 = vmul.f32 %v1622_v63, %v1620_v45  ;;  %v6309_v45 = vld [vmem:[#allocation5 + $0x1a0] sm:$0xff]  ;;  %v6312_v63 = vld [vmem:[#allocation5 + $0x1a8] sm:$0xff]  ;;  %9047 = vst [vmem:[#allocation128_spill] sm:$0xff] %v6328_v31 }
 0x584   :  { %v6280_v13 = vadd.f32 %v1625_v1, %v1624_v55  ;;  %v6315_v55 = vld [vmem:[#allocation5 + $0x1b0] sm:$0xff]  ;;  %v6318_v1 = vld [vmem:[#allocation5 + $0x1b8] sm:$0xff] }
 0x586   :  { %2985 = vtanh.f32 %v6280_v13 }
 0x58c   :  { %v2986_v49 = vpop.eup %2985 }
 0x58d   :  { %v1628_v54 = vmul.f32 %v2986_v49, %v1623_v10  ;;  %v6331_v10 = vld [vmem:[#allocation5 + $0x190] sm:$0xff]  ;;  %v6334_v49 = vld [vmem:[#allocation5 + $0x198] sm:$0xff] }
 0x58e   :  { %9048 = vst [vmem:[#allocation129_spill] sm:$0xff] %v6331_v10 }
 0x58f   :  { %1645 = vmatmul.f32.vlgmr.msrb.gmra.mxu0 %v1628_v54  ;;  %1665 = vmatmul.f32.vlgmr.msrb.gmra.mxu1 %v1628_v54  ;;  %9049 = vst [vmem:[#allocation130_spill] sm:$0xff] %v6334_v49 }
 0x590   :  { %1685 = vmatmul.f32.vlgmr.msra.gmra.mxu2 %v1628_v54  ;;  %1705 = vmatmul.f32.vlgmr.msrb.gmra.mxu3 %v1628_v54  ;;  %v6337_v54 = vld [vmem:[#allocation5 + $0x160] sm:$0xff] }
 0x591   :  { %1806 = vmatpush.msrb.mxu0 %v6285_v21  ;;  %1826 = vmatpush.msrb.mxu1 %v6288_v35  ;;  %9050 = vst [vmem:[#allocation131_spill] sm:$0xff] %v6337_v54 }
 0x592   :  { %1846 = vmatpush.msra.mxu2 %v6291_v61  ;;  %1866 = vmatpush.msrb.mxu3 %v6294_v16 }
 0x593   :  { %1807 = vmatpush.msrb.mxu0 %v6297_v48  ;;  %1827 = vmatpush.msrb.mxu1 %v6300_v7 }
 0x594   :  { %1847 = vmatpush.msra.mxu2 %v6303_v8  ;;  %1867 = vmatpush.msrb.mxu3 %v6306_v3 }
 0x595   :  { %1808 = vmatpush.msrb.mxu0 %v6309_v45  ;;  %1828 = vmatpush.msrb.mxu1 %v6312_v63 }
 0x596   :  { %1848 = vmatpush.msra.mxu2 %v6315_v55  ;;  %1868 = vmatpush.msrb.mxu3 %v6318_v1 }
 0x597   :  { %1725 = vmatmul.f32.vlgmr.msra.gmra.mxu0 %v6067_v26  ;;  %1745 = vmatmul.f32.vlgmr.msra.gmra.mxu1 %v6067_v26 }
 0x598   :  { %1765 = vmatmul.f32.vlgmr.msrb.gmra.mxu2 %v6067_v26  ;;  %1785 = vmatmul.f32.vlgmr.msra.gmra.mxu3 %v6067_v26  ;;  %v6340_v26 = vld [vmem:[#allocation5 + $0x168] sm:$0xff] }
 0x599   :  { %1809 = vmatpush.msrb.mxu0 %v6325_v37  ;;  %1829 = vmatpush.msrb.mxu1 %v6328_v31  ;;  %9051 = vst [vmem:[#allocation132_spill] sm:$0xff] %v6340_v26  ;;  %v6343_v37 = vld [vmem:[#allocation5 + $0x170] sm:$0xff]  ;;  %v6346_v31 = vld [vmem:[#allocation5 + $0x178] sm:$0xff] }
 0x59a   :  { %1849 = vmatpush.msra.mxu2 %v6331_v10  ;;  %1869 = vmatpush.msrb.mxu3 %v6334_v49  ;;  %9052 = vst [vmem:[#allocation133_spill] sm:$0xff] %v6343_v37  ;;  %v6349_v10 = vld [vmem:[#allocation5 + $0x140] sm:$0xff]  ;;  %v6352_v49 = vld [vmem:[#allocation5 + $0x148] sm:$0xff] }
 0x59b   :  { %1810 = vmatpush.msrb.mxu0 %v6337_v54  ;;  %1830 = vmatpush.msrb.mxu1 %v6340_v26  ;;  %9053 = vst [vmem:[#allocation134_spill] sm:$0xff] %v6346_v31  ;;  %v6355_v54 = vld [vmem:[#allocation5 + $0x150] sm:$0xff]  ;;  %v6358_v26 = vld [vmem:[#allocation5 + $0x158] sm:$0xff] }
 0x59c   :  { %1850 = vmatpush.msra.mxu2 %v6343_v37  ;;  %1870 = vmatpush.msrb.mxu3 %v6346_v31  ;;  %9054 = vst [vmem:[#allocation136_spill] sm:$0xff] %v6349_v10  ;;  %v6361_v37 = vld [vmem:[#allocation5 + $0x120] sm:$0xff]  ;;  %v6364_v31 = vld [vmem:[#allocation5 + $0x128] sm:$0xff] }
 0x59d   :  { %1811 = vmatpush.msrb.mxu0 %v6349_v10  ;;  %9055 = vst [vmem:[#allocation137_spill] sm:$0xff] %v6352_v49  ;;  %1831 = vmatpush.msrb.mxu1 %v6352_v49  ;;  %v6367_v10 = vld [vmem:[#allocation5 + $0x130] sm:$0xff]  ;;  %v6370_v49 = vld [vmem:[#allocation5 + $0x138] sm:$0xff] }
 0x59e   :  { %9056 = vst [vmem:[#allocation138_spill] sm:$0xff] %v6355_v54  ;;  %1851 = vmatpush.msra.mxu2 %v6355_v54  ;;  %1871 = vmatpush.msrb.mxu3 %v6358_v26  ;;  %v6373_v54 = vld [vmem:[#allocation5 + $0x100] sm:$0xff] }
 0x59f   :  { %9057 = vst [vmem:[#allocation139_spill] sm:$0xff] %v6358_v26  ;;  %1812 = vmatpush.msrb.mxu0 %v6361_v37  ;;  %1832 = vmatpush.msrb.mxu1 %v6364_v31  ;;  %v6376_v26 = vld [vmem:[#allocation5 + $0x108] sm:$0xff] }
 0x5a0   :  { %9058 = vst [vmem:[#allocation141_spill] sm:$0xff] %v6361_v37  ;;  %1852 = vmatpush.msra.mxu2 %v6367_v10  ;;  %1872 = vmatpush.msrb.mxu3 %v6370_v49  ;;  %v6379_v37 = vld [vmem:[#allocation5 + $0x110] sm:$0xff] }
 0x5a1   :  { %9059 = vst [vmem:[#allocation143_spill] sm:$0xff] %v6364_v31  ;;  %1813 = vmatpush.msrb.mxu0 %v6373_v54  ;;  %1833 = vmatpush.msrb.mxu1 %v6376_v26  ;;  %v6382_v31 = vld [vmem:[#allocation5 + $0x118] sm:$0xff] }
 0x5a2   :  { %9060 = vst [vmem:[#allocation144_spill] sm:$0xff] %v6367_v10  ;;  %1853 = vmatpush.msra.mxu2 %v6379_v37  ;;  %1873 = vmatpush.msrb.mxu3 %v6382_v31  ;;  %v6385_v10 = vld [vmem:[#allocation5 + $0xe0] sm:$0xff] }
 0x5a3   :  { %9061 = vst [vmem:[#allocation145_spill] sm:$0xff] %v6370_v49  ;;  %1814 = vmatpush.msrb.mxu0 %v6385_v10  ;;  %v6388_v49 = vld [vmem:[#allocation5 + $0xe8] sm:$0xff] }
 0x5a4   :  { %9062 = vst [vmem:[#allocation147_spill] sm:$0xff] %v6373_v54  ;;  %1834 = vmatpush.msrb.mxu1 %v6388_v49  ;;  %v6391_v54 = vld [vmem:[#allocation5 + $0xf0] sm:$0xff] }
 0x5a5   :  { %9063 = vst [vmem:[#allocation148_spill] sm:$0xff] %v6376_v26  ;;  %1854 = vmatpush.msra.mxu2 %v6391_v54  ;;  %v6394_v26 = vld [vmem:[#allocation5 + $0xf8] sm:$0xff] }
 0x5a6   :  { %9064 = vst [vmem:[#allocation149_spill] sm:$0xff] %v6379_v37  ;;  %1874 = vmatpush.msrb.mxu3 %v6394_v26  ;;  %v6397_v37 = vld [vmem:[#allocation5 + $0xc0] sm:$0xff] }
 0x5a7   :  { %9065 = vst [vmem:[#allocation150_spill] sm:$0xff] %v6382_v31  ;;  %1815 = vmatpush.msrb.mxu0 %v6397_v37  ;;  %v6400_v31 = vld [vmem:[#allocation5 + $0xc8] sm:$0xff] }
 0x5a8   :  { %9066 = vst [vmem:[#allocation151_spill] sm:$0xff] %v6385_v10  ;;  %1835 = vmatpush.msrb.mxu1 %v6400_v31  ;;  %v6403_v10 = vld [vmem:[#allocation5 + $0xd0] sm:$0xff] }
 0x5a9   :  { %9067 = vst [vmem:[#allocation152_spill] sm:$0xff] %v6388_v49  ;;  %1855 = vmatpush.msra.mxu2 %v6403_v10  ;;  %v6406_v49 = vld [vmem:[#allocation5 + $0xd8] sm:$0xff] }
 0x5aa   :  { %9068 = vst [vmem:[#allocation153_spill] sm:$0xff] %v6391_v54  ;;  %1875 = vmatpush.msrb.mxu3 %v6406_v49  ;;  %v6409_v54 = vld [vmem:[#allocation5 + $0xa0] sm:$0xff] }
 0x5ab   :  { %9069 = vst [vmem:[#allocation154_spill] sm:$0xff] %v6394_v26  ;;  %1816 = vmatpush.msrb.mxu0 %v6409_v54  ;;  %v6412_v26 = vld [vmem:[#allocation5 + $0xa8] sm:$0xff] }
 0x5ac   :  { %9070 = vst [vmem:[#allocation155_spill] sm:$0xff] %v6397_v37  ;;  %1836 = vmatpush.msrb.mxu1 %v6412_v26  ;;  %v6415_v37 = vld [vmem:[#allocation5 + $0xb0] sm:$0xff] }
 0x5ad   :  { %9071 = vst [vmem:[#allocation156_spill] sm:$0xff] %v6400_v31  ;;  %1856 = vmatpush.msra.mxu2 %v6415_v37  ;;  %v6418_v31 = vld [vmem:[#allocation5 + $0xb8] sm:$0xff] }
 0x5ae   :  { %9072 = vst [vmem:[#allocation157_spill] sm:$0xff] %v6403_v10  ;;  %1876 = vmatpush.msrb.mxu3 %v6418_v31  ;;  %v6421_v10 = vld [vmem:[#allocation5 + $0x80] sm:$0xff] }
 0x5af   :  { %9073 = vst [vmem:[#allocation158_spill] sm:$0xff] %v6406_v49  ;;  %1817 = vmatpush.msrb.mxu0 %v6421_v10  ;;  %v6424_v49 = vld [vmem:[#allocation5 + $0x88] sm:$0xff] }
 0x5b0   :  { %9074 = vst [vmem:[#allocation160_spill] sm:$0xff] %v6409_v54  ;;  %1837 = vmatpush.msrb.mxu1 %v6424_v49  ;;  %v6427_v54 = vld [vmem:[#allocation5 + $0x90] sm:$0xff] }
 0x5b1   :  { %9075 = vst [vmem:[#allocation161_spill] sm:$0xff] %v6412_v26  ;;  %1857 = vmatpush.msra.mxu2 %v6427_v54  ;;  %v6430_v26 = vld [vmem:[#allocation5 + $0x98] sm:$0xff] }
 0x5b2   :  { %9076 = vst [vmem:[#allocation162_spill] sm:$0xff] %v6415_v37  ;;  %1877 = vmatpush.msrb.mxu3 %v6430_v26  ;;  %v6433_v37 = vld [vmem:[#allocation5 + $0x60] sm:$0xff] }
 0x5b3   :  { %9077 = vst [vmem:[#allocation163_spill] sm:$0xff] %v6418_v31  ;;  %1818 = vmatpush.msrb.mxu0 %v6433_v37  ;;  %v6436_v31 = vld [vmem:[#allocation5 + $0x68] sm:$0xff] }
 0x5b4   :  { %9078 = vst [vmem:[#allocation165_spill] sm:$0xff] %v6421_v10  ;;  %1838 = vmatpush.msrb.mxu1 %v6436_v31  ;;  %v6439_v10 = vld [vmem:[#allocation5 + $0x70] sm:$0xff] }
 0x5b5   :  { %9079 = vst [vmem:[#allocation168_spill] sm:$0xff] %v6424_v49  ;;  %1858 = vmatpush.msra.mxu2 %v6439_v10  ;;  %v6442_v49 = vld [vmem:[#allocation5 + $0x78] sm:$0xff] }
 0x5b6   :  { %9080 = vst [vmem:[#allocation169_spill] sm:$0xff] %v6427_v54  ;;  %1878 = vmatpush.msrb.mxu3 %v6442_v49  ;;  %v6445_v54 = vld [vmem:[#allocation5 + $0x40] sm:$0xff] }
 0x5b7   :  { %9081 = vst [vmem:[#allocation170_spill] sm:$0xff] %v6430_v26  ;;  %1819 = vmatpush.msrb.mxu0 %v6445_v54  ;;  %v6448_v26 = vld [vmem:[#allocation5 + $0x48] sm:$0xff] }
 0x5b8   :  { %9082 = vst [vmem:[#allocation171_spill] sm:$0xff] %v6433_v37  ;;  %1839 = vmatpush.msrb.mxu1 %v6448_v26  ;;  %v6451_v37 = vld [vmem:[#allocation5 + $0x50] sm:$0xff] }
 0x5b9   :  { %9083 = vst [vmem:[#allocation172_spill] sm:$0xff] %v6436_v31  ;;  %1859 = vmatpush.msra.mxu2 %v6451_v37  ;;  %v6454_v31 = vld [vmem:[#allocation5 + $0x58] sm:$0xff] }
 0x5ba   :  { %9084 = vst [vmem:[#allocation173_spill] sm:$0xff] %v6439_v10  ;;  %1879 = vmatpush.msrb.mxu3 %v6454_v31  ;;  %v6457_v10 = vld [vmem:[#allocation5 + $0x20] sm:$0xff] }
 0x5bb   :  { %9085 = vst [vmem:[#allocation174_spill] sm:$0xff] %v6442_v49  ;;  %1820 = vmatpush.msrb.mxu0 %v6457_v10  ;;  %v6460_v49 = vld [vmem:[#allocation5 + $0x28] sm:$0xff] }
 0x5bc   :  { %9086 = vst [vmem:[#allocation175_spill] sm:$0xff] %v6445_v54  ;;  %1840 = vmatpush.msrb.mxu1 %v6460_v49  ;;  %v6463_v54 = vld [vmem:[#allocation5 + $0x30] sm:$0xff] }
 0x5bd   :  { %9087 = vst [vmem:[#allocation177_spill] sm:$0xff] %v6448_v26  ;;  %1860 = vmatpush.msra.mxu2 %v6463_v54  ;;  %v6466_v26 = vld [vmem:[#allocation5 + $0x38] sm:$0xff] }
 0x5be   :  { %9088 = vst [vmem:[#allocation178_spill] sm:$0xff] %v6451_v37  ;;  %1880 = vmatpush.msrb.mxu3 %v6466_v26  ;;  %v6469_v37 = vld [vmem:[#allocation5] sm:$0xff] }
 0x5bf   :  { %9089 = vst [vmem:[#allocation179_spill] sm:$0xff] %v6454_v31  ;;  %1821 = vmatpush.msrb.mxu0 %v6469_v37  ;;  %v6472_v31 = vld [vmem:[#allocation5 + $0x8] sm:$0xff] }
 0x5c0   :  { %9090 = vst [vmem:[#allocation180_spill] sm:$0xff] %v6457_v10  ;;  %1841 = vmatpush.msrb.mxu1 %v6472_v31  ;;  %v6475_v10 = vld [vmem:[#allocation5 + $0x10] sm:$0xff] }
 0x5c1   :  { %9091 = vst [vmem:[#allocation181_spill] sm:$0xff] %v6460_v49  ;;  %1861 = vmatpush.msra.mxu2 %v6475_v10  ;;  %v6478_v49 = vld [vmem:[#allocation5 + $0x18] sm:$0xff]  ;;  %1903 = vmatpush.msra.mxu0 %v5847_v23  ;;  %v9092_v23 = vld [vmem:[#allocation103_spill] sm:$0xff] }
 0x5c2   :  { %1881 = vmatpush.msrb.mxu3 %v6478_v49  ;;  %1923 = vmatpush.msra.mxu1 %v5850_v19  ;;  %v9093_v19 = vld [vmem:[#allocation102_spill] sm:$0xff] }
 0x5c3   :  { %1943 = vmatpush.msrb.mxu2 %v5853_v44  ;;  %1904 = vmatpush.msra.mxu0 %v5859_v29  ;;  %v9094_v44 = vld [vmem:[#allocation16_spill] sm:$0xff]  ;;  %v9096_v29 = vld [vmem:[#allocation50_spill] sm:$0xff] }
 0x5c4   :  { %1963 = vmatpush.msra.mxu3 %v5856_v15  ;;  %1924 = vmatpush.msra.mxu1 %v5862_v33  ;;  %v9095_v15 = vld [vmem:[#allocation21_spill] sm:$0xff] }
 0x5c5   :  { %1944 = vmatpush.msrb.mxu2 %v5865_v41  ;;  %1905 = vmatpush.msra.mxu0 %v5871_v52  ;;  %v9097_v33 = vld [vmem:[#allocation25_spill] sm:$0xff]  ;;  %v9100_v52 = vld [vmem:[#allocation54_spill] sm:$0xff] }
 0x5c6   :  { %1964 = vmatpush.msra.mxu3 %v5868_v18  ;;  %1925 = vmatpush.msra.mxu1 %v5874_v25  ;;  %v9098_v41 = vld [vmem:[#allocation17_spill] sm:$0xff]  ;;  %v9099_v18 = vld [vmem:[#allocation24_spill] sm:$0xff] }
 0x5c7   :  { %1945 = vmatpush.msrb.mxu2 %v5877_v27  ;;  %1906 = vmatpush.msra.mxu0 %v5883_v42  ;;  %v9101_v25 = vld [vmem:[#allocation28_spill] sm:$0xff]  ;;  %v9102_v27 = vld [vmem:[#allocation18_spill] sm:$0xff] }
 0x5c8   :  { %1965 = vmatpush.msra.mxu3 %v5880_v28  ;;  %1926 = vmatpush.msra.mxu1 %v5886_v46  ;;  %v9103_v28 = vld [vmem:[#allocation27_spill] sm:$0xff]  ;;  %v9104_v42 = vld [vmem:[#allocation58_spill] sm:$0xff] }
 0x5c9   :  { %1946 = vmatpush.msrb.mxu2 %v5889_v51  ;;  %1907 = vmatpush.msra.mxu0 %v5895_v4  ;;  %v9105_v46 = vld [vmem:[#allocation31_spill] sm:$0xff]  ;;  %v9108_v4 = vld [vmem:[#allocation62_spill] sm:$0xff] }
 0x5ca   :  { %1966 = vmatpush.msra.mxu3 %v5892_v56  ;;  %1927 = vmatpush.msra.mxu1 %v5898_v5  ;;  %v9106_v51 = vld [vmem:[#allocation19_spill] sm:$0xff]  ;;  %v9107_v56 = vld [vmem:[#allocation30_spill] sm:$0xff]  ;;  %v9109_v5 = vld [vmem:[#allocation33_spill] sm:$0xff] }
 0x5cb   :  { %1947 = vmatpush.msrb.mxu2 %v5901_v47  ;;  %1908 = vmatpush.msra.mxu0 %v5907_v6  ;;  %v9110_v47 = vld [vmem:[#allocation20_spill] sm:$0xff]  ;;  %v9112_v6 = vld [vmem:[#allocation65_spill] sm:$0xff] }
 0x5cc   :  { %1967 = vmatpush.msra.mxu3 %v5904_v0  ;;  %1928 = vmatpush.msra.mxu1 %v5910_v20  ;;  %v9111_v0 = vld [vmem:[#allocation35_spill] sm:$0xff]  ;;  %v9113_v20 = vld [vmem:[#allocation36_spill] sm:$0xff] }
 0x5cd   :  { %1948 = vmatpush.msrb.mxu2 %v5913_v59  ;;  %1909 = vmatpush.msra.mxu0 %v5919_v12  ;;  %v9114_v59 = vld [vmem:[#allocation23_spill] sm:$0xff]  ;;  %v9116_v12 = vld [vmem:[#allocation69_spill] sm:$0xff] }
 0x5ce   :  { %1968 = vmatpush.msra.mxu3 %v5916_v60  ;;  %1929 = vmatpush.msra.mxu1 %v5922_v58  ;;  %v9115_v60 = vld [vmem:[#allocation38_spill] sm:$0xff]  ;;  %v9117_v58 = vld [vmem:[#allocation39_spill] sm:$0xff] }
 0x5cf   :  { %1949 = vmatpush.msrb.mxu2 %v5925_v11  ;;  %1910 = vmatpush.msra.mxu0 %v9093_v19  ;;  %v9118_v11 = vld [vmem:[#allocation26_spill] sm:$0xff]  ;;  %v9120_v19 = vld [vmem:[#allocation73_spill] sm:$0xff] }
 0x5d0   :  { %1969 = vmatpush.msra.mxu3 %v9092_v23  ;;  %1930 = vmatpush.msra.mxu1 %v9094_v44  ;;  %v9119_v23 = vld [vmem:[#allocation41_spill] sm:$0xff]  ;;  %v9121_v44 = vld [vmem:[#allocation42_spill] sm:$0xff] }
 0x5d1   :  { %1950 = vmatpush.msrb.mxu2 %v9095_v15  ;;  %1911 = vmatpush.msra.mxu0 %v9097_v33  ;;  %v9122_v15 = vld [vmem:[#allocation29_spill] sm:$0xff]  ;;  %v9124_v33 = vld [vmem:[#allocation76_spill] sm:$0xff] }
 0x5d2   :  { %1970 = vmatpush.msra.mxu3 %v9096_v29  ;;  %1931 = vmatpush.msra.mxu1 %v9098_v41  ;;  %v9123_v29 = vld [vmem:[#allocation44_spill] sm:$0xff]  ;;  %v9125_v41 = vld [vmem:[#allocation45_spill] sm:$0xff] }
 0x5d3   :  { %1951 = vmatpush.msrb.mxu2 %v9099_v18  ;;  %1912 = vmatpush.msra.mxu0 %v9101_v25  ;;  %v9126_v18 = vld [vmem:[#allocation32_spill] sm:$0xff]  ;;  %v9128_v25 = vld [vmem:[#allocation79_spill] sm:$0xff] }
 0x5d4   :  { %1971 = vmatpush.msra.mxu3 %v9100_v52  ;;  %1932 = vmatpush.msra.mxu1 %v9102_v27  ;;  %v9127_v52 = vld [vmem:[#allocation48_spill] sm:$0xff] }
 0x5d5   :  { %1952 = vmatpush.msrb.mxu2 %v9103_v28  ;;  %1913 = vmatpush.msra.mxu0 %v9105_v46  ;;  %v9130_v46 = vld [vmem:[#allocation108_spill] sm:$0xff] }
 0x5d6   :  { %1972 = vmatpush.msra.mxu3 %v9104_v42  ;;  %1933 = vmatpush.msra.mxu1 %v9106_v51  ;;  %v9129_v42 = vld [vmem:[#allocation176_spill] sm:$0xff] }
 0x5d7   :  { %1953 = vmatpush.msrb.mxu2 %v9107_v56  ;;  %1914 = vmatpush.msra.mxu0 %v9109_v5  ;;  %v410_v51 = vadd.f32 %v9130_v46, %v9129_v42  ;;  %v9131_v5 = vld [vmem:[#allocation185_spill] sm:$0xff] }
 0x5d8   :  { %1973 = vmatpush.msra.mxu3 %v9108_v4  ;;  %1934 = vmatpush.msra.mxu1 %v9110_v47  ;;  %v9132_v47 = vld [vmem:[#allocation117_spill] sm:$0xff] }
 0x5d9   :  { %1954 = vmatpush.msrb.mxu2 %v9111_v0  ;;  %1915 = vmatpush.msra.mxu0 %v9113_v20  ;;  %v369_v0 = vadd.f32 %v9132_v47, %v9131_v5 }
 0x5da   :  { %1974 = vmatpush.msra.mxu3 %v9112_v6  ;;  %1935 = vmatpush.msra.mxu1 %v9114_v59 }
 0x5db   :  { %1955 = vmatpush.msrb.mxu2 %v9115_v60  ;;  %1916 = vmatpush.msra.mxu0 %v9117_v58 }
 0x5dc   :  { %1975 = vmatpush.msra.mxu3 %v9116_v12  ;;  %1936 = vmatpush.msra.mxu1 %v9118_v11  ;;  %v9133_v12 = vld [vmem:[#allocation115_spill] sm:$0xff] }
 0x5dd   :  { %1956 = vmatpush.msrb.mxu2 %v9119_v23  ;;  %1917 = vmatpush.msra.mxu0 %v9121_v44  ;;  %v451_v58 = vadd.f32 %v9133_v12, %v4688_v2 }
 0x5de   :  { %1976 = vmatpush.msra.mxu3 %v9120_v19  ;;  %1937 = vmatpush.msra.mxu1 %v9122_v15  ;;  %v9134_v15 = vld [vmem:[#allocation114_spill] sm:$0xff] }
 0x5df   :  { %1957 = vmatpush.msrb.mxu2 %v9123_v29  ;;  %1918 = vmatpush.msra.mxu0 %v9125_v41  ;;  %v492_v29 = vadd.f32 %v9134_v15, %v4702_v9  ;;  %v9138_v15 = vld [vmem:[#allocation109_spill] sm:$0xff] }
 0x5e0   :  { %1977 = vmatpush.msra.mxu3 %v9124_v33  ;;  %1938 = vmatpush.msra.mxu1 %v9126_v18 }
 0x5e1   :  { %1958 = vmatpush.msrb.mxu2 %v9127_v52 }
 0x5e2   :  { %1978 = vmatpush.msra.mxu3 %v9128_v25 }
 0x60c   :  { %v6545_v27 = vpop.f32.mrf.mxu0  ;;  %v6547_v28 = vpop.f32.mrf.mxu1 }
 0x613   :  { %v6551_v56 = vpop.f32.mrf.mxu2  ;;  %v6553_v4 = vpop.f32.mrf.mxu3 }
 0x614   :  { %v1726_v6 = vpop.f32.mrf.mxu0  ;;  %v1746_v20 = vpop.f32.mrf.mxu1 }
 0x615   :  { %v1747_v59 = vadd.f32 %v1746_v20, %v410_v51  ;;  %v1727_v60 = vadd.f32 %v1726_v6, %v369_v0 }
 0x617   :  { %2987 = vtanh.f32 %v1747_v59 }
 0x618   :  { %2989 = vtanh.f32 %v1727_v60 }
 0x61b   :  { %v1766_v11 = vpop.f32.mrf.mxu2  ;;  %v1786_v44 = vpop.f32.mrf.mxu3 }
 0x61c   :  { %v1767_v23 = vadd.f32 %v1766_v11, %v451_v58  ;;  %v1787_v18 = vadd.f32 %v1786_v44, %v492_v29  ;;  %v9137_v44 = vld [vmem:[#allocation101_spill] sm:$0xff]  ;;  %v9139_v29 = vld [vmem:[#allocation107_spill] sm:$0xff] }
 0x61d   :  { %v2988_v19 = vpop.eup %2987 }
 0x61e   :  { %2991 = vtanh.f32 %v1767_v23  ;;  %v2990_v33 = vpop.eup %2989  ;;  %v1794_v41 = vmul.f32 %v2988_v19, %v4711_v14  ;;  %v9136_v19 = vld [vmem:[#allocation34_spill] sm:$0xff] }
 0x61f   :  { %v1793_v52 = vmul.f32 %v2990_v33, %v4719_v17  ;;  %2993 = vtanh.f32 %v1787_v18  ;;  %v9140_v33 = vld [vmem:[#allocation106_spill] sm:$0xff]  ;;  %v9147_v18 = vld [vmem:[#allocation57_spill] sm:$0xff] }
 0x620   :  { %v1798_v46 = vadd.f32 %v1794_v41, %v4728_v24  ;;  %v9146_v41 = vld [vmem:[#allocation85_spill] sm:$0xff] }
 0x621   :  { %v1797_v47 = vadd.f32 %v1793_v52, %v4737_v22  ;;  %v9148_v52 = vld [vmem:[#allocation40_spill] sm:$0xff] }
 0x622   :  { %v1801_v6 = vmul.f32 %v1798_v46, %v6062_v50  ;;  %v9135_v50 = vld [vmem:[#allocation49_spill] sm:$0xff]  ;;  %v9150_v46 = vld [vmem:[#allocation88_spill] sm:$0xff] }
 0x624   :  { %v2992_v25 = vpop.eup %2991 }
 0x625   :  { %v1795_v51 = vmul.f32 %v2992_v25, %v4731_v32  ;;  %v2994_v59 = vpop.eup %2993  ;;  %v9149_v25 = vld [vmem:[#allocation60_spill] sm:$0xff] }
 0x626   :  { %v1796_v12 = vmul.f32 %v2994_v59, %v4760_v39  ;;  %v9156_v59 = vld [vmem:[#allocation47_spill] sm:$0xff] }
 0x627   :  { %v1799_v0 = vadd.f32 %v1795_v51, %v4740_v30  ;;  %v9151_v51 = vld [vmem:[#allocation61_spill] sm:$0xff] }
 0x628   :  { %v1800_v58 = vadd.f32 %v1796_v12, %v4773_v38  ;;  %v9157_v12 = vld [vmem:[#allocation68_spill] sm:$0xff] }
 0x629   :  { %v1802_v20 = vmul.f32 %v1799_v0, %v1797_v47  ;;  %v9152_v47 = vld [vmem:[#allocation43_spill] sm:$0xff]  ;;  %v9153_v0 = vld [vmem:[#allocation64_spill] sm:$0xff] }
 0x62b   :  { %v6568_v60 = vadd.f32 %v1802_v20, %v1801_v6  ;;  %v9154_v6 = vld [vmem:[#allocation90_spill] sm:$0xff] }
 0x62c   :  { %v9155_v20 = vld [vmem:[#allocation66_spill] sm:$0xff] }
 0x62d   :  { %2995 = vtanh.f32 %v6568_v60 }
 0x633   :  { %v2996_v11 = vpop.eup %2995 }
 0x634   :  { %v6573_v23 = vmul.f32 %v2996_v11, %v1800_v58  ;;  %v9158_v58 = vld [vmem:[#allocation91_spill] sm:$0xff]  ;;  %v9159_v11 = vld [vmem:[#allocation70_spill] sm:$0xff] }
 0x636   :  { %1822 = vmatmul.f32.vlgmr.msrb.gmra.mxu0 %v6573_v23  ;;  %1842 = vmatmul.f32.vlgmr.msrb.gmra.mxu1 %v6573_v23 }
 0x637   :  { %1862 = vmatmul.f32.vlgmr.msra.gmra.mxu2 %v6573_v23  ;;  %1882 = vmatmul.f32.vlgmr.msrb.gmra.mxu3 %v6573_v23 }
 0x638   :  { %1983 = vmatpush.msrb.mxu0 %v6073_v34  ;;  %2003 = vmatpush.msrb.mxu1 %v6076_v62  ;;  %v9141_v34 = vld [vmem:[#allocation52_spill] sm:$0xff]  ;;  %v9142_v62 = vld [vmem:[#allocation82_spill] sm:$0xff] }
 0x639   :  { %2023 = vmatpush.msra.mxu2 %v6079_v40  ;;  %2043 = vmatpush.msrb.mxu3 %v6082_v43  ;;  %v9143_v40 = vld [vmem:[#allocation53_spill] sm:$0xff] }
 0x63a   :  { %1984 = vmatpush.msrb.mxu0 %v6085_v36  ;;  %2004 = vmatpush.msrb.mxu1 %v9135_v50  ;;  %v9144_v43 = vld [vmem:[#allocation37_spill] sm:$0xff]  ;;  %v9145_v36 = vld [vmem:[#allocation56_spill] sm:$0xff]  ;;  %v9160_v50 = vld [vmem:[#allocation51_spill] sm:$0xff] }
 0x63b   :  { %2024 = vmatpush.msra.mxu2 %v9136_v19  ;;  %2044 = vmatpush.msrb.mxu3 %v9137_v44  ;;  %v9161_v19 = vld [vmem:[#allocation72_spill] sm:$0xff] }
 0x63c   :  { %1985 = vmatpush.msrb.mxu0 %v9138_v15  ;;  %2005 = vmatpush.msrb.mxu1 %v9139_v29  ;;  %v9162_v44 = vld [vmem:[#allocation92_spill] sm:$0xff]  ;;  %v9163_v15 = vld [vmem:[#allocation74_spill] sm:$0xff]  ;;  %v9164_v29 = vld [vmem:[#allocation55_spill] sm:$0xff] }
 0x63d   :  { %2025 = vmatpush.msra.mxu2 %v9140_v33  ;;  %2045 = vmatpush.msrb.mxu3 %v9141_v34  ;;  %v9165_v33 = vld [vmem:[#allocation75_spill] sm:$0xff]  ;;  %v9166_v34 = vld [vmem:[#allocation93_spill] sm:$0xff] }
 0x63e   :  { %1986 = vmatpush.msrb.mxu0 %v9142_v62  ;;  %2006 = vmatpush.msrb.mxu1 %v9143_v40  ;;  %v9167_v62 = vld [vmem:[#allocation77_spill] sm:$0xff]  ;;  %v9168_v40 = vld [vmem:[#allocation59_spill] sm:$0xff] }
 0x63f   :  { %2026 = vmatpush.msra.mxu2 %v9144_v43  ;;  %2046 = vmatpush.msrb.mxu3 %v9145_v36  ;;  %v9169_v43 = vld [vmem:[#allocation78_spill] sm:$0xff] }
 0x640   :  { %1987 = vmatpush.msrb.mxu0 %v9146_v41  ;;  %2007 = vmatpush.msrb.mxu1 %v9147_v18  ;;  %v9170_v36 = vld [vmem:[#allocation94_spill] sm:$0xff]  ;;  %v9171_v41 = vld [vmem:[#allocation80_spill] sm:$0xff]  ;;  %v9172_v18 = vld [vmem:[#allocation63_spill] sm:$0xff] }
 0x641   :  { %2027 = vmatpush.msra.mxu2 %v9148_v52  ;;  %2047 = vmatpush.msrb.mxu3 %v9149_v25  ;;  %v9173_v52 = vld [vmem:[#allocation81_spill] sm:$0xff]  ;;  %v9174_v25 = vld [vmem:[#allocation95_spill] sm:$0xff] }
 0x642   :  { %1988 = vmatpush.msrb.mxu0 %v9150_v46  ;;  %2008 = vmatpush.msrb.mxu1 %v9151_v51  ;;  %v9175_v46 = vld [vmem:[#allocation83_spill] sm:$0xff] }
 0x643   :  { %2028 = vmatpush.msra.mxu2 %v9152_v47  ;;  %2048 = vmatpush.msrb.mxu3 %v9153_v0  ;;  %v9176_v51 = vld [vmem:[#allocation67_spill] sm:$0xff]  ;;  %v9177_v47 = vld [vmem:[#allocation84_spill] sm:$0xff] }
 0x644   :  { %1989 = vmatpush.msrb.mxu0 %v9154_v6  ;;  %2009 = vmatpush.msrb.mxu1 %v9155_v20  ;;  %v9178_v0 = vld [vmem:[#allocation96_spill] sm:$0xff]  ;;  %v9179_v6 = vld [vmem:[#allocation86_spill] sm:$0xff]  ;;  %v9180_v20 = vld [vmem:[#allocation71_spill] sm:$0xff] }
 0x645   :  { %2029 = vmatpush.msra.mxu2 %v9156_v59  ;;  %2049 = vmatpush.msrb.mxu3 %v9157_v12  ;;  %v9181_v59 = vld [vmem:[#allocation87_spill] sm:$0xff]  ;;  %v9182_v12 = vld [vmem:[#allocation97_spill] sm:$0xff] }
 0x646   :  { %1990 = vmatpush.msrb.mxu0 %v9158_v58  ;;  %2010 = vmatpush.msrb.mxu1 %v9159_v11  ;;  %v9183_v58 = vld [vmem:[#allocation89_spill] sm:$0xff]  ;;  %v9184_v11 = vld [vmem:[#allocation159_spill] sm:$0xff] }
 0x647   :  { %2030 = vmatpush.msra.mxu2 %v9160_v50  ;;  %2050 = vmatpush.msrb.mxu3 %v9161_v19  ;;  %v9185_v50 = vld [vmem:[#allocation164_spill] sm:$0xff]  ;;  %v9186_v19 = vld [vmem:[#allocation187_spill] sm:$0xff] }
 0x648   :  { %1991 = vmatpush.msrb.mxu0 %v9162_v44  ;;  %2011 = vmatpush.msrb.mxu1 %v9163_v15  ;;  %v9187_v44 = vld [vmem:[#allocation119_spill] sm:$0xff]  ;;  %v9188_v15 = vld [vmem:[#allocation120_spill] sm:$0xff] }
 0x649   :  { %2031 = vmatpush.msra.mxu2 %v9164_v29  ;;  %2051 = vmatpush.msrb.mxu3 %v9165_v33  ;;  %v9189_v29 = vld [vmem:[#allocation121_spill] sm:$0xff]  ;;  %v9190_v33 = vld [vmem:[#allocation122_spill] sm:$0xff] }
 0x64a   :  { %1992 = vmatpush.msrb.mxu0 %v9166_v34  ;;  %2012 = vmatpush.msrb.mxu1 %v9167_v62  ;;  %v9191_v34 = vld [vmem:[#allocation123_spill] sm:$0xff]  ;;  %v9192_v62 = vld [vmem:[#allocation124_spill] sm:$0xff] }
 0x64b   :  { %2032 = vmatpush.msra.mxu2 %v9168_v40  ;;  %2052 = vmatpush.msrb.mxu3 %v9169_v43  ;;  %v9193_v40 = vld [vmem:[#allocation126_spill] sm:$0xff] }
 0x64c   :  { %1993 = vmatpush.msrb.mxu0 %v9170_v36  ;;  %2013 = vmatpush.msrb.mxu1 %v9171_v41  ;;  %v9194_v43 = vld [vmem:[#allocation46_spill] sm:$0xff] }
 0x64d   :  { %2033 = vmatpush.msra.mxu2 %v9172_v18  ;;  %2053 = vmatpush.msrb.mxu3 %v9173_v52  ;;  %v1667_v36 = vadd.f32 %v6547_v28, %v9194_v43  ;;  %v9195_v41 = vld [vmem:[#allocation22_spill] sm:$0xff]  ;;  %v1707_v28 = vadd.f32 %v6553_v4, %v4880_v57 }
 0x64e   :  { %1994 = vmatpush.msrb.mxu0 %v9174_v25  ;;  %2014 = vmatpush.msrb.mxu1 %v9175_v46  ;;  %v1647_v18 = vadd.f32 %v6545_v27, %v9195_v41 }
 0x64f   :  { %2034 = vmatpush.msra.mxu2 %v9176_v51  ;;  %2054 = vmatpush.msrb.mxu3 %v9177_v47  ;;  %v1687_v47 = vadd.f32 %v6551_v56, %v4876_v53 }
 0x650   :  { %1995 = vmatpush.msrb.mxu0 %v9178_v0  ;;  %2015 = vmatpush.msrb.mxu1 %v9179_v6 }
 0x651   :  { %2035 = vmatpush.msra.mxu2 %v9180_v20  ;;  %2055 = vmatpush.msrb.mxu3 %v9181_v59 }
 0x652   :  { %1996 = vmatpush.msrb.mxu0 %v9182_v12  ;;  %2016 = vmatpush.msrb.mxu1 %v9183_v58 }
 0x653   :  { %2036 = vmatpush.msra.mxu2 %v9184_v11  ;;  %2056 = vmatpush.msrb.mxu3 %v9185_v50 }
 0x654   :  { %1997 = vmatpush.msrb.mxu0 %v9186_v19  ;;  %2017 = vmatpush.msrb.mxu1 %v9187_v44 }
 0x655   :  { %2037 = vmatpush.msra.mxu2 %v9188_v15  ;;  %2057 = vmatpush.msrb.mxu3 %v9189_v29 }
 0x656   :  { %1998 = vmatpush.msrb.mxu0 %v9190_v33  ;;  %2018 = vmatpush.msrb.mxu1 %v9191_v34 }
 0x657   :  { %2038 = vmatpush.msra.mxu2 %v9192_v62  ;;  %2058 = vmatpush.msrb.mxu3 %v9193_v40 }
 0x6b3   :  { %v1823_v52 = vpop.f32.mrf.mxu0  ;;  %v1843_v25 = vpop.f32.mrf.mxu1 }
 0x6b4   :  { %v1844_v46 = vadd.f32 %v1843_v25, %v1667_v36  ;;  %v1824_v51 = vadd.f32 %v1823_v52, %v1647_v18  ;;  %v9210_v52 = vld [vmem:[#allocation144_spill] sm:$0xff]  ;;  %v9211_v25 = vld [vmem:[#allocation145_spill] sm:$0xff] }
 0x6b6   :  { %2997 = vtanh.f32 %v1844_v46  ;;  %v9212_v46 = vld [vmem:[#allocation147_spill] sm:$0xff] }
 0x6b7   :  { %2999 = vtanh.f32 %v1824_v51  ;;  %v9213_v51 = vld [vmem:[#allocation148_spill] sm:$0xff] }
 0x6ba   :  { %v1863_v0 = vpop.f32.mrf.mxu2  ;;  %v1883_v59 = vpop.f32.mrf.mxu3 }
 0x6bb   :  { %v1864_v6 = vadd.f32 %v1863_v0, %v1687_v47  ;;  %v1884_v58 = vadd.f32 %v1883_v59, %v1707_v28  ;;  %v9214_v47 = vld [vmem:[#allocation149_spill] sm:$0xff]  ;;  %v9215_v0 = vld [vmem:[#allocation150_spill] sm:$0xff] }
 0x6bc   :  { %v2998_v20 = vpop.eup %2997  ;;  %v9218_v59 = vld [vmem:[#allocation153_spill] sm:$0xff]  ;;  %v9219_v28 = vld [vmem:[#allocation154_spill] sm:$0xff] }
 0x6bd   :  { %3001 = vtanh.f32 %v1864_v6  ;;  %v3000_v12 = vpop.eup %2999  ;;  %v1891_v27 = vmul.f32 %v2998_v20, %v4711_v14  ;;  %v9216_v6 = vld [vmem:[#allocation151_spill] sm:$0xff]  ;;  %v9217_v20 = vld [vmem:[#allocation152_spill] sm:$0xff] }
 0x6be   :  { %v1890_v11 = vmul.f32 %v3000_v12, %v4719_v17  ;;  %3003 = vtanh.f32 %v1884_v58  ;;  %v9220_v12 = vld [vmem:[#allocation155_spill] sm:$0xff]  ;;  %v9222_v58 = vld [vmem:[#allocation157_spill] sm:$0xff] }
 0x6bf   :  { %v1895_v19 = vadd.f32 %v1891_v27, %v4728_v24  ;;  %v9221_v27 = vld [vmem:[#allocation156_spill] sm:$0xff] }
 0x6c0   :  { %v1894_v44 = vadd.f32 %v1890_v11, %v4737_v22  ;;  %v9223_v11 = vld [vmem:[#allocation158_spill] sm:$0xff] }
 0x6c1   :  { %v1898_v29 = vmul.f32 %v1895_v19, %v6280_v13  ;;  %v9196_v13 = vld [vmem:[#allocation127_spill] sm:$0xff]  ;;  %v9225_v19 = vld [vmem:[#allocation161_spill] sm:$0xff] }
 0x6c3   :  { %v3002_v50 = vpop.eup %3001 }
 0x6c4   :  { %v1892_v56 = vmul.f32 %v3002_v50, %v4731_v32  ;;  %v3004_v4 = vpop.eup %3003  ;;  %v9224_v50 = vld [vmem:[#allocation160_spill] sm:$0xff] }
 0x6c5   :  { %v1893_v62 = vmul.f32 %v3004_v4, %v4760_v39  ;;  %v9231_v4 = vld [vmem:[#allocation170_spill] sm:$0xff] }
 0x6c6   :  { %v1896_v15 = vadd.f32 %v1892_v56, %v4740_v30  ;;  %v9226_v56 = vld [vmem:[#allocation162_spill] sm:$0xff] }
 0x6c7   :  { %v1897_v40 = vadd.f32 %v1893_v62, %v4773_v38  ;;  %v9232_v62 = vld [vmem:[#allocation171_spill] sm:$0xff] }
 0x6c8   :  { %v1899_v33 = vmul.f32 %v1896_v15, %v1894_v44  ;;  %v9227_v44 = vld [vmem:[#allocation163_spill] sm:$0xff]  ;;  %v9228_v15 = vld [vmem:[#allocation165_spill] sm:$0xff] }
 0x6ca   :  { %v6658_v34 = vadd.f32 %v1899_v33, %v1898_v29  ;;  %v9229_v29 = vld [vmem:[#allocation168_spill] sm:$0xff]  ;;  %v9230_v33 = vld [vmem:[#allocation169_spill] sm:$0xff] }
 0x6cc   :  { %3005 = vtanh.f32 %v6658_v34 }
 0x6d2   :  { %v3006_v36 = vpop.eup %3005 }
 0x6d3   :  { %v1902_v18 = vmul.f32 %v3006_v36, %v1897_v40  ;;  %v9233_v40 = vld [vmem:[#allocation172_spill] sm:$0xff]  ;;  %v9234_v36 = vld [vmem:[#allocation173_spill] sm:$0xff] }
 0x6d5   :  { %1919 = vmatmul.f32.vlgmr.msra.gmra.mxu0 %v1902_v18  ;;  %1939 = vmatmul.f32.vlgmr.msra.gmra.mxu1 %v1902_v18 }
 0x6d6   :  { %1959 = vmatmul.f32.vlgmr.msrb.gmra.mxu2 %v1902_v18  ;;  %1979 = vmatmul.f32.vlgmr.msra.gmra.mxu3 %v1902_v18  ;;  %v9235_v18 = vld [vmem:[#allocation174_spill] sm:$0xff] }
 0x6d7   :  { %2080 = vmatpush.msra.mxu0 %v6285_v21  ;;  %2100 = vmatpush.msra.mxu1 %v6288_v35  ;;  %v9197_v21 = vld [vmem:[#allocation128_spill] sm:$0xff]  ;;  %v9198_v35 = vld [vmem:[#allocation129_spill] sm:$0xff] }
 0x6d8   :  { %2120 = vmatpush.msrb.mxu2 %v6291_v61  ;;  %2140 = vmatpush.msra.mxu3 %v6294_v16  ;;  %v9199_v61 = vld [vmem:[#allocation130_spill] sm:$0xff]  ;;  %v9200_v16 = vld [vmem:[#allocation131_spill] sm:$0xff] }
 0x6d9   :  { %2081 = vmatpush.msra.mxu0 %v6297_v48  ;;  %2101 = vmatpush.msra.mxu1 %v6300_v7  ;;  %v9201_v48 = vld [vmem:[#allocation132_spill] sm:$0xff]  ;;  %v9202_v7 = vld [vmem:[#allocation133_spill] sm:$0xff] }
 0x6da   :  { %2121 = vmatpush.msrb.mxu2 %v6303_v8  ;;  %2141 = vmatpush.msra.mxu3 %v6306_v3  ;;  %v9203_v8 = vld [vmem:[#allocation134_spill] sm:$0xff]  ;;  %v9204_v3 = vld [vmem:[#allocation136_spill] sm:$0xff] }
 0x6db   :  { %2082 = vmatpush.msra.mxu0 %v6309_v45  ;;  %2102 = vmatpush.msra.mxu1 %v6312_v63  ;;  %v9205_v45 = vld [vmem:[#allocation137_spill] sm:$0xff]  ;;  %v9206_v63 = vld [vmem:[#allocation138_spill] sm:$0xff] }
 0x6dc   :  { %2122 = vmatpush.msrb.mxu2 %v6315_v55  ;;  %2142 = vmatpush.msra.mxu3 %v6318_v1  ;;  %v9207_v55 = vld [vmem:[#allocation139_spill] sm:$0xff]  ;;  %v9208_v1 = vld [vmem:[#allocation141_spill] sm:$0xff] }
 0x6dd   :  { %1999 = vmatmul.f32.vlgmr.msrb.gmra.mxu0 %v6573_v23  ;;  %2019 = vmatmul.f32.vlgmr.msrb.gmra.mxu1 %v6573_v23 }
 0x6de   :  { %2039 = vmatmul.f32.vlgmr.msra.gmra.mxu2 %v6573_v23  ;;  %2059 = vmatmul.f32.vlgmr.msrb.gmra.mxu3 %v6573_v23  ;;  %v9209_v23 = vld [vmem:[#allocation143_spill] sm:$0xff] }
 0x6df   :  { %2083 = vmatpush.msra.mxu0 %v9196_v13  ;;  %2103 = vmatpush.msra.mxu1 %v9197_v21  ;;  %v9236_v13 = vld [vmem:[#allocation175_spill] sm:$0xff]  ;;  %v9237_v21 = vld [vmem:[#allocation177_spill] sm:$0xff] }
 0x6e0   :  { %2123 = vmatpush.msrb.mxu2 %v9198_v35  ;;  %2143 = vmatpush.msra.mxu3 %v9199_v61  ;;  %v9238_v35 = vld [vmem:[#allocation178_spill] sm:$0xff]  ;;  %v9239_v61 = vld [vmem:[#allocation179_spill] sm:$0xff] }
 0x6e1   :  { %2084 = vmatpush.msra.mxu0 %v9200_v16  ;;  %2104 = vmatpush.msra.mxu1 %v9201_v48  ;;  %v9240_v16 = vld [vmem:[#allocation180_spill] sm:$0xff]  ;;  %v9241_v48 = vld [vmem:[#allocation181_spill] sm:$0xff] }
 0x6e2   :  { %2124 = vmatpush.msrb.mxu2 %v9202_v7  ;;  %2144 = vmatpush.msra.mxu3 %v9203_v8  ;;  %v6731_v7 = vld [vmem:[#allocation7 + $0x1e0] sm:$0xff]  ;;  %v6734_v8 = vld [vmem:[#allocation7 + $0x1e8] sm:$0xff] }
 0x6e3   :  { %2085 = vmatpush.msra.mxu0 %v9204_v3  ;;  %2105 = vmatpush.msra.mxu1 %v9205_v45  ;;  %v6737_v3 = vld [vmem:[#allocation7 + $0x1f0] sm:$0xff]  ;;  %v6758_v45 = vld [vmem:[#allocation7 + $0x1a8] sm:$0xff] }
 0x6e4   :  { %2125 = vmatpush.msrb.mxu2 %v9206_v63  ;;  %2145 = vmatpush.msra.mxu3 %v9207_v55  ;;  %v6761_v63 = vld [vmem:[#allocation7 + $0x1b0] sm:$0xff]  ;;  %v6764_v55 = vld [vmem:[#allocation7 + $0x1b8] sm:$0xff] }
 0x6e5   :  { %2086 = vmatpush.msra.mxu0 %v9208_v1  ;;  %2106 = vmatpush.msra.mxu1 %v9209_v23  ;;  %v6767_v1 = vld [vmem:[#allocation7 + $0x180] sm:$0xff]  ;;  %v6770_v23 = vld [vmem:[#allocation7 + $0x188] sm:$0xff] }
 0x6e6   :  { %2126 = vmatpush.msrb.mxu2 %v9210_v52  ;;  %2146 = vmatpush.msra.mxu3 %v9211_v25  ;;  %v6773_v52 = vld [vmem:[#allocation7 + $0x190] sm:$0xff]  ;;  %v6776_v25 = vld [vmem:[#allocation7 + $0x198] sm:$0xff] }
 0x6e7   :  { %2087 = vmatpush.msra.mxu0 %v9212_v46  ;;  %2107 = vmatpush.msra.mxu1 %v9213_v51  ;;  %v6779_v46 = vld [vmem:[#allocation7 + $0x160] sm:$0xff]  ;;  %v6782_v51 = vld [vmem:[#allocation7 + $0x168] sm:$0xff] }
 0x6e8   :  { %2127 = vmatpush.msrb.mxu2 %v9214_v47  ;;  %2147 = vmatpush.msra.mxu3 %v9215_v0  ;;  %v6785_v47 = vld [vmem:[#allocation7 + $0x170] sm:$0xff]  ;;  %v6788_v0 = vld [vmem:[#allocation7 + $0x178] sm:$0xff] }
 0x6e9   :  { %2088 = vmatpush.msra.mxu0 %v9216_v6  ;;  %2108 = vmatpush.msra.mxu1 %v9217_v20  ;;  %v6791_v6 = vld [vmem:[#allocation7 + $0x140] sm:$0xff]  ;;  %v6794_v20 = vld [vmem:[#allocation7 + $0x148] sm:$0xff] }
 0x6ea   :  { %2128 = vmatpush.msrb.mxu2 %v9218_v59  ;;  %2148 = vmatpush.msra.mxu3 %v9219_v28  ;;  %v6797_v59 = vld [vmem:[#allocation7 + $0x150] sm:$0xff]  ;;  %v6800_v28 = vld [vmem:[#allocation7 + $0x158] sm:$0xff] }
 0x6eb   :  { %2089 = vmatpush.msra.mxu0 %v9220_v12  ;;  %2109 = vmatpush.msra.mxu1 %v9221_v27  ;;  %v6803_v12 = vld [vmem:[#allocation7 + $0x120] sm:$0xff]  ;;  %v6806_v27 = vld [vmem:[#allocation7 + $0x128] sm:$0xff] }
 0x6ec   :  { %2129 = vmatpush.msrb.mxu2 %v9222_v58  ;;  %2149 = vmatpush.msra.mxu3 %v9223_v11  ;;  %v6809_v58 = vld [vmem:[#allocation7 + $0x130] sm:$0xff]  ;;  %v6812_v11 = vld [vmem:[#allocation7 + $0x138] sm:$0xff] }
 0x6ed   :  { %2090 = vmatpush.msra.mxu0 %v9224_v50  ;;  %2110 = vmatpush.msra.mxu1 %v9225_v19  ;;  %9242 = vst [vmem:[#allocation182_spill] sm:$0xff] %v6812_v11  ;;  %v6815_v50 = vld [vmem:[#allocation7 + $0x100] sm:$0xff]  ;;  %v6818_v19 = vld [vmem:[#allocation7 + $0x108] sm:$0xff] }
 0x6ee   :  { %2130 = vmatpush.msrb.mxu2 %v9226_v56  ;;  %2150 = vmatpush.msra.mxu3 %v9227_v44  ;;  %9243 = vst [vmem:[#allocation183_spill] sm:$0xff] %v6815_v50  ;;  %v6821_v56 = vld [vmem:[#allocation7 + $0x110] sm:$0xff]  ;;  %v6824_v44 = vld [vmem:[#allocation7 + $0x118] sm:$0xff] }
 0x6ef   :  { %2091 = vmatpush.msra.mxu0 %v9228_v15  ;;  %2111 = vmatpush.msra.mxu1 %v9229_v29  ;;  %9244 = vst [vmem:[#allocation184_spill] sm:$0xff] %v6818_v19  ;;  %v6827_v15 = vld [vmem:[#allocation7 + $0xe0] sm:$0xff]  ;;  %v6830_v29 = vld [vmem:[#allocation7 + $0xe8] sm:$0xff] }
 0x6f0   :  { %2131 = vmatpush.msrb.mxu2 %v9230_v33  ;;  %2151 = vmatpush.msra.mxu3 %v9231_v4  ;;  %9245 = vst [vmem:[#allocation186_spill] sm:$0xff] %v6821_v56  ;;  %v6833_v33 = vld [vmem:[#allocation7 + $0xf0] sm:$0xff]  ;;  %v6836_v4 = vld [vmem:[#allocation7 + $0xf8] sm:$0xff] }
 0x6f1   :  { %2092 = vmatpush.msra.mxu0 %v9232_v62  ;;  %2112 = vmatpush.msra.mxu1 %v9233_v40  ;;  %9246 = vst [vmem:[#allocation99_spill] sm:$0xff] %v6824_v44  ;;  %v6839_v62 = vld [vmem:[#allocation7 + $0xc0] sm:$0xff]  ;;  %v6842_v40 = vld [vmem:[#allocation7 + $0xc8] sm:$0xff] }
 0x6f2   :  { %2132 = vmatpush.msrb.mxu2 %v9234_v36  ;;  %2152 = vmatpush.msra.mxu3 %v9235_v18  ;;  %9247 = vst [vmem:[#allocation105_spill] sm:$0xff] %v6827_v15  ;;  %v6845_v36 = vld [vmem:[#allocation7 + $0xd0] sm:$0xff]  ;;  %v6848_v18 = vld [vmem:[#allocation7 + $0xd8] sm:$0xff] }
 0x6f3   :  { %2093 = vmatpush.msra.mxu0 %v9236_v13  ;;  %2113 = vmatpush.msra.mxu1 %v9237_v21  ;;  %9248 = vst [vmem:[#allocation104_spill] sm:$0xff] %v6830_v29  ;;  %v6851_v13 = vld [vmem:[#allocation7 + $0xa0] sm:$0xff]  ;;  %v6854_v21 = vld [vmem:[#allocation7 + $0xa8] sm:$0xff] }
 0x6f4   :  { %2133 = vmatpush.msrb.mxu2 %v9238_v35  ;;  %2153 = vmatpush.msra.mxu3 %v9239_v61  ;;  %9249 = vst [vmem:[#allocation113_spill] sm:$0xff] %v6833_v33  ;;  %v6857_v35 = vld [vmem:[#allocation7 + $0xb0] sm:$0xff]  ;;  %v6860_v61 = vld [vmem:[#allocation7 + $0xb8] sm:$0xff] }
 0x6f5   :  { %2094 = vmatpush.msra.mxu0 %v9240_v16  ;;  %2114 = vmatpush.msra.mxu1 %v9241_v48  ;;  %9250 = vst [vmem:[#allocation111_spill] sm:$0xff] %v6836_v4  ;;  %v6863_v16 = vld [vmem:[#allocation7 + $0x80] sm:$0xff]  ;;  %v6866_v48 = vld [vmem:[#allocation7 + $0x88] sm:$0xff] }
 0x6f6   :  { %2134 = vmatpush.msrb.mxu2 %v6463_v54  ;;  %2154 = vmatpush.msra.mxu3 %v6466_v26  ;;  %v6740_v54 = vld [vmem:[#allocation7 + $0x1f8] sm:$0xff]  ;;  %v6755_v26 = vld [vmem:[#allocation7 + $0x1a0] sm:$0xff]  ;;  %9251 = vst [vmem:[#allocation110_spill] sm:$0xff] %v6839_v62 }
 0x6f7   :  { %2095 = vmatpush.msra.mxu0 %v6469_v37  ;;  %2115 = vmatpush.msra.mxu1 %v6472_v31  ;;  %v6743_v37 = vld [vmem:[#allocation7 + $0x1c0] sm:$0xff]  ;;  %v6746_v31 = vld [vmem:[#allocation7 + $0x1c8] sm:$0xff]  ;;  %9252 = vst [vmem:[#allocation103_spill] sm:$0xff] %v6842_v40 }
 0x6f8   :  { %2135 = vmatpush.msrb.mxu2 %v6475_v10  ;;  %2155 = vmatpush.msra.mxu3 %v6478_v49  ;;  %v6749_v10 = vld [vmem:[#allocation7 + $0x1d0] sm:$0xff]  ;;  %v6752_v49 = vld [vmem:[#allocation7 + $0x1d8] sm:$0xff]  ;;  %9253 = vst [vmem:[#allocation102_spill] sm:$0xff] %v6845_v36 }
 0x6f9   :  { %2177 = vmatpush.msrb.mxu0 %v6731_v7  ;;  %2197 = vmatpush.msrb.mxu1 %v6734_v8  ;;  %9254 = vst [vmem:[#allocation16_spill] sm:$0xff] %v6848_v18 }
 0x6fa   :  { %2217 = vmatpush.msra.mxu2 %v6737_v3  ;;  %2237 = vmatpush.msrb.mxu3 %v6740_v54  ;;  %9255 = vst [vmem:[#allocation21_spill] sm:$0xff] %v6851_v13 }
 0x6fb   :  { %2178 = vmatpush.msrb.mxu0 %v6743_v37  ;;  %2198 = vmatpush.msrb.mxu1 %v6746_v31  ;;  %9256 = vst [vmem:[#allocation50_spill] sm:$0xff] %v6854_v21 }
 0x6fc   :  { %2218 = vmatpush.msra.mxu2 %v6749_v10  ;;  %2238 = vmatpush.msrb.mxu3 %v6752_v49  ;;  %9257 = vst [vmem:[#allocation25_spill] sm:$0xff] %v6857_v35 }
 0x6fd   :  { %2179 = vmatpush.msrb.mxu0 %v6755_v26  ;;  %2199 = vmatpush.msrb.mxu1 %v6758_v45  ;;  %9258 = vst [vmem:[#allocation17_spill] sm:$0xff] %v6860_v61 }
 0x6fe   :  { %2219 = vmatpush.msra.mxu2 %v6761_v63  ;;  %2239 = vmatpush.msrb.mxu3 %v6764_v55  ;;  %9259 = vst [vmem:[#allocation24_spill] sm:$0xff] %v6863_v16 }
 0x6ff   :  { %2180 = vmatpush.msrb.mxu0 %v6767_v1  ;;  %2200 = vmatpush.msrb.mxu1 %v6770_v23  ;;  %9260 = vst [vmem:[#allocation54_spill] sm:$0xff] %v6866_v48 }
 0x700   :  { %2220 = vmatpush.msra.mxu2 %v6773_v52  ;;  %2240 = vmatpush.msrb.mxu3 %v6776_v25 }
 0x701   :  { %2181 = vmatpush.msrb.mxu0 %v6779_v46  ;;  %2201 = vmatpush.msrb.mxu1 %v6782_v51 }
 0x702   :  { %2221 = vmatpush.msra.mxu2 %v6785_v47  ;;  %2241 = vmatpush.msrb.mxu3 %v6788_v0 }
 0x703   :  { %2182 = vmatpush.msrb.mxu0 %v6791_v6  ;;  %2202 = vmatpush.msrb.mxu1 %v6794_v20 }
 0x704   :  { %2222 = vmatpush.msra.mxu2 %v6797_v59  ;;  %2242 = vmatpush.msrb.mxu3 %v6800_v28 }
 0x705   :  { %2183 = vmatpush.msrb.mxu0 %v6803_v12  ;;  %2203 = vmatpush.msrb.mxu1 %v6806_v27 }
 0x706   :  { %2223 = vmatpush.msra.mxu2 %v6809_v58  ;;  %2243 = vmatpush.msrb.mxu3 %v6812_v11 }
 0x707   :  { %2184 = vmatpush.msrb.mxu0 %v6815_v50  ;;  %2204 = vmatpush.msrb.mxu1 %v6818_v19 }
 0x708   :  { %2224 = vmatpush.msra.mxu2 %v6821_v56  ;;  %2244 = vmatpush.msrb.mxu3 %v6824_v44 }
 0x709   :  { %2185 = vmatpush.msrb.mxu0 %v6827_v15  ;;  %2205 = vmatpush.msrb.mxu1 %v6830_v29 }
 0x70a   :  { %2225 = vmatpush.msra.mxu2 %v6833_v33  ;;  %2245 = vmatpush.msrb.mxu3 %v6836_v4 }
 0x70b   :  { %2186 = vmatpush.msrb.mxu0 %v6839_v62  ;;  %2206 = vmatpush.msrb.mxu1 %v6842_v40 }
 0x70c   :  { %2226 = vmatpush.msra.mxu2 %v6845_v36  ;;  %2246 = vmatpush.msrb.mxu3 %v6848_v18 }
 0x70d   :  { %2187 = vmatpush.msrb.mxu0 %v6851_v13  ;;  %2207 = vmatpush.msrb.mxu1 %v6854_v21  ;;  %v6869_v13 = vld [vmem:[#allocation7 + $0x90] sm:$0xff]  ;;  %v6872_v21 = vld [vmem:[#allocation7 + $0x98] sm:$0xff] }
 0x70e   :  { %2227 = vmatpush.msra.mxu2 %v6857_v35  ;;  %2247 = vmatpush.msrb.mxu3 %v6860_v61  ;;  %9261 = vst [vmem:[#allocation28_spill] sm:$0xff] %v6869_v13  ;;  %v6875_v35 = vld [vmem:[#allocation7 + $0x60] sm:$0xff]  ;;  %v6878_v61 = vld [vmem:[#allocation7 + $0x68] sm:$0xff] }
 0x70f   :  { %2188 = vmatpush.msrb.mxu0 %v6863_v16  ;;  %2208 = vmatpush.msrb.mxu1 %v6866_v48  ;;  %9262 = vst [vmem:[#allocation18_spill] sm:$0xff] %v6872_v21  ;;  %v6881_v16 = vld [vmem:[#allocation7 + $0x70] sm:$0xff]  ;;  %v6884_v48 = vld [vmem:[#allocation7 + $0x78] sm:$0xff] }
 0x710   :  { %2228 = vmatpush.msra.mxu2 %v6869_v13  ;;  %2248 = vmatpush.msrb.mxu3 %v6872_v21  ;;  %9263 = vst [vmem:[#allocation27_spill] sm:$0xff] %v6875_v35  ;;  %v6887_v13 = vld [vmem:[#allocation7 + $0x40] sm:$0xff]  ;;  %v6890_v21 = vld [vmem:[#allocation7 + $0x48] sm:$0xff] }
 0x711   :  { %2189 = vmatpush.msrb.mxu0 %v6875_v35  ;;  %9264 = vst [vmem:[#allocation58_spill] sm:$0xff] %v6878_v61  ;;  %2209 = vmatpush.msrb.mxu1 %v6878_v61  ;;  %v6893_v35 = vld [vmem:[#allocation7 + $0x50] sm:$0xff]  ;;  %v6896_v61 = vld [vmem:[#allocation7 + $0x58] sm:$0xff] }
 0x712   :  { %9265 = vst [vmem:[#allocation31_spill] sm:$0xff] %v6881_v16  ;;  %2229 = vmatpush.msra.mxu2 %v6881_v16  ;;  %2249 = vmatpush.msrb.mxu3 %v6884_v48  ;;  %v6899_v16 = vld [vmem:[#allocation7 + $0x20] sm:$0xff] }
 0x713   :  { %9266 = vst [vmem:[#allocation19_spill] sm:$0xff] %v6884_v48  ;;  %2190 = vmatpush.msrb.mxu0 %v6887_v13  ;;  %2210 = vmatpush.msrb.mxu1 %v6890_v21  ;;  %v6902_v48 = vld [vmem:[#allocation7 + $0x28] sm:$0xff] }
 0x714   :  { %9267 = vst [vmem:[#allocation30_spill] sm:$0xff] %v6887_v13  ;;  %2230 = vmatpush.msra.mxu2 %v6893_v35  ;;  %2250 = vmatpush.msrb.mxu3 %v6896_v61  ;;  %v6905_v13 = vld [vmem:[#allocation7 + $0x30] sm:$0xff] }
 0x715   :  { %9268 = vst [vmem:[#allocation62_spill] sm:$0xff] %v6890_v21  ;;  %2191 = vmatpush.msrb.mxu0 %v6899_v16  ;;  %2211 = vmatpush.msrb.mxu1 %v6902_v48  ;;  %v6908_v21 = vld [vmem:[#allocation7 + $0x38] sm:$0xff] }
 0x716   :  { %9269 = vst [vmem:[#allocation33_spill] sm:$0xff] %v6893_v35  ;;  %2231 = vmatpush.msra.mxu2 %v6905_v13  ;;  %2251 = vmatpush.msrb.mxu3 %v6908_v21  ;;  %v6911_v35 = vld [vmem:[#allocation7] sm:$0xff] }
 0x717   :  { %9270 = vst [vmem:[#allocation20_spill] sm:$0xff] %v6896_v61  ;;  %2192 = vmatpush.msrb.mxu0 %v6911_v35  ;;  %v6914_v61 = vld [vmem:[#allocation7 + $0x8] sm:$0xff] }
 0x718   :  { %9271 = vst [vmem:[#allocation35_spill] sm:$0xff] %v6899_v16  ;;  %2212 = vmatpush.msrb.mxu1 %v6914_v61  ;;  %v6917_v16 = vld [vmem:[#allocation7 + $0x10] sm:$0xff] }
 0x719   :  { %9272 = vst [vmem:[#allocation65_spill] sm:$0xff] %v6902_v48  ;;  %2232 = vmatpush.msra.mxu2 %v6917_v16  ;;  %v6920_v48 = vld [vmem:[#allocation7 + $0x18] sm:$0xff] }
 0x71a   :  { %9273 = vst [vmem:[#allocation36_spill] sm:$0xff] %v6905_v13  ;;  %2252 = vmatpush.msrb.mxu3 %v6920_v48 }
 0x71b   :  { %9274 = vst [vmem:[#allocation23_spill] sm:$0xff] %v6908_v21  ;;  %v9279_v21 = vld [vmem:[#allocation112_spill] sm:$0xff] }
 0x71c   :  { %9275 = vst [vmem:[#allocation38_spill] sm:$0xff] %v6911_v35  ;;  %v413_v36 = vadd.f32 %v9279_v21, %v9129_v42  ;;  %v9282_v42 = vld [vmem:[#allocation118_spill] sm:$0xff] }
 0x71d   :  { %9276 = vst [vmem:[#allocation69_spill] sm:$0xff] %v6914_v61  ;;  %v9280_v61 = vld [vmem:[#allocation140_spill] sm:$0xff]  ;;  %v495_v50 = vadd.f32 %v9282_v42, %v4702_v9 }
 0x71e   :  { %9277 = vst [vmem:[#allocation39_spill] sm:$0xff] %v6917_v16  ;;  %v372_v62 = vadd.f32 %v9280_v61, %v9131_v5 }
 0x71f   :  { %9278 = vst [vmem:[#allocation26_spill] sm:$0xff] %v6920_v48  ;;  %v9281_v48 = vld [vmem:[#allocation125_spill] sm:$0xff] }
 0x720   :  { %v454_v15 = vadd.f32 %v9281_v48, %v4688_v2 }
 0x752   :  { %v6923_v13 = vpop.f32.mrf.mxu0  ;;  %v6925_v18 = vpop.f32.mrf.mxu1 }
 0x759   :  { %v6929_v35 = vpop.f32.mrf.mxu2  ;;  %v6931_v40 = vpop.f32.mrf.mxu3 }
 0x75a   :  { %v2000_v4 = vpop.f32.mrf.mxu0  ;;  %v2020_v16 = vpop.f32.mrf.mxu1 }
 0x75b   :  { %v2021_v33 = vadd.f32 %v2020_v16, %v413_v36  ;;  %v2001_v29 = vadd.f32 %v2000_v4, %v372_v62 }
 0x75d   :  { %3007 = vtanh.f32 %v2021_v33 }
 0x75e   :  { %3009 = vtanh.f32 %v2001_v29 }
 0x761   :  { %v2040_v44 = vpop.f32.mrf.mxu2  ;;  %v2060_v21 = vpop.f32.mrf.mxu3 }
 0x762   :  { %v2041_v56 = vadd.f32 %v2040_v44, %v454_v15  ;;  %v2061_v5 = vadd.f32 %v2060_v21, %v495_v50  ;;  %v6963_v21 = vld [vmem:[#allocation2 + $0x1f0] sm:$0xff] }
 0x763   :  { %v3008_v19 = vpop.eup %3007 }
 0x764   :  { %3011 = vtanh.f32 %v2041_v56  ;;  %v3010_v11 = vpop.eup %3009  ;;  %v2068_v61 = vmul.f32 %v3008_v19, %v4711_v14 }
 0x765   :  { %v2067_v36 = vmul.f32 %v3010_v11, %v4719_v17  ;;  %3013 = vtanh.f32 %v2061_v5  ;;  %v6957_v5 = vld [vmem:[#allocation2 + $0x1e0] sm:$0xff] }
 0x766   :  { %v2072_v33 = vadd.f32 %v2068_v61, %v4728_v24  ;;  %v6966_v61 = vld [vmem:[#allocation2 + $0x1f8] sm:$0xff] }
 0x767   :  { %v2071_v44 = vadd.f32 %v2067_v36, %v4737_v22  ;;  %v6969_v36 = vld [vmem:[#allocation2 + $0x1c0] sm:$0xff] }
 0x768   :  { %v2075_v15 = vmul.f32 %v2072_v33, %v6568_v60  ;;  %v6960_v60 = vld [vmem:[#allocation2 + $0x1e8] sm:$0xff]  ;;  %v6975_v33 = vld [vmem:[#allocation2 + $0x1d0] sm:$0xff] }
 0x769   :  { %9284 = vst [vmem:[#allocation73_spill] sm:$0xff] %v6975_v33 }
 0x76a   :  { %v3012_v4 = vpop.eup %3011 }
 0x76b   :  { %v2069_v62 = vmul.f32 %v3012_v4, %v4731_v32  ;;  %v3014_v42 = vpop.eup %3013  ;;  %v6972_v4 = vld [vmem:[#allocation2 + $0x1c8] sm:$0xff] }
 0x76c   :  { %v2070_v11 = vmul.f32 %v3014_v42, %v4760_v39  ;;  %9283 = vst [vmem:[#allocation41_spill] sm:$0xff] %v6972_v4  ;;  %v6993_v42 = vld [vmem:[#allocation2 + $0x180] sm:$0xff] }
 0x76d   :  { %v2073_v56 = vadd.f32 %v2069_v62, %v4740_v30  ;;  %v6978_v62 = vld [vmem:[#allocation2 + $0x1d8] sm:$0xff]  ;;  %9290 = vst [vmem:[#allocation32_spill] sm:$0xff] %v6993_v42 }
 0x76e   :  { %v2074_v50 = vadd.f32 %v2070_v11, %v4773_v38  ;;  %9285 = vst [vmem:[#allocation42_spill] sm:$0xff] %v6978_v62  ;;  %v6996_v11 = vld [vmem:[#allocation2 + $0x188] sm:$0xff] }
 0x76f   :  { %v2076_v29 = vmul.f32 %v2073_v56, %v2071_v44  ;;  %v6981_v44 = vld [vmem:[#allocation2 + $0x1a0] sm:$0xff]  ;;  %v6984_v56 = vld [vmem:[#allocation2 + $0x1a8] sm:$0xff]  ;;  %9291 = vst [vmem:[#allocation48_spill] sm:$0xff] %v6996_v11 }
 0x770   :  { %9286 = vst [vmem:[#allocation29_spill] sm:$0xff] %v6981_v44 }
 0x771   :  { %v6946_v16 = vadd.f32 %v2076_v29, %v2075_v15  ;;  %9287 = vst [vmem:[#allocation44_spill] sm:$0xff] %v6984_v56  ;;  %v6987_v15 = vld [vmem:[#allocation2 + $0x1b0] sm:$0xff]  ;;  %v6990_v29 = vld [vmem:[#allocation2 + $0x1b8] sm:$0xff] }
 0x772   :  { %9288 = vst [vmem:[#allocation76_spill] sm:$0xff] %v6987_v15 }
 0x773   :  { %3015 = vtanh.f32 %v6946_v16  ;;  %9289 = vst [vmem:[#allocation45_spill] sm:$0xff] %v6990_v29 }
 0x779   :  { %v3016_v19 = vpop.eup %3015 }
 0x77a   :  { %v6951_v48 = vmul.f32 %v3016_v19, %v2074_v50  ;;  %v6999_v50 = vld [vmem:[#allocation2 + $0x190] sm:$0xff]  ;;  %v7002_v19 = vld [vmem:[#allocation2 + $0x198] sm:$0xff] }
 0x77b   :  { %9292 = vst [vmem:[#allocation79_spill] sm:$0xff] %v6999_v50 }
 0x77c   :  { %2096 = vmatmul.f32.vlgmr.msra.gmra.mxu0 %v6951_v48  ;;  %2116 = vmatmul.f32.vlgmr.msra.gmra.mxu1 %v6951_v48  ;;  %9293 = vst [vmem:[#allocation108_spill] sm:$0xff] %v7002_v19 }
 0x77d   :  { %2136 = vmatmul.f32.vlgmr.msrb.gmra.mxu2 %v6951_v48  ;;  %2156 = vmatmul.f32.vlgmr.msra.gmra.mxu3 %v6951_v48 }
 0x77e   :  { %2257 = vmatpush.msra.mxu0 %v6957_v5  ;;  %2277 = vmatpush.msra.mxu1 %v6960_v60 }
 0x77f   :  { %2297 = vmatpush.msrb.mxu2 %v6963_v21  ;;  %2317 = vmatpush.msra.mxu3 %v6966_v61 }
 0x780   :  { %2258 = vmatpush.msra.mxu0 %v6969_v36  ;;  %2278 = vmatpush.msra.mxu1 %v6972_v4 }
 0x781   :  { %2298 = vmatpush.msrb.mxu2 %v6975_v33  ;;  %2318 = vmatpush.msra.mxu3 %v6978_v62 }
 0x782   :  { %2259 = vmatpush.msra.mxu0 %v6981_v44  ;;  %2279 = vmatpush.msra.mxu1 %v6984_v56 }
 0x783   :  { %2299 = vmatpush.msrb.mxu2 %v6987_v15  ;;  %2319 = vmatpush.msra.mxu3 %v6990_v29  ;;  %v7005_v15 = vld [vmem:[#allocation2 + $0x160] sm:$0xff]  ;;  %v7008_v29 = vld [vmem:[#allocation2 + $0x168] sm:$0xff] }
 0x784   :  { %2260 = vmatpush.msra.mxu0 %v6993_v42  ;;  %2280 = vmatpush.msra.mxu1 %v6996_v11  ;;  %9294 = vst [vmem:[#allocation117_spill] sm:$0xff] %v7005_v15  ;;  %v7011_v42 = vld [vmem:[#allocation2 + $0x170] sm:$0xff]  ;;  %v7014_v11 = vld [vmem:[#allocation2 + $0x178] sm:$0xff] }
 0x785   :  { %2300 = vmatpush.msrb.mxu2 %v6999_v50  ;;  %2320 = vmatpush.msra.mxu3 %v7002_v19  ;;  %9295 = vst [vmem:[#allocation115_spill] sm:$0xff] %v7008_v29  ;;  %v7017_v50 = vld [vmem:[#allocation2 + $0x140] sm:$0xff]  ;;  %v7020_v19 = vld [vmem:[#allocation2 + $0x148] sm:$0xff] }
 0x786   :  { %2261 = vmatpush.msra.mxu0 %v7005_v15  ;;  %2281 = vmatpush.msra.mxu1 %v7008_v29  ;;  %9296 = vst [vmem:[#allocation114_spill] sm:$0xff] %v7011_v42  ;;  %v7023_v15 = vld [vmem:[#allocation2 + $0x150] sm:$0xff]  ;;  %v7026_v29 = vld [vmem:[#allocation2 + $0x158] sm:$0xff] }
 0x787   :  { %2301 = vmatpush.msrb.mxu2 %v7011_v42  ;;  %9297 = vst [vmem:[#allocation49_spill] sm:$0xff] %v7014_v11  ;;  %2321 = vmatpush.msra.mxu3 %v7014_v11  ;;  %v7029_v42 = vld [vmem:[#allocation2 + $0x120] sm:$0xff]  ;;  %v7032_v11 = vld [vmem:[#allocation2 + $0x128] sm:$0xff] }
 0x788   :  { %9298 = vst [vmem:[#allocation34_spill] sm:$0xff] %v7017_v50  ;;  %2262 = vmatpush.msra.mxu0 %v7017_v50  ;;  %2282 = vmatpush.msra.mxu1 %v7020_v19  ;;  %v7035_v50 = vld [vmem:[#allocation2 + $0x130] sm:$0xff] }
 0x789   :  { %9299 = vst [vmem:[#allocation101_spill] sm:$0xff] %v7020_v19  ;;  %2302 = vmatpush.msrb.mxu2 %v7023_v15  ;;  %2322 = vmatpush.msra.mxu3 %v7026_v29  ;;  %v7038_v19 = vld [vmem:[#allocation2 + $0x138] sm:$0xff] }
 0x78a   :  { %9300 = vst [vmem:[#allocation109_spill] sm:$0xff] %v7023_v15  ;;  %2263 = vmatpush.msra.mxu0 %v7029_v42  ;;  %2283 = vmatpush.msra.mxu1 %v7032_v11  ;;  %v7041_v15 = vld [vmem:[#allocation2 + $0x100] sm:$0xff] }
 0x78b   :  { %9301 = vst [vmem:[#allocation107_spill] sm:$0xff] %v7026_v29  ;;  %2303 = vmatpush.msrb.mxu2 %v7035_v50  ;;  %2323 = vmatpush.msra.mxu3 %v7038_v19  ;;  %v7044_v29 = vld [vmem:[#allocation2 + $0x108] sm:$0xff] }
 0x78c   :  { %9302 = vst [vmem:[#allocation106_spill] sm:$0xff] %v7029_v42  ;;  %2264 = vmatpush.msra.mxu0 %v7041_v15  ;;  %2284 = vmatpush.msra.mxu1 %v7044_v29  ;;  %v7047_v42 = vld [vmem:[#allocation2 + $0x110] sm:$0xff] }
 0x78d   :  { %9303 = vst [vmem:[#allocation52_spill] sm:$0xff] %v7032_v11  ;;  %2304 = vmatpush.msrb.mxu2 %v7047_v42  ;;  %v7050_v11 = vld [vmem:[#allocation2 + $0x118] sm:$0xff] }
 0x78e   :  { %9304 = vst [vmem:[#allocation82_spill] sm:$0xff] %v7035_v50  ;;  %2324 = vmatpush.msra.mxu3 %v7050_v11  ;;  %v7053_v50 = vld [vmem:[#allocation2 + $0xe0] sm:$0xff] }
 0x78f   :  { %9305 = vst [vmem:[#allocation53_spill] sm:$0xff] %v7038_v19  ;;  %2265 = vmatpush.msra.mxu0 %v7053_v50  ;;  %v7056_v19 = vld [vmem:[#allocation2 + $0xe8] sm:$0xff] }
 0x790   :  { %9306 = vst [vmem:[#allocation37_spill] sm:$0xff] %v7041_v15  ;;  %2285 = vmatpush.msra.mxu1 %v7056_v19  ;;  %v7059_v15 = vld [vmem:[#allocation2 + $0xf0] sm:$0xff] }
 0x791   :  { %9307 = vst [vmem:[#allocation56_spill] sm:$0xff] %v7044_v29  ;;  %2305 = vmatpush.msrb.mxu2 %v7059_v15  ;;  %v7062_v29 = vld [vmem:[#allocation2 + $0xf8] sm:$0xff] }
 0x792   :  { %9308 = vst [vmem:[#allocation85_spill] sm:$0xff] %v7047_v42  ;;  %2325 = vmatpush.msra.mxu3 %v7062_v29  ;;  %v7065_v42 = vld [vmem:[#allocation2 + $0xc0] sm:$0xff] }
 0x793   :  { %9309 = vst [vmem:[#allocation57_spill] sm:$0xff] %v7050_v11  ;;  %2266 = vmatpush.msra.mxu0 %v7065_v42  ;;  %v7068_v11 = vld [vmem:[#allocation2 + $0xc8] sm:$0xff] }
 0x794   :  { %9310 = vst [vmem:[#allocation40_spill] sm:$0xff] %v7053_v50  ;;  %2286 = vmatpush.msra.mxu1 %v7068_v11  ;;  %v7071_v50 = vld [vmem:[#allocation2 + $0xd0] sm:$0xff] }
 0x795   :  { %9311 = vst [vmem:[#allocation60_spill] sm:$0xff] %v7056_v19  ;;  %2306 = vmatpush.msrb.mxu2 %v7071_v50  ;;  %v7074_v19 = vld [vmem:[#allocation2 + $0xd8] sm:$0xff] }
 0x796   :  { %9312 = vst [vmem:[#allocation88_spill] sm:$0xff] %v7059_v15  ;;  %2326 = vmatpush.msra.mxu3 %v7074_v19  ;;  %v7077_v15 = vld [vmem:[#allocation2 + $0xa0] sm:$0xff] }
 0x797   :  { %9313 = vst [vmem:[#allocation61_spill] sm:$0xff] %v7062_v29  ;;  %2267 = vmatpush.msra.mxu0 %v7077_v15  ;;  %v7080_v29 = vld [vmem:[#allocation2 + $0xa8] sm:$0xff] }
 0x798   :  { %9314 = vst [vmem:[#allocation43_spill] sm:$0xff] %v7065_v42  ;;  %2287 = vmatpush.msra.mxu1 %v7080_v29  ;;  %v7083_v42 = vld [vmem:[#allocation2 + $0xb0] sm:$0xff] }
 0x799   :  { %9315 = vst [vmem:[#allocation64_spill] sm:$0xff] %v7068_v11  ;;  %2307 = vmatpush.msrb.mxu2 %v7083_v42  ;;  %v7086_v11 = vld [vmem:[#allocation2 + $0xb8] sm:$0xff] }
 0x79a   :  { %9316 = vst [vmem:[#allocation90_spill] sm:$0xff] %v7071_v50  ;;  %2327 = vmatpush.msra.mxu3 %v7086_v11  ;;  %v7089_v50 = vld [vmem:[#allocation2 + $0x80] sm:$0xff] }
 0x79b   :  { %9317 = vst [vmem:[#allocation66_spill] sm:$0xff] %v7074_v19  ;;  %2268 = vmatpush.msra.mxu0 %v7089_v50  ;;  %v7092_v19 = vld [vmem:[#allocation2 + $0x88] sm:$0xff] }
 0x79c   :  { %9318 = vst [vmem:[#allocation47_spill] sm:$0xff] %v7077_v15  ;;  %2288 = vmatpush.msra.mxu1 %v7092_v19  ;;  %v7095_v15 = vld [vmem:[#allocation2 + $0x90] sm:$0xff] }
 0x79d   :  { %9319 = vst [vmem:[#allocation68_spill] sm:$0xff] %v7080_v29  ;;  %2308 = vmatpush.msrb.mxu2 %v7095_v15  ;;  %v7098_v29 = vld [vmem:[#allocation2 + $0x98] sm:$0xff] }
 0x79e   :  { %9320 = vst [vmem:[#allocation91_spill] sm:$0xff] %v7083_v42  ;;  %2328 = vmatpush.msra.mxu3 %v7098_v29  ;;  %v7101_v42 = vld [vmem:[#allocation2 + $0x60] sm:$0xff] }
 0x79f   :  { %9321 = vst [vmem:[#allocation70_spill] sm:$0xff] %v7086_v11  ;;  %2269 = vmatpush.msra.mxu0 %v7101_v42  ;;  %v7104_v11 = vld [vmem:[#allocation2 + $0x68] sm:$0xff] }
 0x7a0   :  { %9322 = vst [vmem:[#allocation51_spill] sm:$0xff] %v7089_v50  ;;  %2289 = vmatpush.msra.mxu1 %v7104_v11  ;;  %v7107_v50 = vld [vmem:[#allocation2 + $0x70] sm:$0xff] }
 0x7a1   :  { %9323 = vst [vmem:[#allocation72_spill] sm:$0xff] %v7092_v19  ;;  %2309 = vmatpush.msrb.mxu2 %v7107_v50  ;;  %v7110_v19 = vld [vmem:[#allocation2 + $0x78] sm:$0xff] }
 0x7a2   :  { %9324 = vst [vmem:[#allocation92_spill] sm:$0xff] %v7095_v15  ;;  %2329 = vmatpush.msra.mxu3 %v7110_v19  ;;  %v7113_v15 = vld [vmem:[#allocation2 + $0x40] sm:$0xff] }
 0x7a3   :  { %9325 = vst [vmem:[#allocation74_spill] sm:$0xff] %v7098_v29  ;;  %2270 = vmatpush.msra.mxu0 %v7113_v15  ;;  %v7116_v29 = vld [vmem:[#allocation2 + $0x48] sm:$0xff] }
 0x7a4   :  { %9326 = vst [vmem:[#allocation55_spill] sm:$0xff] %v7101_v42  ;;  %2290 = vmatpush.msra.mxu1 %v7116_v29  ;;  %v7119_v42 = vld [vmem:[#allocation2 + $0x50] sm:$0xff] }
 0x7a5   :  { %9327 = vst [vmem:[#allocation75_spill] sm:$0xff] %v7104_v11  ;;  %2310 = vmatpush.msrb.mxu2 %v7119_v42  ;;  %v7122_v11 = vld [vmem:[#allocation2 + $0x58] sm:$0xff] }
 0x7a6   :  { %9328 = vst [vmem:[#allocation93_spill] sm:$0xff] %v7107_v50  ;;  %2330 = vmatpush.msra.mxu3 %v7122_v11  ;;  %v7125_v50 = vld [vmem:[#allocation2 + $0x20] sm:$0xff] }
 0x7a7   :  { %9329 = vst [vmem:[#allocation77_spill] sm:$0xff] %v7110_v19  ;;  %2271 = vmatpush.msra.mxu0 %v7125_v50  ;;  %v7128_v19 = vld [vmem:[#allocation2 + $0x28] sm:$0xff] }
 0x7a8   :  { %9330 = vst [vmem:[#allocation59_spill] sm:$0xff] %v7113_v15  ;;  %2291 = vmatpush.msra.mxu1 %v7128_v19  ;;  %v7131_v15 = vld [vmem:[#allocation2 + $0x30] sm:$0xff] }
 0x7a9   :  { %9331 = vst [vmem:[#allocation78_spill] sm:$0xff] %v7116_v29  ;;  %2311 = vmatpush.msrb.mxu2 %v7131_v15  ;;  %v7134_v29 = vld [vmem:[#allocation2 + $0x38] sm:$0xff] }
 0x7aa   :  { %9332 = vst [vmem:[#allocation94_spill] sm:$0xff] %v7119_v42  ;;  %2331 = vmatpush.msra.mxu3 %v7134_v29  ;;  %v7137_v42 = vld [vmem:[#allocation2] sm:$0xff] }
 0x7ab   :  { %9333 = vst [vmem:[#allocation80_spill] sm:$0xff] %v7122_v11  ;;  %2272 = vmatpush.msra.mxu0 %v7137_v42  ;;  %v7140_v11 = vld [vmem:[#allocation2 + $0x8] sm:$0xff] }
 0x7ac   :  { %9334 = vst [vmem:[#allocation63_spill] sm:$0xff] %v7125_v50  ;;  %2292 = vmatpush.msra.mxu1 %v7140_v11  ;;  %v7143_v50 = vld [vmem:[#allocation2 + $0x10] sm:$0xff] }
 0x7ad   :  { %9335 = vst [vmem:[#allocation81_spill] sm:$0xff] %v7128_v19  ;;  %2312 = vmatpush.msrb.mxu2 %v7143_v50  ;;  %v7146_v19 = vld [vmem:[#allocation2 + $0x18] sm:$0xff] }
 0x7ae   :  { %9336 = vst [vmem:[#allocation95_spill] sm:$0xff] %v7131_v15  ;;  %2332 = vmatpush.msra.mxu3 %v7146_v19  ;;  %v1941_v15 = vadd.f32 %v6925_v18, %v9194_v43  ;;  %v1981_v18 = vadd.f32 %v6931_v40, %v4880_v57 }
 0x7af   :  { %9337 = vst [vmem:[#allocation83_spill] sm:$0xff] %v7134_v29  ;;  %v1921_v29 = vadd.f32 %v6923_v13, %v9195_v41 }
 0x7b0   :  { %9338 = vst [vmem:[#allocation67_spill] sm:$0xff] %v7137_v42 }
 0x7b1   :  { %9339 = vst [vmem:[#allocation84_spill] sm:$0xff] %v7140_v11  ;;  %v1961_v11 = vadd.f32 %v6929_v35, %v4876_v53 }
 0x7b2   :  { %9340 = vst [vmem:[#allocation96_spill] sm:$0xff] %v7143_v50 }
 0x7b3   :  { %9341 = vst [vmem:[#allocation86_spill] sm:$0xff] %v7146_v19 }
 0x7f9   :  { %v2097_v56 = vpop.f32.mrf.mxu0  ;;  %v2117_v42 = vpop.f32.mrf.mxu1 }
 0x7fa   :  { %v2118_v44 = vadd.f32 %v2117_v42, %v1941_v15  ;;  %v2098_v62 = vadd.f32 %v2097_v56, %v1921_v29 }
 0x7fc   :  { %3017 = vtanh.f32 %v2118_v44 }
 0x7fd   :  { %3019 = vtanh.f32 %v2098_v62 }
 0x800   :  { %v2137_v50 = vpop.f32.mrf.mxu2  ;;  %v2157_v19 = vpop.f32.mrf.mxu3 }
 0x801   :  { %v2138_v33 = vadd.f32 %v2137_v50, %v1961_v11  ;;  %v2158_v41 = vadd.f32 %v2157_v19, %v1981_v18  ;;  %v7175_v18 = vld [vmem:[#allocation5 + $0x1f0] sm:$0xff] }
 0x802   :  { %v3018_v4 = vpop.eup %3017 }
 0x803   :  { %3021 = vtanh.f32 %v2138_v33  ;;  %v3020_v43 = vpop.eup %3019  ;;  %v2165_v13 = vmul.f32 %v3018_v4, %v4711_v14 }
 0x804   :  { %v2164_v15 = vmul.f32 %v3020_v43, %v4719_v17  ;;  %3023 = vtanh.f32 %v2158_v41  ;;  %v7169_v41 = vld [vmem:[#allocation5 + $0x1e0] sm:$0xff] }
 0x805   :  { %v2169_v44 = vadd.f32 %v2165_v13, %v4728_v24  ;;  %v7178_v13 = vld [vmem:[#allocation5 + $0x1f8] sm:$0xff] }
 0x806   :  { %v2168_v62 = vadd.f32 %v2164_v15, %v4737_v22  ;;  %v7181_v15 = vld [vmem:[#allocation5 + $0x1c0] sm:$0xff] }
 0x807   :  { %v2172_v29 = vmul.f32 %v2169_v44, %v6658_v34  ;;  %v7172_v34 = vld [vmem:[#allocation5 + $0x1e8] sm:$0xff]  ;;  %v7187_v44 = vld [vmem:[#allocation5 + $0x1d0] sm:$0xff] }
 0x809   :  { %v3022_v56 = vpop.eup %3021 }
 0x80a   :  { %v2166_v35 = vmul.f32 %v3022_v56, %v4731_v32  ;;  %v3024_v40 = vpop.eup %3023  ;;  %v7184_v56 = vld [vmem:[#allocation5 + $0x1c8] sm:$0xff] }
 0x80b   :  { %v2167_v43 = vmul.f32 %v3024_v40, %v4760_v39  ;;  %v7209_v40 = vld [vmem:[#allocation5 + $0x180] sm:$0xff] }
 0x80c   :  { %v2170_v33 = vadd.f32 %v2166_v35, %v4740_v30  ;;  %v7190_v35 = vld [vmem:[#allocation5 + $0x1d8] sm:$0xff]  ;;  %9342 = vst [vmem:[#allocation71_spill] sm:$0xff] %v7209_v40 }
 0x80d   :  { %v2171_v4 = vadd.f32 %v2167_v43, %v4773_v38  ;;  %v7212_v43 = vld [vmem:[#allocation5 + $0x188] sm:$0xff] }
 0x80e   :  { %v2173_v42 = vmul.f32 %v2170_v33, %v2168_v62  ;;  %v7193_v62 = vld [vmem:[#allocation5 + $0x1a0] sm:$0xff]  ;;  %v7196_v33 = vld [vmem:[#allocation5 + $0x1a8] sm:$0xff]  ;;  %9343 = vst [vmem:[#allocation87_spill] sm:$0xff] %v7212_v43 }
 0x810   :  { %v7164_v11 = vadd.f32 %v2173_v42, %v2172_v29  ;;  %v7199_v29 = vld [vmem:[#allocation5 + $0x1b0] sm:$0xff]  ;;  %v7202_v42 = vld [vmem:[#allocation5 + $0x1b8] sm:$0xff] }
 0x812   :  { %3025 = vtanh.f32 %v7164_v11 }
 0x818   :  { %v3026_v50 = vpop.eup %3025 }
 0x819   :  { %v2176_v19 = vmul.f32 %v3026_v50, %v2171_v4  ;;  %v7215_v4 = vld [vmem:[#allocation5 + $0x190] sm:$0xff]  ;;  %v7218_v50 = vld [vmem:[#allocation5 + $0x198] sm:$0xff] }
 0x81a   :  { %9344 = vst [vmem:[#allocation97_spill] sm:$0xff] %v7215_v4 }
 0x81b   :  { %2193 = vmatmul.f32.vlgmr.msrb.gmra.mxu0 %v2176_v19  ;;  %2213 = vmatmul.f32.vlgmr.msrb.gmra.mxu1 %v2176_v19  ;;  %9345 = vst [vmem:[#allocation89_spill] sm:$0xff] %v7218_v50 }
 0x81c   :  { %2233 = vmatmul.f32.vlgmr.msra.gmra.mxu2 %v2176_v19  ;;  %2253 = vmatmul.f32.vlgmr.msrb.gmra.mxu3 %v2176_v19  ;;  %v7221_v19 = vld [vmem:[#allocation5 + $0x160] sm:$0xff] }
 0x81d   :  { %2354 = vmatpush.msrb.mxu0 %v7169_v41  ;;  %2374 = vmatpush.msrb.mxu1 %v7172_v34  ;;  %9346 = vst [vmem:[#allocation159_spill] sm:$0xff] %v7221_v19 }
 0x81e   :  { %2394 = vmatpush.msra.mxu2 %v7175_v18  ;;  %2414 = vmatpush.msrb.mxu3 %v7178_v13 }
 0x81f   :  { %2355 = vmatpush.msrb.mxu0 %v7181_v15  ;;  %2375 = vmatpush.msrb.mxu1 %v7184_v56 }
 0x820   :  { %2395 = vmatpush.msra.mxu2 %v7187_v44  ;;  %2415 = vmatpush.msrb.mxu3 %v7190_v35 }
 0x821   :  { %2356 = vmatpush.msrb.mxu0 %v7193_v62  ;;  %2376 = vmatpush.msrb.mxu1 %v7196_v33 }
 0x822   :  { %2396 = vmatpush.msra.mxu2 %v7199_v29  ;;  %2416 = vmatpush.msrb.mxu3 %v7202_v42 }
 0x823   :  { %2273 = vmatmul.f32.vlgmr.msra.gmra.mxu0 %v6951_v48  ;;  %2293 = vmatmul.f32.vlgmr.msra.gmra.mxu1 %v6951_v48 }
 0x824   :  { %2313 = vmatmul.f32.vlgmr.msrb.gmra.mxu2 %v6951_v48  ;;  %2333 = vmatmul.f32.vlgmr.msra.gmra.mxu3 %v6951_v48  ;;  %v7224_v48 = vld [vmem:[#allocation5 + $0x168] sm:$0xff] }
 0x825   :  { %2357 = vmatpush.msrb.mxu0 %v7209_v40  ;;  %2377 = vmatpush.msrb.mxu1 %v7212_v43  ;;  %9347 = vst [vmem:[#allocation164_spill] sm:$0xff] %v7224_v48  ;;  %v7227_v40 = vld [vmem:[#allocation5 + $0x170] sm:$0xff]  ;;  %v7230_v43 = vld [vmem:[#allocation5 + $0x178] sm:$0xff] }
 0x826   :  { %2397 = vmatpush.msra.mxu2 %v7215_v4  ;;  %2417 = vmatpush.msrb.mxu3 %v7218_v50  ;;  %9348 = vst [vmem:[#allocation187_spill] sm:$0xff] %v7227_v40  ;;  %v7233_v4 = vld [vmem:[#allocation5 + $0x140] sm:$0xff]  ;;  %v7236_v50 = vld [vmem:[#allocation5 + $0x148] sm:$0xff] }
 0x827   :  { %2358 = vmatpush.msrb.mxu0 %v7221_v19  ;;  %2378 = vmatpush.msrb.mxu1 %v7224_v48  ;;  %9349 = vst [vmem:[#allocation119_spill] sm:$0xff] %v7230_v43  ;;  %v7239_v19 = vld [vmem:[#allocation5 + $0x150] sm:$0xff]  ;;  %v7242_v48 = vld [vmem:[#allocation5 + $0x158] sm:$0xff] }
 0x828   :  { %2398 = vmatpush.msra.mxu2 %v7227_v40  ;;  %2418 = vmatpush.msrb.mxu3 %v7230_v43  ;;  %9350 = vst [vmem:[#allocation120_spill] sm:$0xff] %v7233_v4  ;;  %v7245_v40 = vld [vmem:[#allocation5 + $0x120] sm:$0xff]  ;;  %v7248_v43 = vld [vmem:[#allocation5 + $0x128] sm:$0xff] }
 0x829   :  { %2359 = vmatpush.msrb.mxu0 %v7233_v4  ;;  %9351 = vst [vmem:[#allocation121_spill] sm:$0xff] %v7236_v50  ;;  %2379 = vmatpush.msrb.mxu1 %v7236_v50  ;;  %v7251_v4 = vld [vmem:[#allocation5 + $0x130] sm:$0xff]  ;;  %v7254_v50 = vld [vmem:[#allocation5 + $0x138] sm:$0xff] }
 0x82a   :  { %9352 = vst [vmem:[#allocation122_spill] sm:$0xff] %v7239_v19  ;;  %2399 = vmatpush.msra.mxu2 %v7239_v19  ;;  %2419 = vmatpush.msrb.mxu3 %v7242_v48  ;;  %v7257_v19 = vld [vmem:[#allocation5 + $0x100] sm:$0xff] }
 0x82b   :  { %9353 = vst [vmem:[#allocation123_spill] sm:$0xff] %v7242_v48  ;;  %2360 = vmatpush.msrb.mxu0 %v7245_v40  ;;  %2380 = vmatpush.msrb.mxu1 %v7248_v43  ;;  %v7260_v48 = vld [vmem:[#allocation5 + $0x108] sm:$0xff] }
 0x82c   :  { %9354 = vst [vmem:[#allocation124_spill] sm:$0xff] %v7245_v40  ;;  %2400 = vmatpush.msra.mxu2 %v7251_v4  ;;  %2420 = vmatpush.msrb.mxu3 %v7254_v50  ;;  %v7263_v40 = vld [vmem:[#allocation5 + $0x110] sm:$0xff] }
 0x82d   :  { %9355 = vst [vmem:[#allocation126_spill] sm:$0xff] %v7248_v43  ;;  %2361 = vmatpush.msrb.mxu0 %v7257_v19  ;;  %2381 = vmatpush.msrb.mxu1 %v7260_v48  ;;  %v7266_v43 = vld [vmem:[#allocation5 + $0x118] sm:$0xff] }
 0x82e   :  { %9356 = vst [vmem:[#allocation127_spill] sm:$0xff] %v7251_v4  ;;  %2401 = vmatpush.msra.mxu2 %v7263_v40  ;;  %2421 = vmatpush.msrb.mxu3 %v7266_v43  ;;  %v7269_v4 = vld [vmem:[#allocation5 + $0xe0] sm:$0xff] }
 0x82f   :  { %9357 = vst [vmem:[#allocation128_spill] sm:$0xff] %v7254_v50  ;;  %2362 = vmatpush.msrb.mxu0 %v7269_v4  ;;  %v7272_v50 = vld [vmem:[#allocation5 + $0xe8] sm:$0xff] }
 0x830   :  { %9358 = vst [vmem:[#allocation129_spill] sm:$0xff] %v7257_v19  ;;  %2382 = vmatpush.msrb.mxu1 %v7272_v50  ;;  %v7275_v19 = vld [vmem:[#allocation5 + $0xf0] sm:$0xff] }
 0x831   :  { %9359 = vst [vmem:[#allocation130_spill] sm:$0xff] %v7260_v48  ;;  %2402 = vmatpush.msra.mxu2 %v7275_v19  ;;  %v7278_v48 = vld [vmem:[#allocation5 + $0xf8] sm:$0xff] }
 0x832   :  { %9360 = vst [vmem:[#allocation131_spill] sm:$0xff] %v7263_v40  ;;  %2422 = vmatpush.msrb.mxu3 %v7278_v48  ;;  %v7281_v40 = vld [vmem:[#allocation5 + $0xc0] sm:$0xff] }
 0x833   :  { %9361 = vst [vmem:[#allocation132_spill] sm:$0xff] %v7266_v43  ;;  %2363 = vmatpush.msrb.mxu0 %v7281_v40  ;;  %v7284_v43 = vld [vmem:[#allocation5 + $0xc8] sm:$0xff] }
 0x834   :  { %9362 = vst [vmem:[#allocation133_spill] sm:$0xff] %v7269_v4  ;;  %2383 = vmatpush.msrb.mxu1 %v7284_v43  ;;  %v7287_v4 = vld [vmem:[#allocation5 + $0xd0] sm:$0xff] }
 0x835   :  { %9363 = vst [vmem:[#allocation134_spill] sm:$0xff] %v7272_v50  ;;  %2403 = vmatpush.msra.mxu2 %v7287_v4  ;;  %v7290_v50 = vld [vmem:[#allocation5 + $0xd8] sm:$0xff] }
 0x836   :  { %9364 = vst [vmem:[#allocation136_spill] sm:$0xff] %v7275_v19  ;;  %2423 = vmatpush.msrb.mxu3 %v7290_v50  ;;  %v7293_v19 = vld [vmem:[#allocation5 + $0xa0] sm:$0xff] }
 0x837   :  { %9365 = vst [vmem:[#allocation137_spill] sm:$0xff] %v7278_v48  ;;  %2364 = vmatpush.msrb.mxu0 %v7293_v19  ;;  %v7296_v48 = vld [vmem:[#allocation5 + $0xa8] sm:$0xff] }
 0x838   :  { %9366 = vst [vmem:[#allocation138_spill] sm:$0xff] %v7281_v40  ;;  %2384 = vmatpush.msrb.mxu1 %v7296_v48  ;;  %v7299_v40 = vld [vmem:[#allocation5 + $0xb0] sm:$0xff] }
 0x839   :  { %9367 = vst [vmem:[#allocation139_spill] sm:$0xff] %v7284_v43  ;;  %2404 = vmatpush.msra.mxu2 %v7299_v40  ;;  %v7302_v43 = vld [vmem:[#allocation5 + $0xb8] sm:$0xff] }
 0x83a   :  { %9368 = vst [vmem:[#allocation141_spill] sm:$0xff] %v7287_v4  ;;  %2424 = vmatpush.msrb.mxu3 %v7302_v43  ;;  %v7305_v4 = vld [vmem:[#allocation5 + $0x80] sm:$0xff] }
 0x83b   :  { %9369 = vst [vmem:[#allocation143_spill] sm:$0xff] %v7290_v50  ;;  %2365 = vmatpush.msrb.mxu0 %v7305_v4  ;;  %v7308_v50 = vld [vmem:[#allocation5 + $0x88] sm:$0xff] }
 0x83c   :  { %9370 = vst [vmem:[#allocation144_spill] sm:$0xff] %v7293_v19  ;;  %2385 = vmatpush.msrb.mxu1 %v7308_v50  ;;  %v7311_v19 = vld [vmem:[#allocation5 + $0x90] sm:$0xff] }
 0x83d   :  { %9371 = vst [vmem:[#allocation145_spill] sm:$0xff] %v7296_v48  ;;  %2405 = vmatpush.msra.mxu2 %v7311_v19  ;;  %v7314_v48 = vld [vmem:[#allocation5 + $0x98] sm:$0xff] }
 0x83e   :  { %9372 = vst [vmem:[#allocation147_spill] sm:$0xff] %v7299_v40  ;;  %2425 = vmatpush.msrb.mxu3 %v7314_v48  ;;  %v7317_v40 = vld [vmem:[#allocation5 + $0x60] sm:$0xff] }
 0x83f   :  { %9373 = vst [vmem:[#allocation148_spill] sm:$0xff] %v7302_v43  ;;  %2366 = vmatpush.msrb.mxu0 %v7317_v40  ;;  %v7320_v43 = vld [vmem:[#allocation5 + $0x68] sm:$0xff] }
 0x840   :  { %9374 = vst [vmem:[#allocation149_spill] sm:$0xff] %v7305_v4  ;;  %2386 = vmatpush.msrb.mxu1 %v7320_v43  ;;  %v7323_v4 = vld [vmem:[#allocation5 + $0x70] sm:$0xff] }
 0x841   :  { %9375 = vst [vmem:[#allocation150_spill] sm:$0xff] %v7308_v50  ;;  %2406 = vmatpush.msra.mxu2 %v7323_v4  ;;  %v7326_v50 = vld [vmem:[#allocation5 + $0x78] sm:$0xff] }
 0x842   :  { %9376 = vst [vmem:[#allocation151_spill] sm:$0xff] %v7311_v19  ;;  %2426 = vmatpush.msrb.mxu3 %v7326_v50  ;;  %v7329_v19 = vld [vmem:[#allocation5 + $0x40] sm:$0xff] }
 0x843   :  { %9377 = vst [vmem:[#allocation152_spill] sm:$0xff] %v7314_v48  ;;  %2367 = vmatpush.msrb.mxu0 %v7329_v19  ;;  %v7332_v48 = vld [vmem:[#allocation5 + $0x48] sm:$0xff] }
 0x844   :  { %9378 = vst [vmem:[#allocation153_spill] sm:$0xff] %v7317_v40  ;;  %2387 = vmatpush.msrb.mxu1 %v7332_v48  ;;  %v7335_v40 = vld [vmem:[#allocation5 + $0x50] sm:$0xff] }
 0x845   :  { %9379 = vst [vmem:[#allocation154_spill] sm:$0xff] %v7320_v43  ;;  %2407 = vmatpush.msra.mxu2 %v7335_v40  ;;  %v7338_v43 = vld [vmem:[#allocation5 + $0x58] sm:$0xff] }
 0x846   :  { %9380 = vst [vmem:[#allocation155_spill] sm:$0xff] %v7323_v4  ;;  %2427 = vmatpush.msrb.mxu3 %v7338_v43  ;;  %v7341_v4 = vld [vmem:[#allocation5 + $0x20] sm:$0xff] }
 0x847   :  { %9381 = vst [vmem:[#allocation156_spill] sm:$0xff] %v7326_v50  ;;  %2368 = vmatpush.msrb.mxu0 %v7341_v4  ;;  %v7344_v50 = vld [vmem:[#allocation5 + $0x28] sm:$0xff] }
 0x848   :  { %9382 = vst [vmem:[#allocation157_spill] sm:$0xff] %v7329_v19  ;;  %2388 = vmatpush.msrb.mxu1 %v7344_v50  ;;  %v7347_v19 = vld [vmem:[#allocation5 + $0x30] sm:$0xff] }
 0x849   :  { %9383 = vst [vmem:[#allocation158_spill] sm:$0xff] %v7332_v48  ;;  %2408 = vmatpush.msra.mxu2 %v7347_v19  ;;  %v7350_v48 = vld [vmem:[#allocation5 + $0x38] sm:$0xff] }
 0x84a   :  { %9384 = vst [vmem:[#allocation160_spill] sm:$0xff] %v7335_v40  ;;  %2428 = vmatpush.msrb.mxu3 %v7350_v48  ;;  %v7353_v40 = vld [vmem:[#allocation5] sm:$0xff] }
 0x84b   :  { %9385 = vst [vmem:[#allocation161_spill] sm:$0xff] %v7338_v43  ;;  %2369 = vmatpush.msrb.mxu0 %v7353_v40  ;;  %v7356_v43 = vld [vmem:[#allocation5 + $0x8] sm:$0xff] }
 0x84c   :  { %9386 = vst [vmem:[#allocation162_spill] sm:$0xff] %v7341_v4  ;;  %2389 = vmatpush.msrb.mxu1 %v7356_v43  ;;  %v7359_v4 = vld [vmem:[#allocation5 + $0x10] sm:$0xff] }
 0x84d   :  { %9387 = vst [vmem:[#allocation163_spill] sm:$0xff] %v7344_v50  ;;  %2409 = vmatpush.msra.mxu2 %v7359_v4  ;;  %v7362_v50 = vld [vmem:[#allocation5 + $0x18] sm:$0xff]  ;;  %2451 = vmatpush.msra.mxu0 %v6731_v7 }
 0x84e   :  { %2429 = vmatpush.msrb.mxu3 %v7362_v50  ;;  %2471 = vmatpush.msra.mxu1 %v6734_v8  ;;  %v9388_v7 = vld [vmem:[#allocation182_spill] sm:$0xff]  ;;  %v9389_v8 = vld [vmem:[#allocation183_spill] sm:$0xff] }
 0x84f   :  { %2491 = vmatpush.msrb.mxu2 %v6737_v3  ;;  %2452 = vmatpush.msra.mxu0 %v6743_v37  ;;  %v9390_v3 = vld [vmem:[#allocation184_spill] sm:$0xff]  ;;  %v9392_v37 = vld [vmem:[#allocation99_spill] sm:$0xff] }
 0x850   :  { %2511 = vmatpush.msra.mxu3 %v6740_v54  ;;  %2472 = vmatpush.msra.mxu1 %v6746_v31  ;;  %v9391_v54 = vld [vmem:[#allocation186_spill] sm:$0xff]  ;;  %v9393_v31 = vld [vmem:[#allocation105_spill] sm:$0xff] }
 0x851   :  { %2492 = vmatpush.msrb.mxu2 %v6749_v10  ;;  %2453 = vmatpush.msra.mxu0 %v6755_v26  ;;  %v9394_v10 = vld [vmem:[#allocation104_spill] sm:$0xff]  ;;  %v9396_v26 = vld [vmem:[#allocation111_spill] sm:$0xff] }
 0x852   :  { %2512 = vmatpush.msra.mxu3 %v6752_v49  ;;  %2473 = vmatpush.msra.mxu1 %v6758_v45  ;;  %v9395_v49 = vld [vmem:[#allocation113_spill] sm:$0xff]  ;;  %v9397_v45 = vld [vmem:[#allocation110_spill] sm:$0xff] }
 0x853   :  { %2493 = vmatpush.msrb.mxu2 %v6761_v63  ;;  %2454 = vmatpush.msra.mxu0 %v6767_v1  ;;  %v9398_v63 = vld [vmem:[#allocation103_spill] sm:$0xff]  ;;  %v9400_v1 = vld [vmem:[#allocation16_spill] sm:$0xff] }
 0x854   :  { %2513 = vmatpush.msra.mxu3 %v6764_v55  ;;  %2474 = vmatpush.msra.mxu1 %v6770_v23  ;;  %v9399_v55 = vld [vmem:[#allocation102_spill] sm:$0xff]  ;;  %v9401_v23 = vld [vmem:[#allocation21_spill] sm:$0xff] }
 0x855   :  { %2494 = vmatpush.msrb.mxu2 %v6773_v52  ;;  %2455 = vmatpush.msra.mxu0 %v6779_v46  ;;  %v9402_v52 = vld [vmem:[#allocation50_spill] sm:$0xff]  ;;  %v9404_v46 = vld [vmem:[#allocation17_spill] sm:$0xff] }
 0x856   :  { %2514 = vmatpush.msra.mxu3 %v6776_v25  ;;  %2475 = vmatpush.msra.mxu1 %v6782_v51  ;;  %v9403_v25 = vld [vmem:[#allocation25_spill] sm:$0xff]  ;;  %v9405_v51 = vld [vmem:[#allocation24_spill] sm:$0xff] }
 0x857   :  { %2495 = vmatpush.msrb.mxu2 %v6785_v47  ;;  %2456 = vmatpush.msra.mxu0 %v6791_v6  ;;  %v9406_v47 = vld [vmem:[#allocation54_spill] sm:$0xff] }
 0x858   :  { %2515 = vmatpush.msra.mxu3 %v6788_v0  ;;  %2476 = vmatpush.msra.mxu1 %v6794_v20  ;;  %v9407_v0 = vld [vmem:[#allocation28_spill] sm:$0xff]  ;;  %v9408_v6 = vld [vmem:[#allocation18_spill] sm:$0xff]  ;;  %v9409_v20 = vld [vmem:[#allocation27_spill] sm:$0xff] }
 0x859   :  { %2496 = vmatpush.msrb.mxu2 %v6797_v59  ;;  %2457 = vmatpush.msra.mxu0 %v6803_v12  ;;  %v9410_v59 = vld [vmem:[#allocation58_spill] sm:$0xff]  ;;  %v9412_v12 = vld [vmem:[#allocation19_spill] sm:$0xff] }
 0x85a   :  { %2516 = vmatpush.msra.mxu3 %v6800_v28  ;;  %2477 = vmatpush.msra.mxu1 %v6806_v27  ;;  %v9411_v28 = vld [vmem:[#allocation31_spill] sm:$0xff]  ;;  %v9413_v27 = vld [vmem:[#allocation30_spill] sm:$0xff] }
 0x85b   :  { %2497 = vmatpush.msrb.mxu2 %v6809_v58  ;;  %2458 = vmatpush.msra.mxu0 %v9389_v8  ;;  %v9414_v58 = vld [vmem:[#allocation62_spill] sm:$0xff]  ;;  %v9416_v8 = vld [vmem:[#allocation20_spill] sm:$0xff] }
 0x85c   :  { %2517 = vmatpush.msra.mxu3 %v9388_v7  ;;  %2478 = vmatpush.msra.mxu1 %v9390_v3  ;;  %v9415_v7 = vld [vmem:[#allocation33_spill] sm:$0xff]  ;;  %v9417_v3 = vld [vmem:[#allocation35_spill] sm:$0xff] }
 0x85d   :  { %2498 = vmatpush.msrb.mxu2 %v9391_v54  ;;  %2459 = vmatpush.msra.mxu0 %v9393_v31  ;;  %v9418_v54 = vld [vmem:[#allocation65_spill] sm:$0xff]  ;;  %v9420_v31 = vld [vmem:[#allocation23_spill] sm:$0xff] }
 0x85e   :  { %2518 = vmatpush.msra.mxu3 %v9392_v37  ;;  %2479 = vmatpush.msra.mxu1 %v9394_v10  ;;  %v9419_v37 = vld [vmem:[#allocation36_spill] sm:$0xff]  ;;  %v9421_v10 = vld [vmem:[#allocation38_spill] sm:$0xff] }
 0x85f   :  { %2499 = vmatpush.msrb.mxu2 %v9395_v49  ;;  %2460 = vmatpush.msra.mxu0 %v9397_v45  ;;  %v9422_v49 = vld [vmem:[#allocation69_spill] sm:$0xff]  ;;  %v9424_v45 = vld [vmem:[#allocation26_spill] sm:$0xff] }
 0x860   :  { %2519 = vmatpush.msra.mxu3 %v9396_v26  ;;  %2480 = vmatpush.msra.mxu1 %v9398_v63  ;;  %v9423_v26 = vld [vmem:[#allocation39_spill] sm:$0xff] }
 0x861   :  { %2500 = vmatpush.msrb.mxu2 %v9399_v55  ;;  %2461 = vmatpush.msra.mxu0 %v9401_v23  ;;  %v9426_v23 = vld [vmem:[#allocation116_spill] sm:$0xff] }
 0x862   :  { %2520 = vmatpush.msra.mxu3 %v9400_v1  ;;  %2481 = vmatpush.msra.mxu1 %v9402_v52  ;;  %v9425_v1 = vld [vmem:[#allocation176_spill] sm:$0xff] }
 0x863   :  { %2501 = vmatpush.msrb.mxu2 %v9403_v25  ;;  %2462 = vmatpush.msra.mxu0 %v9405_v51  ;;  %v416_v52 = vadd.f32 %v9426_v23, %v9425_v1  ;;  %v9427_v51 = vld [vmem:[#allocation185_spill] sm:$0xff] }
 0x864   :  { %2521 = vmatpush.msra.mxu3 %v9404_v46  ;;  %2482 = vmatpush.msra.mxu1 %v9406_v47  ;;  %v9428_v47 = vld [vmem:[#allocation98_spill] sm:$0xff] }
 0x865   :  { %2502 = vmatpush.msrb.mxu2 %v9407_v0  ;;  %2463 = vmatpush.msra.mxu0 %v9409_v20  ;;  %v375_v0 = vadd.f32 %v9428_v47, %v9427_v51 }
 0x866   :  { %2522 = vmatpush.msra.mxu3 %v9408_v6  ;;  %2483 = vmatpush.msra.mxu1 %v9410_v59 }
 0x867   :  { %2503 = vmatpush.msrb.mxu2 %v9411_v28  ;;  %2464 = vmatpush.msra.mxu0 %v9413_v27 }
 0x868   :  { %2523 = vmatpush.msra.mxu3 %v9412_v12  ;;  %2484 = vmatpush.msra.mxu1 %v9414_v58  ;;  %v9429_v12 = vld [vmem:[#allocation146_spill] sm:$0xff] }
 0x869   :  { %2504 = vmatpush.msrb.mxu2 %v9415_v7  ;;  %2465 = vmatpush.msra.mxu0 %v9417_v3  ;;  %v457_v27 = vadd.f32 %v9429_v12, %v4688_v2 }
 0x86a   :  { %2524 = vmatpush.msra.mxu3 %v9416_v8  ;;  %2485 = vmatpush.msra.mxu1 %v9418_v54  ;;  %v9430_v54 = vld [vmem:[#allocation142_spill] sm:$0xff] }
 0x86b   :  { %2505 = vmatpush.msrb.mxu2 %v9419_v37  ;;  %2466 = vmatpush.msra.mxu0 %v9421_v10  ;;  %v498_v37 = vadd.f32 %v9430_v54, %v4702_v9  ;;  %v9434_v54 = vld [vmem:[#allocation29_spill] sm:$0xff] }
 0x86c   :  { %2525 = vmatpush.msra.mxu3 %v9420_v31  ;;  %2486 = vmatpush.msra.mxu1 %v9422_v49 }
 0x86d   :  { %2506 = vmatpush.msrb.mxu2 %v9423_v26 }
 0x86e   :  { %2526 = vmatpush.msra.mxu3 %v9424_v45 }
 0x898   :  { %v7429_v63 = vpop.f32.mrf.mxu0  ;;  %v7431_v55 = vpop.f32.mrf.mxu1 }
 0x89f   :  { %v7435_v25 = vpop.f32.mrf.mxu2  ;;  %v7437_v46 = vpop.f32.mrf.mxu3 }
 0x8a0   :  { %v2274_v6 = vpop.f32.mrf.mxu0  ;;  %v2294_v20 = vpop.f32.mrf.mxu1 }
 0x8a1   :  { %v2295_v59 = vadd.f32 %v2294_v20, %v416_v52  ;;  %v2275_v28 = vadd.f32 %v2274_v6, %v375_v0 }
 0x8a3   :  { %3027 = vtanh.f32 %v2295_v59 }
 0x8a4   :  { %3029 = vtanh.f32 %v2275_v28 }
 0x8a7   :  { %v2314_v58 = vpop.f32.mrf.mxu2  ;;  %v2334_v3 = vpop.f32.mrf.mxu3 }
 0x8a8   :  { %v2315_v7 = vadd.f32 %v2314_v58, %v457_v27  ;;  %v2335_v49 = vadd.f32 %v2334_v3, %v498_v37  ;;  %v9433_v3 = vld [vmem:[#allocation42_spill] sm:$0xff]  ;;  %v9435_v37 = vld [vmem:[#allocation44_spill] sm:$0xff] }
 0x8a9   :  { %v3028_v8 = vpop.eup %3027 }
 0x8aa   :  { %3031 = vtanh.f32 %v2315_v7  ;;  %v3030_v31 = vpop.eup %3029  ;;  %v2342_v10 = vmul.f32 %v3028_v8, %v4711_v14  ;;  %v9432_v8 = vld [vmem:[#allocation73_spill] sm:$0xff] }
 0x8ab   :  { %v2341_v26 = vmul.f32 %v3030_v31, %v4719_v17  ;;  %3033 = vtanh.f32 %v2335_v49  ;;  %v9436_v31 = vld [vmem:[#allocation76_spill] sm:$0xff]  ;;  %v9443_v49 = vld [vmem:[#allocation115_spill] sm:$0xff] }
 0x8ac   :  { %v2346_v23 = vadd.f32 %v2342_v10, %v4728_v24  ;;  %v9442_v10 = vld [vmem:[#allocation117_spill] sm:$0xff] }
 0x8ad   :  { %v2345_v47 = vadd.f32 %v2341_v26, %v4737_v22  ;;  %v9444_v26 = vld [vmem:[#allocation114_spill] sm:$0xff] }
 0x8ae   :  { %v2349_v6 = vmul.f32 %v2346_v23, %v6946_v16  ;;  %v9431_v16 = vld [vmem:[#allocation41_spill] sm:$0xff]  ;;  %v9446_v23 = vld [vmem:[#allocation34_spill] sm:$0xff] }
 0x8b0   :  { %v3032_v45 = vpop.eup %3031 }
 0x8b1   :  { %v2343_v52 = vmul.f32 %v3032_v45, %v4731_v32  ;;  %v3034_v59 = vpop.eup %3033  ;;  %v9445_v45 = vld [vmem:[#allocation49_spill] sm:$0xff] }
 0x8b2   :  { %v2344_v12 = vmul.f32 %v3034_v59, %v4760_v39  ;;  %v9452_v59 = vld [vmem:[#allocation82_spill] sm:$0xff] }
 0x8b3   :  { %v2347_v0 = vadd.f32 %v2343_v52, %v4740_v30  ;;  %v9447_v52 = vld [vmem:[#allocation101_spill] sm:$0xff] }
 0x8b4   :  { %v2348_v27 = vadd.f32 %v2344_v12, %v4773_v38  ;;  %v9453_v12 = vld [vmem:[#allocation53_spill] sm:$0xff] }
 0x8b5   :  { %v2350_v20 = vmul.f32 %v2347_v0, %v2345_v47  ;;  %v9448_v47 = vld [vmem:[#allocation109_spill] sm:$0xff]  ;;  %v9449_v0 = vld [vmem:[#allocation107_spill] sm:$0xff] }
 0x8b7   :  { %v7452_v28 = vadd.f32 %v2350_v20, %v2349_v6  ;;  %v9450_v6 = vld [vmem:[#allocation106_spill] sm:$0xff]  ;;  %v9451_v20 = vld [vmem:[#allocation52_spill] sm:$0xff] }
 0x8b9   :  { %3035 = vtanh.f32 %v7452_v28 }
 0x8bf   :  { %v3036_v58 = vpop.eup %3035 }
 0x8c0   :  { %v7457_v7 = vmul.f32 %v3036_v58, %v2348_v27  ;;  %v9454_v27 = vld [vmem:[#allocation37_spill] sm:$0xff]  ;;  %v9455_v58 = vld [vmem:[#allocation56_spill] sm:$0xff] }
 0x8c2   :  { %2370 = vmatmul.f32.vlgmr.msrb.gmra.mxu0 %v7457_v7  ;;  %2390 = vmatmul.f32.vlgmr.msrb.gmra.mxu1 %v7457_v7 }
 0x8c3   :  { %2410 = vmatmul.f32.vlgmr.msra.gmra.mxu2 %v7457_v7  ;;  %2430 = vmatmul.f32.vlgmr.msrb.gmra.mxu3 %v7457_v7 }
 0x8c4   :  { %2531 = vmatpush.msrb.mxu0 %v6957_v5  ;;  %2551 = vmatpush.msrb.mxu1 %v6960_v60  ;;  %v9437_v5 = vld [vmem:[#allocation45_spill] sm:$0xff]  ;;  %v9438_v60 = vld [vmem:[#allocation32_spill] sm:$0xff] }
 0x8c5   :  { %2571 = vmatpush.msra.mxu2 %v6963_v21  ;;  %2591 = vmatpush.msrb.mxu3 %v6966_v61  ;;  %v9439_v21 = vld [vmem:[#allocation48_spill] sm:$0xff]  ;;  %v9440_v61 = vld [vmem:[#allocation79_spill] sm:$0xff] }
 0x8c6   :  { %2532 = vmatpush.msrb.mxu0 %v6969_v36  ;;  %2552 = vmatpush.msrb.mxu1 %v9431_v16  ;;  %v9441_v36 = vld [vmem:[#allocation108_spill] sm:$0xff]  ;;  %v9456_v16 = vld [vmem:[#allocation85_spill] sm:$0xff] }
 0x8c7   :  { %2572 = vmatpush.msra.mxu2 %v9432_v8  ;;  %2592 = vmatpush.msrb.mxu3 %v9433_v3  ;;  %v9457_v8 = vld [vmem:[#allocation57_spill] sm:$0xff]  ;;  %v9458_v3 = vld [vmem:[#allocation40_spill] sm:$0xff] }
 0x8c8   :  { %2533 = vmatpush.msrb.mxu0 %v9434_v54  ;;  %2553 = vmatpush.msrb.mxu1 %v9435_v37  ;;  %v9459_v54 = vld [vmem:[#allocation60_spill] sm:$0xff] }
 0x8c9   :  { %2573 = vmatpush.msra.mxu2 %v9436_v31  ;;  %2593 = vmatpush.msrb.mxu3 %v9437_v5  ;;  %v9460_v37 = vld [vmem:[#allocation88_spill] sm:$0xff]  ;;  %v9461_v31 = vld [vmem:[#allocation61_spill] sm:$0xff]  ;;  %v9462_v5 = vld [vmem:[#allocation43_spill] sm:$0xff] }
 0x8ca   :  { %2534 = vmatpush.msrb.mxu0 %v9438_v60  ;;  %2554 = vmatpush.msrb.mxu1 %v9439_v21  ;;  %v9463_v60 = vld [vmem:[#allocation64_spill] sm:$0xff]  ;;  %v9464_v21 = vld [vmem:[#allocation90_spill] sm:$0xff] }
 0x8cb   :  { %2574 = vmatpush.msra.mxu2 %v9440_v61  ;;  %2594 = vmatpush.msrb.mxu3 %v9441_v36  ;;  %v9465_v61 = vld [vmem:[#allocation66_spill] sm:$0xff]  ;;  %v9466_v36 = vld [vmem:[#allocation47_spill] sm:$0xff] }
 0x8cc   :  { %2535 = vmatpush.msrb.mxu0 %v9442_v10  ;;  %2555 = vmatpush.msrb.mxu1 %v9443_v49  ;;  %v9467_v10 = vld [vmem:[#allocation68_spill] sm:$0xff]  ;;  %v9468_v49 = vld [vmem:[#allocation91_spill] sm:$0xff] }
 0x8cd   :  { %2575 = vmatpush.msra.mxu2 %v9444_v26  ;;  %2595 = vmatpush.msrb.mxu3 %v9445_v45  ;;  %v9469_v26 = vld [vmem:[#allocation70_spill] sm:$0xff]  ;;  %v9470_v45 = vld [vmem:[#allocation51_spill] sm:$0xff] }
 0x8ce   :  { %2536 = vmatpush.msrb.mxu0 %v9446_v23  ;;  %2556 = vmatpush.msrb.mxu1 %v9447_v52  ;;  %v9471_v23 = vld [vmem:[#allocation72_spill] sm:$0xff] }
 0x8cf   :  { %2576 = vmatpush.msra.mxu2 %v9448_v47  ;;  %2596 = vmatpush.msrb.mxu3 %v9449_v0  ;;  %v9472_v52 = vld [vmem:[#allocation92_spill] sm:$0xff]  ;;  %v9473_v47 = vld [vmem:[#allocation74_spill] sm:$0xff]  ;;  %v9474_v0 = vld [vmem:[#allocation55_spill] sm:$0xff] }
 0x8d0   :  { %2537 = vmatpush.msrb.mxu0 %v9450_v6  ;;  %2557 = vmatpush.msrb.mxu1 %v9451_v20  ;;  %v9475_v6 = vld [vmem:[#allocation75_spill] sm:$0xff]  ;;  %v9476_v20 = vld [vmem:[#allocation93_spill] sm:$0xff] }
 0x8d1   :  { %2577 = vmatpush.msra.mxu2 %v9452_v59  ;;  %2597 = vmatpush.msrb.mxu3 %v9453_v12  ;;  %v9477_v59 = vld [vmem:[#allocation77_spill] sm:$0xff]  ;;  %v9478_v12 = vld [vmem:[#allocation59_spill] sm:$0xff] }
 0x8d2   :  { %2538 = vmatpush.msrb.mxu0 %v9454_v27  ;;  %2558 = vmatpush.msrb.mxu1 %v9455_v58  ;;  %v9479_v27 = vld [vmem:[#allocation78_spill] sm:$0xff] }
 0x8d3   :  { %2578 = vmatpush.msra.mxu2 %v9456_v16  ;;  %2598 = vmatpush.msrb.mxu3 %v9457_v8  ;;  %v9480_v58 = vld [vmem:[#allocation94_spill] sm:$0xff]  ;;  %v9481_v16 = vld [vmem:[#allocation80_spill] sm:$0xff]  ;;  %v9482_v8 = vld [vmem:[#allocation63_spill] sm:$0xff] }
 0x8d4   :  { %2539 = vmatpush.msrb.mxu0 %v9458_v3  ;;  %2559 = vmatpush.msrb.mxu1 %v9459_v54  ;;  %v9483_v3 = vld [vmem:[#allocation81_spill] sm:$0xff]  ;;  %v9484_v54 = vld [vmem:[#allocation95_spill] sm:$0xff] }
 0x8d5   :  { %2579 = vmatpush.msra.mxu2 %v9460_v37  ;;  %2599 = vmatpush.msrb.mxu3 %v9461_v31  ;;  %v9485_v37 = vld [vmem:[#allocation83_spill] sm:$0xff] }
 0x8d6   :  { %2540 = vmatpush.msrb.mxu0 %v9462_v5  ;;  %2560 = vmatpush.msrb.mxu1 %v9463_v60  ;;  %v9486_v31 = vld [vmem:[#allocation67_spill] sm:$0xff]  ;;  %v9487_v5 = vld [vmem:[#allocation84_spill] sm:$0xff] }
 0x8d7   :  { %2580 = vmatpush.msra.mxu2 %v9464_v21  ;;  %2600 = vmatpush.msrb.mxu3 %v9465_v61  ;;  %v9488_v60 = vld [vmem:[#allocation96_spill] sm:$0xff]  ;;  %v9489_v21 = vld [vmem:[#allocation86_spill] sm:$0xff] }
 0x8d8   :  { %2541 = vmatpush.msrb.mxu0 %v9466_v36  ;;  %2561 = vmatpush.msrb.mxu1 %v9467_v10  ;;  %v9490_v61 = vld [vmem:[#allocation46_spill] sm:$0xff] }
 0x8d9   :  { %2581 = vmatpush.msra.mxu2 %v9468_v49  ;;  %2601 = vmatpush.msrb.mxu3 %v9469_v26  ;;  %v2215_v36 = vadd.f32 %v7431_v55, %v9490_v61  ;;  %v9491_v10 = vld [vmem:[#allocation22_spill] sm:$0xff]  ;;  %v2255_v55 = vadd.f32 %v7437_v46, %v4880_v57 }
 0x8da   :  { %2542 = vmatpush.msrb.mxu0 %v9470_v45  ;;  %2562 = vmatpush.msrb.mxu1 %v9471_v23  ;;  %v2195_v49 = vadd.f32 %v7429_v63, %v9491_v10 }
 0x8db   :  { %2582 = vmatpush.msra.mxu2 %v9472_v52  ;;  %2602 = vmatpush.msrb.mxu3 %v9473_v47  ;;  %v2235_v47 = vadd.f32 %v7435_v25, %v4876_v53 }
 0x8dc   :  { %2543 = vmatpush.msrb.mxu0 %v9474_v0  ;;  %2563 = vmatpush.msrb.mxu1 %v9475_v6 }
 0x8dd   :  { %2583 = vmatpush.msra.mxu2 %v9476_v20  ;;  %2603 = vmatpush.msrb.mxu3 %v9477_v59 }
 0x8de   :  { %2544 = vmatpush.msrb.mxu0 %v9478_v12  ;;  %2564 = vmatpush.msrb.mxu1 %v9479_v27 }
 0x8df   :  { %2584 = vmatpush.msra.mxu2 %v9480_v58  ;;  %2604 = vmatpush.msrb.mxu3 %v9481_v16 }
 0x8e0   :  { %2545 = vmatpush.msrb.mxu0 %v9482_v8  ;;  %2565 = vmatpush.msrb.mxu1 %v9483_v3 }
 0x8e1   :  { %2585 = vmatpush.msra.mxu2 %v9484_v54  ;;  %2605 = vmatpush.msrb.mxu3 %v9485_v37 }
 0x8e2   :  { %2546 = vmatpush.msrb.mxu0 %v9486_v31  ;;  %2566 = vmatpush.msrb.mxu1 %v9487_v5 }
 0x8e3   :  { %2586 = vmatpush.msra.mxu2 %v9488_v60  ;;  %2606 = vmatpush.msrb.mxu3 %v9489_v21 }
 0x93f   :  { %v2371_v26 = vpop.f32.mrf.mxu0  ;;  %v2391_v45 = vpop.f32.mrf.mxu1 }
 0x940   :  { %v2392_v23 = vadd.f32 %v2391_v45, %v2215_v36  ;;  %v2372_v52 = vadd.f32 %v2371_v26, %v2195_v49  ;;  %v9506_v26 = vld [vmem:[#allocation127_spill] sm:$0xff]  ;;  %v9507_v45 = vld [vmem:[#allocation128_spill] sm:$0xff] }
 0x942   :  { %3037 = vtanh.f32 %v2392_v23  ;;  %v9508_v23 = vld [vmem:[#allocation129_spill] sm:$0xff] }
 0x943   :  { %3039 = vtanh.f32 %v2372_v52  ;;  %v9509_v52 = vld [vmem:[#allocation130_spill] sm:$0xff] }
 0x946   :  { %v2411_v0 = vpop.f32.mrf.mxu2  ;;  %v2431_v59 = vpop.f32.mrf.mxu3 }
 0x947   :  { %v2412_v6 = vadd.f32 %v2411_v0, %v2235_v47  ;;  %v2432_v27 = vadd.f32 %v2431_v59, %v2255_v55  ;;  %v9510_v47 = vld [vmem:[#allocation131_spill] sm:$0xff]  ;;  %v9511_v0 = vld [vmem:[#allocation132_spill] sm:$0xff]  ;;  %v9515_v55 = vld [vmem:[#allocation137_spill] sm:$0xff] }
 0x948   :  { %v3038_v20 = vpop.eup %3037  ;;  %v9514_v59 = vld [vmem:[#allocation136_spill] sm:$0xff] }
 0x949   :  { %3041 = vtanh.f32 %v2412_v6  ;;  %v3040_v12 = vpop.eup %3039  ;;  %v2439_v63 = vmul.f32 %v3038_v20, %v4711_v14  ;;  %v9512_v6 = vld [vmem:[#allocation133_spill] sm:$0xff]  ;;  %v9513_v20 = vld [vmem:[#allocation134_spill] sm:$0xff] }
 0x94a   :  { %v2438_v58 = vmul.f32 %v3040_v12, %v4719_v17  ;;  %3043 = vtanh.f32 %v2432_v27  ;;  %v9516_v12 = vld [vmem:[#allocation138_spill] sm:$0xff]  ;;  %v9518_v27 = vld [vmem:[#allocation141_spill] sm:$0xff] }
 0x94b   :  { %v2443_v8 = vadd.f32 %v2439_v63, %v4728_v24  ;;  %v9517_v63 = vld [vmem:[#allocation139_spill] sm:$0xff] }
 0x94c   :  { %v2442_v3 = vadd.f32 %v2438_v58, %v4737_v22  ;;  %v9519_v58 = vld [vmem:[#allocation143_spill] sm:$0xff] }
 0x94d   :  { %v2446_v37 = vmul.f32 %v2443_v8, %v7164_v11  ;;  %v9492_v11 = vld [vmem:[#allocation71_spill] sm:$0xff]  ;;  %v9521_v8 = vld [vmem:[#allocation145_spill] sm:$0xff] }
 0x94f   :  { %v3042_v16 = vpop.eup %3041 }
 0x950   :  { %v2440_v25 = vmul.f32 %v3042_v16, %v4731_v32  ;;  %v3044_v46 = vpop.eup %3043  ;;  %v9520_v16 = vld [vmem:[#allocation144_spill] sm:$0xff] }
 0x951   :  { %v2441_v60 = vmul.f32 %v3044_v46, %v4760_v39  ;;  %v9527_v46 = vld [vmem:[#allocation152_spill] sm:$0xff] }
 0x952   :  { %v2444_v54 = vadd.f32 %v2440_v25, %v4740_v30  ;;  %v9522_v25 = vld [vmem:[#allocation147_spill] sm:$0xff] }
 0x953   :  { %v2445_v21 = vadd.f32 %v2441_v60, %v4773_v38  ;;  %v9528_v60 = vld [vmem:[#allocation153_spill] sm:$0xff] }
 0x954   :  { %v2447_v31 = vmul.f32 %v2444_v54, %v2442_v3  ;;  %v9523_v3 = vld [vmem:[#allocation148_spill] sm:$0xff]  ;;  %v9524_v54 = vld [vmem:[#allocation149_spill] sm:$0xff] }
 0x956   :  { %v7542_v5 = vadd.f32 %v2447_v31, %v2446_v37  ;;  %v9525_v37 = vld [vmem:[#allocation150_spill] sm:$0xff]  ;;  %v9526_v31 = vld [vmem:[#allocation151_spill] sm:$0xff] }
 0x958   :  { %3045 = vtanh.f32 %v7542_v5 }
 0x95e   :  { %v3046_v36 = vpop.eup %3045 }
 0x95f   :  { %v2450_v49 = vmul.f32 %v3046_v36, %v2445_v21  ;;  %v9529_v21 = vld [vmem:[#allocation154_spill] sm:$0xff]  ;;  %v9530_v36 = vld [vmem:[#allocation155_spill] sm:$0xff] }
 0x961   :  { %2467 = vmatmul.f32.vlgmr.msra.gmra.mxu0 %v2450_v49  ;;  %2487 = vmatmul.f32.vlgmr.msra.gmra.mxu1 %v2450_v49 }
 0x962   :  { %2507 = vmatmul.f32.vlgmr.msrb.gmra.mxu2 %v2450_v49  ;;  %2527 = vmatmul.f32.vlgmr.msra.gmra.mxu3 %v2450_v49  ;;  %v9531_v49 = vld [vmem:[#allocation156_spill] sm:$0xff] }
 0x963   :  { %2628 = vmatpush.msra.mxu0 %v7169_v41  ;;  %2648 = vmatpush.msra.mxu1 %v7172_v34  ;;  %v9493_v41 = vld [vmem:[#allocation87_spill] sm:$0xff]  ;;  %v9494_v34 = vld [vmem:[#allocation97_spill] sm:$0xff] }
 0x964   :  { %2668 = vmatpush.msrb.mxu2 %v7175_v18  ;;  %2688 = vmatpush.msra.mxu3 %v7178_v13  ;;  %v9495_v18 = vld [vmem:[#allocation89_spill] sm:$0xff]  ;;  %v9496_v13 = vld [vmem:[#allocation159_spill] sm:$0xff] }
 0x965   :  { %2629 = vmatpush.msra.mxu0 %v7181_v15  ;;  %2649 = vmatpush.msra.mxu1 %v7184_v56  ;;  %v9497_v15 = vld [vmem:[#allocation164_spill] sm:$0xff]  ;;  %v9498_v56 = vld [vmem:[#allocation187_spill] sm:$0xff] }
 0x966   :  { %2669 = vmatpush.msrb.mxu2 %v7187_v44  ;;  %2689 = vmatpush.msra.mxu3 %v7190_v35  ;;  %v9499_v44 = vld [vmem:[#allocation119_spill] sm:$0xff]  ;;  %v9500_v35 = vld [vmem:[#allocation120_spill] sm:$0xff] }
 0x967   :  { %2630 = vmatpush.msra.mxu0 %v7193_v62  ;;  %2650 = vmatpush.msra.mxu1 %v7196_v33  ;;  %v9501_v62 = vld [vmem:[#allocation121_spill] sm:$0xff]  ;;  %v9502_v33 = vld [vmem:[#allocation122_spill] sm:$0xff] }
 0x968   :  { %2670 = vmatpush.msrb.mxu2 %v7199_v29  ;;  %2690 = vmatpush.msra.mxu3 %v7202_v42  ;;  %v9503_v29 = vld [vmem:[#allocation123_spill] sm:$0xff]  ;;  %v9504_v42 = vld [vmem:[#allocation124_spill] sm:$0xff] }
 0x969   :  { %2547 = vmatmul.f32.vlgmr.msrb.gmra.mxu0 %v7457_v7  ;;  %2567 = vmatmul.f32.vlgmr.msrb.gmra.mxu1 %v7457_v7 }
 0x96a   :  { %2587 = vmatmul.f32.vlgmr.msra.gmra.mxu2 %v7457_v7  ;;  %2607 = vmatmul.f32.vlgmr.msrb.gmra.mxu3 %v7457_v7  ;;  %v9505_v7 = vld [vmem:[#allocation126_spill] sm:$0xff] }
 0x96b   :  { %2631 = vmatpush.msra.mxu0 %v9492_v11  ;;  %2651 = vmatpush.msra.mxu1 %v9493_v41  ;;  %v9532_v11 = vld [vmem:[#allocation157_spill] sm:$0xff]  ;;  %v9533_v41 = vld [vmem:[#allocation158_spill] sm:$0xff] }
 0x96c   :  { %2671 = vmatpush.msrb.mxu2 %v9494_v34  ;;  %2691 = vmatpush.msra.mxu3 %v9495_v18  ;;  %v9534_v34 = vld [vmem:[#allocation160_spill] sm:$0xff]  ;;  %v9535_v18 = vld [vmem:[#allocation161_spill] sm:$0xff] }
 0x96d   :  { %2632 = vmatpush.msra.mxu0 %v9496_v13  ;;  %2652 = vmatpush.msra.mxu1 %v9497_v15  ;;  %v9536_v13 = vld [vmem:[#allocation162_spill] sm:$0xff]  ;;  %v9537_v15 = vld [vmem:[#allocation163_spill] sm:$0xff] }
 0x96e   :  { %2672 = vmatpush.msrb.mxu2 %v9498_v56  ;;  %2692 = vmatpush.msra.mxu3 %v9499_v44 }
 0x96f   :  { %2633 = vmatpush.msra.mxu0 %v9500_v35  ;;  %2653 = vmatpush.msra.mxu1 %v9501_v62  ;;  %v9538_v35 = vld [vmem:[#allocation135_spill] sm:$0xff] }
 0x970   :  { %2673 = vmatpush.msrb.mxu2 %v9502_v33  ;;  %2693 = vmatpush.msra.mxu3 %v9503_v29  ;;  %v419_v62 = vadd.f32 %v9538_v35, %v9425_v1  ;;  %v2726_v35 = vld [vmem:[%s7741_s9 + $0x8] sm:$0xff] }
 0x971   :  { %2634 = vmatpush.msra.mxu0 %v9504_v42  ;;  %2654 = vmatpush.msra.mxu1 %v9505_v7 }
 0x972   :  { %2674 = vmatpush.msrb.mxu2 %v9506_v26  ;;  %2694 = vmatpush.msra.mxu3 %v9507_v45 }
 0x973   :  { %2635 = vmatpush.msra.mxu0 %v9508_v23  ;;  %2655 = vmatpush.msra.mxu1 %v9509_v52  ;;  %v9541_v52 = vld [vmem:[#allocation166_spill] sm:$0xff] }
 0x974   :  { %2675 = vmatpush.msrb.mxu2 %v9510_v47  ;;  %2695 = vmatpush.msra.mxu3 %v9511_v0  ;;  %v501_v47 = vadd.f32 %v9541_v52, %v4702_v9 }
 0x975   :  { %2636 = vmatpush.msra.mxu0 %v9512_v6  ;;  %2656 = vmatpush.msra.mxu1 %v9513_v20 }
 0x976   :  { %2676 = vmatpush.msrb.mxu2 %v9514_v59  ;;  %2696 = vmatpush.msra.mxu3 %v9515_v55 }
 0x977   :  { %2637 = vmatpush.msra.mxu0 %v9516_v12  ;;  %2657 = vmatpush.msra.mxu1 %v9517_v63 }
 0x978   :  { %2677 = vmatpush.msrb.mxu2 %v9518_v27  ;;  %2697 = vmatpush.msra.mxu3 %v9519_v58 }
 0x979   :  { %2638 = vmatpush.msra.mxu0 %v9520_v16  ;;  %2658 = vmatpush.msra.mxu1 %v9521_v8 }
 0x97a   :  { %2678 = vmatpush.msrb.mxu2 %v9522_v25  ;;  %2698 = vmatpush.msra.mxu3 %v9523_v3 }
 0x97b   :  { %2639 = vmatpush.msra.mxu0 %v9524_v54  ;;  %2659 = vmatpush.msra.mxu1 %v9525_v37  ;;  %v2739_v37 = vld [vmem:[%s7741_s9 + $0x70] sm:$0xff] }
 0x97c   :  { %2679 = vmatpush.msrb.mxu2 %v9526_v31  ;;  %2699 = vmatpush.msra.mxu3 %v9527_v46  ;;  %v2738_v31 = vld [vmem:[%s7741_s9 + $0x68] sm:$0xff]  ;;  %v2737_v46 = vld [vmem:[%s7741_s9 + $0x60] sm:$0xff] }
 0x97d   :  { %2640 = vmatpush.msra.mxu0 %v9528_v60  ;;  %2660 = vmatpush.msra.mxu1 %v9529_v21  ;;  %v2736_v60 = vld [vmem:[%s7741_s9 + $0x58] sm:$0xff]  ;;  %v2735_v21 = vld [vmem:[%s7741_s9 + $0x50] sm:$0xff] }
 0x97e   :  { %2680 = vmatpush.msrb.mxu2 %v9530_v36  ;;  %2700 = vmatpush.msra.mxu3 %v9531_v49  ;;  %v2734_v36 = vld [vmem:[%s7741_s9 + $0x48] sm:$0xff]  ;;  %v2733_v49 = vld [vmem:[%s7741_s9 + $0x40] sm:$0xff] }
 0x97f   :  { %2641 = vmatpush.msra.mxu0 %v9532_v11  ;;  %2661 = vmatpush.msra.mxu1 %v9533_v41  ;;  %v2732_v11 = vld [vmem:[%s7741_s9 + $0x38] sm:$0xff]  ;;  %v2731_v41 = vld [vmem:[%s7741_s9 + $0x30] sm:$0xff] }
 0x980   :  { %2681 = vmatpush.msrb.mxu2 %v9534_v34  ;;  %2701 = vmatpush.msra.mxu3 %v9535_v18  ;;  %v2730_v34 = vld [vmem:[%s7741_s9 + $0x28] sm:$0xff]  ;;  %v2729_v18 = vld [vmem:[%s7741_s9 + $0x20] sm:$0xff] }
 0x981   :  { %2642 = vmatpush.msra.mxu0 %v9536_v13  ;;  %2662 = vmatpush.msra.mxu1 %v9537_v15  ;;  %v2728_v13 = vld [vmem:[%s7741_s9 + $0x18] sm:$0xff]  ;;  %v2727_v15 = vld [vmem:[%s7741_s9 + $0x10] sm:$0xff] }
 0x982   :  { %2682 = vmatpush.msrb.mxu2 %v7347_v19  ;;  %2702 = vmatpush.msra.mxu3 %v7350_v48  ;;  %v9539_v48 = vld [vmem:[#allocation100_spill] sm:$0xff] }
 0x983   :  { %2643 = vmatpush.msra.mxu0 %v7353_v40  ;;  %2663 = vmatpush.msra.mxu1 %v7356_v43  ;;  %v378_v40 = vadd.f32 %v9539_v48, %v9427_v51  ;;  %v2725_v48 = vld [vmem:[%s7741_s9] sm:$0xff] }
 0x984   :  { %2683 = vmatpush.msrb.mxu2 %v7359_v4  ;;  %2703 = vmatpush.msra.mxu3 %v7362_v50  ;;  %v9540_v50 = vld [vmem:[#allocation167_spill] sm:$0xff] }
 0x985   :  { %v460_v7 = vadd.f32 %v9540_v50, %v4688_v2  ;;  %v2769_v50 = vld [vmem:[%s7743_s11 + $0x18] sm:$0xff] }
 0x986   :  { %2790 = vmatpush.msrb.mxu1 %v2769_v50 }
 0x9de   :  { %v7615_v56 = vpop.f32.mrf.mxu0  ;;  %v7617_v44 = vpop.f32.mrf.mxu1 }
 0x9e5   :  { %v7621_v33 = vpop.f32.mrf.mxu2  ;;  %v7623_v19 = vpop.f32.mrf.mxu3 }
 0x9e6   :  { %v2548_v29 = vpop.f32.mrf.mxu0  ;;  %v2568_v43 = vpop.f32.mrf.mxu1 }
 0x9e7   :  { %v2569_v42 = vadd.f32 %v2568_v43, %v419_v62  ;;  %v2549_v4 = vadd.f32 %v2548_v29, %v378_v40  ;;  %v2489_v62 = vadd.f32 %v7617_v44, %v9490_v61  ;;  %v2469_v40 = vadd.f32 %v7615_v56, %v9491_v10  ;;  %v2768_v61 = vld [vmem:[%s7743_s11 + $0x10] sm:$0xff] }
 0x9e8   :  { %2791 = vmatpush.msrb.mxu1 %v2768_v61  ;;  %v2509_v10 = vadd.f32 %v7621_v33, %v4876_v53 }
 0x9e9   :  { %3047 = vtanh.f32 %v2569_v42 }
 0x9ea   :  { %3049 = vtanh.f32 %v2549_v4 }
 0x9ed   :  { %v2588_v26 = vpop.f32.mrf.mxu2  ;;  %v2608_v1 = vpop.f32.mrf.mxu3 }
 0x9ee   :  { %v2589_v45 = vadd.f32 %v2588_v26, %v460_v7  ;;  %v2609_v6 = vadd.f32 %v2608_v1, %v501_v47 }
 0x9ef   :  { %v3048_v23 = vpop.eup %3047 }
 0x9f0   :  { %3051 = vtanh.f32 %v2589_v45  ;;  %v3050_v0 = vpop.eup %3049  ;;  %v2616_v51 = vmul.f32 %v3048_v23, %v4711_v14  ;;  %v2529_v45 = vadd.f32 %v7623_v19, %v4880_v57 }
 0x9f1   :  { %v2615_v20 = vmul.f32 %v3050_v0, %v4719_v17  ;;  %3053 = vtanh.f32 %v2609_v6 }
 0x9f2   :  { %v2620_v55 = vadd.f32 %v2616_v51, %v4728_v24 }
 0x9f3   :  { %v2619_v12 = vadd.f32 %v2615_v20, %v4737_v22 }
 0x9f4   :  { %v2623_v27 = vmul.f32 %v2620_v55, %v7452_v28  ;;  %v2740_v28 = vld [vmem:[%s7741_s9 + $0x78] sm:$0xff] }
 0x9f5   :  { %2745 = vmatpush.msrb.mxu0 %v2740_v28 }
 0x9f6   :  { %v3052_v59 = vpop.eup %3051 }
 0x9f7   :  { %v2617_v2 = vmul.f32 %v3052_v59, %v4731_v32  ;;  %v3054_v9 = vpop.eup %3053  ;;  %2746 = vmatpush.msrb.mxu0 %v2739_v37 }
 0x9f8   :  { %v2618_v8 = vmul.f32 %v3054_v9, %v4760_v39 }
 0x9f9   :  { %v2621_v63 = vadd.f32 %v2617_v2, %v4740_v30  ;;  %2747 = vmatpush.msrb.mxu0 %v2738_v31  ;;  %v2906_v2 = vld [vmem:[%s7744_s12] ss:$0 sm:$0xff] }
 0x9fa   :  { %v2622_v25 = vadd.f32 %v2618_v8, %v4773_v38 }
 0x9fb   :  { %v2624_v58 = vmul.f32 %v2621_v63, %v2619_v12  ;;  %2748 = vmatpush.msrb.mxu0 %v2737_v46 }
 0x9fd   :  { %v2625_v16 = vadd.f32 %v2624_v58, %v2623_v27  ;;  %2749 = vmatpush.msrb.mxu0 %v2736_v60 }
 0x9ff   :  { %3055 = vtanh.f32 %v2625_v16  ;;  %2803 = vst [vmem:[#allocation11] sm:$0xff] %v2625_v16  ;;  %2750 = vmatpush.msrb.mxu0 %v2735_v21 }
 0xa01   :  { %2751 = vmatpush.msrb.mxu0 %v2734_v36 }
 0xa03   :  { %2752 = vmatpush.msrb.mxu0 %v2733_v49 }
 0xa05   :  { %v3056_v3 = vpop.eup %3055  ;;  %2753 = vmatpush.msrb.mxu0 %v2732_v11 }
 0xa06   :  { %v2627_v54 = vmul.f32 %v3056_v3, %v2622_v25 }
 0xa07   :  { %2754 = vmatpush.msrb.mxu0 %v2731_v41 }
 0xa08   :  { %2644 = vmatmul.f32.vlgmr.msra.gmra.mxu0 %v2627_v54  ;;  %2800 = vst [vmem:[#allocation9] sm:$0xff] %v2627_v54  ;;  %2664 = vmatmul.f32.vlgmr.msra.gmra.mxu1 %v2627_v54 }
 0xa09   :  { %2684 = vmatmul.f32.vlgmr.msrb.gmra.mxu2 %v2627_v54  ;;  %2704 = vmatmul.f32.vlgmr.msra.gmra.mxu3 %v2627_v54 }
 0xa0a   :  { %2755 = vmatpush.msrb.mxu0 %v2730_v34 }
 0xa0c   :  { %2756 = vmatpush.msrb.mxu0 %v2729_v18 }
 0xa0e   :  { %2757 = vmatpush.msrb.mxu0 %v2728_v13 }
 0xa10   :  { %2758 = vmatpush.msrb.mxu0 %v2727_v15 }
 0xa12   :  { %2759 = vmatpush.msrb.mxu0 %v2726_v35 }
 0xa14   :  { %2760 = vmatpush.msrb.mxu0 %v2725_v48 }
 0xa85   :  { %v2645_v29 = vpop.f32.mrf.mxu0  ;;  %v2665_v43 = vpop.f32.mrf.mxu1 }
 0xa86   :  { %v2666_v42 = vadd.f32 %v2665_v43, %v2489_v62  ;;  %v2646_v4 = vadd.f32 %v2645_v29, %v2469_v40 }
 0xa88   :  { %3057 = vtanh.f32 %v2666_v42 }
 0xa89   :  { %3059 = vtanh.f32 %v2646_v4 }
 0xa8c   :  { %v2685_v56 = vpop.f32.mrf.mxu2  ;;  %v2705_v26 = vpop.f32.mrf.mxu3 }
 0xa8d   :  { %v2686_v44 = vadd.f32 %v2685_v56, %v2509_v10  ;;  %v2706_v52 = vadd.f32 %v2705_v26, %v2529_v45 }
 0xa8e   :  { %v3058_v7 = vpop.eup %3057 }
 0xa8f   :  { %3061 = vtanh.f32 %v2686_v44  ;;  %v3060_v23 = vpop.eup %3059  ;;  %v2713_v1 = vmul.f32 %v3058_v7, %v4711_v14 }
 0xa90   :  { %v2712_v47 = vmul.f32 %v3060_v23, %v4719_v17  ;;  %3063 = vtanh.f32 %v2706_v52 }
 0xa91   :  { %v2717_v51 = vadd.f32 %v2713_v1, %v4728_v24 }
 0xa92   :  { %v2716_v33 = vadd.f32 %v2712_v47, %v4737_v22  ;;  %v2766_v22 = vld [vmem:[%s7743_s11] sm:$0xff] }
 0xa93   :  { %v2720_v20 = vmul.f32 %v2717_v51, %v7542_v5 }
 0xa95   :  { %v3062_v0 = vpop.eup %3061 }
 0xa96   :  { %v2714_v53 = vmul.f32 %v3062_v0, %v4731_v32  ;;  %v3064_v57 = vpop.eup %3063  ;;  %v2767_v32 = vld [vmem:[%s7743_s11 + $0x8] sm:$0xff]  ;;  %s3803_s11 = smov 8  }
 0xa97   :  { %v2715_v14 = vmul.f32 %v3064_v57, %v4760_v39  ;;  %2792 = vmatpush.msrb.mxu1 %v2767_v32 }
 0xa98   :  { %v2718_v6 = vadd.f32 %v2714_v53, %v4740_v30  ;;  %v2905_v30 = vld [vmem:[%s7742_s10] ss:$0 sm:$0xff]  ;;  %s2836_s10 = sshll.u32 %s7747_s15, 4  ;;  %s2837_s10 = int_to_ptr.hbm [resolvable:$true] %s2836_s10 }
 0xa99   :  { %v2719_v17 = vadd.f32 %v2715_v14, %v4773_v38  ;;  %2793 = vmatpush.msrb.mxu1 %v2766_v22 }
 0xa9a   :  { %v2721_v59 = vmul.f32 %v2718_v6, %v2716_v33 }
 0xa9c   :  { %v2722_v19 = vadd.f32 %v2721_v59, %v2720_v20 }
 0xa9e   :  { %3065 = vtanh.f32 %v2722_v19  ;;  %2805 = vst [vmem:[#allocation11 + $0x8] sm:$0xff] %v2722_v19 }
 0xaa4   :  { %v3066_v55 = vpop.eup %3065 }
 0xaa5   :  { %v2724_v24 = vmul.f32 %v3066_v55, %v2719_v17 }
 0xaa7   :  { %2761 = vmatmul.f32.vlgmr.msrb.gmra.mxu0 %v2724_v24  ;;  %2802 = vst [vmem:[#allocation9 + $0x8] sm:$0xff] %v2724_v24 }
 0xaa8   :  { %2829 = dma.vmem_to_hbm [thread:$0]  %s2822_s17, 256, %s2824_s16, [#allocation10], %s3802_s8, %s3802_s8, %s3803_s11  }
 0xaa9   :  { %2842 = dma.vmem_to_hbm [thread:$0]  %s2835_s2, 256, %s2837_s10, [#allocation10], %s3802_s8, %s3802_s8, %s3803_s11  }
 0xb24   :  { %v2762_v39 = vpop.f32.mrf.mxu0 }
 0xb25   :  { %v2763_v38 = vadd.f32 %v2905_v30, %v2762_v39 }
 0xb27   :  { %v2765_v5 = vmax.f32 %v2763_v38, 0.0 }
 0xb29   :  { %2891 = vmatmul.msk.f32.vlgmr.msrb.gmra.mxu1 %vm2774_vm1, %v2765_v5 }
 0xba6   :  { %v2795_v12 = vpop.f32.mrf.mxu1 }
 0xba7   :  { %v2796_v63 = vadd.f32 %v2906_v2, %v2795_v12 }
 0xba9   :  { %2799 = vst.msk [vmem:[#allocation8] sm:$0xff] %vm2798_vm2, %v2796_v63 }
 0xbaa   :  { %2816 = dma.vmem_to_hbm [thread:$0]  %s2812_s20, 128, %s2814_s22, [#allocation4]  }
 0xbab   :  { %3791 = dma.done.wait [#allocation4], 128  }
 0xbac   :  { %3792 = vsyncadd [#allocation4], 4294967168 }
 0xbad   :  { %3793 = dma.done.wait [#allocation10], 512  }
 0xbae   :  { %3794 = vsyncadd [#allocation10], 4294966784 }
 0xbaf   :  { %2855 = vsyncpa [#allocation3], 1 }
 0xbb0   :  { %2856 = vsyncpa [#allocation6], 1 }
 0xbb1   :  { %2857 = vsyncpa [#allocation4], 1 }
 0xbb2   :  { %2858 = vsyncpa [#allocation10], 1 }

</bundles_post_ra>
